<compile_context>
chip_gen: v7x
topology: tpu7x:2x2x1
jax: 0.10.0
libtpu: 0.0.40
codegen_flags: <defaults>
</compile_context>

<pallas_src>
import math

import jax
import jax.numpy as jnp
import numpy as np
from jax.experimental import pallas as pl
from jax.experimental.pallas import tpu as pltpu

# ----------------------------- hyper-parameters -----------------------------
B, T, N, D = 2, 8, 16, 32          # batch, time, nodes, embed_dim
NH = 4                             # attention heads
DH = D // NH                       # head dim
FF = 64                            # feed-forward hidden dim
KT = 3                             # temporal conv kernel size
EPS = 1e-5                         # LayerNorm epsilon

BT = B * T                         # folded batch*time
R = B * T * N                      # total rows after folding the batch


def _ln(v, g, b):
    mu = jnp.mean(v, axis=-1, keepdims=True)
    var = jnp.mean((v - mu) ** 2, axis=-1, keepdims=True)
    return (v - mu) * jax.lax.rsqrt(var + EPS) * g + b


# --------------------------------- kernel -----------------------------------
def tgraphormer_kernel(
    x_ref, deg_ref, bias_ref,
    g0_ref, be0_ref, g1_ref, be1_ref, g2_ref, be2_ref,
    wqkv_ref, bqkv_ref, wo_ref, bo_ref,
    w1_ref, bf1_ref, w2_ref, bf2_ref,
    wt_ref, bt_ref,
    o_ref,
):
    f32, bf16 = jnp.float32, jnp.bfloat16
    x = x_ref[...]                                          # (R, D) f32

    # ---- sublayer 0: spatial (graph) attention ------------------------------
    xn = _ln(x, g0_ref[...], be0_ref[...])
    h = (xn.reshape(BT, N, D) + deg_ref[...][None]).reshape(R, D)
    # single fused QKV projection (1/sqrt(DH) folded into Wq host-side).
    qkv = jnp.dot(h.astype(bf16), wqkv_ref[...],
                  preferred_element_type=f32) + bqkv_ref[...]     # (R, 3D)
    qkv_bf = qkv.astype(bf16)                               # cast ONCE

    def heads(base):
        # gather the NH per-head lane blocks into a leading head-batch axis:
        # (R, DH) slices stacked along sublanes -> (NH*BT, N, DH).
        parts = [qkv_bf[:, base + hh * DH: base + (hh + 1) * DH]
                 for hh in range(NH)]
        return jnp.concatenate(parts, axis=0).reshape(NH * BT, N, DH)

    qh = heads(0)          # (NH*BT, N, DH) bf16
    kh = heads(D)
    vh = heads(2 * D)

    # head-batched attention: two einsums with batch dim NH*BT = 64.
    s = jnp.einsum("bnd,bmd->bnm", qh, kh,
                   preferred_element_type=f32) + bias_ref[...][None]
    m = jnp.max(s, axis=-1, keepdims=True)
    e = jnp.exp(s - m)
    p = e * pl.reciprocal(jnp.sum(e, axis=-1, keepdims=True), approx=True)
    ctx_b = jnp.einsum("bnm,bmd->bnd", p.astype(bf16), vh,
                       preferred_element_type=f32)          # (NH*BT, N, DH)
    # regroup heads back onto lanes: (NH, BT*N, DH) -> lane concat -> (R, D)
    ctx_r = ctx_b.reshape(NH, BT * N, DH)
    ctx = jnp.concatenate([ctx_r[hh] for hh in range(NH)], axis=-1)
    sa = jnp.dot(ctx.astype(bf16), wo_ref[...],
                 preferred_element_type=f32) + bo_ref[...]
    x1 = x + sa                                             # dropout == identity

    # ---- sublayer 1: position-wise feed forward ------------------------------
    xn = _ln(x1, g1_ref[...], be1_ref[...])
    hid = jnp.maximum(jnp.dot(xn.astype(bf16), w1_ref[...],
                              preferred_element_type=f32) + bf1_ref[...], 0.0)
    ff = jnp.dot(hid.astype(bf16), w2_ref[...],
                 preferred_element_type=f32) + bf2_ref[...]
    x2 = x1 + ff

    # ---- sublayer 2: temporal gated conv (TGC) --------------------------------
    xn = _ln(x2, g2_ref[...], be2_ref[...])
    row = jax.lax.broadcasted_iota(jnp.int32, (R, 1), 0)
    tn = T * N
    tmod = jnp.bitwise_and(row, tn - 1) if (tn & (tn - 1)) == 0 else row % tn
    # shifted-in-time taps via sublane roll on the flat slab + time-boundary
    # masks (also masks the roll wrap-around between folded batches).
    prev = jnp.where(tmod >= N, pltpu.roll(xn, N, axis=0), 0.0)        # x[t-1]
    nxt = jnp.where(tmod < tn - N, pltpu.roll(xn, R - N, axis=0), 0.0)  # x[t+1]
    taps = jnp.concatenate([prev, xn, nxt], axis=-1).astype(bf16)      # (R, 3D)
    # single K=96 matmul with the host-flattened [wta|wtb] weight (96, 64).
    ag = jnp.dot(taps, wt_ref[...], preferred_element_type=f32) + bt_ref[...]
    a = ag[:, :D]
    g = ag[:, D:]
    o_ref[...] = x2 + a * jax.nn.sigmoid(g)


# -------------------------------- wrapper ------------------------------------
def tgraphormer_layer(x, indeg, outdeg, sp, hop, params):
    bf16 = jnp.bfloat16
    scale = 1.0 / math.sqrt(DH)

    # host-side folding: pre-summed embeddings / bias, fused + pre-scaled weights
    deg = (indeg + outdeg).astype(jnp.float32)
    bias = (sp + hop).astype(jnp.float32)
    wqkv = jnp.concatenate(
        [params["wq"] * scale, params["wk"], params["wv"]], axis=1).astype(bf16)
    bqkv = jnp.concatenate(
        [params["bq"] * scale, params["bk"], params["bv"]], axis=1)
    # temporal conv: fuse the a/b gates along lanes and the KT taps along the
    # contraction dim -> one (KT*D, 2D) weight.
    wt = jnp.concatenate([params["wta"], params["wtb"]], axis=2)   # (KT, D, 2D)
    wt = wt.reshape(KT * D, 2 * D).astype(bf16)
    bt = jnp.concatenate([params["bta"], params["btb"]], axis=1)

    ops = [
        deg, bias,
        params["g0"], params["be0"], params["g1"], params["be1"],
        params["g2"], params["be2"],
        wqkv, bqkv,
        params["wo"].astype(bf16), params["bo"],
        params["w1"].astype(bf16), params["bf1"],
        params["w2"].astype(bf16), params["bf2"],
        wt, bt,
    ]

    flops = (2 * R * D * (3 * D)                    # fused QKV projection
             + 2 * (NH * BT) * N * N * DH * 2       # attention scores + context
             + 2 * R * D * D                        # output projection
             + 2 * R * D * FF * 2                   # feed-forward
             + 2 * R * (KT * D) * (2 * D))          # fused temporal gated conv
    transcendentals = (NH * BT) * N * N + R * D + 4 * R
    x2d = x.reshape(R, D)
    bytes_accessed = (sum(int(np.prod(o.shape)) * o.dtype.itemsize
                          for o in [x2d] + ops) + R * D * 4)

    # Folded-B single invocation: whole working set (<1 MiB) lives in VMEM, no
    # grid-step overhead, 256-row matmuls.  (On v7x a grid=(B,) "parallel" split
    # over the two TensorCores is possible, but at a few µs of total work the
    # folded version is preferred.)
    out = pl.pallas_call(
        tgraphormer_kernel,
        out_shape=jax.ShapeDtypeStruct((R, D), jnp.float32),
        cost_estimate=pl.CostEstimate(flops=flops,
                                      transcendentals=transcendentals,
                                      bytes_accessed=bytes_accessed),
    )(x2d, *ops)
    return out.reshape(B, T, N, D)


# --------------------------- pure-JAX reference -------------------------------
def _softmax_ref(s):
    m = jnp.max(s, axis=-1, keepdims=True)
    e = jnp.exp(s - m)
    return e / jnp.sum(e, axis=-1, keepdims=True)


def reference(x, indeg, outdeg, sp, hop, p):
    xn = _ln(x, p["g0"], p["be0"])
    h = xn + indeg + outdeg
    q = (h @ p["wq"] + p["bq"]).reshape(B, T, N, NH, DH)
    k = (h @ p["wk"] + p["bk"]).reshape(B, T, N, NH, DH)
    v = (h @ p["wv"] + p["bv"]).reshape(B, T, N, NH, DH)
    s = jnp.einsum("btnhd,btmhd->bthnm", q, k) / math.sqrt(DH)
    s = s + (sp + hop)[None, None, None]
    attn = _softmax_ref(s)
    ctx = jnp.einsum("bthnm,btmhd->btnhd", attn, v).reshape(B, T, N, D)
    x1 = x + ctx @ p["wo"] + p["bo"]

    xn = _ln(x1, p["g1"], p["be1"])
    x2 = x1 + jnp.maximum(xn @ p["w1"] + p["bf1"], 0.0) @ p["w2"] + p["bf2"]

    xn = _ln(x2, p["g2"], p["be2"])
    pad = jnp.pad(xn, ((0, 0), (1, 1), (0, 0), (0, 0)))
    a = sum(pad[:, kk:kk + T] @ p["wta"][kk] for kk in range(KT)) + p["bta"]
    g = sum(pad[:, kk:kk + T] @ p["wtb"][kk] for kk in range(KT)) + p["btb"]
    return x2 + a * jax.nn.sigmoid(g)


# ---------------------------------- main --------------------------------------
if __name__ == "__main__":
    key = jax.random.PRNGKey(0)
    ks = iter(jax.random.split(key, 40))

    def rnd(shape, scale=0.1):
        return scale * jax.random.normal(next(ks), shape, jnp.float32)

    x = jax.random.normal(next(ks), (B, T, N, D), jnp.float32)
    in_degree_emb = rnd((N, D))
    out_degree_emb = rnd((N, D))
    shortest_path_emb = rnd((N, N))
    shortest_hop_emb = rnd((N, N))

    params = {
        "g0": jnp.ones((1, D), jnp.float32), "be0": jnp.zeros((1, D), jnp.float32),
        "g1": jnp.ones((1, D), jnp.float32), "be1": jnp.zeros((1, D), jnp.float32),
        "g2": jnp.ones((1, D), jnp.float32), "be2": jnp.zeros((1, D), jnp.float32),
        "wq": rnd((D, D)), "bq": rnd((1, D)),
        "wk": rnd((D, D)), "bk": rnd((1, D)),
        "wv": rnd((D, D)), "bv": rnd((1, D)),
        "wo": rnd((D, D)), "bo": rnd((1, D)),
        "w1": rnd((D, FF)), "bf1": rnd((1, FF)),
        "w2": rnd((FF, D)), "bf2": rnd((1, D)),
        "wta": rnd((KT, D, D)), "bta": rnd((1, D)),
        "wtb": rnd((KT, D, D)), "btb": rnd((1, D)),
    }

    out = tgraphormer_layer(x, in_degree_emb, out_degree_emb,
                            shortest_path_emb, shortest_hop_emb, params)
    out = jax.block_until_ready(out)

    ref = reference(x, in_degree_emb, out_degree_emb,
                    shortest_path_emb, shortest_hop_emb, params)
    assert out.shape == (B, T, N, D)
    # bf16-operand matmuls (f32 accumulation) + approx reciprocal vs. the pure
    # f32 reference: slightly loosened tolerance.
    assert np.allclose(np.asarray(out), np.asarray(ref), rtol=2e-2, atol=2e-2)
    print("KERNEL_OK")
</pallas_src>

<mosaic_0001>
module attributes {stable_mosaic.version = 11 : i64} {
  func.func @tgraphormer_kernel(%arg0: memref<256x32xf32, #tpu.memory_space<vmem>>, %arg1: memref<16x32xf32, #tpu.memory_space<vmem>>, %arg2: memref<16x16xf32, #tpu.memory_space<vmem>>, %arg3: memref<1x32xf32, #tpu.memory_space<vmem>>, %arg4: memref<1x32xf32, #tpu.memory_space<vmem>>, %arg5: memref<1x32xf32, #tpu.memory_space<vmem>>, %arg6: memref<1x32xf32, #tpu.memory_space<vmem>>, %arg7: memref<1x32xf32, #tpu.memory_space<vmem>>, %arg8: memref<1x32xf32, #tpu.memory_space<vmem>>, %arg9: memref<32x96xbf16, #tpu.memory_space<vmem>>, %arg10: memref<1x96xf32, #tpu.memory_space<vmem>>, %arg11: memref<32x32xbf16, #tpu.memory_space<vmem>>, %arg12: memref<1x32xf32, #tpu.memory_space<vmem>>, %arg13: memref<32x64xbf16, #tpu.memory_space<vmem>>, %arg14: memref<1x64xf32, #tpu.memory_space<vmem>>, %arg15: memref<64x32xbf16, #tpu.memory_space<vmem>>, %arg16: memref<1x32xf32, #tpu.memory_space<vmem>>, %arg17: memref<96x64xbf16, #tpu.memory_space<vmem>>, %arg18: memref<1x64xf32, #tpu.memory_space<vmem>>, %arg19: memref<256x32xf32, #tpu.memory_space<vmem>>) attributes {dimension_semantics = [], scalar_prefetch = 0 : i64, scratch_operands = 0 : i64, tpu.core_type = #tpu.core_type<tc>} {
    %c0 = arith.constant 0 : index
    %c0_0 = arith.constant 0 : index
    %0 = vector.load %arg0[%c0, %c0_0] : memref<256x32xf32, #tpu.memory_space<vmem>>, vector<256x32xf32>
    %c0_1 = arith.constant 0 : index
    %c0_2 = arith.constant 0 : index
    %1 = vector.load %arg3[%c0_1, %c0_2] : memref<1x32xf32, #tpu.memory_space<vmem>>, vector<1x32xf32>
    %c0_3 = arith.constant 0 : index
    %c0_4 = arith.constant 0 : index
    %2 = vector.load %arg4[%c0_3, %c0_4] : memref<1x32xf32, #tpu.memory_space<vmem>>, vector<1x32xf32>
    %cst = arith.constant dense<0.000000e+00> : vector<256xf32>
    %3 = vector.multi_reduction <add>, %0, %cst [1] : vector<256x32xf32> to vector<256xf32>
    %4 = vector.shape_cast %3 : vector<256xf32> to vector<256x1xf32>
    %cst_5 = arith.constant 3.200000e+01 : f32
    %5 = vector.broadcast %cst_5 : f32 to vector<256x1xf32>
    %6 = arith.divf %4, %5 : vector<256x1xf32>
    %7 = vector.broadcast %6 : vector<256x1xf32> to vector<256x32xf32>
    %8 = arith.subf %0, %7 : vector<256x32xf32>
    %9 = arith.mulf %8, %8 : vector<256x32xf32>
    %cst_6 = arith.constant dense<0.000000e+00> : vector<256xf32>
    %10 = vector.multi_reduction <add>, %9, %cst_6 [1] : vector<256x32xf32> to vector<256xf32>
    %11 = vector.shape_cast %10 : vector<256xf32> to vector<256x1xf32>
    %cst_7 = arith.constant 3.200000e+01 : f32
    %12 = vector.broadcast %cst_7 : f32 to vector<256x1xf32>
    %13 = arith.divf %11, %12 : vector<256x1xf32>
    %14 = vector.broadcast %6 : vector<256x1xf32> to vector<256x32xf32>
    %15 = arith.subf %0, %14 : vector<256x32xf32>
    %cst_8 = arith.constant 9.99999974E-6 : f32
    %16 = vector.broadcast %cst_8 : f32 to vector<256x1xf32>
    %17 = arith.addf %13, %16 : vector<256x1xf32>
    %18 = math.rsqrt %17 : vector<256x1xf32>
    %19 = vector.broadcast %18 : vector<256x1xf32> to vector<256x32xf32>
    %20 = arith.mulf %15, %19 : vector<256x32xf32>
    %21 = vector.broadcast %1 : vector<1x32xf32> to vector<256x32xf32>
    %22 = arith.mulf %20, %21 : vector<256x32xf32>
    %23 = vector.broadcast %2 : vector<1x32xf32> to vector<256x32xf32>
    %24 = arith.addf %22, %23 : vector<256x32xf32>
    %25 = vector.shape_cast %24 : vector<256x32xf32> to vector<16x16x32xf32>
    %c0_9 = arith.constant 0 : index
    %c0_10 = arith.constant 0 : index
    %26 = vector.load %arg1[%c0_9, %c0_10] : memref<16x32xf32, #tpu.memory_space<vmem>>, vector<16x32xf32>
    %27 = vector.shape_cast %26 : vector<16x32xf32> to vector<1x16x32xf32>
    %28 = vector.broadcast %27 : vector<1x16x32xf32> to vector<16x16x32xf32>
    %29 = arith.addf %25, %28 : vector<16x16x32xf32>
    %30 = vector.shape_cast %29 : vector<16x16x32xf32> to vector<256x32xf32>
    %31 = arith.truncf %30 : vector<256x32xf32> to vector<256x32xbf16>
    %c0_11 = arith.constant 0 : index
    %c0_12 = arith.constant 0 : index
    %32 = vector.load %arg9[%c0_11, %c0_12] : memref<32x96xbf16, #tpu.memory_space<vmem>>, vector<32x96xbf16>
    %cst_13 = arith.constant dense<0.000000e+00> : vector<256x96xf32>
    %33 = tpu.matmul %31, %32, %cst_13 {dimension_numbers = #tpu.dot_dimension_numbers<[1], [0], [0], [1], [0, 0, 1, 1], [], []>} : vector<256x32xbf16>, vector<32x96xbf16>, vector<256x96xf32> -> vector<256x96xf32>
    %c0_14 = arith.constant 0 : index
    %c0_15 = arith.constant 0 : index
    %34 = vector.load %arg10[%c0_14, %c0_15] : memref<1x96xf32, #tpu.memory_space<vmem>>, vector<1x96xf32>
    %35 = vector.broadcast %34 : vector<1x96xf32> to vector<256x96xf32>
    %36 = arith.addf %33, %35 : vector<256x96xf32>
    %37 = arith.truncf %36 : vector<256x96xf32> to vector<256x96xbf16>
    %38 = vector.extract_strided_slice %37 {offsets = [0, 0], sizes = [256, 8], strides = [1, 1]} : vector<256x96xbf16> to vector<256x8xbf16>
    %39 = vector.extract_strided_slice %37 {offsets = [0, 8], sizes = [256, 8], strides = [1, 1]} : vector<256x96xbf16> to vector<256x8xbf16>
    %40 = vector.extract_strided_slice %37 {offsets = [0, 16], sizes = [256, 8], strides = [1, 1]} : vector<256x96xbf16> to vector<256x8xbf16>
    %41 = vector.extract_strided_slice %37 {offsets = [0, 24], sizes = [256, 8], strides = [1, 1]} : vector<256x96xbf16> to vector<256x8xbf16>
    %42 = tpu.concatenate %38, %39, %40, %41 in 0 : vector<256x8xbf16>, vector<256x8xbf16>, vector<256x8xbf16>, vector<256x8xbf16> -> vector<1024x8xbf16>
    %43 = vector.shape_cast %42 : vector<1024x8xbf16> to vector<64x16x8xbf16>
    %44 = vector.extract_strided_slice %37 {offsets = [0, 32], sizes = [256, 8], strides = [1, 1]} : vector<256x96xbf16> to vector<256x8xbf16>
    %45 = vector.extract_strided_slice %37 {offsets = [0, 40], sizes = [256, 8], strides = [1, 1]} : vector<256x96xbf16> to vector<256x8xbf16>
    %46 = vector.extract_strided_slice %37 {offsets = [0, 48], sizes = [256, 8], strides = [1, 1]} : vector<256x96xbf16> to vector<256x8xbf16>
    %47 = vector.extract_strided_slice %37 {offsets = [0, 56], sizes = [256, 8], strides = [1, 1]} : vector<256x96xbf16> to vector<256x8xbf16>
    %48 = tpu.concatenate %44, %45, %46, %47 in 0 : vector<256x8xbf16>, vector<256x8xbf16>, vector<256x8xbf16>, vector<256x8xbf16> -> vector<1024x8xbf16>
    %49 = vector.shape_cast %48 : vector<1024x8xbf16> to vector<64x16x8xbf16>
    %50 = vector.extract_strided_slice %37 {offsets = [0, 64], sizes = [256, 8], strides = [1, 1]} : vector<256x96xbf16> to vector<256x8xbf16>
    %51 = vector.extract_strided_slice %37 {offsets = [0, 72], sizes = [256, 8], strides = [1, 1]} : vector<256x96xbf16> to vector<256x8xbf16>
    %52 = vector.extract_strided_slice %37 {offsets = [0, 80], sizes = [256, 8], strides = [1, 1]} : vector<256x96xbf16> to vector<256x8xbf16>
    %53 = vector.extract_strided_slice %37 {offsets = [0, 88], sizes = [256, 8], strides = [1, 1]} : vector<256x96xbf16> to vector<256x8xbf16>
    %54 = tpu.concatenate %50, %51, %52, %53 in 0 : vector<256x8xbf16>, vector<256x8xbf16>, vector<256x8xbf16>, vector<256x8xbf16> -> vector<1024x8xbf16>
    %55 = vector.shape_cast %54 : vector<1024x8xbf16> to vector<64x16x8xbf16>
    "tpu.trace_start"() <{level = 10 : i32, message = "bnd,bmd->bnm"}> : () -> ()
    %cst_16 = arith.constant dense<0.000000e+00> : vector<64x16x16xf32>
    %56 = tpu.matmul %43, %49, %cst_16 {dimension_numbers = #tpu.dot_dimension_numbers<[2], [2], [1], [1], [0, 0, 0, 1, 1, 1], [0], [0]>} : vector<64x16x8xbf16>, vector<64x16x8xbf16>, vector<64x16x16xf32> -> vector<64x16x16xf32>
    "tpu.trace_stop"() : () -> ()
    %c0_17 = arith.constant 0 : index
    %c0_18 = arith.constant 0 : index
    %57 = vector.load %arg2[%c0_17, %c0_18] : memref<16x16xf32, #tpu.memory_space<vmem>>, vector<16x16xf32>
    %58 = vector.shape_cast %57 : vector<16x16xf32> to vector<1x16x16xf32>
    %59 = vector.broadcast %58 : vector<1x16x16xf32> to vector<64x16x16xf32>
    %60 = arith.addf %56, %59 : vector<64x16x16xf32>
    %cst_19 = arith.constant dense<0xFF800000> : vector<64x16xf32>
    %61 = vector.multi_reduction <maximumf>, %60, %cst_19 [2] : vector<64x16x16xf32> to vector<64x16xf32>
    %62 = vector.shape_cast %61 : vector<64x16xf32> to vector<64x16x1xf32>
    %63 = vector.broadcast %62 : vector<64x16x1xf32> to vector<64x16x16xf32>
    %64 = arith.subf %60, %63 : vector<64x16x16xf32>
    %65 = math.exp %64 : vector<64x16x16xf32>
    %cst_20 = arith.constant dense<0.000000e+00> : vector<64x16xf32>
    %66 = vector.multi_reduction <add>, %65, %cst_20 [2] : vector<64x16x16xf32> to vector<64x16xf32>
    %67 = vector.shape_cast %66 : vector<64x16xf32> to vector<64x16x1xf32>
    %68 = tpu.reciprocal %67 {approx = true} : vector<64x16x1xf32> -> vector<64x16x1xf32>
    %69 = vector.broadcast %68 : vector<64x16x1xf32> to vector<64x16x16xf32>
    %70 = arith.mulf %65, %69 : vector<64x16x16xf32>
    %71 = arith.truncf %70 : vector<64x16x16xf32> to vector<64x16x16xbf16>
    "tpu.trace_start"() <{level = 10 : i32, message = "bnm,bmd->bnd"}> : () -> ()
    %cst_21 = arith.constant dense<0.000000e+00> : vector<64x16x8xf32>
    %72 = tpu.matmul %71, %55, %cst_21 {dimension_numbers = #tpu.dot_dimension_numbers<[2], [1], [1], [2], [0, 0, 0, 1, 1, 2], [0], [0]>} : vector<64x16x16xbf16>, vector<64x16x8xbf16>, vector<64x16x8xf32> -> vector<64x16x8xf32>
    "tpu.trace_stop"() : () -> ()
    %73 = vector.shape_cast %72 : vector<64x16x8xf32> to vector<4x256x8xf32>
    %74 = vector.extract_strided_slice %73 {offsets = [0, 0, 0], sizes = [1, 256, 8], strides = [1, 1, 1]} : vector<4x256x8xf32> to vector<1x256x8xf32>
    %75 = vector.shape_cast %74 : vector<1x256x8xf32> to vector<256x8xf32>
    %76 = vector.extract_strided_slice %73 {offsets = [1, 0, 0], sizes = [1, 256, 8], strides = [1, 1, 1]} : vector<4x256x8xf32> to vector<1x256x8xf32>
    %77 = vector.shape_cast %76 : vector<1x256x8xf32> to vector<256x8xf32>
    %78 = vector.extract_strided_slice %73 {offsets = [2, 0, 0], sizes = [1, 256, 8], strides = [1, 1, 1]} : vector<4x256x8xf32> to vector<1x256x8xf32>
    %79 = vector.shape_cast %78 : vector<1x256x8xf32> to vector<256x8xf32>
    %80 = vector.extract_strided_slice %73 {offsets = [3, 0, 0], sizes = [1, 256, 8], strides = [1, 1, 1]} : vector<4x256x8xf32> to vector<1x256x8xf32>
    %81 = vector.shape_cast %80 : vector<1x256x8xf32> to vector<256x8xf32>
    %82 = tpu.concatenate %75, %77, %79, %81 in 1 : vector<256x8xf32>, vector<256x8xf32>, vector<256x8xf32>, vector<256x8xf32> -> vector<256x32xf32>
    %83 = arith.truncf %82 : vector<256x32xf32> to vector<256x32xbf16>
    %c0_22 = arith.constant 0 : index
    %c0_23 = arith.constant 0 : index
    %84 = vector.load %arg11[%c0_22, %c0_23] : memref<32x32xbf16, #tpu.memory_space<vmem>>, vector<32x32xbf16>
    %cst_24 = arith.constant dense<0.000000e+00> : vector<256x32xf32>
    %85 = tpu.matmul %83, %84, %cst_24 {dimension_numbers = #tpu.dot_dimension_numbers<[1], [0], [0], [1], [0, 0, 1, 1], [], []>} : vector<256x32xbf16>, vector<32x32xbf16>, vector<256x32xf32> -> vector<256x32xf32>
    %c0_25 = arith.constant 0 : index
    %c0_26 = arith.constant 0 : index
    %86 = vector.load %arg12[%c0_25, %c0_26] : memref<1x32xf32, #tpu.memory_space<vmem>>, vector<1x32xf32>
    %87 = vector.broadcast %86 : vector<1x32xf32> to vector<256x32xf32>
    %88 = arith.addf %85, %87 : vector<256x32xf32>
    %89 = arith.addf %0, %88 : vector<256x32xf32>
    %c0_27 = arith.constant 0 : index
    %c0_28 = arith.constant 0 : index
    %90 = vector.load %arg5[%c0_27, %c0_28] : memref<1x32xf32, #tpu.memory_space<vmem>>, vector<1x32xf32>
    %c0_29 = arith.constant 0 : index
    %c0_30 = arith.constant 0 : index
    %91 = vector.load %arg6[%c0_29, %c0_30] : memref<1x32xf32, #tpu.memory_space<vmem>>, vector<1x32xf32>
    %cst_31 = arith.constant dense<0.000000e+00> : vector<256xf32>
    %92 = vector.multi_reduction <add>, %89, %cst_31 [1] : vector<256x32xf32> to vector<256xf32>
    %93 = vector.shape_cast %92 : vector<256xf32> to vector<256x1xf32>
    %cst_32 = arith.constant 3.200000e+01 : f32
    %94 = vector.broadcast %cst_32 : f32 to vector<256x1xf32>
    %95 = arith.divf %93, %94 : vector<256x1xf32>
    %96 = vector.broadcast %95 : vector<256x1xf32> to vector<256x32xf32>
    %97 = arith.subf %89, %96 : vector<256x32xf32>
    %98 = arith.mulf %97, %97 : vector<256x32xf32>
    %cst_33 = arith.constant dense<0.000000e+00> : vector<256xf32>
    %99 = vector.multi_reduction <add>, %98, %cst_33 [1] : vector<256x32xf32> to vector<256xf32>
    %100 = vector.shape_cast %99 : vector<256xf32> to vector<256x1xf32>
    %cst_34 = arith.constant 3.200000e+01 : f32
    %101 = vector.broadcast %cst_34 : f32 to vector<256x1xf32>
    %102 = arith.divf %100, %101 : vector<256x1xf32>
    %103 = vector.broadcast %95 : vector<256x1xf32> to vector<256x32xf32>
    %104 = arith.subf %89, %103 : vector<256x32xf32>
    %cst_35 = arith.constant 9.99999974E-6 : f32
    %105 = vector.broadcast %cst_35 : f32 to vector<256x1xf32>
    %106 = arith.addf %102, %105 : vector<256x1xf32>
    %107 = math.rsqrt %106 : vector<256x1xf32>
    %108 = vector.broadcast %107 : vector<256x1xf32> to vector<256x32xf32>
    %109 = arith.mulf %104, %108 : vector<256x32xf32>
    %110 = vector.broadcast %90 : vector<1x32xf32> to vector<256x32xf32>
    %111 = arith.mulf %109, %110 : vector<256x32xf32>
    %112 = vector.broadcast %91 : vector<1x32xf32> to vector<256x32xf32>
    %113 = arith.addf %111, %112 : vector<256x32xf32>
    %114 = arith.truncf %113 : vector<256x32xf32> to vector<256x32xbf16>
    %c0_36 = arith.constant 0 : index
    %c0_37 = arith.constant 0 : index
    %115 = vector.load %arg13[%c0_36, %c0_37] : memref<32x64xbf16, #tpu.memory_space<vmem>>, vector<32x64xbf16>
    %cst_38 = arith.constant dense<0.000000e+00> : vector<256x64xf32>
    %116 = tpu.matmul %114, %115, %cst_38 {dimension_numbers = #tpu.dot_dimension_numbers<[1], [0], [0], [1], [0, 0, 1, 1], [], []>} : vector<256x32xbf16>, vector<32x64xbf16>, vector<256x64xf32> -> vector<256x64xf32>
    %c0_39 = arith.constant 0 : index
    %c0_40 = arith.constant 0 : index
    %117 = vector.load %arg14[%c0_39, %c0_40] : memref<1x64xf32, #tpu.memory_space<vmem>>, vector<1x64xf32>
    %118 = vector.broadcast %117 : vector<1x64xf32> to vector<256x64xf32>
    %119 = arith.addf %116, %118 : vector<256x64xf32>
    %cst_41 = arith.constant 0.000000e+00 : f32
    %120 = vector.broadcast %cst_41 : f32 to vector<256x64xf32>
    %121 = arith.maximumf %119, %120 : vector<256x64xf32>
    %122 = arith.truncf %121 : vector<256x64xf32> to vector<256x64xbf16>
    %c0_42 = arith.constant 0 : index
    %c0_43 = arith.constant 0 : index
    %123 = vector.load %arg15[%c0_42, %c0_43] : memref<64x32xbf16, #tpu.memory_space<vmem>>, vector<64x32xbf16>
    %cst_44 = arith.constant dense<0.000000e+00> : vector<256x32xf32>
    %124 = tpu.matmul %122, %123, %cst_44 {dimension_numbers = #tpu.dot_dimension_numbers<[1], [0], [0], [1], [0, 0, 1, 1], [], []>} : vector<256x64xbf16>, vector<64x32xbf16>, vector<256x32xf32> -> vector<256x32xf32>
    %c0_45 = arith.constant 0 : index
    %c0_46 = arith.constant 0 : index
    %125 = vector.load %arg16[%c0_45, %c0_46] : memref<1x32xf32, #tpu.memory_space<vmem>>, vector<1x32xf32>
    %126 = vector.broadcast %125 : vector<1x32xf32> to vector<256x32xf32>
    %127 = arith.addf %124, %126 : vector<256x32xf32>
    %128 = arith.addf %89, %127 : vector<256x32xf32>
    %c0_47 = arith.constant 0 : index
    %c0_48 = arith.constant 0 : index
    %129 = vector.load %arg7[%c0_47, %c0_48] : memref<1x32xf32, #tpu.memory_space<vmem>>, vector<1x32xf32>
    %c0_49 = arith.constant 0 : index
    %c0_50 = arith.constant 0 : index
    %130 = vector.load %arg8[%c0_49, %c0_50] : memref<1x32xf32, #tpu.memory_space<vmem>>, vector<1x32xf32>
    %cst_51 = arith.constant dense<0.000000e+00> : vector<256xf32>
    %131 = vector.multi_reduction <add>, %128, %cst_51 [1] : vector<256x32xf32> to vector<256xf32>
    %132 = vector.shape_cast %131 : vector<256xf32> to vector<256x1xf32>
    %cst_52 = arith.constant 3.200000e+01 : f32
    %133 = vector.broadcast %cst_52 : f32 to vector<256x1xf32>
    %134 = arith.divf %132, %133 : vector<256x1xf32>
    %135 = vector.broadcast %134 : vector<256x1xf32> to vector<256x32xf32>
    %136 = arith.subf %128, %135 : vector<256x32xf32>
    %137 = arith.mulf %136, %136 : vector<256x32xf32>
    %cst_53 = arith.constant dense<0.000000e+00> : vector<256xf32>
    %138 = vector.multi_reduction <add>, %137, %cst_53 [1] : vector<256x32xf32> to vector<256xf32>
    %139 = vector.shape_cast %138 : vector<256xf32> to vector<256x1xf32>
    %cst_54 = arith.constant 3.200000e+01 : f32
    %140 = vector.broadcast %cst_54 : f32 to vector<256x1xf32>
    %141 = arith.divf %139, %140 : vector<256x1xf32>
    %142 = vector.broadcast %134 : vector<256x1xf32> to vector<256x32xf32>
    %143 = arith.subf %128, %142 : vector<256x32xf32>
    %cst_55 = arith.constant 9.99999974E-6 : f32
    %144 = vector.broadcast %cst_55 : f32 to vector<256x1xf32>
    %145 = arith.addf %141, %144 : vector<256x1xf32>
    %146 = math.rsqrt %145 : vector<256x1xf32>
    %147 = vector.broadcast %146 : vector<256x1xf32> to vector<256x32xf32>
    %148 = arith.mulf %143, %147 : vector<256x32xf32>
    %149 = vector.broadcast %129 : vector<1x32xf32> to vector<256x32xf32>
    %150 = arith.mulf %148, %149 : vector<256x32xf32>
    %151 = vector.broadcast %130 : vector<1x32xf32> to vector<256x32xf32>
    %152 = arith.addf %150, %151 : vector<256x32xf32>
    %153 = tpu.iota {dimensions = array<i32: 0>} : vector<256x1xi32>
    %c127_i32 = arith.constant 127 : i32
    %154 = vector.broadcast %c127_i32 : i32 to vector<256x1xi32>
    %155 = arith.andi %153, %154 : vector<256x1xi32>
    %c16_i32 = arith.constant 16 : i32
    %156 = vector.broadcast %c16_i32 : i32 to vector<256x1xi32>
    %157 = arith.cmpi sge, %155, %156 : vector<256x1xi32>
    %c16_i32_56 = arith.constant 16 : i32
    %158 = tpu.dynamic_rotate %152 by %c16_i32_56 dim 0 : vector<256x32xf32>, i32 -> vector<256x32xf32>
    %cst_57 = arith.constant 0.000000e+00 : f32
    %159 = vector.shape_cast %157 : vector<256x1xi1> to vector<256x1xi1>
    %160 = vector.broadcast %159 : vector<256x1xi1> to vector<256x32xi1>
    %161 = vector.broadcast %cst_57 : f32 to vector<256x32xf32>
    %162 = arith.select %160, %158, %161 : vector<256x32xi1>, vector<256x32xf32>
    %c112_i32 = arith.constant 112 : i32
    %163 = vector.broadcast %c112_i32 : i32 to vector<256x1xi32>
    %164 = arith.cmpi slt, %155, %163 : vector<256x1xi32>
    %c240_i32 = arith.constant 240 : i32
    %165 = tpu.dynamic_rotate %152 by %c240_i32 dim 0 : vector<256x32xf32>, i32 -> vector<256x32xf32>
    %cst_58 = arith.constant 0.000000e+00 : f32
    %166 = vector.shape_cast %164 : vector<256x1xi1> to vector<256x1xi1>
    %167 = vector.broadcast %166 : vector<256x1xi1> to vector<256x32xi1>
    %168 = vector.broadcast %cst_58 : f32 to vector<256x32xf32>
    %169 = arith.select %167, %165, %168 : vector<256x32xi1>, vector<256x32xf32>
    %170 = tpu.concatenate %162, %152, %169 in 1 : vector<256x32xf32>, vector<256x32xf32>, vector<256x32xf32> -> vector<256x96xf32>
    %171 = arith.truncf %170 : vector<256x96xf32> to vector<256x96xbf16>
    %c0_59 = arith.constant 0 : index
    %c0_60 = arith.constant 0 : index
    %172 = vector.load %arg17[%c0_59, %c0_60] : memref<96x64xbf16, #tpu.memory_space<vmem>>, vector<96x64xbf16>
    %cst_61 = arith.constant dense<0.000000e+00> : vector<256x64xf32>
    %173 = tpu.matmul %171, %172, %cst_61 {dimension_numbers = #tpu.dot_dimension_numbers<[1], [0], [0], [1], [0, 0, 1, 1], [], []>} : vector<256x96xbf16>, vector<96x64xbf16>, vector<256x64xf32> -> vector<256x64xf32>
    %c0_62 = arith.constant 0 : index
    %c0_63 = arith.constant 0 : index
    %174 = vector.load %arg18[%c0_62, %c0_63] : memref<1x64xf32, #tpu.memory_space<vmem>>, vector<1x64xf32>
    %175 = vector.broadcast %174 : vector<1x64xf32> to vector<256x64xf32>
    %176 = arith.addf %173, %175 : vector<256x64xf32>
    %177 = vector.extract_strided_slice %176 {offsets = [0, 0], sizes = [256, 32], strides = [1, 1]} : vector<256x64xf32> to vector<256x32xf32>
    %178 = vector.extract_strided_slice %176 {offsets = [0, 32], sizes = [256, 32], strides = [1, 1]} : vector<256x64xf32> to vector<256x32xf32>
    %179 = arith.negf %178 : vector<256x32xf32>
    %180 = math.exp %179 : vector<256x32xf32>
    %cst_64 = arith.constant 1.000000e+00 : f32
    %181 = vector.broadcast %cst_64 : f32 to vector<256x32xf32>
    %182 = arith.addf %181, %180 : vector<256x32xf32>
    %183 = arith.divf %181, %182 : vector<256x32xf32>
    %184 = arith.mulf %177, %183 : vector<256x32xf32>
    %185 = arith.addf %128, %184 : vector<256x32xf32>
    %c0_65 = arith.constant 0 : index
    %c0_66 = arith.constant 0 : index
    %186 = vector.load %arg19[%c0_65, %c0_66] : memref<256x32xf32, #tpu.memory_space<vmem>>, vector<256x32xf32>
    tpu.vector_store %arg19[%c0_65, %c0_66], %185 {strides = array<i32>} : memref<256x32xf32, #tpu.memory_space<vmem>>, vector<256x32xf32>,
    return
  }
}

</mosaic_0001>

<bundles_post_ra>
// kernel: tpu_custom_call.1
= control target key start
LH: loop header
LB: loop body
LE: loop exit
PB: predicated region body
PF: predicated region fallthrough
CT: control target
= control target key end

     0   :  { %vm97_vm0 = vcmask 261120   ;;  %vm15166_vm1 = vmmov 0   ;;  %s15169_s27 = smov 112   ;;  %s15170_s28 = smov 104   ;;  %vm1005_vm2 = vcmask 64512   ;;  %vm4140_vm3 = vcmask 130048   ;;  %s21704_s0 = inlined_call_operand.vmem [shape: f32[256,32], index: 0, kind: input, shape index: {}]   ;;  %s21705_s9 = inlined_call_operand.vmem [shape: bf16[32,96], index: 9, kind: input, shape index: {}]   ;;  %s21706_s3 = inlined_call_operand.vmem [shape: f32[1,32], index: 3, kind: input, shape index: {}]   ;;  %s21707_s4 = inlined_call_operand.vmem [shape: f32[1,32], index: 4, kind: input, shape index: {}]   ;;  %s21708_s1 = inlined_call_operand.vmem [shape: f32[16,32], index: 1, kind: input, shape index: {}]   ;;  %s21709_s10 = inlined_call_operand.vmem [shape: f32[1,96], index: 10, kind: input, shape index: {}]   ;;  %s21710_s2 = inlined_call_operand.vmem [shape: f32[16,16], index: 2, kind: input, shape index: {}]   ;;  %s21711_s11 = inlined_call_operand.vmem [shape: bf16[32,32], index: 11, kind: input, shape index: {}]   ;;  %s21712_s12 = inlined_call_operand.vmem [shape: f32[1,32], index: 12, kind: input, shape index: {}]   ;;  %s21713_s13 = inlined_call_operand.vmem [shape: bf16[32,64], index: 13, kind: input, shape index: {}]   ;;  %s21714_s5 = inlined_call_operand.vmem [shape: f32[1,32], index: 5, kind: input, shape index: {}]   ;;  %s21715_s6 = inlined_call_operand.vmem [shape: f32[1,32], index: 6, kind: input, shape index: {}]   ;;  %s21716_s15 = inlined_call_operand.vmem [shape: bf16[64,32], index: 15, kind: input, shape index: {}]   ;;  %s21717_s14 = inlined_call_operand.vmem [shape: f32[1,64], index: 14, kind: input, shape index: {}]   ;;  %s21718_s16 = inlined_call_operand.vmem [shape: f32[1,32], index: 16, kind: input, shape index: {}]   ;;  %s21719_s7 = inlined_call_operand.vmem [shape: f32[1,32], index: 7, kind: input, shape index: {}]   ;;  %s21720_s8 = inlined_call_operand.vmem [shape: f32[1,32], index: 8, kind: input, shape index: {}]   ;;  %s21721_s17 = inlined_call_operand.vmem [shape: bf16[96,64], index: 17, kind: input, shape index: {}]   ;;  %s21722_s18 = inlined_call_operand.vmem [shape: f32[1,64], index: 18, kind: input, shape index: {}]   ;;  %s21723_s19 = inlined_call_operand.vmem [shape: f32[256,32], index: 19, kind: output, shape index: {}]  }
   0x1   :  { %21995 = sst [smem:[#allocation162_spill]] %s21704_s0  ;;  %s15171_s29 = smov 64   ;;  %vm9069_vm4 = vcmask 195584   ;;  %vm10211_vm5 = vcmask 523264   ;;  %vm11659_vm6 = vcmask 785408  }
   0x2   :  { %21996 = sst [smem:[#allocation163_spill]] %s21705_s9  ;;  %s21999_s20 = sld [smem:[#allocation162_spill]] }
   0x3   :  { %21997 = sst [smem:[#allocation164_spill]] %s21706_s3  ;;  %s22000_s26 = sld [smem:[#allocation163_spill]] }
   0x4   :  { %21998 = sst [smem:[#allocation165_spill]] %s21707_s4  ;;  %s22001_s30 = sld [smem:[#allocation164_spill]] }
   0x5   :  { %s22002_s22 = sld [smem:[#allocation165_spill]]  ;;  %s15173_s21 = smov 16  }
   0x6   :  { %s15174_s9 = smov 24  }
   0x8   :  { %v15279_v0 = vld [vmem:[%s21999_s20] sm:$0xff]  ;;  %v15284_v1 = vld [vmem:[%s21999_s20 + $0x10] sm:$0xff]  ;;  %v15289_v2 = vld [vmem:[%s21999_s20 + $0x8] sm:$0xff] }
   0x9   :  { %v98_v3 = vsel %vm97_vm0, %v15279_v0, 0.0  ;;  %v104_v4 = vsel %vm97_vm0, %v15284_v1, 0.0  ;;  %v15298_v5 = vld [vmem:[%s21999_s20 + $0x18] sm:$0xff]  ;;  %v101_v6 = vsel %vm97_vm0, %v15289_v2, 0.0  ;;  %v15307_v8 = vld [vmem:[%s21999_s20 + $0x20] sm:$0xff]  ;;  %v15312_v9 = vld [vmem:[%s21999_s20 + $0x28] sm:$0xff] }
   0xa   :  { %99 = vadd.xlane.f32.xlu0 %v98_v3  ;;  %105 = vadd.xlane.f32.xlu1 %v104_v4  ;;  %v107_v7 = vsel %vm97_vm0, %v15298_v5, 0.0  ;;  %v110_v10 = vsel %vm97_vm0, %v15307_v8, 0.0  ;;  %v113_v11 = vsel %vm97_vm0, %v15312_v9, 0.0  ;;  %v15321_v12 = vld [vmem:[%s21999_s20 + $0x30] sm:$0xff]  ;;  %v15326_v13 = vld [vmem:[%s21999_s20 + $0x38] sm:$0xff]  ;;  %v15335_v16 = vld [vmem:[%s21999_s20 + $0x40] sm:$0xff] }
   0xb   :  { %v116_v14 = vsel %vm97_vm0, %v15321_v12, 0.0  ;;  %v119_v15 = vsel %vm97_vm0, %v15326_v13, 0.0  ;;  %v15340_v17 = vld [vmem:[%s21999_s20 + $0x48] sm:$0xff]  ;;  %v122_v18 = vsel %vm97_vm0, %v15335_v16, 0.0  ;;  %v15349_v20 = vld [vmem:[%s21999_s20 + $0x50] sm:$0xff]  ;;  %v15354_v21 = vld [vmem:[%s21999_s20 + $0x58] sm:$0xff] }
   0xc   :  { %v125_v19 = vsel %vm97_vm0, %v15340_v17, 0.0  ;;  %v128_v22 = vsel %vm97_vm0, %v15349_v20, 0.0  ;;  %v131_v23 = vsel %vm97_vm0, %v15354_v21, 0.0  ;;  %v15363_v24 = vld [vmem:[%s21999_s20 + $0x60] sm:$0xff]  ;;  %v15368_v25 = vld [vmem:[%s21999_s20 + $0x68] sm:$0xff]  ;;  %v15377_v28 = vld [vmem:[%s21999_s20 + $0x70] sm:$0xff] }
   0xd   :  { %v134_v26 = vsel %vm97_vm0, %v15363_v24, 0.0  ;;  %v137_v27 = vsel %vm97_vm0, %v15368_v25, 0.0  ;;  %v15382_v29 = vld [vmem:[%s21999_s20 + $0x78] sm:$0xff]  ;;  %v140_v30 = vsel %vm97_vm0, %v15377_v28, 0.0  ;;  %v15391_v32 = vld [vmem:[%s21999_s20 + $0x80] sm:$0xff]  ;;  %v15396_v33 = vld [vmem:[%s21999_s20 + $0x88] sm:$0xff] }
   0xe   :  { %102 = vadd.xlane.f32.xlu0 %v101_v6  ;;  %108 = vadd.xlane.f32.xlu1 %v107_v7  ;;  %v143_v31 = vsel %vm97_vm0, %v15382_v29, 0.0  ;;  %v146_v34 = vsel %vm97_vm0, %v15391_v32, 0.0  ;;  %v149_v35 = vsel %vm97_vm0, %v15396_v33, 0.0  ;;  %v15405_v36 = vld [vmem:[%s21999_s20 + $0x90] sm:$0xff]  ;;  %v15410_v37 = vld [vmem:[%s21999_s20 + $0x98] sm:$0xff]  ;;  %v15419_v40 = vld [vmem:[%s21999_s20 + $0xa0] sm:$0xff] }
   0xf   :  { %v152_v38 = vsel %vm97_vm0, %v15405_v36, 0.0  ;;  %v155_v39 = vsel %vm97_vm0, %v15410_v37, 0.0  ;;  %v15424_v41 = vld [vmem:[%s21999_s20 + $0xa8] sm:$0xff]  ;;  %v158_v42 = vsel %vm97_vm0, %v15419_v40, 0.0  ;;  %v15433_v44 = vld [vmem:[%s21999_s20 + $0xb0] sm:$0xff]  ;;  %v15438_v45 = vld [vmem:[%s21999_s20 + $0xb8] sm:$0xff] }
  0x10   :  { %v161_v43 = vsel %vm97_vm0, %v15424_v41, 0.0  ;;  %v164_v46 = vsel %vm97_vm0, %v15433_v44, 0.0  ;;  %v167_v47 = vsel %vm97_vm0, %v15438_v45, 0.0  ;;  %v15447_v48 = vld [vmem:[%s21999_s20 + $0xc0] sm:$0xff]  ;;  %v15452_v49 = vld [vmem:[%s21999_s20 + $0xc8] sm:$0xff]  ;;  %v15461_v52 = vld [vmem:[%s21999_s20 + $0xd0] sm:$0xff] }
  0x11   :  { %v170_v50 = vsel %vm97_vm0, %v15447_v48, 0.0  ;;  %v173_v51 = vsel %vm97_vm0, %v15452_v49, 0.0  ;;  %v15466_v53 = vld [vmem:[%s21999_s20 + $0xd8] sm:$0xff]  ;;  %v176_v54 = vsel %vm97_vm0, %v15461_v52, 0.0  ;;  %v15475_v56 = vld [vmem:[%s21999_s20 + $0xe0] sm:$0xff]  ;;  %v15480_v57 = vld [vmem:[%s21999_s20 + $0xe8] sm:$0xff] }
  0x12   :  { %111 = vadd.xlane.f32.xlu0 %v110_v10  ;;  %114 = vadd.xlane.f32.xlu1 %v113_v11  ;;  %v179_v55 = vsel %vm97_vm0, %v15466_v53, 0.0  ;;  %v182_v58 = vsel %vm97_vm0, %v15475_v56, 0.0  ;;  %v185_v59 = vsel %vm97_vm0, %v15480_v57, 0.0  ;;  %v15489_v60 = vld [vmem:[%s21999_s20 + $0xf0] sm:$0xff]  ;;  %v15494_v61 = vld [vmem:[%s21999_s20 + $0xf8] sm:$0xff] }
  0x13   :  { %v188_v62 = vsel %vm97_vm0, %v15489_v60, 0.0  ;;  %v191_v63 = vsel %vm97_vm0, %v15494_v61, 0.0 }
  0x16   :  { %117 = vadd.xlane.f32.xlu0 %v116_v14  ;;  %120 = vadd.xlane.f32.xlu1 %v119_v15 }
  0x1a   :  { %123 = vadd.xlane.f32.xlu0 %v122_v18  ;;  %126 = vadd.xlane.f32.xlu1 %v125_v19 }
  0x1e   :  { %129 = vadd.xlane.f32.xlu0 %v128_v22  ;;  %132 = vadd.xlane.f32.xlu1 %v131_v23 }
  0x22   :  { %135 = vadd.xlane.f32.xlu0 %v134_v26  ;;  %138 = vadd.xlane.f32.xlu1 %v137_v27 }
  0x26   :  { %141 = vadd.xlane.f32.xlu0 %v140_v30  ;;  %144 = vadd.xlane.f32.xlu1 %v143_v31 }
  0x2a   :  { %147 = vadd.xlane.f32.xlu0 %v146_v34  ;;  %150 = vadd.xlane.f32.xlu1 %v149_v35 }
  0x2e   :  { %153 = vadd.xlane.f32.xlu0 %v152_v38  ;;  %156 = vadd.xlane.f32.xlu1 %v155_v39 }
  0x32   :  { %159 = vadd.xlane.f32.xlu0 %v158_v42  ;;  %162 = vadd.xlane.f32.xlu1 %v161_v43 }
  0x36   :  { %165 = vadd.xlane.f32.xlu0 %v164_v46  ;;  %168 = vadd.xlane.f32.xlu1 %v167_v47 }
  0x3a   :  { %171 = vadd.xlane.f32.xlu0 %v170_v50  ;;  %174 = vadd.xlane.f32.xlu1 %v173_v51 }
  0x3e   :  { %177 = vadd.xlane.f32.xlu0 %v176_v54  ;;  %180 = vadd.xlane.f32.xlu1 %v179_v55 }
  0x42   :  { %183 = vadd.xlane.f32.xlu0 %v182_v58  ;;  %186 = vadd.xlane.f32.xlu1 %v185_v59 }
  0x46   :  { %189 = vadd.xlane.f32.xlu0 %v188_v62  ;;  %192 = vadd.xlane.f32.xlu1 %v191_v63 }
  0x97   :  { %v100_v3 = vpop.xlane.xlu0 %99  ;;  %v106_v4 = vpop.xlane.xlu1 %105 }
  0x98   :  { %v195_v6 = vmul.f32 0.03125, %v100_v3  ;;  %v197_v7 = vmul.f32 0.03125, %v106_v4 }
  0x9a   :  { %v15501_v10 = vsub.f32 %v15279_v0, %v195_v6  ;;  %v15504_v11 = vsub.f32 %v15284_v1, %v197_v7 }
  0x9b   :  { %v103_v14 = vpop.xlane.xlu0 %102  ;;  %v109_v15 = vpop.xlane.xlu1 %108 }
  0x9c   :  { %v196_v18 = vmul.f32 0.03125, %v103_v14  ;;  %v198_v19 = vmul.f32 0.03125, %v109_v15  ;;  %v259_v22 = vmul.f32 %v15501_v10, %v15501_v10  ;;  %v261_v23 = vmul.f32 %v15504_v11, %v15504_v11 }
  0x9e   :  { %v15511_v26 = vsub.f32 %v15289_v2, %v196_v18  ;;  %v15514_v27 = vsub.f32 %v15298_v5, %v198_v19  ;;  %v291_v0 = vsel %vm97_vm0, %v259_v22, 0.0  ;;  %v297_v31 = vsel %vm97_vm0, %v261_v23, 0.0 }
  0x9f   :  { %292 = vadd.xlane.f32.xlu0 %v291_v0  ;;  %v112_v1 = vpop.xlane.xlu0 %111  ;;  %v115_v30 = vpop.xlane.xlu1 %114 }
  0xa0   :  { %v199_v34 = vmul.f32 0.03125, %v112_v1  ;;  %v200_v35 = vmul.f32 0.03125, %v115_v30  ;;  %v260_v38 = vmul.f32 %v15511_v26, %v15511_v26  ;;  %v262_v39 = vmul.f32 %v15514_v27, %v15514_v27 }
  0xa2   :  { %v15523_v2 = vsub.f32 %v15307_v8, %v199_v34  ;;  %v15526_v5 = vsub.f32 %v15312_v9, %v200_v35  ;;  %v294_v42 = vsel %vm97_vm0, %v260_v38, 0.0  ;;  %v300_v47 = vsel %vm97_vm0, %v262_v39, 0.0 }
  0xa3   :  { %298 = vadd.xlane.f32.xlu0 %v297_v31  ;;  %295 = vadd.xlane.f32.xlu1 %v294_v42  ;;  %v118_v43 = vpop.xlane.xlu0 %117  ;;  %v121_v46 = vpop.xlane.xlu1 %120 }
  0xa4   :  { %v201_v50 = vmul.f32 0.03125, %v118_v43  ;;  %v202_v51 = vmul.f32 0.03125, %v121_v46  ;;  %v263_v54 = vmul.f32 %v15523_v2, %v15523_v2  ;;  %v264_v8 = vmul.f32 %v15526_v5, %v15526_v5 }
  0xa6   :  { %v15535_v55 = vsub.f32 %v15321_v12, %v201_v50  ;;  %v15538_v9 = vsub.f32 %v15326_v13, %v202_v51  ;;  %v303_v58 = vsel %vm97_vm0, %v263_v54, 0.0  ;;  %v306_v63 = vsel %vm97_vm0, %v264_v8, 0.0 }
  0xa7   :  { %301 = vadd.xlane.f32.xlu1 %v300_v47  ;;  %304 = vadd.xlane.f32.xlu0 %v303_v58  ;;  %v124_v59 = vpop.xlane.xlu0 %123  ;;  %v127_v62 = vpop.xlane.xlu1 %126 }
  0xa8   :  { %v203_v3 = vmul.f32 0.03125, %v124_v59  ;;  %v204_v4 = vmul.f32 0.03125, %v127_v62  ;;  %v265_v6 = vmul.f32 %v15535_v55, %v15535_v55  ;;  %v266_v12 = vmul.f32 %v15538_v9, %v15538_v9 }
  0xaa   :  { %v15547_v7 = vsub.f32 %v15335_v16, %v203_v3  ;;  %v15550_v13 = vsub.f32 %v15340_v17, %v204_v4  ;;  %v309_v14 = vsel %vm97_vm0, %v265_v6, 0.0  ;;  %v312_v19 = vsel %vm97_vm0, %v266_v12, 0.0 }
  0xab   :  { %307 = vadd.xlane.f32.xlu1 %v306_v63  ;;  %310 = vadd.xlane.f32.xlu0 %v309_v14  ;;  %v130_v15 = vpop.xlane.xlu0 %129  ;;  %v133_v18 = vpop.xlane.xlu1 %132 }
  0xac   :  { %v205_v22 = vmul.f32 0.03125, %v130_v15  ;;  %v206_v23 = vmul.f32 0.03125, %v133_v18  ;;  %v267_v0 = vmul.f32 %v15547_v7, %v15547_v7  ;;  %v268_v16 = vmul.f32 %v15550_v13, %v15550_v13 }
  0xae   :  { %v15559_v1 = vsub.f32 %v15349_v20, %v205_v22  ;;  %v15562_v17 = vsub.f32 %v15354_v21, %v206_v23  ;;  %v315_v30 = vsel %vm97_vm0, %v267_v0, 0.0  ;;  %v318_v35 = vsel %vm97_vm0, %v268_v16, 0.0 }
  0xaf   :  { %313 = vadd.xlane.f32.xlu1 %v312_v19  ;;  %316 = vadd.xlane.f32.xlu0 %v315_v30  ;;  %v136_v31 = vpop.xlane.xlu0 %135  ;;  %v139_v34 = vpop.xlane.xlu1 %138 }
  0xb0   :  { %v207_v38 = vmul.f32 0.03125, %v136_v31  ;;  %v208_v39 = vmul.f32 0.03125, %v139_v34  ;;  %v269_v42 = vmul.f32 %v15559_v1, %v15559_v1  ;;  %v270_v20 = vmul.f32 %v15562_v17, %v15562_v17 }
  0xb2   :  { %v15571_v43 = vsub.f32 %v15363_v24, %v207_v38  ;;  %v15574_v21 = vsub.f32 %v15368_v25, %v208_v39  ;;  %v321_v46 = vsel %vm97_vm0, %v269_v42, 0.0  ;;  %v324_v51 = vsel %vm97_vm0, %v270_v20, 0.0 }
  0xb3   :  { %319 = vadd.xlane.f32.xlu1 %v318_v35  ;;  %322 = vadd.xlane.f32.xlu0 %v321_v46  ;;  %v142_v47 = vpop.xlane.xlu0 %141  ;;  %v145_v50 = vpop.xlane.xlu1 %144 }
  0xb4   :  { %v209_v54 = vmul.f32 0.03125, %v142_v47  ;;  %v210_v8 = vmul.f32 0.03125, %v145_v50  ;;  %v271_v58 = vmul.f32 %v15571_v43, %v15571_v43  ;;  %v272_v24 = vmul.f32 %v15574_v21, %v15574_v21 }
  0xb6   :  { %v15583_v59 = vsub.f32 %v15377_v28, %v209_v54  ;;  %v15586_v25 = vsub.f32 %v15382_v29, %v210_v8  ;;  %v327_v62 = vsel %vm97_vm0, %v271_v58, 0.0  ;;  %v330_v4 = vsel %vm97_vm0, %v272_v24, 0.0 }
  0xb7   :  { %325 = vadd.xlane.f32.xlu1 %v324_v51  ;;  %328 = vadd.xlane.f32.xlu0 %v327_v62  ;;  %v148_v63 = vpop.xlane.xlu0 %147  ;;  %v151_v3 = vpop.xlane.xlu1 %150 }
  0xb8   :  { %v211_v6 = vmul.f32 0.03125, %v148_v63  ;;  %v212_v12 = vmul.f32 0.03125, %v151_v3  ;;  %v273_v14 = vmul.f32 %v15583_v59, %v15583_v59  ;;  %v274_v28 = vmul.f32 %v15586_v25, %v15586_v25 }
  0xba   :  { %v15595_v15 = vsub.f32 %v15391_v32, %v211_v6  ;;  %v15598_v29 = vsub.f32 %v15396_v33, %v212_v12  ;;  %v333_v18 = vsel %vm97_vm0, %v273_v14, 0.0  ;;  %v336_v23 = vsel %vm97_vm0, %v274_v28, 0.0 }
  0xbb   :  { %331 = vadd.xlane.f32.xlu1 %v330_v4  ;;  %334 = vadd.xlane.f32.xlu0 %v333_v18  ;;  %v154_v19 = vpop.xlane.xlu0 %153  ;;  %v157_v22 = vpop.xlane.xlu1 %156 }
  0xbc   :  { %v213_v0 = vmul.f32 0.03125, %v154_v19  ;;  %v214_v16 = vmul.f32 0.03125, %v157_v22  ;;  %v275_v30 = vmul.f32 %v15595_v15, %v15595_v15  ;;  %v276_v32 = vmul.f32 %v15598_v29, %v15598_v29 }
  0xbe   :  { %v15607_v31 = vsub.f32 %v15405_v36, %v213_v0  ;;  %v15610_v33 = vsub.f32 %v15410_v37, %v214_v16  ;;  %v339_v34 = vsel %vm97_vm0, %v275_v30, 0.0  ;;  %v342_v39 = vsel %vm97_vm0, %v276_v32, 0.0 }
  0xbf   :  { %337 = vadd.xlane.f32.xlu1 %v336_v23  ;;  %340 = vadd.xlane.f32.xlu0 %v339_v34  ;;  %v160_v35 = vpop.xlane.xlu0 %159  ;;  %v163_v38 = vpop.xlane.xlu1 %162 }
  0xc0   :  { %v215_v42 = vmul.f32 0.03125, %v160_v35  ;;  %v216_v20 = vmul.f32 0.03125, %v163_v38  ;;  %v277_v46 = vmul.f32 %v15607_v31, %v15607_v31  ;;  %v278_v36 = vmul.f32 %v15610_v33, %v15610_v33 }
  0xc2   :  { %v15619_v47 = vsub.f32 %v15419_v40, %v215_v42  ;;  %v15622_v37 = vsub.f32 %v15424_v41, %v216_v20  ;;  %v345_v50 = vsel %vm97_vm0, %v277_v46, 0.0  ;;  %v348_v8 = vsel %vm97_vm0, %v278_v36, 0.0  ;;  %v14279_v41 = vld [vmem:[%s22000_s26] sm:$0xff]  }
  0xc3   :  { %343 = vadd.xlane.f32.xlu1 %v342_v39  ;;  %346 = vadd.xlane.f32.xlu0 %v345_v50  ;;  %v166_v51 = vpop.xlane.xlu0 %165  ;;  %v169_v54 = vpop.xlane.xlu1 %168 }
  0xc4   :  { %v217_v58 = vmul.f32 0.03125, %v166_v51  ;;  %v218_v24 = vmul.f32 0.03125, %v169_v54  ;;  %v279_v62 = vmul.f32 %v15619_v47, %v15619_v47  ;;  %v280_v40 = vmul.f32 %v15622_v37, %v15622_v37  ;;  %12908 = vmatprep.subr.bf16.mxu0 %v14279_v41 }
  0xc5   :  { %12909 = vmatpush3.bf16.msra.mxu0 %v14279_v41 }
  0xc6   :  { %v15634_v63 = vsub.f32 %v15433_v44, %v217_v58  ;;  %v15637_v3 = vsub.f32 %v15438_v45, %v218_v24  ;;  %v351_v4 = vsel %vm97_vm0, %v279_v62, 0.0  ;;  %v354_v14 = vsel %vm97_vm0, %v280_v40, 0.0  ;;  %v14280_v45 = vld [vmem:[%s22000_s26 + $0x8] sm:$0xff]   ;;  %s15168_s26 = smov 96  }
  0xc7   :  { %349 = vadd.xlane.f32.xlu1 %v348_v8  ;;  %352 = vadd.xlane.f32.xlu0 %v351_v4  ;;  %v172_v6 = vpop.xlane.xlu0 %171  ;;  %v175_v12 = vpop.xlane.xlu1 %174 }
  0xc8   :  { %v219_v28 = vmul.f32 0.03125, %v172_v6  ;;  %v220_v18 = vmul.f32 0.03125, %v175_v12  ;;  %v281_v19 = vmul.f32 %v15634_v63, %v15634_v63  ;;  %v282_v44 = vmul.f32 %v15637_v3, %v15637_v3  ;;  %12910 = vmatprep.subr.bf16.mxu0 %v14280_v45 }
  0xc9   :  { %12911 = vmatpush3.bf16.msra.mxu0 %v14280_v45 }
  0xca   :  { %v15649_v22 = vsub.f32 %v15447_v48, %v219_v28  ;;  %v15652_v23 = vsub.f32 %v15452_v49, %v220_v18  ;;  %v357_v0 = vsel %vm97_vm0, %v281_v19, 0.0  ;;  %v360_v32 = vsel %vm97_vm0, %v282_v44, 0.0 }
  0xcb   :  { %355 = vadd.xlane.f32.xlu1 %v354_v14  ;;  %358 = vadd.xlane.f32.xlu0 %v357_v0  ;;  %v178_v16 = vpop.xlane.xlu0 %177  ;;  %v181_v30 = vpop.xlane.xlu1 %180 }
  0xcc   :  { %v221_v34 = vmul.f32 0.03125, %v178_v16  ;;  %v222_v35 = vmul.f32 0.03125, %v181_v30  ;;  %v283_v38 = vmul.f32 %v15649_v22, %v15649_v22  ;;  %v284_v48 = vmul.f32 %v15652_v23, %v15652_v23 }
  0xce   :  { %v15661_v49 = vsub.f32 %v15461_v52, %v221_v34  ;;  %v15664_v39 = vsub.f32 %v15466_v53, %v222_v35  ;;  %v363_v42 = vsel %vm97_vm0, %v283_v38, 0.0  ;;  %v366_v36 = vsel %vm97_vm0, %v284_v48, 0.0 }
  0xcf   :  { %361 = vadd.xlane.f32.xlu1 %v360_v32  ;;  %364 = vadd.xlane.f32.xlu0 %v363_v42  ;;  %v184_v20 = vpop.xlane.xlu0 %183  ;;  %v187_v46 = vpop.xlane.xlu1 %186 }
  0xd0   :  { %v223_v50 = vmul.f32 0.03125, %v184_v20  ;;  %v224_v51 = vmul.f32 0.03125, %v187_v46  ;;  %v285_v54 = vmul.f32 %v15661_v49, %v15661_v49  ;;  %v286_v52 = vmul.f32 %v15664_v39, %v15664_v39 }
  0xd2   :  { %v15673_v8 = vsub.f32 %v15475_v56, %v223_v50  ;;  %v15676_v53 = vsub.f32 %v15480_v57, %v224_v51  ;;  %v369_v58 = vsel %vm97_vm0, %v285_v54, 0.0  ;;  %v372_v40 = vsel %vm97_vm0, %v286_v52, 0.0 }
  0xd3   :  { %367 = vadd.xlane.f32.xlu1 %v366_v36  ;;  %370 = vadd.xlane.f32.xlu0 %v369_v58  ;;  %v190_v24 = vpop.xlane.xlu0 %189  ;;  %v193_v62 = vpop.xlane.xlu1 %192 }
  0xd4   :  { %v225_v41 = vmul.f32 0.03125, %v190_v24  ;;  %v226_v4 = vmul.f32 0.03125, %v193_v62  ;;  %v287_v6 = vmul.f32 %v15673_v8, %v15673_v8  ;;  %v288_v56 = vmul.f32 %v15676_v53, %v15676_v53 }
  0xd6   :  { %v15685_v12 = vsub.f32 %v15489_v60, %v225_v41  ;;  %v15688_v57 = vsub.f32 %v15494_v61, %v226_v4  ;;  %v375_v14 = vsel %vm97_vm0, %v287_v6, 0.0  ;;  %v378_v28 = vsel %vm97_vm0, %v288_v56, 0.0  ;;  %v15701_v41 = vld [vmem:[%s22001_s30] ss:$0 sm:$0xff] }
  0xd7   :  { %373 = vadd.xlane.f32.xlu1 %v372_v40  ;;  %376 = vadd.xlane.f32.xlu0 %v375_v14 }
  0xd8   :  { %v289_v18 = vmul.f32 %v15685_v12, %v15685_v12  ;;  %v290_v19 = vmul.f32 %v15688_v57, %v15688_v57 }
  0xda   :  { %v381_v44 = vsel %vm97_vm0, %v289_v18, 0.0  ;;  %v384_v60 = vsel %vm97_vm0, %v290_v19, 0.0  ;;  %v15707_v18 = vld [vmem:[%s22002_s22] ss:$0 sm:$0xff] }
  0xdb   :  { %379 = vadd.xlane.f32.xlu1 %v378_v28  ;;  %382 = vadd.xlane.f32.xlu0 %v381_v44 }
  0xdf   :  { %385 = vadd.xlane.f32.xlu1 %v384_v60 }
 0x12c   :  { %v293_v61 = vpop.xlane.xlu0 %292 }
 0x12d   :  { %v387_v45 = vmul.f32 0.03125, %v293_v61 }
 0x12f   :  { %v419_v0 = vadd.f32 1e-05, %v387_v45 }
 0x130   :  { %v296_v16 = vpop.xlane.xlu1 %295  ;;  %v299_v30 = vpop.xlane.xlu0 %298 }
 0x131   :  { %14295 = vrsqrt.f32 %v419_v0  ;;  %v388_v32 = vmul.f32 0.03125, %v296_v16  ;;  %v389_v34 = vmul.f32 0.03125, %v299_v30 }
 0x133   :  { %v420_v35 = vadd.f32 1e-05, %v388_v32  ;;  %v421_v38 = vadd.f32 1e-05, %v389_v34 }
 0x134   :  { %v302_v48 = vpop.xlane.xlu1 %301  ;;  %v305_v42 = vpop.xlane.xlu0 %304 }
 0x135   :  { %14297 = vrsqrt.f32 %v420_v35  ;;  %v390_v20 = vmul.f32 0.03125, %v302_v48  ;;  %v391_v46 = vmul.f32 0.03125, %v305_v42 }
 0x136   :  { %14299 = vrsqrt.f32 %v421_v38  ;;  %v15716_v38 = vld [vmem:[%s21708_s1] sm:$0xff] }
 0x137   :  { %v422_v36 = vadd.f32 1e-05, %v390_v20  ;;  %v423_v50 = vadd.f32 1e-05, %v391_v46 }
 0x138   :  { %v308_v51 = vpop.xlane.xlu1 %307  ;;  %v311_v54 = vpop.xlane.xlu0 %310 }
 0x139   :  { %14301 = vrsqrt.f32 %v422_v36  ;;  %v392_v52 = vmul.f32 0.03125, %v308_v51  ;;  %v393_v58 = vmul.f32 0.03125, %v311_v54 }
 0x13a   :  { %14303 = vrsqrt.f32 %v423_v50 }
 0x13b   :  { %v14296_v24 = vpop.eup %14295  ;;  %v424_v62 = vadd.f32 1e-05, %v392_v52  ;;  %v425_v40 = vadd.f32 1e-05, %v393_v58 }
 0x13c   :  { %v314_v4 = vpop.xlane.xlu1 %313  ;;  %v317_v6 = vpop.xlane.xlu0 %316  ;;  %v483_v56 = vmul.f32 %v14296_v24, %v15501_v10 }
 0x13d   :  { %14305 = vrsqrt.f32 %v424_v62  ;;  %v394_v14 = vmul.f32 0.03125, %v314_v4  ;;  %v395_v28 = vmul.f32 0.03125, %v317_v6 }
 0x13e   :  { %14307 = vrsqrt.f32 %v425_v40  ;;  %v521_v19 = vmul.f32 %v15701_v41, %v483_v56 }
 0x13f   :  { %v14298_v44 = vpop.eup %14297  ;;  %v426_v60 = vadd.f32 1e-05, %v394_v14  ;;  %v427_v61 = vadd.f32 1e-05, %v395_v28 }
 0x140   :  { %v14300_v45 = vpop.eup %14299  ;;  %v320_v0 = vpop.xlane.xlu1 %319  ;;  %v484_v30 = vmul.f32 %v14298_v44, %v15511_v26  ;;  %v559_v10 = vadd.f32 %v15707_v18, %v521_v19  ;;  %v15722_v26 = vld [vmem:[%s21708_s1 + $0x8] sm:$0xff] }
 0x141   :  { %v323_v16 = vpop.xlane.xlu0 %322  ;;  %v485_v32 = vmul.f32 %v14300_v45, %v15504_v11  ;;  %14309 = vrsqrt.f32 %v426_v60  ;;  %v396_v34 = vmul.f32 0.03125, %v320_v0 }
 0x142   :  { %v397_v35 = vmul.f32 0.03125, %v323_v16  ;;  %14311 = vrsqrt.f32 %v427_v61  ;;  %v522_v48 = vmul.f32 %v15701_v41, %v484_v30  ;;  %v593_v58 = vadd.f32 %v15716_v38, %v559_v10 }
 0x143   :  { %v14302_v42 = vpop.eup %14301  ;;  %v428_v20 = vadd.f32 1e-05, %v396_v34  ;;  %v523_v11 = vmul.f32 %v15701_v41, %v485_v32 }
 0x144   :  { %v429_v46 = vadd.f32 1e-05, %v397_v35  ;;  %v14304_v36 = vpop.eup %14303  ;;  %v486_v50 = vmul.f32 %v14302_v42, %v15514_v27  ;;  %v326_v51 = vpop.xlane.xlu1 %325  ;;  %v560_v52 = vadd.f32 %v15707_v18, %v522_v48 }
 0x145   :  { %v329_v54 = vpop.xlane.xlu0 %328  ;;  %v487_v24 = vmul.f32 %v14304_v36, %v15523_v2  ;;  %14313 = vrsqrt.f32 %v428_v20  ;;  %v398_v62 = vmul.f32 0.03125, %v326_v51  ;;  %v561_v56 = vadd.f32 %v15707_v18, %v523_v11 }
 0x146   :  { %v399_v40 = vmul.f32 0.03125, %v329_v54  ;;  %14315 = vrsqrt.f32 %v429_v46  ;;  %v594_v4 = vadd.f32 %v15722_v26, %v560_v52  ;;  %v524_v6 = vmul.f32 %v15701_v41, %v486_v50 }
 0x147   :  { %v14306_v14 = vpop.eup %14305  ;;  %v430_v27 = vadd.f32 1e-05, %v398_v62  ;;  %v525_v19 = vmul.f32 %v15701_v41, %v487_v24  ;;  %v595_v16 = vadd.f32 %v15716_v38, %v561_v56 }
 0x148   :  { %v431_v28 = vadd.f32 1e-05, %v399_v40  ;;  %v14308_v44 = vpop.eup %14307  ;;  %v488_v60 = vmul.f32 %v14306_v14, %v15526_v5  ;;  %v332_v61 = vpop.xlane.xlu1 %331  ;;  %v625_v45 = vpack.c.bf16 %v594_v4, %v593_v58  ;;  %v562_v0 = vadd.f32 %v15707_v18, %v524_v6 }
 0x149   :  { %v335_v2 = vpop.xlane.xlu0 %334  ;;  %v489_v30 = vmul.f32 %v14308_v44, %v15535_v55  ;;  %14317 = vrsqrt.f32 %v430_v27  ;;  %v400_v10 = vmul.f32 0.03125, %v332_v61  ;;  %v563_v5 = vadd.f32 %v15707_v18, %v525_v19 }
 0x14a   :  { %v401_v32 = vmul.f32 0.03125, %v335_v2  ;;  %14319 = vrsqrt.f32 %v431_v28  ;;  %12912 = vmatprep.mubr.msk.bf16.mxu0 %vm97_vm0, %v625_v45  ;;  %v596_v34 = vadd.f32 %v15722_v26, %v562_v0  ;;  %v526_v35 = vmul.f32 %v15701_v41, %v488_v60 }
 0x14b   :  { %v14310_v48 = vpop.eup %14309  ;;  %v432_v42 = vadd.f32 1e-05, %v400_v10  ;;  %v527_v46 = vmul.f32 %v15701_v41, %v489_v30  ;;  %v597_v52 = vadd.f32 %v15716_v38, %v563_v5 }
 0x14c   :  { %v433_v20 = vadd.f32 1e-05, %v401_v32  ;;  %v14312_v11 = vpop.eup %14311  ;;  %v490_v55 = vmul.f32 %v14310_v48, %v15538_v9  ;;  %v338_v36 = vpop.xlane.xlu1 %337  ;;  %v626_v51 = vpack.c.bf16 %v596_v34, %v595_v16  ;;  %v564_v54 = vadd.f32 %v15707_v18, %v526_v35 }
 0x14d   :  { %v341_v50 = vpop.xlane.xlu0 %340  ;;  %v491_v58 = vmul.f32 %v14312_v11, %v15547_v7  ;;  %14321 = vrsqrt.f32 %v432_v42  ;;  %v402_v24 = vmul.f32 0.03125, %v338_v36  ;;  %v565_v9 = vadd.f32 %v15707_v18, %v527_v46 }
 0x14e   :  { %v403_v62 = vmul.f32 0.03125, %v341_v50  ;;  %14323 = vrsqrt.f32 %v433_v20  ;;  %12913 = vmatmul.mubr.msk.bf16.vlgmr.msra.gmra.mrb[0].mxu0 %vm97_vm0, %v626_v51  ;;  %v598_v40 = vadd.f32 %v15722_v26, %v564_v54  ;;  %v528_v4 = vmul.f32 %v15701_v41, %v490_v55 }
 0x14f   :  { %v14314_v6 = vpop.eup %14313  ;;  %v434_v56 = vadd.f32 1e-05, %v402_v24  ;;  %v529_v27 = vmul.f32 %v15701_v41, %v491_v58  ;;  %v599_v2 = vadd.f32 %v15716_v38, %v565_v9 }
 0x150   :  { %v435_v14 = vadd.f32 1e-05, %v403_v62  ;;  %v14316_v28 = vpop.eup %14315  ;;  %v492_v7 = vmul.f32 %v14314_v6, %v15550_v13  ;;  %v344_v19 = vpop.xlane.xlu1 %343  ;;  %v627_v60 = vpack.c.bf16 %v598_v40, %v597_v52  ;;  %v566_v61 = vadd.f32 %v15707_v18, %v528_v4 }
 0x151   :  { %v347_v44 = vpop.xlane.xlu0 %346  ;;  %v493_v45 = vmul.f32 %v14316_v28, %v15559_v1  ;;  %14325 = vrsqrt.f32 %v434_v56  ;;  %v404_v0 = vmul.f32 0.03125, %v344_v19  ;;  %v567_v13 = vadd.f32 %v15707_v18, %v529_v27 }
 0x152   :  { %v405_v16 = vmul.f32 0.03125, %v347_v44  ;;  %14327 = vrsqrt.f32 %v435_v14  ;;  %12916 = vmatprep.mubr.msk.bf16.mxu0 %vm97_vm0, %v627_v60  ;;  %v600_v30 = vadd.f32 %v15722_v26, %v566_v61  ;;  %v530_v10 = vmul.f32 %v15701_v41, %v492_v7 }
 0x153   :  { %v14318_v32 = vpop.eup %14317  ;;  %v436_v34 = vadd.f32 1e-05, %v404_v0  ;;  %v531_v5 = vmul.f32 %v15701_v41, %v493_v45  ;;  %v601_v55 = vadd.f32 %v15716_v38, %v567_v13 }
 0x154   :  { %v437_v35 = vadd.f32 1e-05, %v405_v16  ;;  %v14320_v48 = vpop.eup %14319  ;;  %v494_v1 = vmul.f32 %v14318_v32, %v15562_v17  ;;  %v350_v42 = vpop.xlane.xlu1 %349  ;;  %v628_v46 = vpack.c.bf16 %v600_v30, %v599_v2  ;;  %v568_v11 = vadd.f32 %v15707_v18, %v530_v10 }
 0x155   :  { %v353_v20 = vpop.xlane.xlu0 %352  ;;  %v495_v36 = vmul.f32 %v14320_v48, %v15571_v43  ;;  %14329 = vrsqrt.f32 %v436_v34  ;;  %v406_v50 = vmul.f32 0.03125, %v350_v42  ;;  %v569_v17 = vadd.f32 %v15707_v18, %v531_v5 }
 0x156   :  { %v407_v51 = vmul.f32 0.03125, %v353_v20  ;;  %14331 = vrsqrt.f32 %v437_v35  ;;  %12917 = vmatmul.mubr.msk.bf16.gmra.mrb[4].mxu0 %vm97_vm0, %v628_v46  ;;  %v602_v54 = vadd.f32 %v15722_v26, %v568_v11  ;;  %v532_v52 = vmul.f32 %v15701_v41, %v494_v1 }
 0x157   :  { %v14322_v58 = vpop.eup %14321  ;;  %v438_v24 = vadd.f32 1e-05, %v406_v50  ;;  %v533_v40 = vmul.f32 %v15701_v41, %v495_v36  ;;  %v603_v27 = vadd.f32 %v15716_v38, %v569_v17 }
 0x158   :  { %v439_v62 = vadd.f32 1e-05, %v407_v51  ;;  %v14324_v4 = vpop.eup %14323  ;;  %v496_v43 = vmul.f32 %v14322_v58, %v15574_v21  ;;  %v356_v9 = vpop.xlane.xlu1 %355  ;;  %v629_v56 = vpack.c.bf16 %v602_v54, %v601_v55  ;;  %v570_v14 = vadd.f32 %v15707_v18, %v532_v52 }
 0x159   :  { %v359_v6 = vpop.xlane.xlu0 %358  ;;  %v497_v28 = vmul.f32 %v14324_v4, %v15583_v59  ;;  %14333 = vrsqrt.f32 %v438_v24  ;;  %v408_v7 = vmul.f32 0.03125, %v356_v9  ;;  %v571_v21 = vadd.f32 %v15707_v18, %v533_v40 }
 0x15a   :  { %v409_v19 = vmul.f32 0.03125, %v359_v6  ;;  %14335 = vrsqrt.f32 %v439_v62  ;;  %12920 = vmatprep.mubr.msk.bf16.mxu0 %vm97_vm0, %v629_v56  ;;  %v604_v44 = vadd.f32 %v15722_v26, %v570_v14  ;;  %v534_v60 = vmul.f32 %v15701_v41, %v496_v43 }
 0x15b   :  { %v14326_v61 = vpop.eup %14325  ;;  %v440_v2 = vadd.f32 1e-05, %v408_v7  ;;  %v535_v0 = vmul.f32 %v15701_v41, %v497_v28  ;;  %v605_v34 = vadd.f32 %v15716_v38, %v571_v21 }
 0x15c   :  { %v441_v45 = vadd.f32 1e-05, %v409_v19  ;;  %v14328_v16 = vpop.eup %14327  ;;  %v498_v59 = vmul.f32 %v14326_v61, %v15586_v25  ;;  %v362_v30 = vpop.xlane.xlu1 %361  ;;  %v630_v13 = vpack.c.bf16 %v604_v44, %v603_v27  ;;  %v572_v32 = vadd.f32 %v15707_v18, %v534_v60 }
 0x15d   :  { %v365_v10 = vpop.xlane.xlu0 %364  ;;  %v499_v35 = vmul.f32 %v14328_v16, %v15595_v15  ;;  %14337 = vrsqrt.f32 %v440_v2  ;;  %v410_v5 = vmul.f32 0.03125, %v362_v30  ;;  %v573_v25 = vadd.f32 %v15707_v18, %v535_v0 }
 0x15e   :  { %v411_v48 = vmul.f32 0.03125, %v365_v10  ;;  %14339 = vrsqrt.f32 %v441_v45  ;;  %12921 = vmatmul.mubr.msk.bf16.gmra.mrb[8].mxu0 %vm97_vm0, %v630_v13  ;;  %v606_v1 = vadd.f32 %v15722_v26, %v572_v32  ;;  %v536_v42 = vmul.f32 %v15701_v41, %v498_v59 }
 0x15f   :  { %v14330_v20 = vpop.eup %14329  ;;  %v442_v46 = vadd.f32 1e-05, %v410_v5  ;;  %v537_v55 = vmul.f32 %v15701_v41, %v499_v35  ;;  %v607_v17 = vadd.f32 %v15716_v38, %v573_v25 }
 0x160   :  { %v443_v11 = vadd.f32 1e-05, %v411_v48  ;;  %v14332_v36 = vpop.eup %14331  ;;  %v500_v15 = vmul.f32 %v14330_v20, %v15598_v29  ;;  %v368_v50 = vpop.xlane.xlu1 %367  ;;  %v631_v54 = vpack.c.bf16 %v606_v1, %v605_v34  ;;  %v574_v52 = vadd.f32 %v15707_v18, %v536_v42 }
 0x161   :  { %v371_v51 = vpop.xlane.xlu0 %370  ;;  %v501_v58 = vmul.f32 %v14332_v36, %v15607_v31  ;;  %14341 = vrsqrt.f32 %v442_v46  ;;  %v412_v24 = vmul.f32 0.03125, %v368_v50  ;;  %v575_v29 = vadd.f32 %v15707_v18, %v537_v55 }
 0x162   :  { %v413_v62 = vmul.f32 0.03125, %v371_v51  ;;  %14343 = vrsqrt.f32 %v443_v11  ;;  %12924 = vmatprep.mubr.msk.bf16.mxu0 %vm97_vm0, %v631_v54  ;;  %v608_v40 = vadd.f32 %v15722_v26, %v574_v52  ;;  %v538_v4 = vmul.f32 %v15701_v41, %v500_v15 }
 0x163   :  { %v14334_v43 = vpop.eup %14333  ;;  %v444_v9 = vadd.f32 1e-05, %v412_v24  ;;  %v539_v56 = vmul.f32 %v15701_v41, %v501_v58  ;;  %v609_v44 = vadd.f32 %v15716_v38, %v575_v29 }
 0x164   :  { %v445_v6 = vadd.f32 1e-05, %v413_v62  ;;  %v14336_v14 = vpop.eup %14335  ;;  %v502_v31 = vmul.f32 %v14334_v43, %v15610_v33  ;;  %v374_v27 = vpop.xlane.xlu1 %373  ;;  %v632_v7 = vpack.c.bf16 %v608_v40, %v607_v17  ;;  %v576_v19 = vadd.f32 %v15707_v18, %v538_v4 }
 0x165   :  { %v377_v28 = vpop.xlane.xlu0 %376  ;;  %v503_v60 = vmul.f32 %v14336_v14, %v15619_v47  ;;  %14345 = vrsqrt.f32 %v444_v9  ;;  %v414_v21 = vmul.f32 0.03125, %v374_v27  ;;  %v577_v33 = vadd.f32 %v15707_v18, %v539_v56 }
 0x166   :  { %v415_v61 = vmul.f32 0.03125, %v377_v28  ;;  %14347 = vrsqrt.f32 %v445_v6  ;;  %12925 = vmatmul.mubr.msk.bf16.gmra.mrb[12].mxu0 %vm97_vm0, %v632_v7  ;;  %v610_v2 = vadd.f32 %v15722_v26, %v576_v19  ;;  %v540_v45 = vmul.f32 %v15701_v41, %v502_v31 }
 0x167   :  { %v14338_v0 = vpop.eup %14337  ;;  %v446_v16 = vadd.f32 1e-05, %v414_v21  ;;  %v541_v30 = vmul.f32 %v15701_v41, %v503_v60  ;;  %v611_v5 = vadd.f32 %v15716_v38, %v577_v33 }
 0x168   :  { %v447_v59 = vadd.f32 1e-05, %v415_v61  ;;  %v14340_v10 = vpop.eup %14339  ;;  %v504_v47 = vmul.f32 %v14338_v0, %v15622_v37  ;;  %v380_v13 = vpop.xlane.xlu1 %379  ;;  %v633_v34 = vpack.c.bf16 %v610_v2, %v609_v44  ;;  %v578_v35 = vadd.f32 %v15707_v18, %v540_v45 }
 0x169   :  { %v383_v32 = vpop.xlane.xlu0 %382  ;;  %v505_v48 = vmul.f32 %v14340_v10, %v15634_v63  ;;  %14349 = vrsqrt.f32 %v446_v16  ;;  %v416_v1 = vmul.f32 0.03125, %v380_v13  ;;  %v579_v37 = vadd.f32 %v15707_v18, %v541_v30 }
 0x16a   :  { %v417_v42 = vmul.f32 0.03125, %v383_v32  ;;  %14351 = vrsqrt.f32 %v447_v59  ;;  %12928 = vmatprep.mubr.msk.bf16.mxu0 %vm97_vm0, %v633_v34  ;;  %v612_v25 = vadd.f32 %v15722_v26, %v578_v35  ;;  %v542_v20 = vmul.f32 %v15701_v41, %v504_v47 }
 0x16b   :  { %v14342_v46 = vpop.eup %14341  ;;  %v448_v11 = vadd.f32 1e-05, %v416_v1  ;;  %v543_v36 = vmul.f32 %v15701_v41, %v505_v48  ;;  %v613_v58 = vadd.f32 %v15716_v38, %v579_v37 }
 0x16c   :  { %v449_v55 = vadd.f32 1e-05, %v417_v42  ;;  %v14344_v15 = vpop.eup %14343  ;;  %v506_v63 = vmul.f32 %v14342_v46, %v15637_v3  ;;  %v386_v50 = vpop.xlane.xlu1 %385  ;;  %v634_v51 = vpack.c.bf16 %v612_v25, %v611_v5  ;;  %v580_v54 = vadd.f32 %v15707_v18, %v542_v20 }
 0x16d   :  { %v507_v52 = vmul.f32 %v14344_v15, %v15649_v22  ;;  %14353 = vrsqrt.f32 %v448_v11  ;;  %v418_v17 = vmul.f32 0.03125, %v386_v50  ;;  %v581_v40 = vadd.f32 %v15707_v18, %v543_v36  ;;  %v15867_v15 = vld [vmem:[%s21709_s10] ss:$0 sm:$0xff]  ;;  %s15167_s10 = smov 120  }
 0x16e   :  { %14355 = vrsqrt.f32 %v449_v55  ;;  %12929 = vmatmul.mubr.msk.bf16.gmra.mrb[16].mxu0 %vm97_vm0, %v634_v51  ;;  %v614_v24 = vadd.f32 %v15722_v26, %v580_v54  ;;  %v544_v62 = vmul.f32 %v15701_v41, %v506_v63  ;;  %v21737_v36 = vmov 0.0  }
 0x16f   :  { %v14346_v3 = vpop.eup %14345  ;;  %v450_v4 = vadd.f32 1e-05, %v418_v17  ;;  %v545_v29 = vmul.f32 %v15701_v41, %v507_v52  ;;  %v615_v14 = vadd.f32 %v15716_v38, %v581_v40  ;;  %12944 = vmatprep.subr.bf16.mxu1 %v21737_v36  ;;  %12992 = vmatprep.subr.bf16.mxu0 %v21737_v36 }
 0x170   :  { %v14348_v43 = vpop.eup %14347  ;;  %v508_v22 = vmul.f32 %v14346_v3, %v15652_v23  ;;  %v635_v9 = vpack.c.bf16 %v614_v24, %v613_v58  ;;  %v582_v6 = vadd.f32 %v15707_v18, %v544_v62  ;;  %12946 = vmatprep.mubr.msk.bf16.mxu1 %vm15166_vm1, %v21737_v36 }
 0x171   :  { %v509_v56 = vmul.f32 %v14348_v43, %v15661_v49  ;;  %14357 = vrsqrt.f32 %v450_v4  ;;  %v583_v28 = vadd.f32 %v15707_v18, %v545_v29 }
 0x172   :  { %12932 = vmatprep.mubr.msk.bf16.mxu0 %vm97_vm0, %v635_v9  ;;  %v616_v31 = vadd.f32 %v15722_v26, %v582_v6  ;;  %v546_v27 = vmul.f32 %v15701_v41, %v508_v22 }
 0x173   :  { %v14350_v7 = vpop.eup %14349  ;;  %v547_v19 = vmul.f32 %v15701_v41, %v509_v56  ;;  %v617_v61 = vadd.f32 %v15716_v38, %v583_v28 }
 0x174   :  { %v14352_v23 = vpop.eup %14351  ;;  %v510_v44 = vmul.f32 %v14350_v7, %v15664_v39  ;;  %v636_v60 = vpack.c.bf16 %v616_v31, %v615_v14  ;;  %v584_v49 = vadd.f32 %v15707_v18, %v546_v27 }
 0x175   :  { %v511_v21 = vmul.f32 %v14352_v23, %v15673_v8  ;;  %v585_v33 = vadd.f32 %v15707_v18, %v547_v19 }
 0x176   :  { %12933 = vmatmul.mubr.msk.bf16.gmra.mrb[20].mxu0 %vm97_vm0, %v636_v60  ;;  %v618_v2 = vadd.f32 %v15722_v26, %v584_v49  ;;  %v548_v45 = vmul.f32 %v15701_v41, %v510_v44 }
 0x177   :  { %v14354_v0 = vpop.eup %14353  ;;  %v549_v16 = vmul.f32 %v15701_v41, %v511_v21  ;;  %v619_v47 = vadd.f32 %v15716_v38, %v585_v33 }
 0x178   :  { %v14356_v59 = vpop.eup %14355  ;;  %v512_v39 = vmul.f32 %v14354_v0, %v15676_v53  ;;  %v637_v30 = vpack.c.bf16 %v618_v2, %v617_v61  ;;  %v586_v10 = vadd.f32 %v15707_v18, %v548_v45 }
 0x179   :  { %v513_v8 = vmul.f32 %v14356_v59, %v15685_v12  ;;  %v587_v34 = vadd.f32 %v15707_v18, %v549_v16 }
 0x17a   :  { %12936 = vmatprep.mubr.msk.bf16.mxu0 %vm97_vm0, %v637_v30  ;;  %v620_v13 = vadd.f32 %v15722_v26, %v586_v10  ;;  %v550_v32 = vmul.f32 %v15701_v41, %v512_v39 }
 0x17b   :  { %v14358_v35 = vpop.eup %14357  ;;  %v551_v5 = vmul.f32 %v15701_v41, %v513_v8  ;;  %v621_v12 = vadd.f32 %v15716_v38, %v587_v34 }
 0x17c   :  { %v514_v53 = vmul.f32 %v14358_v35, %v15688_v57  ;;  %v638_v48 = vpack.c.bf16 %v620_v13, %v619_v47  ;;  %v588_v1 = vadd.f32 %v15707_v18, %v550_v32 }
 0x17d   :  { %v589_v20 = vadd.f32 %v15707_v18, %v551_v5 }
 0x17e   :  { %12937 = vmatmul.mubr.msk.bf16.gmra.mrb[24].mxu0 %vm97_vm0, %v638_v48  ;;  %v622_v42 = vadd.f32 %v15722_v26, %v588_v1  ;;  %v552_v25 = vmul.f32 %v15701_v41, %v514_v53 }
 0x17f   :  { %v623_v57 = vadd.f32 %v15716_v38, %v589_v20 }
 0x180   :  { %v639_v37 = vpack.c.bf16 %v622_v42, %v621_v12  ;;  %v590_v46 = vadd.f32 %v15707_v18, %v552_v25 }
 0x182   :  { %12940 = vmatprep.mubr.msk.bf16.mxu0 %vm97_vm0, %v639_v37  ;;  %v624_v11 = vadd.f32 %v15722_v26, %v590_v46 }
 0x184   :  { %v640_v55 = vpack.c.bf16 %v624_v11, %v623_v57 }
 0x186   :  { %12941 = vmatmul.mubr.msk.bf16.gmra.mrb[28].mxu0 %vm97_vm0, %v640_v55 }
 0x187   :  { %12994 = vmatprep.mubr.msk.bf16.mxu0 %vm15166_vm1, %v21737_v36 }
 0x221   :  { %v12914_v41 = vpop.f32.mrb[0].mxu0 }
 0x222   :  { %v746_v18 = vpop.f32.mrb[1].mxu0  ;;  %v755_v38 = vadd.f32 %v12914_v41, %v15867_v15 }
 0x223   :  { %v12915_v63 = vpop.f32.mrb[2].mxu0  ;;  %v747_v51 = vadd.f32 %v15867_v15, %v746_v18 }
 0x224   :  { %v758_v26 = vadd.f32 %v12915_v63, %v15867_v15  ;;  %v749_v50 = vpop.f32.mrb[3].mxu0 }
 0x225   :  { %v750_v54 = vadd.f32 %v15867_v15, %v749_v50 }
 0x226   :  { %v15877_v52 = vpack.c.bf16 %v758_v26, %v755_v38 }
 0x227   :  { %v15879_v17 = vpack.c.bf16 %v750_v54, %v747_v51 }
 0x228   :  { %907 = vrot.lane.b32.xlu0 %v15877_v52, %s15167_s10  ;;  %1053 = vrot.lane.b32.xlu1 %v15877_v52, %s15168_s26 }
 0x229   :  { %v12918_v58 = vpop.f32.mrb[4].mxu0 }
 0x22a   :  { %v762_v24 = vpop.f32.mrb[5].mxu0  ;;  %v771_v40 = vadd.f32 %v12918_v58, %v15867_v15 }
 0x22b   :  { %v12919_v62 = vpop.f32.mrb[6].mxu0  ;;  %v763_v29 = vadd.f32 %v15867_v15, %v762_v24 }
 0x22c   :  { %v774_v3 = vadd.f32 %v12919_v62, %v15867_v15  ;;  %939 = vrot.lane.b32.xlu1 %v15877_v52, %s15169_s27  ;;  %1003 = vrot.lane.b32.xlu0 %v15879_v17, %s15168_s26  ;;  %v765_v4 = vpop.f32.mrb[7].mxu0 }
 0x22d   :  { %v766_v43 = vadd.f32 %v15867_v15, %v765_v4 }
 0x22e   :  { %v15893_v22 = vpack.c.bf16 %v774_v3, %v771_v40 }
 0x22f   :  { %v15895_v9 = vpack.c.bf16 %v766_v43, %v763_v29 }
 0x230   :  { %971 = vrot.lane.b32.xlu1 %v15877_v52, %s15170_s28  ;;  %937 = vrot.lane.b32.xlu0 %v15879_v17, %s15169_s27 }
 0x231   :  { %v12922_v6 = vpop.f32.mrb[8].mxu0 }
 0x232   :  { %v778_v56 = vpop.f32.mrb[9].mxu0  ;;  %v787_v31 = vadd.f32 %v12922_v6, %v15867_v15 }
 0x233   :  { %v12923_v14 = vpop.f32.mrb[10].mxu0  ;;  %v779_v7 = vadd.f32 %v15867_v15, %v778_v56 }
 0x234   :  { %v790_v27 = vadd.f32 %v12923_v14, %v15867_v15  ;;  %5660 = vrot.lane.b32.xlu1 %v15877_v52, %s15171_s29  ;;  %969 = vrot.lane.b32.xlu0 %v15879_v17, %s15170_s28  ;;  %v781_v28 = vpop.f32.mrb[11].mxu0 }
 0x235   :  { %v782_v19 = vadd.f32 %v15867_v15, %v781_v28 }
 0x236   :  { %v15909_v23 = vpack.c.bf16 %v790_v27, %v787_v31 }
 0x237   :  { %v15911_v44 = vpack.c.bf16 %v782_v19, %v779_v7 }
 0x238   :  { %905 = vrot.lane.b32.xlu1 %v15879_v17, %s15167_s10  ;;  %5613 = vrot.lane.b32.xlu0 %v15879_v17, %s15171_s29 }
 0x239   :  { %v12926_v60 = vpop.f32.mrb[12].mxu0 }
 0x23a   :  { %v803_v49 = vadd.f32 %v12926_v60, %v15867_v15  ;;  %v794_v21 = vpop.f32.mrb[13].mxu0 }
 0x23b   :  { %v12927_v61 = vpop.f32.mrb[14].mxu0  ;;  %v795_v33 = vadd.f32 %v15867_v15, %v794_v21 }
 0x23c   :  { %v806_v2 = vadd.f32 %v12927_v61, %v15867_v15  ;;  %1151 = vrot.lane.b32.xlu1 %v15893_v22, %s15168_s26  ;;  %909 = vrot.lane.b32.xlu0 %v15895_v9, %s15167_s10  ;;  %v797_v45 = vpop.f32.mrb[15].mxu0 }
 0x23d   :  { %v798_v0 = vadd.f32 %v15867_v15, %v797_v45 }
 0x23e   :  { %v15925_v16 = vpack.c.bf16 %v806_v2, %v803_v49 }
 0x23f   :  { %v15927_v59 = vpack.c.bf16 %v798_v0, %v795_v33 }
 0x240   :  { %911 = vrot.lane.b32.xlu1 %v15893_v22, %s15167_s10  ;;  %941 = vrot.lane.b32.xlu0 %v15895_v9, %s15169_s27 }
 0x241   :  { %v12930_v39 = vpop.f32.mrb[16].mxu0 }
 0x242   :  { %v819_v30 = vadd.f32 %v12930_v39, %v15867_v15  ;;  %v810_v10 = vpop.f32.mrb[17].mxu0 }
 0x243   :  { %v811_v8 = vadd.f32 %v15867_v15, %v810_v10  ;;  %v12931_v47 = vpop.f32.mrb[18].mxu0 }
 0x244   :  { %v822_v13 = vadd.f32 %v12931_v47, %v15867_v15  ;;  %943 = vrot.lane.b32.xlu1 %v15893_v22, %s15169_s27  ;;  %973 = vrot.lane.b32.xlu0 %v15895_v9, %s15170_s28  ;;  %v813_v32 = vpop.f32.mrb[19].mxu0 }
 0x245   :  { %v814_v34 = vadd.f32 %v15867_v15, %v813_v32 }
 0x246   :  { %v15941_v35 = vpack.c.bf16 %v822_v13, %v819_v30 }
 0x247   :  { %v15943_v5 = vpack.c.bf16 %v814_v34, %v811_v8 }
 0x248   :  { %975 = vrot.lane.b32.xlu1 %v15893_v22, %s15170_s28  ;;  %5707 = vrot.lane.b32.xlu0 %v15895_v9, %s15171_s29 }
 0x249   :  { %v12934_v53 = vpop.f32.mrb[20].mxu0 }
 0x24a   :  { %v835_v48 = vadd.f32 %v12934_v53, %v15867_v15  ;;  %v826_v1 = vpop.f32.mrb[21].mxu0 }
 0x24b   :  { %v827_v12 = vadd.f32 %v15867_v15, %v826_v1  ;;  %v12935_v42 = vpop.f32.mrb[22].mxu0 }
 0x24c   :  { %v838_v25 = vadd.f32 %v12935_v42, %v15867_v15  ;;  %5754 = vrot.lane.b32.xlu1 %v15893_v22, %s15171_s29  ;;  %915 = vrot.lane.b32.xlu0 %v15909_v23, %s15167_s10  ;;  %v829_v20 = vpop.f32.mrb[23].mxu0 }
 0x24d   :  { %v830_v37 = vadd.f32 %v15867_v15, %v829_v20 }
 0x24e   :  { %v15957_v46 = vpack.c.bf16 %v838_v25, %v835_v48 }
 0x24f   :  { %v15959_v57 = vpack.c.bf16 %v830_v37, %v827_v12 }
 0x250   :  { %1102 = vrot.lane.b32.xlu1 %v15895_v9, %s15168_s26  ;;  %1200 = vrot.lane.b32.xlu0 %v15911_v44, %s15168_s26 }
 0x251   :  { %v12938_v11 = vpop.f32.mrb[24].mxu0 }
 0x252   :  { %v851_v55 = vadd.f32 %v12938_v11, %v15867_v15  ;;  %v842_v41 = vpop.f32.mrb[25].mxu0 }
 0x253   :  { %v843_v18 = vadd.f32 %v15867_v15, %v842_v41  ;;  %v12939_v63 = vpop.f32.mrb[26].mxu0 }
 0x254   :  { %v854_v38 = vadd.f32 %v12939_v63, %v15867_v15  ;;  %1249 = vrot.lane.b32.xlu1 %v15909_v23, %s15168_s26  ;;  %945 = vrot.lane.b32.xlu0 %v15911_v44, %s15169_s27  ;;  %v845_v26 = vpop.f32.mrb[27].mxu0 }
 0x255   :  { %v846_v50 = vadd.f32 %v15867_v15, %v845_v26 }
 0x256   :  { %v15973_v51 = vpack.c.bf16 %v854_v38, %v851_v55 }
 0x257   :  { %v15975_v54 = vpack.c.bf16 %v846_v50, %v843_v18 }
 0x258   :  { %947 = vrot.lane.b32.xlu1 %v15909_v23, %s15169_s27  ;;  %977 = vrot.lane.b32.xlu0 %v15911_v44, %s15170_s28 }
 0x259   :  { %v12942_v58 = vpop.f32.mrb[28].mxu0 }
 0x25a   :  { %v867_v24 = vadd.f32 %v12942_v58, %v15867_v15  ;;  %v858_v62 = vpop.f32.mrb[29].mxu0 }
 0x25b   :  { %v859_v40 = vadd.f32 %v15867_v15, %v858_v62  ;;  %v12943_v3 = vpop.f32.mrb[30].mxu0 }
 0x25c   :  { %v870_v4 = vadd.f32 %v12943_v3, %v15867_v15  ;;  %979 = vrot.lane.b32.xlu1 %v15909_v23, %s15170_s28  ;;  %5801 = vrot.lane.b32.xlu0 %v15911_v44, %s15171_s29  ;;  %v861_v29 = vpop.f32.mrb[31].mxu0 }
 0x25d   :  { %v862_v43 = vadd.f32 %v15867_v15, %v861_v29 }
 0x25e   :  { %v15989_v6 = vpack.c.bf16 %v870_v4, %v867_v24 }
 0x25f   :  { %v15991_v56 = vpack.c.bf16 %v862_v43, %v859_v40 }
 0x260   :  { %5848 = vrot.lane.b32.xlu1 %v15909_v23, %s15171_s29  ;;  %1298 = vrot.lane.b32.xlu0 %v15927_v59, %s15168_s26 }
 0x264   :  { %913 = vrot.lane.b32.xlu1 %v15911_v44, %s15167_s10  ;;  %917 = vrot.lane.b32.xlu0 %v15927_v59, %s15167_s10 }
 0x268   :  { %1347 = vrot.lane.b32.xlu1 %v15925_v16, %s15168_s26  ;;  %949 = vrot.lane.b32.xlu0 %v15927_v59, %s15169_s27 }
 0x26c   :  { %919 = vrot.lane.b32.xlu1 %v15925_v16, %s15167_s10  ;;  %981 = vrot.lane.b32.xlu0 %v15927_v59, %s15170_s28 }
 0x270   :  { %951 = vrot.lane.b32.xlu1 %v15925_v16, %s15169_s27  ;;  %5895 = vrot.lane.b32.xlu0 %v15927_v59, %s15171_s29 }
 0x274   :  { %983 = vrot.lane.b32.xlu1 %v15925_v16, %s15170_s28  ;;  %1396 = vrot.lane.b32.xlu0 %v15943_v5, %s15168_s26 }
 0x278   :  { %5942 = vrot.lane.b32.xlu1 %v15925_v16, %s15171_s29  ;;  %921 = vrot.lane.b32.xlu0 %v15943_v5, %s15167_s10 }
 0x27c   :  { %1445 = vrot.lane.b32.xlu1 %v15941_v35, %s15168_s26  ;;  %953 = vrot.lane.b32.xlu0 %v15943_v5, %s15169_s27 }
 0x280   :  { %923 = vrot.lane.b32.xlu1 %v15941_v35, %s15167_s10  ;;  %985 = vrot.lane.b32.xlu0 %v15943_v5, %s15170_s28 }
 0x284   :  { %955 = vrot.lane.b32.xlu1 %v15941_v35, %s15169_s27  ;;  %5989 = vrot.lane.b32.xlu0 %v15943_v5, %s15171_s29 }
 0x288   :  { %987 = vrot.lane.b32.xlu1 %v15941_v35, %s15170_s28  ;;  %1494 = vrot.lane.b32.xlu0 %v15959_v57, %s15168_s26 }
 0x28c   :  { %6036 = vrot.lane.b32.xlu1 %v15941_v35, %s15171_s29  ;;  %925 = vrot.lane.b32.xlu0 %v15959_v57, %s15167_s10 }
 0x290   :  { %1543 = vrot.lane.b32.xlu1 %v15957_v46, %s15168_s26  ;;  %957 = vrot.lane.b32.xlu0 %v15959_v57, %s15169_s27 }
 0x294   :  { %927 = vrot.lane.b32.xlu1 %v15957_v46, %s15167_s10  ;;  %989 = vrot.lane.b32.xlu0 %v15959_v57, %s15170_s28 }
 0x298   :  { %959 = vrot.lane.b32.xlu1 %v15957_v46, %s15169_s27  ;;  %6083 = vrot.lane.b32.xlu0 %v15959_v57, %s15171_s29 }
 0x29a   :  { %v1054_v15 = vpop.permute.xlu1 %1053  ;;  %v16053_v14 = vpop.permute.xlu0 %907 }
 0x29b   :  { %v1059_v21 = vsel %vm1005_vm2, %v1054_v15, 0 }
 0x29c   :  { %991 = vrot.lane.b32.xlu1 %v15957_v46, %s15170_s28  ;;  %1592 = vrot.lane.b32.xlu0 %v15975_v54, %s15168_s26 }
 0x29e   :  { %v16059_v31 = vpop.permute.xlu1 %939  ;;  %v1004_v27 = vpop.permute.xlu0 %1003 }
 0x29f   :  { %22003 = vst [vmem:[#allocation2_spill] sm:$0xff] %v16059_v31  ;;  %v1010_v28 = vsel %vm1005_vm2, %v1004_v27, 0 }
 0x2a0   :  { %6130 = vrot.lane.b32.xlu1 %v15957_v46, %s15171_s29  ;;  %929 = vrot.lane.b32.xlu0 %v15975_v54, %s15167_s10 }
 0x2a1   :  { %12945 = vmatpush3.bf16.xpose.msra.mxu1 %v1010_v28 }
 0x2a2   :  { %v16066_v7 = vpop.permute.xlu1 %971  ;;  %v16068_v19 = vpop.permute.xlu0 %937  ;;  %12950 = vmatprep.subr.bf16.mxu1 %v21737_v36 }
 0x2a3   :  { %22004 = vst [vmem:[#allocation3_spill] sm:$0xff] %v16066_v7  ;;  %22005 = vst [vmem:[#allocation4_spill] sm:$0xff] %v16068_v19 }
 0x2a4   :  { %1641 = vrot.lane.b32.xlu1 %v15973_v51, %s15168_s26  ;;  %961 = vrot.lane.b32.xlu0 %v15975_v54, %s15169_s27 }
 0x2a6   :  { %v16075_v60 = vpop.permute.xlu1 %5660  ;;  %v16077_v49 = vpop.permute.xlu0 %969 }
 0x2a7   :  { %22006 = vst [vmem:[#allocation5_spill] sm:$0xff] %v16075_v60  ;;  %22007 = vst [vmem:[#allocation6_spill] sm:$0xff] %v16077_v49 }
 0x2a8   :  { %12947 = vmatmul.mubr.msk.bf16.vlgmr.msra.gmra.mrb[0].mxu1 %vm1005_vm2, %v15879_v17  ;;  %931 = vrot.lane.b32.xlu1 %v15973_v51, %s15167_s10 }
 0x2a9   :  { %993 = vrot.lane.b32.xlu0 %v15975_v54, %s15170_s28  ;;  %12951 = vmatpush3.bf16.xpose.msra.mxu1 %v1059_v21 }
 0x2aa   :  { %v16086_v61 = vpop.permute.xlu1 %905  ;;  %v16088_v2 = vpop.permute.xlu0 %5613  ;;  %12952 = vmatprep.mubr.msk.bf16.mxu1 %vm15166_vm1, %v21737_v36  ;;  %12956 = vmatprep.subr.bf16.mxu1 %v21737_v36 }
 0x2ab   :  { %22008 = vst [vmem:[#allocation7_spill] sm:$0xff] %v16088_v2  ;;  %v16535_v2 = vld [vmem:[%s21710_s2 + $0x8] sm:$0xff] }
 0x2ac   :  { %963 = vrot.lane.b32.xlu1 %v15973_v51, %s15169_s27 }
 0x2ad   :  { %6177 = vrot.lane.b32.xlu0 %v15975_v54, %s15171_s29 }
 0x2ae   :  { %v1152_v17 = vpop.permute.xlu1 %1151  ;;  %v16097_v45 = vpop.permute.xlu0 %909 }
 0x2af   :  { %v1157_v42 = vsel %vm1005_vm2, %v1152_v17, 0 }
 0x2b0   :  { %12953 = vmatmul.mubr.msk.bf16.vlgmr.msra.gmra.mrb[4].mxu1 %vm1005_vm2, %v15877_v52  ;;  %995 = vrot.lane.b32.xlu1 %v15973_v51, %s15170_s28 }
 0x2b1   :  { %1690 = vrot.lane.b32.xlu0 %v15991_v56, %s15168_s26  ;;  %12958 = vmatprep.mubr.msk.bf16.mxu1 %vm15166_vm1, %v21737_v36 }
 0x2b2   :  { %v16107_v33 = vpop.permute.xlu1 %911  ;;  %v16109_v0 = vpop.permute.xlu0 %941 }
 0x2b3   :  { %22009 = vst [vmem:[#allocation8_spill] sm:$0xff] %v16109_v0 }
 0x2b4   :  { %6224 = vrot.lane.b32.xlu1 %v15973_v51, %s15171_s29 }
 0x2b5   :  { %933 = vrot.lane.b32.xlu0 %v15991_v56, %s15167_s10 }
 0x2b6   :  { %v16115_v52 = vpop.permute.xlu1 %943  ;;  %v16117_v39 = vpop.permute.xlu0 %973 }
 0x2b7   :  { %22010 = vst [vmem:[#allocation9_spill] sm:$0xff] %v16115_v52  ;;  %22011 = vst [vmem:[#allocation10_spill] sm:$0xff] %v16117_v39 }
 0x2b8   :  { %1739 = vrot.lane.b32.xlu1 %v15989_v6, %s15168_s26 }
 0x2b9   :  { %965 = vrot.lane.b32.xlu0 %v15991_v56, %s15169_s27 }
 0x2ba   :  { %v16123_v30 = vpop.permute.xlu1 %975  ;;  %v16125_v10 = vpop.permute.xlu0 %5707 }
 0x2bb   :  { %22012 = vst [vmem:[#allocation11_spill] sm:$0xff] %v16123_v30  ;;  %22013 = vst [vmem:[#allocation12_spill] sm:$0xff] %v16125_v10 }
 0x2bc   :  { %935 = vrot.lane.b32.xlu1 %v15989_v6, %s15167_s10 }
 0x2bd   :  { %997 = vrot.lane.b32.xlu0 %v15991_v56, %s15170_s28 }
 0x2be   :  { %v16131_v8 = vpop.permute.xlu1 %5754  ;;  %v16133_v47 = vpop.permute.xlu0 %915 }
 0x2bf   :  { %22014 = vst [vmem:[#allocation13_spill] sm:$0xff] %v16131_v8  ;;  %22015 = vst [vmem:[#allocation14_spill] sm:$0xff] %v16133_v47 }
 0x2c0   :  { %967 = vrot.lane.b32.xlu1 %v15989_v6, %s15169_s27 }
 0x2c1   :  { %6271 = vrot.lane.b32.xlu0 %v15991_v56, %s15171_s29 }
 0x2c2   :  { %v1103_v13 = vpop.permute.xlu1 %1102  ;;  %v1201_v32 = vpop.permute.xlu0 %1200 }
 0x2c3   :  { %v1108_v34 = vsel %vm1005_vm2, %v1103_v13, 0  ;;  %v1206_v11 = vsel %vm1005_vm2, %v1201_v32, 0 }
 0x2c4   :  { %999 = vrot.lane.b32.xlu1 %v15989_v6, %s15170_s28  ;;  %12957 = vmatpush3.bf16.xpose.msra.mxu1 %v1108_v34 }
 0x2c5   :  { %1788 = vrot.lane.b32.xlu0 %v16086_v61, %s15168_s26  ;;  %12962 = vmatprep.subr.bf16.mxu1 %v21737_v36 }
 0x2c6   :  { %v1250_v53 = vpop.permute.xlu1 %1249  ;;  %v16145_v48 = vpop.permute.xlu0 %945 }
 0x2c7   :  { %22016 = vst [vmem:[#allocation15_spill] sm:$0xff] %v16145_v48  ;;  %v1255_v63 = vsel %vm1005_vm2, %v1250_v53, 0 }
 0x2c8   :  { %6318 = vrot.lane.b32.xlu1 %v15989_v6, %s15171_s29 }
 0x2c9   :  { %2572 = vrot.lane.b32.xlu0 %v16068_v19, %s15168_s26 }
 0x2ca   :  { %v16151_v1 = vpop.permute.xlu1 %947  ;;  %v16153_v12 = vpop.permute.xlu0 %977 }
 0x2cb   :  { %22017 = vst [vmem:[#allocation16_spill] sm:$0xff] %v16151_v1  ;;  %22018 = vst [vmem:[#allocation17_spill] sm:$0xff] %v16153_v12  ;;  %12959 = vmatmul.mubr.msk.bf16.vlgmr.msra.gmra.mrb[8].mxu1 %vm1005_vm2, %v15895_v9 }
 0x2cc   :  { %1837 = vrot.lane.b32.xlu1 %v16053_v14, %s15168_s26  ;;  %12963 = vmatpush3.bf16.xpose.msra.mxu1 %v1157_v42 }
 0x2cd   :  { %3356 = vrot.lane.b32.xlu0 %v16077_v49, %s15168_s26  ;;  %12964 = vmatprep.mubr.msk.bf16.mxu1 %vm15166_vm1, %v21737_v36 }
 0x2ce   :  { %v16164_v25 = vpop.permute.xlu1 %979  ;;  %v16166_v20 = vpop.permute.xlu0 %5801  ;;  %12968 = vmatprep.subr.bf16.mxu1 %v21737_v36 }
 0x2cf   :  { %22019 = vst [vmem:[#allocation18_spill] sm:$0xff] %v16164_v25  ;;  %22020 = vst [vmem:[#allocation19_spill] sm:$0xff] %v16166_v20 }
 0x2d0   :  { %2621 = vrot.lane.b32.xlu1 %v16059_v31, %s15168_s26 }
 0x2d1   :  { %6365 = vrot.lane.b32.xlu0 %v16086_v61, %s15171_s29 }
 0x2d2   :  { %v16173_v9 = vpop.permute.xlu1 %5848  ;;  %v1299_v37 = vpop.permute.xlu0 %1298 }
 0x2d3   :  { %22021 = vst [vmem:[#allocation20_spill] sm:$0xff] %v16173_v9  ;;  %12965 = vmatmul.mubr.msk.bf16.vlgmr.msra.gmra.mrb[12].mxu1 %vm1005_vm2, %v15893_v22  ;;  %v1304_v58 = vsel %vm1005_vm2, %v1299_v37, 0 }
 0x2d4   :  { %3405 = vrot.lane.b32.xlu1 %v16066_v7, %s15168_s26  ;;  %12969 = vmatpush3.bf16.xpose.msra.mxu1 %v1206_v11 }
 0x2d5   :  { %1886 = vrot.lane.b32.xlu0 %v16097_v45, %s15168_s26  ;;  %12970 = vmatprep.mubr.msk.bf16.mxu1 %vm15166_vm1, %v21737_v36 }
 0x2d6   :  { %v16184_v55 = vpop.permute.xlu1 %913  ;;  %v16186_v41 = vpop.permute.xlu0 %917  ;;  %12974 = vmatprep.subr.bf16.mxu1 %v21737_v36 }
 0x2d7   :  { %22022 = vst [vmem:[#allocation21_spill] sm:$0xff] %v16184_v55  ;;  %22023 = vst [vmem:[#allocation22_spill] sm:$0xff] %v16186_v41 }
 0x2d8   :  { %6412 = vrot.lane.b32.xlu1 %v16053_v14, %s15171_s29 }
 0x2d9   :  { %2670 = vrot.lane.b32.xlu0 %v16109_v0, %s15168_s26 }
 0x2da   :  { %v1348_v22 = vpop.permute.xlu1 %1347  ;;  %v16193_v18 = vpop.permute.xlu0 %949 }
 0x2db   :  { %22024 = vst [vmem:[#allocation23_spill] sm:$0xff] %v16193_v18  ;;  %12971 = vmatmul.mubr.msk.bf16.vlgmr.msra.gmra.mrb[16].mxu1 %vm1005_vm2, %v15911_v44  ;;  %v1353_v4 = vsel %vm1005_vm2, %v1348_v22, 0 }
 0x2dc   :  { %1935 = vrot.lane.b32.xlu1 %v16107_v33, %s15168_s26  ;;  %12975 = vmatpush3.bf16.xpose.msra.mxu1 %v1255_v63 }
 0x2dd   :  { %3454 = vrot.lane.b32.xlu0 %v16117_v39, %s15168_s26  ;;  %12976 = vmatprep.mubr.msk.bf16.mxu1 %vm15166_vm1, %v21737_v36 }
 0x2de   :  { %v16204_v38 = vpop.permute.xlu1 %919  ;;  %v16206_v26 = vpop.permute.xlu0 %981  ;;  %12980 = vmatprep.subr.bf16.mxu1 %v21737_v36 }
 0x2df   :  { %22025 = vst [vmem:[#allocation24_spill] sm:$0xff] %v16204_v38  ;;  %22026 = vst [vmem:[#allocation25_spill] sm:$0xff] %v16206_v26 }
 0x2e0   :  { %2719 = vrot.lane.b32.xlu1 %v16115_v52, %s15168_s26 }
 0x2e1   :  { %6459 = vrot.lane.b32.xlu0 %v16097_v45, %s15171_s29 }
 0x2e2   :  { %v16213_v44 = vpop.permute.xlu1 %951  ;;  %v16215_v50 = vpop.permute.xlu0 %5895 }
 0x2e3   :  { %22027 = vst [vmem:[#allocation26_spill] sm:$0xff] %v16213_v44  ;;  %22028 = vst [vmem:[#allocation27_spill] sm:$0xff] %v16215_v50  ;;  %12977 = vmatmul.mubr.msk.bf16.vlgmr.msra.gmra.mrb[20].mxu1 %vm1005_vm2, %v15909_v23 }
 0x2e4   :  { %3503 = vrot.lane.b32.xlu1 %v16123_v30, %s15168_s26  ;;  %12981 = vmatpush3.bf16.xpose.msra.mxu1 %v1304_v58 }
 0x2e5   :  { %1984 = vrot.lane.b32.xlu0 %v16184_v55, %s15168_s26  ;;  %12982 = vmatprep.mubr.msk.bf16.mxu1 %vm15166_vm1, %v21737_v36 }
 0x2e6   :  { %v16226_v24 = vpop.permute.xlu1 %983  ;;  %v1397_v62 = vpop.permute.xlu0 %1396  ;;  %12986 = vmatprep.subr.bf16.mxu1 %v21737_v36 }
 0x2e7   :  { %22029 = vst [vmem:[#allocation28_spill] sm:$0xff] %v16226_v24  ;;  %v1402_v40 = vsel %vm1005_vm2, %v1397_v62, 0 }
 0x2e8   :  { %6506 = vrot.lane.b32.xlu1 %v16107_v33, %s15171_s29  ;;  %12993 = vmatpush3.bf16.xpose.msra.mxu0 %v1402_v40 }
 0x2e9   :  { %2768 = vrot.lane.b32.xlu0 %v16145_v48, %s15168_s26  ;;  %13004 = vmatprep.subr.bf16.mxu0 %v21737_v36 }
 0x2ea   :  { %v16235_v23 = vpop.permute.xlu1 %5942  ;;  %v16237_v3 = vpop.permute.xlu0 %921 }
 0x2eb   :  { %22030 = vst [vmem:[#allocation29_spill] sm:$0xff] %v16235_v23  ;;  %22031 = vst [vmem:[#allocation30_spill] sm:$0xff] %v16237_v3  ;;  %12983 = vmatmul.mubr.msk.bf16.vlgmr.msra.gmra.mrb[24].mxu1 %vm1005_vm2, %v15927_v59 }
 0x2ec   :  { %2033 = vrot.lane.b32.xlu1 %v16133_v47, %s15168_s26  ;;  %12987 = vmatpush3.bf16.xpose.msra.mxu1 %v1353_v4 }
 0x2ed   :  { %3552 = vrot.lane.b32.xlu0 %v16153_v12, %s15168_s26  ;;  %12988 = vmatprep.mubr.msk.bf16.mxu1 %vm15166_vm1, %v21737_v36 }
 0x2ee   :  { %v1446_v29 = vpop.permute.xlu1 %1445  ;;  %v16248_v43 = vpop.permute.xlu0 %953  ;;  %12998 = vmatprep.subr.bf16.mxu1 %v21737_v36 }
 0x2ef   :  { %22032 = vst [vmem:[#allocation31_spill] sm:$0xff] %v16248_v43  ;;  %12995 = vmatmul.mubr.msk.bf16.vlgmr.msra.gmra.mrb[32].mxu0 %vm1005_vm2, %v15943_v5  ;;  %v1451_v27 = vsel %vm1005_vm2, %v1446_v29, 0 }
 0x2f0   :  { %2817 = vrot.lane.b32.xlu1 %v16151_v1, %s15168_s26  ;;  %13006 = vmatprep.mubr.msk.bf16.mxu0 %vm15166_vm1, %v21737_v36 }
 0x2f1   :  { %2082 = vrot.lane.b32.xlu0 %v16186_v41, %s15168_s26 }
 0x2f2   :  { %v16259_v59 = vpop.permute.xlu1 %923  ;;  %v16261_v15 = vpop.permute.xlu0 %985 }
 0x2f3   :  { %22033 = vst [vmem:[#allocation32_spill] sm:$0xff] %v16259_v59  ;;  %22034 = vst [vmem:[#allocation33_spill] sm:$0xff] %v16261_v15  ;;  %12989 = vmatmul.mubr.msk.bf16.vlgmr.msra.gmra.mrb[28].mxu1 %vm1005_vm2, %v15925_v16 }
 0x2f4   :  { %3601 = vrot.lane.b32.xlu1 %v16164_v25, %s15168_s26  ;;  %12999 = vmatpush3.bf16.xpose.msra.mxu1 %v1451_v27 }
 0x2f5   :  { %2866 = vrot.lane.b32.xlu0 %v16193_v18, %s15168_s26  ;;  %13000 = vmatprep.mubr.msk.bf16.mxu1 %vm15166_vm1, %v21737_v36 }
 0x2f6   :  { %v16272_v5 = vpop.permute.xlu1 %955  ;;  %v16274_v28 = vpop.permute.xlu0 %5989  ;;  %13010 = vmatprep.subr.bf16.mxu1 %v21737_v36 }
 0x2f7   :  { %22035 = vst [vmem:[#allocation34_spill] sm:$0xff] %v16272_v5  ;;  %22036 = vst [vmem:[#allocation35_spill] sm:$0xff] %v16274_v28 }
 0x2f8   :  { %2131 = vrot.lane.b32.xlu1 %v16204_v38, %s15168_s26 }
 0x2f9   :  { %3650 = vrot.lane.b32.xlu0 %v16206_v26, %s15168_s26 }
 0x2fa   :  { %v16281_v16 = vpop.permute.xlu1 %987  ;;  %v1495_v21 = vpop.permute.xlu0 %1494 }
 0x2fb   :  { %22037 = vst [vmem:[#allocation36_spill] sm:$0xff] %v16281_v16  ;;  %v1500_v17 = vsel %vm1005_vm2, %v1495_v21, 0  ;;  %13001 = vmatmul.mubr.msk.bf16.vlgmr.msra.gmra.mrb[32].mxu1 %vm1005_vm2, %v15941_v35 }
 0x2fc   :  { %2915 = vrot.lane.b32.xlu1 %v16213_v44, %s15168_s26  ;;  %13005 = vmatpush3.bf16.xpose.msra.mxu0 %v1500_v17 }
 0x2fd   :  { %2180 = vrot.lane.b32.xlu0 %v16237_v3, %s15168_s26  ;;  %13012 = vmatprep.mubr.msk.bf16.mxu1 %vm15166_vm1, %v21737_v36 }
 0x2fe   :  { %v16292_v13 = vpop.permute.xlu1 %6036  ;;  %v16294_v32 = vpop.permute.xlu0 %925  ;;  %13016 = vmatprep.subr.bf16.mxu0 %v21737_v36 }
 0x2ff   :  { %22038 = vst [vmem:[#allocation37_spill] sm:$0xff] %v16292_v13  ;;  %22039 = vst [vmem:[#allocation38_spill] sm:$0xff] %v16294_v32 }
 0x300   :  { %3699 = vrot.lane.b32.xlu1 %v16226_v24, %s15168_s26 }
 0x301   :  { %2964 = vrot.lane.b32.xlu0 %v16248_v43, %s15168_s26 }
 0x302   :  { %v1544_v35 = vpop.permute.xlu1 %1543  ;;  %v16301_v34 = vpop.permute.xlu0 %957 }
 0x303   :  { %22040 = vst [vmem:[#allocation39_spill] sm:$0xff] %v16301_v34  ;;  %v1549_v53 = vsel %vm1005_vm2, %v1544_v35, 0  ;;  %13007 = vmatmul.mubr.msk.bf16.vlgmr.msra.gmra.mrb[36].mxu0 %vm1005_vm2, %v15959_v57 }
 0x304   :  { %2229 = vrot.lane.b32.xlu1 %v16259_v59, %s15168_s26  ;;  %13011 = vmatpush3.bf16.xpose.msra.mxu1 %v1549_v53 }
 0x305   :  { %3748 = vrot.lane.b32.xlu0 %v16261_v15, %s15168_s26  ;;  %13018 = vmatprep.mubr.msk.bf16.mxu0 %vm15166_vm1, %v21737_v36 }
 0x306   :  { %v16312_v42 = vpop.permute.xlu1 %927  ;;  %v16314_v37 = vpop.permute.xlu0 %989  ;;  %13022 = vmatprep.subr.bf16.mxu1 %v21737_v36 }
 0x307   :  { %22041 = vst [vmem:[#allocation40_spill] sm:$0xff] %v16312_v42  ;;  %22042 = vst [vmem:[#allocation41_spill] sm:$0xff] %v16314_v37 }
 0x308   :  { %3013 = vrot.lane.b32.xlu1 %v16272_v5, %s15168_s26 }
 0x309   :  { %2278 = vrot.lane.b32.xlu0 %v16294_v32, %s15168_s26 }
 0x30a   :  { %v16321_v57 = vpop.permute.xlu1 %959  ;;  %v16323_v11 = vpop.permute.xlu0 %6083 }
 0x30b   :  { %22043 = vst [vmem:[#allocation42_spill] sm:$0xff] %v16321_v57  ;;  %22044 = vst [vmem:[#allocation43_spill] sm:$0xff] %v16323_v11  ;;  %13013 = vmatmul.mubr.msk.bf16.vlgmr.msra.gmra.mrb[36].mxu1 %vm1005_vm2, %v15957_v46 }
 0x30c   :  { %3797 = vrot.lane.b32.xlu1 %v16281_v16, %s15168_s26  ;;  %13024 = vmatprep.mubr.msk.bf16.mxu1 %vm15166_vm1, %v21737_v36  ;;  %v22069_v16 = vmov 0.0  }
 0x30d   :  { %3062 = vrot.lane.b32.xlu0 %v16301_v34, %s15168_s26 }
 0x30e   :  { %v16333_v22 = vpop.permute.xlu1 %991  ;;  %v1593_v63 = vpop.permute.xlu0 %1592 }
 0x30f   :  { %22045 = vst [vmem:[#allocation44_spill] sm:$0xff] %v16333_v22  ;;  %v1598_v58 = vsel %vm1005_vm2, %v1593_v63, 0 }
 0x310   :  { %2327 = vrot.lane.b32.xlu1 %v16312_v42, %s15168_s26  ;;  %13017 = vmatpush3.bf16.xpose.msra.mxu0 %v1598_v58 }
 0x311   :  { %3846 = vrot.lane.b32.xlu0 %v16314_v37, %s15168_s26  ;;  %13028 = vmatprep.subr.bf16.mxu0 %v21737_v36 }
 0x312   :  { %v16341_v46 = vpop.permute.xlu1 %6130  ;;  %v16343_v62 = vpop.permute.xlu0 %929 }
 0x313   :  { %22046 = vst [vmem:[#allocation45_spill] sm:$0xff] %v16341_v46  ;;  %22047 = vst [vmem:[#allocation46_spill] sm:$0xff] %v16343_v62 }
 0x314   :  { %3111 = vrot.lane.b32.xlu1 %v16321_v57, %s15168_s26 }
 0x315   :  { %2376 = vrot.lane.b32.xlu0 %v16343_v62, %s15168_s26 }
 0x316   :  { %v1642_v40 = vpop.permute.xlu1 %1641  ;;  %v16349_v4 = vpop.permute.xlu0 %961 }
 0x317   :  { %22048 = vst [vmem:[#allocation47_spill] sm:$0xff] %v16349_v4  ;;  %v1647_v29 = vsel %vm1005_vm2, %v1642_v40, 0  ;;  %13019 = vmatmul.mubr.msk.bf16.vlgmr.msra.gmra.mrb[40].mxu0 %vm1005_vm2, %v15975_v54 }
 0x318   :  { %3895 = vrot.lane.b32.xlu1 %v16333_v22, %s15168_s26  ;;  %13023 = vmatpush3.bf16.xpose.msra.mxu1 %v1647_v29 }
 0x319   :  { %3160 = vrot.lane.b32.xlu0 %v16349_v4, %s15168_s26  ;;  %13030 = vmatprep.mubr.msk.bf16.mxu0 %vm15166_vm1, %v21737_v36 }
 0x31a   :  { %v16360_v27 = vpop.permute.xlu1 %931  ;;  %13034 = vmatprep.subr.bf16.mxu1 %v21737_v36 }
 0x31b   :  { %22049 = vst [vmem:[#allocation48_spill] sm:$0xff] %v16360_v27  ;;  %v16363_v21 = vpop.permute.xlu0 %993 }
 0x31c   :  { %22050 = vst [vmem:[#allocation49_spill] sm:$0xff] %v16363_v21  ;;  %2425 = vrot.lane.b32.xlu1 %v16360_v27, %s15168_s26 }
 0x31d   :  { %3944 = vrot.lane.b32.xlu0 %v16363_v21, %s15168_s26 }
 0x31e   :  { %v16369_v54 = vpop.permute.xlu1 %963 }
 0x31f   :  { %22051 = vst [vmem:[#allocation50_spill] sm:$0xff] %v16369_v54  ;;  %v16371_v17 = vpop.permute.xlu0 %6177  ;;  %13025 = vmatmul.mubr.msk.bf16.vlgmr.msra.gmra.mrb[40].mxu1 %vm1005_vm2, %v15973_v51 }
 0x320   :  { %22052 = vst [vmem:[#allocation51_spill] sm:$0xff] %v16371_v17  ;;  %3209 = vrot.lane.b32.xlu1 %v16369_v54, %s15168_s26  ;;  %13036 = vmatprep.mubr.msk.bf16.mxu1 %vm15166_vm1, %v21737_v36 }
 0x322   :  { %v16379_v35 = vpop.permute.xlu1 %995 }
 0x323   :  { %22053 = vst [vmem:[#allocation52_spill] sm:$0xff] %v16379_v35  ;;  %v1691_v53 = vpop.permute.xlu0 %1690 }
 0x324   :  { %v1696_v63 = vsel %vm1005_vm2, %v1691_v53, 0  ;;  %3993 = vrot.lane.b32.xlu1 %v16379_v35, %s15168_s26 }
 0x325   :  { %13029 = vmatpush3.bf16.xpose.msra.mxu0 %v1696_v63 }
 0x326   :  { %v16384_v58 = vpop.permute.xlu1 %6224  ;;  %13040 = vmatprep.subr.bf16.mxu0 %v21737_v36 }
 0x327   :  { %22054 = vst [vmem:[#allocation53_spill] sm:$0xff] %v16384_v58  ;;  %v16387_v51 = vpop.permute.xlu0 %933 }
 0x328   :  { %22055 = vst [vmem:[#allocation54_spill] sm:$0xff] %v16387_v51  ;;  %2474 = vrot.lane.b32.xlu0 %v16387_v51, %s15168_s26 }
 0x32a   :  { %v1740_v40 = vpop.permute.xlu1 %1739 }
 0x32b   :  { %v1745_v29 = vsel %vm1005_vm2, %v1740_v40, 0  ;;  %v16392_v46 = vpop.permute.xlu0 %965 }
 0x32c   :  { %22056 = vst [vmem:[#allocation55_spill] sm:$0xff] %v16392_v46  ;;  %13031 = vmatmul.mubr.msk.bf16.vlgmr.msra.gmra.mrb[44].mxu0 %vm1005_vm2, %v15991_v56  ;;  %3258 = vrot.lane.b32.xlu0 %v16392_v46, %s15168_s26 }
 0x32d   :  { %13035 = vmatpush3.bf16.xpose.msra.mxu1 %v1745_v29  ;;  %13042 = vmatprep.mubr.msk.bf16.mxu0 %vm15166_vm1, %v21737_v36 }
 0x32e   :  { %v16400_v53 = vpop.permute.xlu1 %935  ;;  %13046 = vmatprep.subr.bf16.mxu1 %v21737_v36 }
 0x32f   :  { %22057 = vst [vmem:[#allocation56_spill] sm:$0xff] %v16400_v53  ;;  %v16403_v63 = vpop.permute.xlu0 %997  ;;  %2523 = vrot.lane.b32.xlu1 %v16400_v53, %s15168_s26 }
 0x330   :  { %22058 = vst [vmem:[#allocation57_spill] sm:$0xff] %v16403_v63  ;;  %4042 = vrot.lane.b32.xlu0 %v16403_v63, %s15168_s26 }
 0x332   :  { %v16409_v56 = vpop.permute.xlu1 %967 }
 0x333   :  { %22059 = vst [vmem:[#allocation58_spill] sm:$0xff] %v16409_v56  ;;  %v16411_v40 = vpop.permute.xlu0 %6271  ;;  %3307 = vrot.lane.b32.xlu1 %v16409_v56, %s15168_s26 }
 0x334   :  { %22060 = vst [vmem:[#allocation59_spill] sm:$0xff] %v16411_v40  ;;  %13037 = vmatmul.mubr.msk.bf16.vlgmr.msra.gmra.mrb[44].mxu1 %vm1005_vm2, %v15989_v6 }
 0x335   :  { %13048 = vmatprep.mubr.msk.bf16.mxu1 %vm15166_vm1, %v21737_v36 }
 0x336   :  { %v16419_v29 = vpop.permute.xlu1 %999 }
 0x337   :  { %22061 = vst [vmem:[#allocation60_spill] sm:$0xff] %v16419_v29  ;;  %v1789_v58 = vpop.permute.xlu0 %1788  ;;  %4091 = vrot.lane.b32.xlu1 %v16419_v29, %s15168_s26 }
 0x338   :  { %v1794_v17 = vsel %vm1005_vm2, %v1789_v58, 0 }
 0x339   :  { %13041 = vmatpush3.bf16.xpose.msra.mxu0 %v1794_v17 }
 0x33a   :  { %v16424_v13 = vpop.permute.xlu1 %6318  ;;  %13052 = vmatprep.subr.bf16.mxu0 %v21737_v36 }
 0x33b   :  { %22062 = vst [vmem:[#allocation61_spill] sm:$0xff] %v16424_v13  ;;  %v16427_v40 = vpop.permute.xlu0 %2572 }
 0x33e   :  { %v1838_v11 = vpop.permute.xlu1 %1837 }
 0x33f   :  { %v1843_v6 = vsel %vm1005_vm2, %v1838_v11, 0  ;;  %v16430_v28 = vpop.permute.xlu0 %3356 }
 0x340   :  { %13043 = vmatmul.mubr.msk.bf16.vlgmr.msra.gmra.mrb[48].mxu0 %vm1005_vm2, %v16086_v61  ;;  %13047 = vmatpush3.bf16.xpose.msra.mxu1 %v1843_v6 }
 0x341   :  { %13054 = vmatprep.mubr.msk.bf16.mxu0 %vm15166_vm1, %v21737_v36  ;;  %13058 = vmatprep.subr.bf16.mxu1 %v21737_v36 }
 0x342   :  { %v16437_v17 = vpop.permute.xlu1 %2621 }
 0x343   :  { %v16439_v58 = vpop.permute.xlu0 %6365 }
 0x344   :  { %22063 = vst [vmem:[#allocation62_spill] sm:$0xff] %v16439_v58 }
 0x346   :  { %v16441_v13 = vpop.permute.xlu1 %3405 }
 0x347   :  { %v1887_v23 = vpop.permute.xlu0 %1886  ;;  %13049 = vmatmul.mubr.msk.bf16.vlgmr.msra.gmra.mrb[48].mxu1 %vm1005_vm2, %v16053_v14 }
 0x348   :  { %v1892_v11 = vsel %vm1005_vm2, %v1887_v23, 0  ;;  %13060 = vmatprep.mubr.msk.bf16.mxu1 %vm15166_vm1, %v21737_v36 }
 0x349   :  { %13053 = vmatpush3.bf16.xpose.msra.mxu0 %v1892_v11 }
 0x34a   :  { %v16448_v61 = vpop.permute.xlu1 %6412  ;;  %13064 = vmatprep.subr.bf16.mxu0 %v21737_v36 }
 0x34b   :  { %22064 = vst [vmem:[#allocation63_spill] sm:$0xff] %v16448_v61  ;;  %v16451_v6 = vpop.permute.xlu0 %2670 }
 0x34e   :  { %v1936_v50 = vpop.permute.xlu1 %1935 }
 0x34f   :  { %v1941_v58 = vsel %vm1005_vm2, %v1936_v50, 0  ;;  %v16454_v9 = vpop.permute.xlu0 %3454 }
 0x350   :  { %13055 = vmatmul.mubr.msk.bf16.vlgmr.msra.gmra.mrb[52].mxu0 %vm1005_vm2, %v16097_v45  ;;  %13059 = vmatpush3.bf16.xpose.msra.mxu1 %v1941_v58 }
 0x351   :  { %13066 = vmatprep.mubr.msk.bf16.mxu0 %vm15166_vm1, %v21737_v36  ;;  %13070 = vmatprep.subr.bf16.mxu1 %v21737_v36 }
 0x352   :  { %v16461_v14 = vpop.permute.xlu1 %2719 }
 0x353   :  { %v16463_v23 = vpop.permute.xlu0 %6459 }
 0x354   :  { %22065 = vst [vmem:[#allocation64_spill] sm:$0xff] %v16463_v23 }
 0x356   :  { %v16465_v11 = vpop.permute.xlu1 %3503 }
 0x357   :  { %v1985_v61 = vpop.permute.xlu0 %1984  ;;  %13061 = vmatmul.mubr.msk.bf16.vlgmr.msra.gmra.mrb[52].mxu1 %vm1005_vm2, %v16107_v33 }
 0x358   :  { %v1990_v50 = vsel %vm1005_vm2, %v1985_v61, 0  ;;  %13072 = vmatprep.mubr.msk.bf16.mxu1 %vm15166_vm1, %v21737_v36 }
 0x359   :  { %13065 = vmatpush3.bf16.xpose.msra.mxu0 %v1990_v50 }
 0x35a   :  { %v16472_v45 = vpop.permute.xlu1 %6506  ;;  %13076 = vmatprep.subr.bf16.mxu0 %v21737_v36 }
 0x35b   :  { %22066 = vst [vmem:[#allocation65_spill] sm:$0xff] %v16472_v45  ;;  %v16475_v58 = vpop.permute.xlu0 %2768 }
 0x35e   :  { %v2034_v20 = vpop.permute.xlu1 %2033 }
 0x35f   :  { %v2039_v23 = vsel %vm1005_vm2, %v2034_v20, 0  ;;  %v16478_v8 = vpop.permute.xlu0 %3552 }
 0x360   :  { %13067 = vmatmul.mubr.msk.bf16.vlgmr.msra.gmra.mrb[56].mxu0 %vm1005_vm2, %v16184_v55  ;;  %13071 = vmatpush3.bf16.xpose.msra.mxu1 %v2039_v23 }
 0x361   :  { %13078 = vmatprep.mubr.msk.bf16.mxu0 %vm15166_vm1, %v21737_v36  ;;  %13082 = vmatprep.subr.bf16.mxu1 %v21737_v36 }
 0x362   :  { %v16485_v33 = vpop.permute.xlu1 %2817 }
 0x363   :  { %v2083_v61 = vpop.permute.xlu0 %2082 }
 0x364   :  { %v2088_v50 = vsel %vm1005_vm2, %v2083_v61, 0 }
 0x365   :  { %13077 = vmatpush3.bf16.xpose.msra.mxu0 %v2088_v50 }
 0x366   :  { %v16488_v45 = vpop.permute.xlu1 %3601  ;;  %13088 = vmatprep.subr.bf16.mxu0 %v21737_v36 }
 0x367   :  { %v16491_v20 = vpop.permute.xlu0 %2866  ;;  %13073 = vmatmul.mubr.msk.bf16.vlgmr.msra.gmra.mrb[56].mxu1 %vm1005_vm2, %v16133_v47 }
 0x368   :  { %13084 = vmatprep.mubr.msk.bf16.mxu1 %vm15166_vm1, %v21737_v36 }
 0x36a   :  { %v2132_v23 = vpop.permute.xlu1 %2131 }
 0x36b   :  { %v2137_v55 = vsel %vm1005_vm2, %v2132_v23, 0  ;;  %v16498_v10 = vpop.permute.xlu0 %3650 }
 0x36c   :  { %13079 = vmatmul.mubr.msk.bf16.vlgmr.msra.gmra.mrb[60].mxu0 %vm1005_vm2, %v16186_v41  ;;  %13083 = vmatpush3.bf16.xpose.msra.mxu1 %v2137_v55 }
 0x36d   :  { %13090 = vmatprep.mubr.msk.bf16.mxu0 %vm15166_vm1, %v21737_v36  ;;  %13094 = vmatprep.subr.bf16.mxu1 %v21737_v36 }
 0x36e   :  { %v16505_v61 = vpop.permute.xlu1 %2915 }
 0x36f   :  { %v2181_v50 = vpop.permute.xlu0 %2180 }
 0x370   :  { %v2186_v47 = vsel %vm1005_vm2, %v2181_v50, 0 }
 0x371   :  { %13089 = vmatpush3.bf16.xpose.msra.mxu0 %v2186_v47  ;;  %v16525_v47 = vld [vmem:[%s21710_s2] sm:$0xff] }
 0x372   :  { %v16508_v60 = vpop.permute.xlu1 %3699  ;;  %13100 = vmatprep.subr.bf16.mxu0 %v21737_v36 }
 0x373   :  { %v16511_v23 = vpop.permute.xlu0 %2964  ;;  %13085 = vmatmul.mubr.msk.bf16.vlgmr.msra.gmra.mrb[60].mxu1 %vm1005_vm2, %v16204_v38 }
 0x374   :  { %13096 = vmatprep.mubr.msk.bf16.mxu1 %vm15166_vm1, %v21737_v36 }
 0x376   :  { %v2230_v55 = vpop.permute.xlu1 %2229 }
 0x377   :  { %v2235_v41 = vsel %vm1005_vm2, %v2230_v55, 0  ;;  %v16518_v29 = vpop.permute.xlu0 %3748 }
 0x378   :  { %13091 = vmatmul.mubr.msk.bf16.vlgmr.msra.gmra.mrb[64].mxu0 %vm1005_vm2, %v16237_v3  ;;  %13095 = vmatpush3.bf16.xpose.msra.mxu1 %v2235_v41 }
 0x379   :  { %13102 = vmatprep.mubr.msk.bf16.mxu0 %vm15166_vm1, %v21737_v36  ;;  %13106 = vmatprep.subr.bf16.mxu1 %v21737_v36 }
 0x37a   :  { %v16530_v50 = vpop.permute.xlu1 %3013 }
 0x37b   :  { %v1046_v38 = vpop.f32.mrb[0].mxu1  ;;  %v2279_v55 = vpop.permute.xlu0 %2278 }
 0x37c   :  { %v16538_v41 = vadd.f32 %v1046_v38, %v16525_v47  ;;  %v2284_v3 = vsel %vm1005_vm2, %v2279_v55, 0  ;;  %v12948_v63 = vpop.f32.mrb[1].mxu1 }
 0x37d   :  { %v1049_v35 = vpop.f32.mrb[2].mxu1  ;;  %13101 = vmatpush3.bf16.xpose.msra.mxu0 %v2284_v3 }
 0x37e   :  { %22067 = vst [vmem:[#allocation66_spill] sm:$0xff] %v16538_v41  ;;  %v16542_v36 = vadd.f32 %v1049_v35, %v16535_v2  ;;  %v12949_v21 = vpop.f32.mrb[3].mxu1  ;;  %v16544_v22 = vpop.permute.xlu1 %3797  ;;  %v4141_v37 = vsel %vm4140_vm3, %v16538_v41, -inf  ;;  %13112 = vmatprep.subr.bf16.mxu0 %v22069_v16 }
 0x37f   :  { %4142 = vmax.xlane.f32.xlu0 %v4141_v37  ;;  %v16549_v15 = vpop.permute.xlu0 %3062  ;;  %13097 = vmatmul.mubr.msk.bf16.vlgmr.msra.gmra.mrb[64].mxu1 %vm1005_vm2, %v16259_v59 }
 0x380   :  { %22068 = vst [vmem:[#allocation67_spill] sm:$0xff] %v16542_v36  ;;  %v4144_v38 = vsel %vm4140_vm3, %v16542_v36, -inf  ;;  %13108 = vmatprep.mubr.msk.bf16.mxu1 %vm15166_vm1, %v22069_v16 }
 0x381   :  { %4145 = vmax.xlane.f32.xlu1 %v4144_v38 }
 0x382   :  { %v2328_v3 = vpop.permute.xlu1 %2327 }
 0x383   :  { %v1095_v21 = vpop.f32.mrb[4].mxu1  ;;  %v2333_v35 = vsel %vm1005_vm2, %v2328_v3, 0  ;;  %v16558_v63 = vpop.permute.xlu0 %3846 }
 0x384   :  { %22070 = vst [vmem:[#allocation68_spill] sm:$0xff] %v16558_v63  ;;  %v16561_v37 = vadd.f32 %v1095_v21, %v16525_v47  ;;  %v12954_v55 = vpop.f32.mrb[5].mxu1  ;;  %13103 = vmatmul.mubr.msk.bf16.vlgmr.msra.gmra.mrb[68].mxu0 %vm1005_vm2, %v16294_v32  ;;  %13107 = vmatpush3.bf16.xpose.msra.mxu1 %v2333_v35 }
 0x385   :  { %v1098_v59 = vpop.f32.mrb[6].mxu1  ;;  %13114 = vmatprep.mubr.msk.bf16.mxu0 %vm15166_vm1, %v22069_v16  ;;  %13118 = vmatprep.subr.bf16.mxu1 %v22069_v16 }
 0x386   :  { %22071 = vst [vmem:[#allocation69_spill] sm:$0xff] %v16561_v37  ;;  %v16569_v38 = vadd.f32 %v1098_v59, %v16535_v2  ;;  %v12955_v3 = vpop.f32.mrb[7].mxu1  ;;  %v16571_v36 = vpop.permute.xlu1 %3111  ;;  %v4147_v21 = vsel %vm4140_vm3, %v16561_v37, -inf }
 0x387   :  { %4148 = vmax.xlane.f32.xlu0 %v4147_v21  ;;  %v2377_v55 = vpop.permute.xlu0 %2376 }
 0x388   :  { %22072 = vst [vmem:[#allocation70_spill] sm:$0xff] %v16569_v38  ;;  %v2382_v32 = vsel %vm1005_vm2, %v2377_v55, 0  ;;  %v4150_v41 = vsel %vm4140_vm3, %v16569_v38, -inf }
 0x389   :  { %13113 = vmatpush3.bf16.xpose.msra.mxu0 %v2382_v32 }
 0x38a   :  { %v16576_v35 = vpop.permute.xlu1 %3895  ;;  %13124 = vmatprep.subr.bf16.mxu0 %v22069_v16 }
 0x38b   :  { %22073 = vst [vmem:[#allocation71_spill] sm:$0xff] %v16576_v35  ;;  %4151 = vmax.xlane.f32.xlu0 %v4150_v41  ;;  %13109 = vmatmul.mubr.msk.bf16.vlgmr.msra.gmra.mrb[68].mxu1 %vm1005_vm2, %v16312_v42  ;;  %v16586_v21 = vpop.permute.xlu0 %3160 }
 0x38c   :  { %13120 = vmatprep.mubr.msk.bf16.mxu1 %vm15166_vm1, %v22069_v16 }
 0x38e   :  { %v2426_v59 = vpop.permute.xlu1 %2425 }
 0x38f   :  { %v2431_v3 = vsel %vm1005_vm2, %v2426_v59, 0  ;;  %v16593_v32 = vpop.permute.xlu0 %3944 }
 0x390   :  { %13115 = vmatmul.mubr.msk.bf16.vlgmr.msra.gmra.mrb[72].mxu0 %vm1005_vm2, %v16343_v62  ;;  %13119 = vmatpush3.bf16.xpose.msra.mxu1 %v2431_v3  ;;  %22074 = vst [vmem:[#allocation72_spill] sm:$0xff] %v16593_v32 }
 0x391   :  { %13126 = vmatprep.mubr.msk.bf16.mxu0 %vm15166_vm1, %v22069_v16  ;;  %13130 = vmatprep.subr.bf16.mxu1 %v22069_v16 }
 0x392   :  { %v16595_v41 = vpop.permute.xlu1 %3209 }
 0x396   :  { %v16602_v3 = vpop.permute.xlu1 %3993 }
 0x397   :  { %13121 = vmatmul.mubr.msk.bf16.vlgmr.msra.gmra.mrb[72].mxu1 %vm1005_vm2, %v16360_v27 }
 0x398   :  { %13132 = vmatprep.mubr.msk.bf16.mxu1 %vm15166_vm1, %v22069_v16 }
 0x39a   :  { %v2475_v55 = vpop.permute.xlu0 %2474 }
 0x39b   :  { %v2480_v59 = vsel %vm1005_vm2, %v2475_v55, 0 }
 0x39c   :  { %13125 = vmatpush3.bf16.xpose.msra.mxu0 %v2480_v59  ;;  %v2578_v59 = vsel %vm1005_vm2, %v16427_v40, 0 }
 0x39d   :  { %13136 = vmatprep.subr.bf16.mxu0 %v22069_v16 }
 0x39e   :  { %v1144_v62 = vpop.f32.mrb[8].mxu1 }
 0x39f   :  { %v16606_v42 = vadd.f32 %v1144_v62, %v16525_v47  ;;  %v12960_v38 = vpop.f32.mrb[9].mxu1 }
 0x3a0   :  { %v1147_v37 = vpop.f32.mrb[10].mxu1 }
 0x3a1   :  { %v16609_v32 = vadd.f32 %v1147_v37, %v16535_v2  ;;  %v12961_v27 = vpop.f32.mrb[11].mxu1  ;;  %v2524_v35 = vpop.permute.xlu1 %2523  ;;  %v4153_v63 = vsel %vm4140_vm3, %v16606_v42, -inf }
 0x3a2   :  { %v2529_v55 = vsel %vm1005_vm2, %v2524_v35, 0  ;;  %4154 = vmax.xlane.f32.xlu0 %v4153_v63 }
 0x3a3   :  { %13127 = vmatmul.mubr.msk.bf16.vlgmr.msra.gmra.mrb[76].mxu0 %vm1005_vm2, %v16387_v51  ;;  %13131 = vmatpush3.bf16.xpose.msra.mxu1 %v2529_v55  ;;  %v4156_v62 = vsel %vm4140_vm3, %v16609_v32, -inf }
 0x3a4   :  { %13137 = vmatpush3.bf16.xpose.msra.mxu0 %v2578_v59  ;;  %4157 = vmax.xlane.f32.xlu1 %v4156_v62  ;;  %v2627_v59 = vsel %vm1005_vm2, %v16437_v17, 0  ;;  %v2676_v62 = vsel %vm1005_vm2, %v16451_v6, 0 }
 0x3a5   :  { %13138 = vmatprep.mubr.msk.bf16.mxu0 %vm15166_vm1, %v22069_v16  ;;  %13142 = vmatprep.subr.bf16.mxu1 %v22069_v16 }
 0x3a6   :  { %v1193_v27 = vpop.f32.mrb[12].mxu1  ;;  %13148 = vmatprep.subr.bf16.mxu0 %v22069_v16 }
 0x3a7   :  { %v16625_v63 = vadd.f32 %v1193_v27, %v16525_v47  ;;  %v12966_v40 = vpop.f32.mrb[13].mxu1 }
 0x3a8   :  { %v1196_v37 = vpop.f32.mrb[14].mxu1 }
 0x3a9   :  { %v16628_v38 = vadd.f32 %v1196_v37, %v16535_v2  ;;  %v12967_v35 = vpop.f32.mrb[15].mxu1  ;;  %v4159_v55 = vsel %vm4140_vm3, %v16625_v63, -inf }
 0x3aa   :  { %13133 = vmatmul.mubr.msk.bf16.vlgmr.msra.gmra.mrb[76].mxu1 %vm1005_vm2, %v16400_v53  ;;  %4160 = vmax.xlane.f32.xlu0 %v4159_v55 }
 0x3ab   :  { %13139 = vmatmul.mubr.msk.bf16.vlgmr.msra.gmra.mrb[80].mxu0 %vm1005_vm2, %v16068_v19  ;;  %13143 = vmatpush3.bf16.xpose.msra.mxu1 %v2627_v59  ;;  %v4162_v27 = vsel %vm4140_vm3, %v16628_v38, -inf }
 0x3ac   :  { %13149 = vmatpush3.bf16.xpose.msra.mxu0 %v2676_v62  ;;  %4163 = vmax.xlane.f32.xlu1 %v4162_v27  ;;  %v2725_v62 = vsel %vm1005_vm2, %v16461_v14, 0  ;;  %v2774_v27 = vsel %vm1005_vm2, %v16475_v58, 0 }
 0x3ad   :  { %13144 = vmatprep.mubr.msk.bf16.mxu1 %vm15166_vm1, %v22069_v16  ;;  %13150 = vmatprep.mubr.msk.bf16.mxu0 %vm15166_vm1, %v22069_v16 }
 0x3ae   :  { %v1242_v17 = vpop.f32.mrb[16].mxu1  ;;  %13154 = vmatprep.subr.bf16.mxu1 %v22069_v16  ;;  %13160 = vmatprep.subr.bf16.mxu0 %v22069_v16 }
 0x3af   :  { %v16649_v6 = vadd.f32 %v1242_v17, %v16525_v47  ;;  %v12972_v40 = vpop.f32.mrb[17].mxu1 }
 0x3b0   :  { %v1245_v37 = vpop.f32.mrb[18].mxu1 }
 0x3b1   :  { %v16652_v35 = vadd.f32 %v1245_v37, %v16535_v2  ;;  %v12973_v55 = vpop.f32.mrb[19].mxu1  ;;  %v4165_v59 = vsel %vm4140_vm3, %v16649_v6, -inf }
 0x3b2   :  { %13145 = vmatmul.mubr.msk.bf16.vlgmr.msra.gmra.mrb[80].mxu1 %vm1005_vm2, %v16059_v31  ;;  %4166 = vmax.xlane.f32.xlu0 %v4165_v59  ;;  %v2823_v55 = vsel %vm1005_vm2, %v16485_v33, 0  ;;  %v2872_v59 = vsel %vm1005_vm2, %v16491_v20, 0  ;;  %v22100_v31 = vld [vmem:[#allocation67_spill] sm:$0xff] }
 0x3b3   :  { %13151 = vmatmul.mubr.msk.bf16.vlgmr.msra.gmra.mrb[84].mxu0 %vm1005_vm2, %v16109_v0  ;;  %13155 = vmatpush3.bf16.xpose.msra.mxu1 %v2725_v62  ;;  %v4168_v17 = vsel %vm4140_vm3, %v16652_v35, -inf }
 0x3b4   :  { %13161 = vmatpush3.bf16.xpose.msra.mxu0 %v2774_v27  ;;  %4169 = vmax.xlane.f32.xlu1 %v4168_v17  ;;  %v2921_v17 = vsel %vm1005_vm2, %v16505_v61, 0 }
 0x3b5   :  { %13156 = vmatprep.mubr.msk.bf16.mxu1 %vm15166_vm1, %v22069_v16  ;;  %13162 = vmatprep.mubr.msk.bf16.mxu0 %vm15166_vm1, %v22069_v16 }
 0x3b6   :  { %v1291_v14 = vpop.f32.mrb[20].mxu1  ;;  %13166 = vmatprep.subr.bf16.mxu1 %v22069_v16  ;;  %13172 = vmatprep.subr.bf16.mxu0 %v22069_v16 }
 0x3b7   :  { %v12978_v58 = vpop.f32.mrb[21].mxu1  ;;  %v16704_v61 = vadd.f32 %v1291_v14, %v16525_v47 }
 0x3b8   :  { %v1294_v40 = vpop.f32.mrb[22].mxu1 }
 0x3b9   :  { %v12979_v37 = vpop.f32.mrb[23].mxu1  ;;  %v16718_v14 = vadd.f32 %v1294_v40, %v16535_v2  ;;  %v3068_v40 = vsel %vm1005_vm2, %v16549_v15, 0 }
 0x3ba   :  { %13157 = vmatmul.mubr.msk.bf16.vlgmr.msra.gmra.mrb[84].mxu1 %vm1005_vm2, %v16115_v52  ;;  %v2970_v37 = vsel %vm1005_vm2, %v16511_v23, 0  ;;  %v22097_v52 = vld [vmem:[#allocation66_spill] sm:$0xff] }
 0x3bb   :  { %13163 = vmatmul.mubr.msk.bf16.vlgmr.msra.gmra.mrb[88].mxu0 %vm1005_vm2, %v16145_v48  ;;  %13167 = vmatpush3.bf16.xpose.msra.mxu1 %v2823_v55  ;;  %v3019_v48 = vsel %vm1005_vm2, %v16530_v50, 0 }
 0x3bc   :  { %13173 = vmatpush3.bf16.xpose.msra.mxu0 %v2872_v59  ;;  %13168 = vmatprep.mubr.msk.bf16.mxu1 %vm15166_vm1, %v22069_v16 }
 0x3bd   :  { %13174 = vmatprep.mubr.msk.bf16.mxu0 %vm15166_vm1, %v22069_v16  ;;  %13178 = vmatprep.subr.bf16.mxu1 %v22069_v16 }
 0x3be   :  { %v16685_v33 = vpop.f32.mrb[24].mxu1  ;;  %13184 = vmatprep.subr.bf16.mxu0 %v22069_v16 }
 0x3bf   :  { %v12984_v62 = vpop.f32.mrb[25].mxu1 }
 0x3c0   :  { %v16688_v27 = vpop.f32.mrb[26].mxu1 }
 0x3c1   :  { %v12985_v20 = vpop.f32.mrb[27].mxu1 }
 0x3c2   :  { %v1438_v58 = vpop.f32.mrb[32].mxu0  ;;  %13169 = vmatmul.mubr.msk.bf16.vlgmr.msra.gmra.mrb[88].mxu1 %vm1005_vm2, %v16151_v1 }
 0x3c3   :  { %v16697_v55 = vadd.f32 %v1438_v58, %v16525_v47  ;;  %13175 = vmatmul.mubr.msk.bf16.vlgmr.msra.gmra.mrb[92].mxu0 %vm1005_vm2, %v16193_v18  ;;  %v12996_v59 = vpop.f32.mrb[33].mxu0  ;;  %13179 = vmatpush3.bf16.xpose.msra.mxu1 %v2921_v17  ;;  %v4171_v18 = vsel %vm4140_vm3, %v16704_v61, -inf }
 0x3c4   :  { %13185 = vmatpush3.bf16.xpose.msra.mxu0 %v2970_v37  ;;  %v1441_v62 = vpop.f32.mrb[34].mxu0  ;;  %13180 = vmatprep.mubr.msk.bf16.mxu1 %vm15166_vm1, %v22069_v16 }
 0x3c5   :  { %v16707_v20 = vadd.f32 %v1441_v62, %v16535_v2  ;;  %v12997_v23 = vpop.f32.mrb[35].mxu0  ;;  %v4189_v58 = vsel %vm4140_vm3, %v16697_v55, -inf  ;;  %13186 = vmatprep.mubr.msk.bf16.mxu0 %vm15166_vm1, %v22069_v16  ;;  %13190 = vmatprep.subr.bf16.mxu1 %v22069_v16 }
 0x3c6   :  { %v16714_v17 = vpop.f32.mrb[28].mxu1  ;;  %4190 = vmax.xlane.f32.xlu0 %v4189_v58  ;;  %13196 = vmatprep.subr.bf16.mxu0 %v22069_v16  ;;  %v4174_v58 = vsel %vm4140_vm3, %v16718_v14, -inf }
 0x3c7   :  { %v12990_v37 = vpop.f32.mrb[29].mxu1  ;;  %v4192_v59 = vsel %vm4140_vm3, %v16707_v20, -inf }
 0x3c8   :  { %v16722_v62 = vpop.f32.mrb[30].mxu1  ;;  %4193 = vmax.xlane.f32.xlu1 %v4192_v59  ;;  %v3117_v37 = vsel %vm1005_vm2, %v16571_v36, 0  ;;  %v3166_v59 = vsel %vm1005_vm2, %v16586_v21, 0 }
 0x3c9   :  { %v12991_v23 = vpop.f32.mrb[31].mxu1 }
 0x3ca   :  { %13181 = vmatmul.mubr.msk.bf16.vlgmr.msra.gmra.mrb[92].mxu1 %vm1005_vm2, %v16213_v44  ;;  %4172 = vmax.xlane.f32.xlu0 %v4171_v18 }
 0x3cb   :  { %13187 = vmatmul.mubr.msk.bf16.vlgmr.msra.gmra.mrb[96].mxu0 %vm1005_vm2, %v16248_v43  ;;  %13191 = vmatpush3.bf16.xpose.msra.mxu1 %v3019_v48 }
 0x3cc   :  { %13197 = vmatpush3.bf16.xpose.msra.mxu0 %v3068_v40  ;;  %4175 = vmax.xlane.f32.xlu1 %v4174_v58  ;;  %v3259_v40 = vpop.permute.xlu0 %3258 }
 0x3cd   :  { %13192 = vmatprep.mubr.msk.bf16.mxu1 %vm15166_vm1, %v22069_v16  ;;  %13198 = vmatprep.mubr.msk.bf16.mxu0 %vm15166_vm1, %v22069_v16 }
 0x3ce   :  { %v16740_v50 = vpop.f32.mrb[32].mxu1  ;;  %13202 = vmatprep.subr.bf16.mxu1 %v22069_v16  ;;  %13208 = vmatprep.subr.bf16.mxu0 %v22069_v16 }
 0x3cf   :  { %v13002_v18 = vpop.f32.mrb[33].mxu1 }
 0x3d0   :  { %v16744_v15 = vpop.f32.mrb[34].mxu1  ;;  %v16765_v18 = vadd.f32 %v16685_v33, %v16525_v47  ;;  %v16779_v33 = vadd.f32 %v16688_v27, %v16535_v2 }
 0x3d1   :  { %v13003_v48 = vpop.f32.mrb[35].mxu1 }
 0x3d2   :  { %13193 = vmatmul.mubr.msk.bf16.vlgmr.msra.gmra.mrb[96].mxu1 %vm1005_vm2, %v16272_v5 }
 0x3d3   :  { %13199 = vmatmul.mubr.msk.bf16.vlgmr.msra.gmra.mrb[100].mxu0 %vm1005_vm2, %v16301_v34  ;;  %13203 = vmatpush3.bf16.xpose.msra.mxu1 %v3117_v37  ;;  %v3215_v34 = vsel %vm1005_vm2, %v16595_v41, 0  ;;  %v4177_v41 = vsel %vm4140_vm3, %v16765_v18, -inf }
 0x3d4   :  { %13209 = vmatpush3.bf16.xpose.msra.mxu0 %v3166_v59  ;;  %13204 = vmatprep.mubr.msk.bf16.mxu1 %vm15166_vm1, %v22069_v16 }
 0x3d5   :  { %13210 = vmatprep.mubr.msk.bf16.mxu0 %vm15166_vm1, %v22069_v16  ;;  %13214 = vmatprep.subr.bf16.mxu1 %v22069_v16 }
 0x3d6   :  { %v1536_v36 = vpop.f32.mrb[36].mxu0  ;;  %13220 = vmatprep.subr.bf16.mxu0 %v22069_v16 }
 0x3d7   :  { %v16761_v23 = vadd.f32 %v1536_v36, %v16525_v47  ;;  %v13008_v21 = vpop.f32.mrb[37].mxu0  ;;  %v3264_v36 = vsel %vm1005_vm2, %v3259_v40, 0 }
 0x3d8   :  { %v1539_v58 = vpop.f32.mrb[38].mxu0 }
 0x3d9   :  { %v16768_v48 = vadd.f32 %v1539_v58, %v16535_v2  ;;  %v13009_v37 = vpop.f32.mrb[39].mxu0  ;;  %v4201_v59 = vsel %vm4140_vm3, %v16761_v23, -inf  ;;  %v4180_v58 = vsel %vm4140_vm3, %v16779_v33, -inf }
 0x3da   :  { %13205 = vmatmul.mubr.msk.bf16.vlgmr.msra.gmra.mrb[100].mxu1 %vm1005_vm2, %v16321_v57  ;;  %4202 = vmax.xlane.f32.xlu0 %v4201_v59 }
 0x3db   :  { %13211 = vmatmul.mubr.msk.bf16.vlgmr.msra.gmra.mrb[104].mxu0 %vm1005_vm2, %v16349_v4  ;;  %13215 = vmatpush3.bf16.xpose.msra.mxu1 %v3215_v34  ;;  %v4204_v21 = vsel %vm4140_vm3, %v16768_v48, -inf  ;;  %v3308_v34 = vpop.permute.xlu1 %3307 }
 0x3dc   :  { %13221 = vmatpush3.bf16.xpose.msra.mxu0 %v3264_v36  ;;  %4205 = vmax.xlane.f32.xlu1 %v4204_v21  ;;  %v3313_v36 = vsel %vm1005_vm2, %v3308_v34, 0  ;;  %v3362_v21 = vsel %vm1005_vm2, %v16430_v28, 0  ;;  %v3460_v28 = vsel %vm1005_vm2, %v16454_v9, 0 }
 0x3dd   :  { %13216 = vmatprep.mubr.msk.bf16.mxu1 %vm15166_vm1, %v22069_v16  ;;  %13222 = vmatprep.mubr.msk.bf16.mxu0 %vm15166_vm1, %v22069_v16 }
 0x3de   :  { %v16791_v27 = vpop.f32.mrb[36].mxu1  ;;  %4178 = vmax.xlane.f32.xlu0 %v4177_v41  ;;  %13226 = vmatprep.subr.bf16.mxu1 %v22069_v16  ;;  %v3411_v41 = vsel %vm1005_vm2, %v16441_v13, 0  ;;  %v16827_v13 = vadd.f32 %v16714_v17, %v16525_v47 }
 0x3df   :  { %v13014_v40 = vpop.f32.mrb[37].mxu1  ;;  %13232 = vmatprep.subr.bf16.mxu0 %v22069_v16 }
 0x3e0   :  { %v16797_v37 = vpop.f32.mrb[38].mxu1  ;;  %4181 = vmax.xlane.f32.xlu1 %v4180_v58 }
 0x3e1   :  { %v13015_v59 = vpop.f32.mrb[39].mxu1 }
 0x3e2   :  { %13217 = vmatmul.mubr.msk.bf16.vlgmr.msra.gmra.mrb[104].mxu1 %vm1005_vm2, %v16369_v54 }
 0x3e3   :  { %13223 = vmatmul.mubr.msk.bf16.vlgmr.msra.gmra.mrb[108].mxu0 %vm1005_vm2, %v16392_v46  ;;  %13227 = vmatpush3.bf16.xpose.msra.mxu1 %v3313_v36 }
 0x3e4   :  { %13233 = vmatpush3.bf16.xpose.msra.mxu0 %v3362_v21  ;;  %13228 = vmatprep.mubr.msk.bf16.mxu1 %vm15166_vm1, %v22069_v16 }
 0x3e5   :  { %13234 = vmatprep.mubr.msk.bf16.mxu0 %vm15166_vm1, %v22069_v16  ;;  %13238 = vmatprep.subr.bf16.mxu1 %v22069_v16 }
 0x3e6   :  { %13244 = vmatprep.subr.bf16.mxu0 %v22069_v16 }
 0x3ea   :  { %v1634_v34 = vpop.f32.mrb[40].mxu0  ;;  %13229 = vmatmul.mubr.msk.bf16.vlgmr.msra.gmra.mrb[108].mxu1 %vm1005_vm2, %v16409_v56 }
 0x3eb   :  { %v16819_v40 = vadd.f32 %v1634_v34, %v16525_v47  ;;  %13235 = vmatmul.mubr.msk.bf16.vlgmr.msra.gmra.mrb[112].mxu0 %vm1005_vm2, %v16077_v49  ;;  %v13020_v58 = vpop.f32.mrb[41].mxu0  ;;  %13239 = vmatpush3.bf16.xpose.msra.mxu1 %v3411_v41  ;;  %v16840_v41 = vadd.f32 %v16722_v62, %v16535_v2  ;;  %v4183_v34 = vsel %vm4140_vm3, %v16827_v13, -inf }
 0x3ec   :  { %13245 = vmatpush3.bf16.xpose.msra.mxu0 %v3460_v28  ;;  %v1637_v59 = vpop.f32.mrb[42].mxu0  ;;  %13240 = vmatprep.mubr.msk.bf16.mxu1 %vm15166_vm1, %v22069_v16  ;;  %v3509_v28 = vsel %vm1005_vm2, %v16465_v11, 0 }
 0x3ed   :  { %v16830_v36 = vadd.f32 %v1637_v59, %v16535_v2  ;;  %v13021_v9 = vpop.f32.mrb[43].mxu0  ;;  %v4213_v21 = vsel %vm4140_vm3, %v16819_v40, -inf  ;;  %13246 = vmatprep.mubr.msk.bf16.mxu0 %vm15166_vm1, %v22069_v16  ;;  %13250 = vmatprep.subr.bf16.mxu1 %v22069_v16  ;;  %v3558_v59 = vsel %vm1005_vm2, %v16478_v8, 0  ;;  %v3607_v8 = vsel %vm1005_vm2, %v16488_v45, 0 }
 0x3ee   :  { %4214 = vmax.xlane.f32.xlu0 %v4213_v21  ;;  %13256 = vmatprep.subr.bf16.mxu0 %v22069_v16  ;;  %v4186_v9 = vsel %vm4140_vm3, %v16840_v41, -inf }
 0x3ef   :  { %v4216_v17 = vsel %vm4140_vm3, %v16830_v36, -inf }
 0x3f0   :  { %4217 = vmax.xlane.f32.xlu1 %v4216_v17  ;;  %v3656_v17 = vsel %vm1005_vm2, %v16498_v10, 0 }
 0x3f2   :  { %v1683_v58 = vpop.f32.mrb[40].mxu1  ;;  %13241 = vmatmul.mubr.msk.bf16.vlgmr.msra.gmra.mrb[112].mxu1 %vm1005_vm2, %v16066_v7  ;;  %4184 = vmax.xlane.f32.xlu0 %v4183_v34 }
 0x3f3   :  { %13247 = vmatmul.mubr.msk.bf16.vlgmr.msra.gmra.mrb[116].mxu0 %vm1005_vm2, %v16117_v39  ;;  %v13026_v62 = vpop.f32.mrb[41].mxu1  ;;  %13251 = vmatpush3.bf16.xpose.msra.mxu1 %v3509_v28 }
 0x3f4   :  { %13257 = vmatpush3.bf16.xpose.msra.mxu0 %v3558_v59  ;;  %v1686_v21 = vpop.f32.mrb[42].mxu1  ;;  %4187 = vmax.xlane.f32.xlu1 %v4186_v9  ;;  %v16881_v59 = vadd.f32 %v16740_v50, %v16525_v47  ;;  %v16898_v50 = vadd.f32 %v16744_v15, %v16535_v2 }
 0x3f5   :  { %v13027_v11 = vpop.f32.mrb[43].mxu1  ;;  %13252 = vmatprep.mubr.msk.bf16.mxu1 %vm15166_vm1, %v22069_v16  ;;  %13258 = vmatprep.mubr.msk.bf16.mxu0 %vm15166_vm1, %v22069_v16 }
 0x3f6   :  { %13262 = vmatprep.subr.bf16.mxu1 %v22069_v16  ;;  %13268 = vmatprep.subr.bf16.mxu0 %v22069_v16 }
 0x3fa   :  { %13253 = vmatmul.mubr.msk.bf16.vlgmr.msra.gmra.mrb[116].mxu1 %vm1005_vm2, %v16123_v30 }
 0x3fb   :  { %13259 = vmatmul.mubr.msk.bf16.vlgmr.msra.gmra.mrb[120].mxu0 %vm1005_vm2, %v16153_v12  ;;  %13263 = vmatpush3.bf16.xpose.msra.mxu1 %v3607_v8  ;;  %v3705_v8 = vsel %vm1005_vm2, %v16508_v60, 0  ;;  %v16906_v60 = vadd.f32 %v16791_v27, %v16525_v47  ;;  %v4198_v27 = vsel %vm4140_vm3, %v16898_v50, -inf }
 0x3fc   :  { %13269 = vmatpush3.bf16.xpose.msra.mxu0 %v3656_v17  ;;  %13264 = vmatprep.mubr.msk.bf16.mxu1 %vm15166_vm1, %v22069_v16  ;;  %v3754_v17 = vsel %vm1005_vm2, %v16518_v29, 0  ;;  %v4195_v29 = vsel %vm4140_vm3, %v16881_v59, -inf }
 0x3fd   :  { %13270 = vmatprep.mubr.msk.bf16.mxu0 %vm15166_vm1, %v22069_v16  ;;  %13274 = vmatprep.subr.bf16.mxu1 %v22069_v16 }
 0x3fe   :  { %13280 = vmatprep.subr.bf16.mxu0 %v22069_v16 }
 0x3ff   :  { %v1732_v45 = vpop.f32.mrb[44].mxu0 }
 0x400   :  { %v16877_v34 = vadd.f32 %v1732_v45, %v16525_v47  ;;  %v13032_v10 = vpop.f32.mrb[45].mxu0 }
 0x401   :  { %v1735_v28 = vpop.f32.mrb[46].mxu0  ;;  %v16916_v10 = vadd.f32 %v16797_v37, %v16535_v2  ;;  %v22075_v37 = vld [vmem:[#allocation68_spill] sm:$0xff] }
 0x402   :  { %v16884_v62 = vadd.f32 %v1735_v28, %v16535_v2  ;;  %v13033_v9 = vpop.f32.mrb[47].mxu0  ;;  %13265 = vmatmul.mubr.msk.bf16.vlgmr.msra.gmra.mrb[120].mxu1 %vm1005_vm2, %v16164_v25  ;;  %v4225_v11 = vsel %vm4140_vm3, %v16877_v34, -inf }
 0x403   :  { %4226 = vmax.xlane.f32.xlu0 %v4225_v11  ;;  %13271 = vmatmul.mubr.msk.bf16.vlgmr.msra.gmra.mrb[124].mxu0 %vm1005_vm2, %v16206_v26  ;;  %v16921_v11 = vadd.f32 %v1683_v58, %v16525_v47  ;;  %v4210_v58 = vsel %vm4140_vm3, %v16916_v10, -inf }
 0x404   :  { %13275 = vmatpush3.bf16.xpose.msra.mxu1 %v3705_v8  ;;  %13281 = vmatpush3.bf16.xpose.msra.mxu0 %v3754_v17  ;;  %v4228_v45 = vsel %vm4140_vm3, %v16884_v62, -inf  ;;  %v4207_v17 = vsel %vm4140_vm3, %v16906_v60, -inf }
 0x405   :  { %4229 = vmax.xlane.f32.xlu1 %v4228_v45  ;;  %13276 = vmatprep.mubr.msk.bf16.mxu1 %vm15166_vm1, %v22069_v16  ;;  %v3803_v45 = vsel %vm1005_vm2, %v16544_v22, 0 }
 0x406   :  { %13282 = vmatprep.mubr.msk.bf16.mxu0 %vm15166_vm1, %v22069_v16  ;;  %13286 = vmatprep.subr.bf16.mxu1 %v22069_v16 }
 0x407   :  { %v1781_v15 = vpop.f32.mrb[44].mxu1  ;;  %4196 = vmax.xlane.f32.xlu0 %v4195_v29  ;;  %13292 = vmatprep.subr.bf16.mxu0 %v22069_v16  ;;  %v3852_v29 = vsel %vm1005_vm2, %v22075_v37, 0 }
 0x408   :  { %v13038_v28 = vpop.f32.mrb[45].mxu1  ;;  %v16939_v22 = vadd.f32 %v1781_v15, %v16525_v47 }
 0x409   :  { %v1784_v9 = vpop.f32.mrb[46].mxu1  ;;  %4199 = vmax.xlane.f32.xlu1 %v4198_v27  ;;  %v16932_v28 = vadd.f32 %v1686_v21, %v16535_v2  ;;  %v22076_v27 = vld [vmem:[#allocation33_spill] sm:$0xff] }
 0x40a   :  { %v13039_v8 = vpop.f32.mrb[47].mxu1  ;;  %v16949_v21 = vadd.f32 %v1784_v9, %v16535_v2  ;;  %v4231_v15 = vsel %vm4140_vm3, %v16939_v22, -inf }
 0x40b   :  { %13277 = vmatmul.mubr.msk.bf16.vlgmr.msra.gmra.mrb[124].mxu1 %vm1005_vm2, %v16226_v24  ;;  %4208 = vmax.xlane.f32.xlu0 %v4207_v17  ;;  %v4219_v8 = vsel %vm4140_vm3, %v16921_v11, -inf  ;;  %v4222_v17 = vsel %vm4140_vm3, %v16932_v28, -inf }
 0x40c   :  { %13283 = vmatmul.mubr.msk.bf16.vlgmr.msra.gmra.mrb[128].mxu0 %vm1005_vm2, %v22076_v27  ;;  %13287 = vmatpush3.bf16.xpose.msra.mxu1 %v3803_v45  ;;  %v22077_v45 = vld [vmem:[#allocation71_spill] sm:$0xff]  ;;  %v22080_v27 = vld [vmem:[#allocation41_spill] sm:$0xff] }
 0x40d   :  { %13293 = vmatpush3.bf16.xpose.msra.mxu0 %v3852_v29  ;;  %4211 = vmax.xlane.f32.xlu1 %v4210_v58  ;;  %v3901_v37 = vsel %vm1005_vm2, %v22077_v45, 0  ;;  %v22078_v29 = vld [vmem:[#allocation36_spill] sm:$0xff] }
 0x40e   :  { %13288 = vmatprep.mubr.msk.bf16.mxu1 %vm15166_vm1, %v22069_v16  ;;  %13294 = vmatprep.mubr.msk.bf16.mxu0 %vm15166_vm1, %v22069_v16 }
 0x40f   :  { %4220 = vmax.xlane.f32.xlu0 %v4219_v8  ;;  %13298 = vmatprep.subr.bf16.mxu1 %v22069_v16  ;;  %v22079_v8 = vld [vmem:[#allocation72_spill] sm:$0xff] }
 0x410   :  { %13304 = vmatprep.subr.bf16.mxu0 %v22069_v16  ;;  %v3950_v9 = vsel %vm1005_vm2, %v22079_v8, 0 }
 0x411   :  { %4223 = vmax.xlane.f32.xlu1 %v4222_v17  ;;  %v4234_v17 = vsel %vm4140_vm3, %v16949_v21, -inf }
 0x413   :  { %13289 = vmatmul.mubr.msk.bf16.vlgmr.msra.gmra.mrb[128].mxu1 %vm1005_vm2, %v22078_v29  ;;  %4232 = vmax.xlane.f32.xlu0 %v4231_v15  ;;  %v1830_v58 = vpop.f32.mrb[48].mxu0  ;;  %v4043_v15 = vpop.permute.xlu0 %4042 }
 0x414   :  { %13295 = vmatmul.mubr.msk.bf16.vlgmr.msra.gmra.mrb[132].mxu0 %vm1005_vm2, %v22080_v27  ;;  %v13044_v26 = vpop.f32.mrb[49].mxu0  ;;  %13299 = vmatpush3.bf16.xpose.msra.mxu1 %v3901_v37  ;;  %v3999_v37 = vsel %vm1005_vm2, %v16602_v3, 0  ;;  %v22082_v27 = vld [vmem:[#allocation49_spill] sm:$0xff]  ;;  %v16983_v12 = vadd.f32 %v1830_v58, %v16525_v47 }
 0x415   :  { %13305 = vmatpush3.bf16.xpose.msra.mxu0 %v3950_v9  ;;  %4235 = vmax.xlane.f32.xlu1 %v4234_v17  ;;  %v1833_v24 = vpop.f32.mrb[50].mxu0  ;;  %v22081_v9 = vld [vmem:[#allocation44_spill] sm:$0xff] }
 0x416   :  { %v13045_v45 = vpop.f32.mrb[51].mxu0  ;;  %13300 = vmatprep.mubr.msk.bf16.mxu1 %vm15166_vm1, %v22069_v16  ;;  %13306 = vmatprep.mubr.msk.bf16.mxu0 %vm15166_vm1, %v22069_v16  ;;  %v16999_v58 = vadd.f32 %v1833_v24, %v16535_v2 }
 0x417   :  { %13310 = vmatprep.subr.bf16.mxu1 %v22069_v16  ;;  %13316 = vmatprep.subr.bf16.mxu0 %v22069_v16  ;;  %v4048_v45 = vsel %vm1005_vm2, %v4043_v15, 0 }
 0x418   :  { %v4240_v24 = vsel %vm4140_vm3, %v16999_v58, -inf }
 0x41a   :  { %v1879_v26 = vpop.f32.mrb[48].mxu1 }
 0x41b   :  { %v16975_v8 = vadd.f32 %v1879_v26, %v16525_v47  ;;  %13301 = vmatmul.mubr.msk.bf16.vlgmr.msra.gmra.mrb[132].mxu1 %vm1005_vm2, %v22081_v9  ;;  %v13050_v17 = vpop.f32.mrb[49].mxu1  ;;  %v22085_v9 = vld [vmem:[#allocation7_spill] sm:$0xff] }
 0x41c   :  { %13307 = vmatmul.mubr.msk.bf16.vlgmr.msra.gmra.mrb[136].mxu0 %vm1005_vm2, %v22082_v27  ;;  %13311 = vmatpush3.bf16.xpose.msra.mxu1 %v3999_v37  ;;  %v1882_v29 = vpop.f32.mrb[50].mxu1  ;;  %v4237_v37 = vsel %vm4140_vm3, %v16983_v12, -inf  ;;  %v22083_v17 = vld [vmem:[#allocation52_spill] sm:$0xff] }
 0x41d   :  { %13317 = vmatpush3.bf16.xpose.msra.mxu0 %v4048_v45  ;;  %v16986_v3 = vadd.f32 %v1882_v29, %v16535_v2  ;;  %v13051_v26 = vpop.f32.mrb[51].mxu1  ;;  %v4243_v25 = vsel %vm4140_vm3, %v16975_v8, -inf  ;;  %13312 = vmatprep.mubr.msk.bf16.mxu1 %vm15166_vm1, %v22069_v16  ;;  %v4092_v29 = vpop.permute.xlu1 %4091 }
 0x41e   :  { %4244 = vmax.xlane.f32.xlu0 %v4243_v25  ;;  %13318 = vmatprep.mubr.msk.bf16.mxu0 %vm15166_vm1, %v22069_v16  ;;  %v4097_v25 = vsel %vm1005_vm2, %v4092_v29, 0  ;;  %v22084_v26 = vld [vmem:[#allocation57_spill] sm:$0xff] }
 0x41f   :  { %v4246_v15 = vsel %vm4140_vm3, %v16986_v3, -inf  ;;  %13322 = vmatprep.subr.bf16.mxu1 %v22069_v16  ;;  %13328 = vmatprep.subr.bf16.mxu0 %v22069_v16 }
 0x420   :  { %4247 = vmax.xlane.f32.xlu1 %v4246_v15 }
 0x422   :  { %4238 = vmax.xlane.f32.xlu0 %v4237_v37  ;;  %v22086_v37 = vld [vmem:[#allocation60_spill] sm:$0xff] }
 0x423   :  { %13313 = vmatmul.mubr.msk.bf16.vlgmr.msra.gmra.mrb[136].mxu1 %vm1005_vm2, %v22083_v17  ;;  %v1928_v45 = vpop.f32.mrb[52].mxu0 }
 0x424   :  { %13319 = vmatmul.mubr.msk.bf16.vlgmr.msra.gmra.mrb[140].mxu0 %vm1005_vm2, %v22084_v26  ;;  %v13056_v27 = vpop.f32.mrb[53].mxu0  ;;  %13323 = vmatpush3.bf16.xpose.msra.mxu1 %v4097_v25  ;;  %v22087_v25 = vld [vmem:[#allocation5_spill] sm:$0xff] }
 0x425   :  { %13329 = vmatpush3.bf16.msra.mxu0 %v22085_v9  ;;  %4241 = vmax.xlane.f32.xlu1 %v4240_v24  ;;  %v1931_v15 = vpop.f32.mrb[54].mxu0  ;;  %v17026_v24 = vadd.f32 %v1928_v45, %v16525_v47 }
 0x426   :  { %v13057_v39 = vpop.f32.mrb[55].mxu0  ;;  %13324 = vmatprep.mubr.msk.bf16.mxu1 %vm15166_vm1, %v22069_v16  ;;  %13334 = vmatprep.subr.bf16.mxu1 %v22069_v16 }
 0x427   :  { %13330 = vmatprep.mubr.msk.bf16.mxu0 %vm15166_vm1, %v22069_v16  ;;  %13340 = vmatprep.subr.bf16.mxu0 %v22069_v16  ;;  %v4249_v45 = vsel %vm4140_vm3, %v17026_v24, -inf }
 0x42a   :  { %v1977_v27 = vpop.f32.mrb[52].mxu1 }
 0x42b   :  { %v17018_v29 = vadd.f32 %v1977_v27, %v16525_v47  ;;  %13325 = vmatmul.mubr.msk.bf16.vlgmr.msra.gmra.mrb[140].mxu1 %vm1005_vm2, %v22086_v37  ;;  %v13062_v9 = vpop.f32.mrb[53].mxu1 }
 0x42c   :  { %13335 = vmatpush3.bf16.msra.mxu1 %v22087_v25  ;;  %v1980_v39 = vpop.f32.mrb[54].mxu1  ;;  %13336 = vmatprep.mubr.msk.bf16.mxu1 %vm15166_vm1, %v22069_v16  ;;  %v17035_v9 = vadd.f32 %v1931_v15, %v16535_v2 }
 0x42d   :  { %v17029_v26 = vadd.f32 %v1980_v39, %v16535_v2  ;;  %v13063_v17 = vpop.f32.mrb[55].mxu1  ;;  %v4255_v27 = vsel %vm4140_vm3, %v17018_v29, -inf  ;;  %13346 = vmatprep.subr.bf16.mxu1 %v22069_v16 }
 0x42e   :  { %4256 = vmax.xlane.f32.xlu0 %v4255_v27  ;;  %v4252_v17 = vsel %vm4140_vm3, %v17035_v9, -inf }
 0x42f   :  { %v4258_v25 = vsel %vm4140_vm3, %v17029_v26, -inf }
 0x430   :  { %4259 = vmax.xlane.f32.xlu1 %v4258_v25 }
 0x432   :  { %4250 = vmax.xlane.f32.xlu0 %v4249_v45 }
 0x433   :  { %v2026_v39 = vpop.f32.mrb[56].mxu0 }
 0x434   :  { %v13068_v37 = vpop.f32.mrb[57].mxu0  ;;  %4253 = vmax.xlane.f32.xlu1 %v4252_v17  ;;  %v17047_v25 = vadd.f32 %v2026_v39, %v16525_v47 }
 0x435   :  { %v2029_v30 = vpop.f32.mrb[58].mxu0 }
 0x436   :  { %v13069_v49 = vpop.f32.mrb[59].mxu0  ;;  %22089 = vst [vmem:[#allocation71_spill] sm:$0xff] %v17047_v25  ;;  %v17055_v37 = vadd.f32 %v2029_v30, %v16535_v2  ;;  %v4261_v39 = vsel %vm4140_vm3, %v17047_v25, -inf }
 0x438   :  { %22091 = vst [vmem:[#allocation7_spill] sm:$0xff] %v17055_v37 }
 0x43a   :  { %v2075_v27 = vpop.f32.mrb[56].mxu1 }
 0x43b   :  { %v17044_v15 = vadd.f32 %v2075_v27, %v16525_v47  ;;  %v13074_v7 = vpop.f32.mrb[57].mxu1 }
 0x43c   :  { %v2078_v46 = vpop.f32.mrb[58].mxu1 }
 0x43d   :  { %22088 = vst [vmem:[#allocation68_spill] sm:$0xff] %v17044_v15  ;;  %v17050_v56 = vadd.f32 %v2078_v46, %v16535_v2  ;;  %v13075_v45 = vpop.f32.mrb[59].mxu1  ;;  %v4267_v4 = vsel %vm4140_vm3, %v17044_v15, -inf }
 0x43e   :  { %4268 = vmax.xlane.f32.xlu0 %v4267_v4  ;;  %v4264_v45 = vsel %vm4140_vm3, %v17055_v37, -inf }
 0x43f   :  { %22090 = vst [vmem:[#allocation72_spill] sm:$0xff] %v17050_v56  ;;  %v2124_v49 = vpop.f32.mrb[60].mxu0  ;;  %v4270_v17 = vsel %vm4140_vm3, %v17050_v56, -inf }
 0x440   :  { %v13080_v7 = vpop.f32.mrb[61].mxu0  ;;  %4271 = vmax.xlane.f32.xlu1 %v4270_v17  ;;  %v17067_v43 = vadd.f32 %v2124_v49, %v16525_v47 }
 0x441   :  { %v2127_v27 = vpop.f32.mrb[62].mxu0 }
 0x442   :  { %v13081_v46 = vpop.f32.mrb[63].mxu0  ;;  %4262 = vmax.xlane.f32.xlu0 %v4261_v39  ;;  %22093 = vst [vmem:[#allocation73_spill] sm:$0xff] %v17067_v43  ;;  %v4273_v49 = vsel %vm4140_vm3, %v17067_v43, -inf }
 0x443   :  { %v17075_v46 = vadd.f32 %v2127_v27, %v16535_v2  ;;  %v4146_v27 = vpop.xlane.xlu1 %4145 }
 0x444   :  { %4265 = vmax.xlane.f32.xlu1 %v4264_v45  ;;  %v4526_v51 = vsub.f32 %v22100_v31, %v4146_v27 }
 0x445   :  { %22095 = vst [vmem:[#allocation75_spill] sm:$0xff] %v17075_v46 }
 0x446   :  { %v2173_v4 = vpop.f32.mrb[60].mxu1  ;;  %v4655_v16 = vmul.f32 1.442695, %v4526_v51 }
 0x447   :  { %v17064_v30 = vadd.f32 %v2173_v4, %v16525_v47  ;;  %v13086_v54 = vpop.f32.mrb[61].mxu1 }
 0x448   :  { %v2176_v57 = vpop.f32.mrb[62].mxu1 }
 0x449   :  { %22092 = vst [vmem:[#allocation5_spill] sm:$0xff] %v17064_v30  ;;  %v17070_v17 = vadd.f32 %v2176_v57, %v16535_v2  ;;  %v13087_v7 = vpop.f32.mrb[63].mxu1  ;;  %v4279_v39 = vsel %vm4140_vm3, %v17064_v30, -inf }
 0x44a   :  { %4280 = vmax.xlane.f32.xlu0 %v4279_v39  ;;  %v4276_v7 = vsel %vm4140_vm3, %v17075_v46, -inf  ;;  %v4143_v39 = vpop.xlane.xlu0 %4142 }
 0x44b   :  { %22094 = vst [vmem:[#allocation74_spill] sm:$0xff] %v17070_v17  ;;  %v2222_v45 = vpop.f32.mrb[64].mxu0  ;;  %v4282_v4 = vsel %vm4140_vm3, %v17070_v17, -inf }
 0x44c   :  { %v13092_v54 = vpop.f32.mrb[65].mxu0  ;;  %4283 = vmax.xlane.f32.xlu1 %v4282_v4  ;;  %v17088_v19 = vadd.f32 %v2222_v45, %v16525_v47 }
 0x44d   :  { %v2225_v5 = vpop.f32.mrb[66].mxu0  ;;  %v4525_v54 = vsub.f32 %v22097_v52, %v4143_v39 }
 0x44e   :  { %v13093_v57 = vpop.f32.mrb[67].mxu0  ;;  %4274 = vmax.xlane.f32.xlu0 %v4273_v49  ;;  %22098 = vst [vmem:[#allocation66_spill] sm:$0xff] %v17088_v19  ;;  %v4149_v53 = vpop.xlane.xlu0 %4148 }
 0x44f   :  { %v4653_v45 = vmul.f32 1.442695, %v4525_v54 }
 0x450   :  { %4277 = vmax.xlane.f32.xlu1 %v4276_v7 }
 0x451   :  { %14359 = vpow2.f32 %v4653_v45 }
 0x452   :  { %v2271_v44 = vpop.f32.mrb[64].mxu1  ;;  %14361 = vpow2.f32 %v4655_v16 }
 0x453   :  { %v17084_v1 = vadd.f32 %v2271_v44, %v16525_v47  ;;  %v13098_v0 = vpop.f32.mrb[65].mxu1  ;;  %v17097_v44 = vadd.f32 %v2225_v5, %v16535_v2  ;;  %v4152_v5 = vpop.xlane.xlu0 %4151 }
 0x454   :  { %v2274_v4 = vpop.f32.mrb[66].mxu1 }
 0x455   :  { %22096 = vst [vmem:[#allocation76_spill] sm:$0xff] %v17084_v1  ;;  %v17091_v57 = vadd.f32 %v2274_v4, %v16535_v2  ;;  %v13099_v49 = vpop.f32.mrb[67].mxu1  ;;  %v4291_v7 = vsel %vm4140_vm3, %v17084_v1, -inf  ;;  %22101 = vst [vmem:[#allocation67_spill] sm:$0xff] %v17097_v44  ;;  %v4288_v31 = vsel %vm4140_vm3, %v17097_v44, -inf }
 0x456   :  { %4292 = vmax.xlane.f32.xlu0 %v4291_v7  ;;  %v4285_v49 = vsel %vm4140_vm3, %v17088_v19, -inf }
 0x457   :  { %22099 = vst [vmem:[#allocation77_spill] sm:$0xff] %v17091_v57  ;;  %v2320_v0 = vpop.f32.mrb[68].mxu0  ;;  %v4294_v52 = vsel %vm4140_vm3, %v17091_v57, -inf  ;;  %v17109_v46 = vpop.xlane.xlu0 %4154 }
 0x458   :  { %v13104_v39 = vpop.f32.mrb[69].mxu0  ;;  %4295 = vmax.xlane.f32.xlu1 %v4294_v52  ;;  %v22103_v52 = vld [vmem:[#allocation69_spill] sm:$0xff] }
 0x459   :  { %v2323_v4 = vpop.f32.mrb[70].mxu0  ;;  %v4527_v39 = vsub.f32 %v22103_v52, %v4149_v53 }
 0x45a   :  { %v13105_v1 = vpop.f32.mrb[71].mxu0  ;;  %4286 = vmax.xlane.f32.xlu0 %v4285_v49  ;;  %v22106_v49 = vld [vmem:[#allocation70_spill] sm:$0xff] }
 0x45b   :  { %v17112_v1 = vadd.f32 %v2320_v0, %v16525_v47  ;;  %v4657_v52 = vmul.f32 1.442695, %v4527_v39  ;;  %v17129_v44 = vpop.eup %14359 }
 0x45c   :  { %4289 = vmax.xlane.f32.xlu1 %v4288_v31  ;;  %v4528_v31 = vsub.f32 %v22106_v49, %v4152_v5  ;;  %22108 = vst [vmem:[#allocation80_spill] sm:$0xff] %v17129_v44 }
 0x45d   :  { %22104 = vst [vmem:[#allocation69_spill] sm:$0xff] %v17112_v1  ;;  %14363 = vpow2.f32 %v4657_v52 }
 0x45e   :  { %v2369_v27 = vpop.f32.mrb[68].mxu1  ;;  %v4659_v5 = vmul.f32 1.442695, %v4528_v31 }
 0x45f   :  { %v17106_v7 = vadd.f32 %v2369_v27, %v16525_v47  ;;  %v13110_v54 = vpop.f32.mrb[69].mxu1  ;;  %v17121_v27 = vadd.f32 %v2323_v4, %v16535_v2  ;;  %v4158_v47 = vpop.xlane.xlu1 %4157 }
 0x460   :  { %v2372_v57 = vpop.f32.mrb[70].mxu1  ;;  %v17133_v4 = vpop.eup %14361  ;;  %14365 = vpow2.f32 %v4659_v5 }
 0x461   :  { %22102 = vst [vmem:[#allocation78_spill] sm:$0xff] %v17106_v7  ;;  %v17115_v51 = vadd.f32 %v2372_v57, %v16535_v2  ;;  %v13111_v45 = vpop.f32.mrb[71].mxu1  ;;  %v4303_v16 = vsel %vm4140_vm3, %v17106_v7, -inf  ;;  %22107 = vst [vmem:[#allocation70_spill] sm:$0xff] %v17121_v27  ;;  %v17125_v57 = vpop.xlane.xlu0 %4160  ;;  %v4297_v7 = vsel %vm4140_vm3, %v17112_v1, -inf  ;;  %v4300_v2 = vsel %vm4140_vm3, %v17121_v27, -inf }
 0x462   :  { %4304 = vmax.xlane.f32.xlu0 %v4303_v16  ;;  %22109 = vst [vmem:[#allocation81_spill] sm:$0xff] %v17133_v4 }
 0x463   :  { %22105 = vst [vmem:[#allocation79_spill] sm:$0xff] %v17115_v51  ;;  %v2418_v53 = vpop.f32.mrb[72].mxu0  ;;  %v4306_v54 = vsel %vm4140_vm3, %v17115_v51, -inf  ;;  %v17135_v39 = vpop.xlane.xlu1 %4163 }
 0x464   :  { %v13116_v0 = vpop.f32.mrb[73].mxu0  ;;  %4307 = vmax.xlane.f32.xlu1 %v4306_v54  ;;  %v4909_v54 = vsel %vm4140_vm3, %v17129_v44, 0.0 }
 0x465   :  { %v2421_v45 = vpop.f32.mrb[74].mxu0  ;;  %v17137_v49 = vpop.xlane.xlu0 %4166 }
 0x466   :  { %v13117_v16 = vpop.f32.mrb[75].mxu0  ;;  %4298 = vmax.xlane.f32.xlu0 %v4297_v7  ;;  %v17144_v7 = vld [vmem:[%s21710_s2] sm:$0xff] }
 0x467   :  { %v4912_v16 = vsel %vm4140_vm3, %v17133_v4, 0.0  ;;  %v17156_v5 = vadd.f32 %v17144_v7, %v2418_v53  ;;  %v4530_v4 = vsub.f32 %v16609_v32, %v4158_v47  ;;  %v17178_v44 = vpop.eup %14363 }
 0x468   :  { %4301 = vmax.xlane.f32.xlu1 %v4300_v2  ;;  %v17151_v2 = vpop.xlane.xlu1 %4169  ;;  %22114 = vst [vmem:[#allocation86_spill] sm:$0xff] %v17178_v44  ;;  %v4915_v32 = vsel %vm4140_vm3, %v17178_v44, 0.0 }
 0x469   :  { %v17153_v27 = vpop.xlane.xlu0 %4190  ;;  %22111 = vst [vmem:[#allocation83_spill] sm:$0xff] %v17156_v5 }
 0x46a   :  { %v2467_v0 = vpop.f32.mrb[72].mxu1  ;;  %4910 = vadd.xlane.f32.xlu0 %v4909_v54  ;;  %v17161_v54 = vld [vmem:[%s21710_s2 + $0x8] sm:$0xff] }
 0x46b   :  { %v17147_v31 = vadd.f32 %v17144_v7, %v2467_v0  ;;  %v13122_v52 = vpop.f32.mrb[73].mxu1 }
 0x46c   :  { %v2470_v51 = vpop.f32.mrb[74].mxu1  ;;  %4913 = vadd.xlane.f32.xlu1 %v4912_v16  ;;  %v17169_v16 = vadd.f32 %v17161_v54, %v2421_v45  ;;  %v17173_v19 = vpop.xlane.xlu1 %4193 }
 0x46d   :  { %22110 = vst [vmem:[#allocation82_spill] sm:$0xff] %v17147_v31  ;;  %v17164_v0 = vadd.f32 %v17161_v54, %v2470_v51  ;;  %v13123_v52 = vpop.f32.mrb[75].mxu1  ;;  %v4315_v1 = vsel %vm4140_vm3, %v17147_v31, -inf  ;;  %v4309_v51 = vsel %vm4140_vm3, %v17156_v5, -inf  ;;  %v17186_v31 = vpop.eup %14365 }
 0x46e   :  { %4316 = vmax.xlane.f32.xlu0 %v4315_v1  ;;  %22113 = vst [vmem:[#allocation85_spill] sm:$0xff] %v17169_v16  ;;  %v4529_v1 = vsub.f32 %v16606_v42, %v17109_v46  ;;  %v17182_v52 = vpop.xlane.xlu0 %4172  ;;  %v4312_v45 = vsel %vm4140_vm3, %v17169_v16, -inf  ;;  %22115 = vst [vmem:[#allocation87_spill] sm:$0xff] %v17186_v31  ;;  %v4918_v16 = vsel %vm4140_vm3, %v17186_v31, 0.0 }
 0x46f   :  { %22112 = vst [vmem:[#allocation84_spill] sm:$0xff] %v17164_v0  ;;  %v4318_v53 = vsel %vm4140_vm3, %v17164_v0, -inf }
 0x470   :  { %4319 = vmax.xlane.f32.xlu1 %v4318_v53  ;;  %v4663_v53 = vmul.f32 1.442695, %v4530_v4  ;;  %v17190_v47 = vpop.xlane.xlu1 %4175 }
 0x472   :  { %4310 = vmax.xlane.f32.xlu0 %v4309_v51  ;;  %v4661_v51 = vmul.f32 1.442695, %v4529_v1  ;;  %v17192_v5 = vpop.xlane.xlu0 %4202  ;;  %14367 = vpow2.f32 %v4663_v53  ;;  %v4532_v1 = vsub.f32 %v16628_v38, %v17135_v39  ;;  %v4531_v53 = vsub.f32 %v16625_v63, %v17125_v57 }
 0x474   :  { %4313 = vmax.xlane.f32.xlu1 %v4312_v45  ;;  %v17199_v45 = vpop.xlane.xlu1 %4205  ;;  %14369 = vpow2.f32 %v4661_v51 }
 0x476   :  { %v2516_v0 = vpop.f32.mrb[76].mxu0  ;;  %4916 = vadd.xlane.f32.xlu0 %v4915_v32 }
 0x477   :  { %v17195_v42 = vadd.f32 %v17144_v7, %v2516_v0  ;;  %v13128_v46 = vpop.f32.mrb[77].mxu0  ;;  %v17205_v0 = vpop.xlane.xlu0 %4178 }
 0x478   :  { %v2519_v43 = vpop.f32.mrb[78].mxu0  ;;  %4919 = vadd.xlane.f32.xlu1 %v4918_v16  ;;  %v17212_v17 = vpop.xlane.xlu1 %4181 }
 0x479   :  { %22116 = vst [vmem:[#allocation88_spill] sm:$0xff] %v17195_v42  ;;  %v13129_v4 = vpop.f32.mrb[79].mxu0  ;;  %v4321_v32 = vsel %vm4140_vm3, %v17195_v42, -inf  ;;  %v4667_v42 = vmul.f32 1.442695, %v4532_v1 }
 0x47b   :  { %14371 = vpow2.f32 %v4667_v42 }
 0x47c   :  { %4322 = vmax.xlane.f32.xlu1 %v4321_v32  ;;  %v17215_v32 = vadd.f32 %v17161_v54, %v2519_v43  ;;  %v17224_v57 = vpop.eup %14367  ;;  %v17226_v43 = vpop.xlane.xlu0 %4214 }
 0x47d   :  { %v2565_v46 = vpop.f32.mrb[76].mxu1  ;;  %22120 = vst [vmem:[#allocation92_spill] sm:$0xff] %v17224_v57 }
 0x47e   :  { %v17208_v44 = vadd.f32 %v17144_v7, %v2565_v46  ;;  %v2614_v31 = vpop.f32.mrb[80].mxu0  ;;  %v13134_v16 = vpop.f32.mrb[77].mxu1  ;;  %22118 = vst [vmem:[#allocation90_spill] sm:$0xff] %v17215_v32 }
 0x47f   :  { %v13140_v4 = vpop.f32.mrb[81].mxu0  ;;  %v2568_v51 = vpop.f32.mrb[78].mxu1  ;;  %v17235_v1 = vadd.f32 %v17144_v7, %v2614_v31  ;;  %v4534_v31 = vsub.f32 %v16652_v35, %v17151_v2  ;;  %v4542_v2 = vsub.f32 %v16707_v20, %v17173_v19 }
 0x480   :  { %22117 = vst [vmem:[#allocation89_spill] sm:$0xff] %v17208_v44  ;;  %v17218_v38 = vadd.f32 %v17161_v54, %v2568_v51  ;;  %v2617_v39 = vpop.f32.mrb[82].mxu0  ;;  %v4327_v46 = vsel %vm4140_vm3, %v17208_v44, -inf  ;;  %v13135_v30 = vpop.f32.mrb[79].mxu1  ;;  %v4665_v4 = vmul.f32 1.442695, %v4531_v53 }
 0x481   :  { %v13141_v16 = vpop.f32.mrb[83].mxu0  ;;  %4328 = vmax.xlane.f32.xlu0 %v4327_v46  ;;  %v4324_v51 = vsel %vm4140_vm3, %v17215_v32, -inf  ;;  %v17230_v37 = vpop.eup %14369  ;;  %22122 = vst [vmem:[#allocation94_spill] sm:$0xff] %v17235_v1  ;;  %v4924_v53 = vsel %vm4140_vm3, %v17224_v57, 0.0 }
 0x482   :  { %22119 = vst [vmem:[#allocation91_spill] sm:$0xff] %v17218_v38  ;;  %v4330_v63 = vsel %vm4140_vm3, %v17218_v38, -inf  ;;  %22121 = vst [vmem:[#allocation93_spill] sm:$0xff] %v17230_v37  ;;  %v17232_v44 = vpop.xlane.xlu1 %4217  ;;  %14373 = vpow2.f32 %v4665_v4  ;;  %v4333_v4 = vsel %vm4140_vm3, %v17235_v1, -inf }
 0x483   :  { %4331 = vmax.xlane.f32.xlu1 %v4330_v63 }
 0x485   :  { %v2663_v30 = vpop.f32.mrb[80].mxu1  ;;  %4325 = vmax.xlane.f32.xlu0 %v4324_v51  ;;  %v4921_v51 = vsel %vm4140_vm3, %v17230_v37, 0.0 }
 0x486   :  { %v2712_v46 = vpop.f32.mrb[84].mxu0  ;;  %v13146_v16 = vpop.f32.mrb[81].mxu1  ;;  %v17240_v32 = vadd.f32 %v17144_v7, %v2663_v30  ;;  %v4533_v30 = vsub.f32 %v16649_v6, %v17137_v49 }
 0x487   :  { %v13152_v63 = vpop.f32.mrb[85].mxu0  ;;  %v2666_v38 = vpop.f32.mrb[82].mxu1  ;;  %4925 = vadd.xlane.f32.xlu1 %v4924_v53 }
 0x488   :  { %22123 = vst [vmem:[#allocation95_spill] sm:$0xff] %v17240_v32  ;;  %v2715_v42 = vpop.f32.mrb[86].mxu0  ;;  %v13147_v25 = vpop.f32.mrb[83].mxu1  ;;  %v17247_v16 = vadd.f32 %v17161_v54, %v2666_v38  ;;  %v4339_v35 = vsel %vm4140_vm3, %v17240_v32, -inf  ;;  %v4541_v32 = vsub.f32 %v16697_v55, %v17153_v27 }
 0x489   :  { %v13153_v56 = vpop.f32.mrb[87].mxu0  ;;  %4922 = vadd.xlane.f32.xlu0 %v4921_v51  ;;  %v17254_v25 = vadd.f32 %v17161_v54, %v2617_v39  ;;  %v17256_v53 = vpop.xlane.xlu0 %4184 }
 0x48a   :  { %22124 = vst [vmem:[#allocation96_spill] sm:$0xff] %v17247_v16  ;;  %v4671_v56 = vmul.f32 1.442695, %v4534_v31  ;;  %v17262_v38 = vpop.xlane.xlu1 %4187  ;;  %v4342_v49 = vsel %vm4140_vm3, %v17247_v16, -inf  ;;  %v17268_v39 = vpop.eup %14371  ;;  %v4687_v16 = vmul.f32 1.442695, %v4542_v2 }
 0x48b   :  { %4334 = vmax.xlane.f32.xlu1 %v4333_v4  ;;  %22125 = vst [vmem:[#allocation97_spill] sm:$0xff] %v17254_v25  ;;  %22126 = vst [vmem:[#allocation98_spill] sm:$0xff] %v17268_v39  ;;  %v4669_v4 = vmul.f32 1.442695, %v4533_v30  ;;  %v17281_v30 = vadd.f32 %v17144_v7, %v2712_v46  ;;  %v4930_v55 = vsel %vm4140_vm3, %v17268_v39, 0.0 }
 0x48c   :  { %14375 = vpow2.f32 %v4671_v56  ;;  %v4685_v27 = vmul.f32 1.442695, %v4541_v32 }
 0x48d   :  { %v2761_v63 = vpop.f32.mrb[84].mxu1  ;;  %4340 = vmax.xlane.f32.xlu0 %v4339_v35  ;;  %v4336_v35 = vsel %vm4140_vm3, %v17254_v25, -inf  ;;  %22128 = vst [vmem:[#allocation100_spill] sm:$0xff] %v17281_v30  ;;  %14377 = vpow2.f32 %v4669_v4  ;;  %v4345_v32 = vsel %vm4140_vm3, %v17281_v30, -inf }
 0x48e   :  { %v17264_v51 = vpop.f32.mrb[88].mxu0  ;;  %v13158_v6 = vpop.f32.mrb[85].mxu1  ;;  %14379 = vpow2.f32 %v4687_v16  ;;  %v17302_v16 = vadd.f32 %v17161_v54, %v2715_v42  ;;  %v4535_v42 = vsub.f32 %v16704_v61, %v17182_v52 }
 0x48f   :  { %v13164_v31 = vpop.f32.mrb[89].mxu0  ;;  %v2764_v1 = vpop.f32.mrb[86].mxu1  ;;  %4343 = vmax.xlane.f32.xlu1 %v4342_v49  ;;  %v17286_v49 = vadd.f32 %v17144_v7, %v2761_v63  ;;  %14381 = vpow2.f32 %v4685_v27 }
 0x490   :  { %v17272_v19 = vpop.f32.mrb[90].mxu0  ;;  %v17274_v20 = vpop.xlane.xlu0 %4226  ;;  %22131 = vst [vmem:[#allocation103_spill] sm:$0xff] %v17302_v16 }
 0x491   :  { %v17278_v6 = vpop.eup %14373  ;;  %v13159_v37 = vpop.f32.mrb[87].mxu1  ;;  %4337 = vmax.xlane.f32.xlu0 %v4336_v35  ;;  %22129 = vst [vmem:[#allocation101_spill] sm:$0xff] %v17286_v49 }
 0x492   :  { %22127 = vst [vmem:[#allocation99_spill] sm:$0xff] %v17278_v6  ;;  %v13165_v57 = vpop.f32.mrb[91].mxu0  ;;  %v4927_v31 = vsel %vm4140_vm3, %v17278_v6, 0.0  ;;  %v17290_v56 = vpop.xlane.xlu1 %4229 }
 0x493   :  { %4931 = vadd.xlane.f32.xlu1 %v4930_v55  ;;  %v17293_v57 = vadd.f32 %v17161_v54, %v2764_v1  ;;  %v4351_v1 = vsel %vm4140_vm3, %v17286_v49, -inf }
 0x494   :  { %v17295_v46 = vpop.xlane.xlu0 %4196 }
 0x495   :  { %v2859_v37 = vpop.f32.mrb[88].mxu1  ;;  %4928 = vadd.xlane.f32.xlu0 %v4927_v31  ;;  %22130 = vst [vmem:[#allocation102_spill] sm:$0xff] %v17293_v57  ;;  %v4536_v31 = vsub.f32 %v16718_v14, %v17190_v47  ;;  %v4354_v27 = vsel %vm4140_vm3, %v17293_v57, -inf  ;;  %v4546_v14 = vsub.f32 %v16768_v48, %v17199_v45 }
 0x496   :  { %v17297_v2 = vpop.f32.mrb[92].mxu0  ;;  %v13170_v63 = vpop.f32.mrb[89].mxu1 }
 0x497   :  { %v13176_v4 = vpop.f32.mrb[93].mxu0  ;;  %4346 = vmax.xlane.f32.xlu1 %v4345_v32  ;;  %v2862_v35 = vpop.f32.mrb[90].mxu1  ;;  %v4348_v32 = vsel %vm4140_vm3, %v17302_v16, -inf  ;;  %v4675_v49 = vmul.f32 1.442695, %v4536_v31  ;;  %v4545_v31 = vsub.f32 %v16761_v23, %v17192_v5 }
 0x498   :  { %v17304_v55 = vpop.f32.mrb[94].mxu0  ;;  %v13171_v25 = vpop.f32.mrb[91].mxu1 }
 0x499   :  { %4352 = vmax.xlane.f32.xlu0 %v4351_v1  ;;  %v13177_v6 = vpop.f32.mrb[95].mxu0  ;;  %v17312_v63 = vpop.eup %14375  ;;  %14383 = vpow2.f32 %v4675_v49 }
 0x49a   :  { %22132 = vst [vmem:[#allocation104_spill] sm:$0xff] %v17312_v63  ;;  %v17318_v4 = vpop.eup %14377  ;;  %v17322_v47 = vpop.xlane.xlu1 %4199  ;;  %v4936_v61 = vsel %vm4140_vm3, %v17312_v63, 0.0  ;;  %v4695_v63 = vmul.f32 1.442695, %v4546_v14  ;;  %v17362_v14 = vadd.f32 %v17161_v54, %v2862_v35 }
 0x49b   :  { %4355 = vmax.xlane.f32.xlu1 %v4354_v27  ;;  %22133 = vst [vmem:[#allocation105_spill] sm:$0xff] %v17318_v4  ;;  %v17326_v6 = vpop.xlane.xlu0 %4208  ;;  %v17332_v52 = vpop.eup %14379  ;;  %v4673_v27 = vmul.f32 1.442695, %v4535_v42  ;;  %v17346_v42 = vadd.f32 %v17144_v7, %v17264_v51 }
 0x49c   :  { %22134 = vst [vmem:[#allocation106_spill] sm:$0xff] %v17332_v52  ;;  %v17342_v16 = vpop.eup %14381  ;;  %v4960_v5 = vsel %vm4140_vm3, %v17332_v52, 0.0  ;;  %22138 = vst [vmem:[#allocation110_spill] sm:$0xff] %v17362_v14 }
 0x49d   :  { %v17324_v25 = vpop.f32.mrb[92].mxu1  ;;  %4349 = vmax.xlane.f32.xlu0 %v4348_v32  ;;  %v4933_v32 = vsel %vm4140_vm3, %v17318_v4, 0.0  ;;  %22135 = vst [vmem:[#allocation107_spill] sm:$0xff] %v17342_v16  ;;  %22136 = vst [vmem:[#allocation108_spill] sm:$0xff] %v17346_v42  ;;  %14385 = vpow2.f32 %v4673_v27 }
 0x49e   :  { %v17328_v1 = vpop.f32.mrb[96].mxu0  ;;  %v13182_v57 = vpop.f32.mrb[93].mxu1  ;;  %14387 = vpow2.f32 %v4695_v63  ;;  %v17372_v63 = vadd.f32 %v17161_v54, %v17272_v19  ;;  %v4537_v19 = vsub.f32 %v16765_v18, %v17205_v0 }
 0x49f   :  { %v13188_v48 = vpop.f32.mrb[97].mxu0  ;;  %4937 = vadd.xlane.f32.xlu1 %v4936_v61  ;;  %v17336_v45 = vpop.f32.mrb[94].mxu1  ;;  %v4693_v57 = vmul.f32 1.442695, %v4545_v31  ;;  %v17351_v61 = vadd.f32 %v17144_v7, %v2859_v37  ;;  %v4357_v37 = vsel %vm4140_vm3, %v17346_v42, -inf }
 0x4a0   :  { %v17338_v30 = vpop.f32.mrb[98].mxu0  ;;  %v13183_v39 = vpop.f32.mrb[95].mxu1  ;;  %22139 = vst [vmem:[#allocation111_spill] sm:$0xff] %v17372_v63 }
 0x4a1   :  { %4934 = vadd.xlane.f32.xlu0 %v4933_v32  ;;  %v13189_v23 = vpop.f32.mrb[99].mxu0  ;;  %22137 = vst [vmem:[#allocation109_spill] sm:$0xff] %v17351_v61  ;;  %v17353_v48 = vpop.xlane.xlu1 %4211  ;;  %v4957_v39 = vsel %vm4140_vm3, %v17342_v16, 0.0  ;;  %14389 = vpow2.f32 %v4693_v57  ;;  %v4363_v35 = vsel %vm4140_vm3, %v17351_v61, -inf }
 0x4a2   :  { %v17357_v49 = vpop.xlane.xlu0 %4220 }
 0x4a3   :  { %4961 = vadd.xlane.f32.xlu1 %v4960_v5 }
 0x4a5   :  { %v17359_v51 = vpop.f32.mrb[96].mxu1  ;;  %4958 = vadd.xlane.f32.xlu0 %v4957_v39  ;;  %v17380_v57 = vpop.xlane.xlu1 %4223 }
 0x4a6   :  { %v17364_v27 = vpop.f32.mrb[100].mxu0  ;;  %v13194_v31 = vpop.f32.mrb[97].mxu1 }
 0x4a7   :  { %v13200_v32 = vpop.f32.mrb[101].mxu0  ;;  %v17368_v23 = vpop.f32.mrb[98].mxu1  ;;  %4358 = vmax.xlane.f32.xlu1 %v4357_v37  ;;  %v4538_v31 = vsub.f32 %v16779_v33, %v17212_v17  ;;  %v4366_v37 = vsel %vm4140_vm3, %v17362_v14, -inf  ;;  %v4550_v33 = vsub.f32 %v16830_v36, %v17232_v44 }
 0x4a8   :  { %v17374_v5 = vpop.f32.mrb[102].mxu0  ;;  %v13195_v39 = vpop.f32.mrb[99].mxu1 }
 0x4a9   :  { %v13201_v52 = vpop.f32.mrb[103].mxu0  ;;  %4364 = vmax.xlane.f32.xlu0 %v4363_v35  ;;  %v17384_v32 = vpop.eup %14383  ;;  %v4360_v39 = vsel %vm4140_vm3, %v17372_v63, -inf  ;;  %v4679_v42 = vmul.f32 1.442695, %v4538_v31  ;;  %v4549_v31 = vsub.f32 %v16819_v40, %v17226_v43  ;;  %v17418_v40 = vadd.f32 %v17144_v7, %v17297_v2 }
 0x4aa   :  { %22140 = vst [vmem:[#allocation112_spill] sm:$0xff] %v17384_v32  ;;  %v17390_v61 = vpop.eup %14385  ;;  %v17394_v17 = vpop.xlane.xlu0 %4232  ;;  %v4942_v18 = vsel %vm4140_vm3, %v17384_v32, 0.0  ;;  %v4703_v32 = vmul.f32 1.442695, %v4550_v33  ;;  %v17436_v33 = vadd.f32 %v17161_v54, %v17336_v45 }
 0x4ab   :  { %4367 = vmax.xlane.f32.xlu1 %v4366_v37  ;;  %22141 = vst [vmem:[#allocation113_spill] sm:$0xff] %v17390_v61  ;;  %v17402_v0 = vpop.eup %14387  ;;  %v4677_v37 = vmul.f32 1.442695, %v4537_v19  ;;  %v17408_v36 = vpop.xlane.xlu1 %4235  ;;  %14391 = vpow2.f32 %v4679_v42  ;;  %22144 = vst [vmem:[#allocation116_spill] sm:$0xff] %v17418_v40 }
 0x4ac   :  { %22142 = vst [vmem:[#allocation114_spill] sm:$0xff] %v17402_v0  ;;  %v4972_v43 = vsel %vm4140_vm3, %v17402_v0, 0.0  ;;  %22146 = vst [vmem:[#allocation118_spill] sm:$0xff] %v17436_v33 }
 0x4ad   :  { %v17396_v52 = vpop.f32.mrb[100].mxu1  ;;  %4361 = vmax.xlane.f32.xlu0 %v4360_v39  ;;  %v17414_v39 = vpop.eup %14389  ;;  %14393 = vpow2.f32 %v4677_v37 }
 0x4ae   :  { %v17398_v35 = vpop.f32.mrb[104].mxu0  ;;  %v13206_v14 = vpop.f32.mrb[101].mxu1  ;;  %22143 = vst [vmem:[#allocation115_spill] sm:$0xff] %v17414_v39  ;;  %14395 = vpow2.f32 %v4703_v32  ;;  %v17446_v32 = vadd.f32 %v17161_v54, %v17304_v55  ;;  %v4539_v55 = vsub.f32 %v16827_v13, %v17256_v53 }
 0x4af   :  { %v13212_v63 = vpop.f32.mrb[105].mxu0  ;;  %v17406_v16 = vpop.f32.mrb[102].mxu1  ;;  %4943 = vadd.xlane.f32.xlu1 %v4942_v18  ;;  %v4939_v14 = vsel %vm4140_vm3, %v17390_v61, 0.0  ;;  %v17426_v61 = vadd.f32 %v17144_v7, %v17324_v25  ;;  %v4369_v25 = vsel %vm4140_vm3, %v17418_v40, -inf }
 0x4b0   :  { %v17410_v44 = vpop.f32.mrb[106].mxu0  ;;  %v13207_v4 = vpop.f32.mrb[103].mxu1  ;;  %v4701_v63 = vmul.f32 1.442695, %v4549_v31  ;;  %22147 = vst [vmem:[#allocation119_spill] sm:$0xff] %v17446_v32 }
 0x4b1   :  { %v13213_v19 = vpop.f32.mrb[107].mxu0  ;;  %4940 = vadd.xlane.f32.xlu0 %v4939_v14  ;;  %v17422_v18 = vpop.xlane.xlu0 %4244  ;;  %22145 = vst [vmem:[#allocation117_spill] sm:$0xff] %v17426_v61  ;;  %v4969_v4 = vsel %vm4140_vm3, %v17414_v39, 0.0  ;;  %v4375_v45 = vsel %vm4140_vm3, %v17426_v61, -inf  ;;  %v4372_v61 = vsel %vm4140_vm3, %v17446_v32, -inf }
 0x4b2   :  { %v17430_v42 = vpop.xlane.xlu1 %4247  ;;  %14397 = vpow2.f32 %v4701_v63  ;;  %v4681_v32 = vmul.f32 1.442695, %v4539_v55  ;;  %v17492_v55 = vadd.f32 %v17144_v7, %v17328_v1 }
 0x4b3   :  { %4973 = vadd.xlane.f32.xlu1 %v4972_v43 }
 0x4b4   :  { %22152 = vst [vmem:[#allocation124_spill] sm:$0xff] %v17492_v55 }
 0x4b5   :  { %v17432_v2 = vpop.f32.mrb[104].mxu1  ;;  %4970 = vadd.xlane.f32.xlu0 %v4969_v4  ;;  %v17454_v0 = vpop.xlane.xlu0 %4238 }
 0x4b6   :  { %v17438_v37 = vpop.f32.mrb[108].mxu0  ;;  %v13218_v31 = vpop.f32.mrb[105].mxu1 }
 0x4b7   :  { %v13224_v14 = vpop.f32.mrb[109].mxu0  ;;  %v17442_v19 = vpop.f32.mrb[106].mxu1  ;;  %4370 = vmax.xlane.f32.xlu1 %v4369_v25  ;;  %v4540_v31 = vsub.f32 %v16840_v41, %v17262_v38  ;;  %v4378_v25 = vsel %vm4140_vm3, %v17436_v33, -inf  ;;  %v4554_v38 = vsub.f32 %v16884_v62, %v17290_v56 }
 0x4b8   :  { %v17448_v43 = vpop.f32.mrb[110].mxu0  ;;  %v13219_v4 = vpop.f32.mrb[107].mxu1 }
 0x4b9   :  { %v13225_v63 = vpop.f32.mrb[111].mxu0  ;;  %4376 = vmax.xlane.f32.xlu0 %v4375_v45  ;;  %v17458_v14 = vpop.eup %14391  ;;  %v4683_v41 = vmul.f32 1.442695, %v4540_v31  ;;  %v4553_v31 = vsub.f32 %v16877_v34, %v17274_v20 }
 0x4ba   :  { %22148 = vst [vmem:[#allocation120_spill] sm:$0xff] %v17458_v14  ;;  %v17462_v4 = vpop.xlane.xlu1 %4241  ;;  %v17466_v40 = vpop.eup %14393  ;;  %v4948_v53 = vsel %vm4140_vm3, %v17458_v14, 0.0 }
 0x4bb   :  { %4379 = vmax.xlane.f32.xlu1 %v4378_v25  ;;  %v17470_v45 = vpop.xlane.xlu0 %4256  ;;  %v17478_v25 = vpop.eup %14395  ;;  %v4945_v56 = vsel %vm4140_vm3, %v17466_v40, 0.0  ;;  %14399 = vpow2.f32 %v4683_v41  ;;  %v4709_v20 = vmul.f32 1.442695, %v4553_v31 }
 0x4bc   :  { %22150 = vst [vmem:[#allocation122_spill] sm:$0xff] %v17478_v25  ;;  %v4984_v34 = vsel %vm4140_vm3, %v17478_v25, 0.0  ;;  %14401 = vpow2.f32 %v4681_v32  ;;  %v17510_v32 = vadd.f32 %v17161_v54, %v17368_v23 }
 0x4bd   :  { %v17472_v63 = vpop.f32.mrb[108].mxu1  ;;  %4373 = vmax.xlane.f32.xlu0 %v4372_v61  ;;  %v17488_v61 = vpop.eup %14397 }
 0x4be   :  { %v17474_v33 = vpop.f32.mrb[112].mxu0  ;;  %v13230_v13 = vpop.f32.mrb[109].mxu1  ;;  %22151 = vst [vmem:[#allocation123_spill] sm:$0xff] %v17488_v61  ;;  %22154 = vst [vmem:[#allocation126_spill] sm:$0xff] %v17510_v32 }
 0x4bf   :  { %22149 = vst [vmem:[#allocation121_spill] sm:$0xff] %v17474_v33  ;;  %v13236_v39 = vpop.f32.mrb[113].mxu0  ;;  %v17482_v15 = vpop.f32.mrb[110].mxu1  ;;  %4949 = vadd.xlane.f32.xlu1 %v4948_v53  ;;  %v4711_v13 = vmul.f32 1.442695, %v4554_v38  ;;  %v17500_v53 = vadd.f32 %v17144_v7, %v17359_v51  ;;  %v4381_v51 = vsel %vm4140_vm3, %v17492_v55, -inf }
 0x4c0   :  { %v17484_v62 = vpop.f32.mrb[114].mxu0  ;;  %v13231_v14 = vpop.f32.mrb[111].mxu1 }
 0x4c1   :  { %v13237_v33 = vpop.f32.mrb[115].mxu0  ;;  %4946 = vadd.xlane.f32.xlu0 %v4945_v56  ;;  %v17496_v39 = vpop.xlane.xlu1 %4259  ;;  %22153 = vst [vmem:[#allocation125_spill] sm:$0xff] %v17500_v53  ;;  %14403 = vpow2.f32 %v4711_v13  ;;  %v17520_v13 = vadd.f32 %v17161_v54, %v17338_v30  ;;  %v4387_v23 = vsel %vm4140_vm3, %v17500_v53, -inf  ;;  %v4543_v30 = vsub.f32 %v16881_v59, %v17295_v46 }
 0x4c2   :  { %v4981_v33 = vsel %vm4140_vm3, %v17488_v61, 0.0  ;;  %v17504_v14 = vpop.xlane.xlu0 %4250  ;;  %14405 = vpow2.f32 %v4709_v20 }
 0x4c3   :  { %4985 = vadd.xlane.f32.xlu1 %v4984_v34  ;;  %22155 = vst [vmem:[#allocation127_spill] sm:$0xff] %v17520_v13  ;;  %v4384_v53 = vsel %vm4140_vm3, %v17520_v13, -inf }
 0x4c5   :  { %v17506_v1 = vpop.f32.mrb[112].mxu1  ;;  %4982 = vadd.xlane.f32.xlu0 %v4981_v33  ;;  %v17528_v25 = vpop.xlane.xlu1 %4253 }
 0x4c6   :  { %v17512_v41 = vpop.f32.mrb[116].mxu0  ;;  %v13242_v38 = vpop.f32.mrb[113].mxu1 }
 0x4c7   :  { %v13248_v31 = vpop.f32.mrb[117].mxu0  ;;  %v17516_v56 = vpop.f32.mrb[114].mxu1  ;;  %4382 = vmax.xlane.f32.xlu1 %v4381_v51  ;;  %v4544_v38 = vsub.f32 %v16898_v50, %v17322_v47  ;;  %v4390_v51 = vsel %vm4140_vm3, %v17510_v32, -inf }
 0x4c8   :  { %v17522_v34 = vpop.f32.mrb[118].mxu0  ;;  %v13243_v33 = vpop.f32.mrb[115].mxu1 }
 0x4c9   :  { %22156 = vst [vmem:[#allocation128_spill] sm:$0xff] %v17522_v34  ;;  %v13249_v20 = vpop.f32.mrb[119].mxu0  ;;  %4388 = vmax.xlane.f32.xlu0 %v4387_v23  ;;  %v17532_v31 = vpop.eup %14399  ;;  %v4691_v50 = vmul.f32 1.442695, %v4544_v38 }
 0x4ca   :  { %v17540_v55 = vpop.eup %14401  ;;  %v4954_v59 = vsel %vm4140_vm3, %v17532_v31, 0.0 }
 0x4cb   :  { %4391 = vmax.xlane.f32.xlu1 %v4390_v51  ;;  %v17536_v33 = vpop.xlane.xlu0 %4268  ;;  %v17550_v46 = vpop.eup %14403  ;;  %v4689_v51 = vmul.f32 1.442695, %v4543_v30  ;;  %v4951_v38 = vsel %vm4140_vm3, %v17540_v55, 0.0  ;;  %14407 = vpow2.f32 %v4691_v50  ;;  %v17568_v30 = vadd.f32 %v17144_v7, %v17396_v52 }
 0x4cc   :  { %22159 = vst [vmem:[#allocation131_spill] sm:$0xff] %v17550_v46 }
 0x4cd   :  { %v17542_v47 = vpop.f32.mrb[116].mxu1  ;;  %v17544_v23 = vpop.xlane.xlu1 %4271  ;;  %4385 = vmax.xlane.f32.xlu0 %v4384_v53  ;;  %14409 = vpow2.f32 %v4689_v51  ;;  %22162 = vst [vmem:[#allocation134_spill] sm:$0xff] %v17568_v30  ;;  %v17582_v51 = vadd.f32 %v17161_v54, %v17406_v16 }
 0x4ce   :  { %22157 = vst [vmem:[#allocation129_spill] sm:$0xff] %v17542_v47  ;;  %v17546_v20 = vpop.f32.mrb[120].mxu0  ;;  %v13254_v32 = vpop.f32.mrb[117].mxu1 }
 0x4cf   :  { %22158 = vst [vmem:[#allocation130_spill] sm:$0xff] %v17546_v20  ;;  %v13260_v61 = vpop.f32.mrb[121].mxu0  ;;  %v17552_v34 = vpop.f32.mrb[118].mxu1  ;;  %4955 = vadd.xlane.f32.xlu1 %v4954_v59  ;;  %v17562_v20 = vadd.f32 %v17144_v7, %v17364_v27  ;;  %22164 = vst [vmem:[#allocation136_spill] sm:$0xff] %v17582_v51 }
 0x4d0   :  { %v17554_v13 = vpop.f32.mrb[122].mxu0  ;;  %v17558_v47 = vpop.eup %14405  ;;  %v4996_v61 = vsel %vm4140_vm3, %v17550_v46, 0.0 }
 0x4d1   :  { %22160 = vst [vmem:[#allocation132_spill] sm:$0xff] %v17554_v13  ;;  %v13255_v53 = vpop.f32.mrb[119].mxu1  ;;  %v13261_v32 = vpop.f32.mrb[123].mxu0  ;;  %4952 = vadd.xlane.f32.xlu0 %v4951_v38  ;;  %22161 = vst [vmem:[#allocation133_spill] sm:$0xff] %v17562_v20  ;;  %v4993_v50 = vsel %vm4140_vm3, %v17558_v47, 0.0  ;;  %v4548_v38 = vsub.f32 %v16916_v10, %v17353_v48  ;;  %v4547_v13 = vsub.f32 %v16906_v60, %v17326_v6  ;;  %v4402_v60 = vsel %vm4140_vm3, %v17582_v51, -inf }
 0x4d2   :  { %v17570_v59 = vpop.xlane.xlu0 %4262  ;;  %v17576_v53 = vpop.xlane.xlu1 %4265  ;;  %v17594_v48 = vadd.f32 %v17161_v54, %v17374_v5  ;;  %v4552_v51 = vsub.f32 %v16932_v28, %v17380_v57  ;;  %v17648_v28 = vadd.f32 %v17161_v54, %v17410_v44 }
 0x4d3   :  { %4997 = vadd.xlane.f32.xlu1 %v4996_v61  ;;  %v4393_v61 = vsel %vm4140_vm3, %v17562_v20, -inf }
 0x4d4   :  { %22166 = vst [vmem:[#allocation138_spill] sm:$0xff] %v17594_v48  ;;  %22173 = vst [vmem:[#allocation145_spill] sm:$0xff] %v17648_v28 }
 0x4d5   :  { %v17578_v27 = vpop.f32.mrb[120].mxu1  ;;  %4994 = vadd.xlane.f32.xlu0 %v4993_v50  ;;  %v17604_v6 = vpop.eup %14407 }
 0x4d6   :  { %22163 = vst [vmem:[#allocation135_spill] sm:$0xff] %v17578_v27  ;;  %v17584_v32 = vpop.f32.mrb[124].mxu0  ;;  %v13266_v52 = vpop.f32.mrb[121].mxu1 }
 0x4d7   :  { %22165 = vst [vmem:[#allocation137_spill] sm:$0xff] %v17584_v32  ;;  %v13272_v46 = vpop.f32.mrb[125].mxu0  ;;  %v17590_v10 = vpop.f32.mrb[122].mxu1  ;;  %4394 = vmax.xlane.f32.xlu1 %v4393_v61  ;;  %v4399_v52 = vsel %vm4140_vm3, %v17568_v30, -inf  ;;  %v4699_v32 = vmul.f32 1.442695, %v4548_v38 }
 0x4d8   :  { %v17596_v50 = vpop.f32.mrb[126].mxu0  ;;  %v17598_v16 = vpop.xlane.xlu0 %4280  ;;  %v4697_v46 = vmul.f32 1.442695, %v4547_v13  ;;  %v4396_v61 = vsel %vm4140_vm3, %v17594_v48, -inf  ;;  %v4966_v13 = vsel %vm4140_vm3, %v17604_v6, 0.0 }
 0x4d9   :  { %22167 = vst [vmem:[#allocation139_spill] sm:$0xff] %v17596_v50  ;;  %v13267_v20 = vpop.f32.mrb[123].mxu1  ;;  %v13273_v27 = vpop.f32.mrb[127].mxu0  ;;  %4400 = vmax.xlane.f32.xlu0 %v4399_v52  ;;  %14411 = vpow2.f32 %v4699_v32  ;;  %v17626_v32 = vadd.f32 %v17144_v7, %v17432_v2 }
 0x4da   :  { %v17606_v5 = vpop.xlane.xlu1 %4283  ;;  %v17610_v50 = vpop.eup %14409  ;;  %v17614_v20 = vadd.f32 %v17144_v7, %v17398_v35  ;;  %14413 = vpow2.f32 %v4697_v46 }
 0x4db   :  { %4403 = vmax.xlane.f32.xlu1 %v4402_v60  ;;  %22170 = vst [vmem:[#allocation142_spill] sm:$0xff] %v17626_v32  ;;  %v4963_v35 = vsel %vm4140_vm3, %v17610_v50, 0.0  ;;  %v4411_v57 = vsel %vm4140_vm3, %v17626_v32, -inf }
 0x4dc   :  { %22168 = vst [vmem:[#allocation140_spill] sm:$0xff] %v17614_v20  ;;  %v17616_v38 = vpop.xlane.xlu0 %4274 }
 0x4dd   :  { %4397 = vmax.xlane.f32.xlu0 %v4396_v61 }
 0x4de   :  { %v17618_v27 = vpop.f32.mrb[124].mxu1 }
 0x4df   :  { %v17622_v52 = vpop.f32.mrb[128].mxu0  ;;  %v13278_v60 = vpop.f32.mrb[125].mxu1  ;;  %4967 = vadd.xlane.f32.xlu1 %v4966_v13  ;;  %v17638_v13 = vadd.f32 %v17161_v54, %v17442_v19  ;;  %v4556_v19 = vsub.f32 %v16949_v21, %v17408_v36 }
 0x4e0   :  { %22169 = vst [vmem:[#allocation141_spill] sm:$0xff] %v17622_v52  ;;  %v13284_v61 = vpop.f32.mrb[129].mxu0  ;;  %v17628_v30 = vpop.f32.mrb[126].mxu1  ;;  %v4551_v52 = vsub.f32 %v16921_v11, %v17357_v49 }
 0x4e1   :  { %v17634_v48 = vpop.f32.mrb[130].mxu0  ;;  %v13279_v46 = vpop.f32.mrb[127].mxu1  ;;  %4964 = vadd.xlane.f32.xlu0 %v4963_v35  ;;  %22172 = vst [vmem:[#allocation144_spill] sm:$0xff] %v17638_v13  ;;  %v4405_v61 = vsel %vm4140_vm3, %v17614_v20, -inf  ;;  %v4707_v35 = vmul.f32 1.442695, %v4552_v51 }
 0x4e2   :  { %22171 = vst [vmem:[#allocation143_spill] sm:$0xff] %v17634_v48  ;;  %v17640_v60 = vpop.xlane.xlu1 %4277  ;;  %v13285_v2 = vpop.f32.mrb[131].mxu0  ;;  %v4414_v11 = vsel %vm4140_vm3, %v17638_v13, -inf  ;;  %v4705_v44 = vmul.f32 1.442695, %v4551_v52 }
 0x4e3   :  { %4406 = vmax.xlane.f32.xlu1 %v4405_v61  ;;  %v17654_v46 = vpop.xlane.xlu0 %4292  ;;  %v17662_v49 = vpop.eup %14411  ;;  %v4555_v61 = vsub.f32 %v16939_v22, %v17394_v17  ;;  %14415 = vpow2.f32 %v4707_v35  ;;  %v4715_v13 = vmul.f32 1.442695, %v4556_v19  ;;  %v17678_v22 = vadd.f32 %v17144_v7, %v17438_v37 }
 0x4e4   :  { %14417 = vpow2.f32 %v4705_v44  ;;  %v17686_v35 = vadd.f32 %v17144_v7, %v17472_v63  ;;  %v4560_v37 = vsub.f32 %v16986_v3, %v17430_v42  ;;  %v17696_v44 = vadd.f32 %v17161_v54, %v17482_v15 }
 0x4e5   :  { %4412 = vmax.xlane.f32.xlu0 %v4411_v57  ;;  %v4408_v57 = vsel %vm4140_vm3, %v17648_v28, -inf  ;;  %22178 = vst [vmem:[#allocation150_spill] sm:$0xff] %v17678_v22  ;;  %14419 = vpow2.f32 %v4715_v13  ;;  %v4417_v63 = vsel %vm4140_vm3, %v17678_v22, -inf  ;;  %v4557_v13 = vsub.f32 %v16983_v12, %v17454_v0 }
 0x4e6   :  { %v17656_v2 = vpop.f32.mrb[128].mxu1  ;;  %v17658_v20 = vpop.xlane.xlu1 %4295  ;;  %22179 = vst [vmem:[#allocation151_spill] sm:$0xff] %v17686_v35  ;;  %22180 = vst [vmem:[#allocation152_spill] sm:$0xff] %v17696_v44  ;;  %v17710_v15 = vadd.f32 %v17161_v54, %v17448_v43  ;;  %v4563_v0 = vsub.f32 %v17018_v29, %v17470_v45 }
 0x4e7   :  { %22174 = vst [vmem:[#allocation146_spill] sm:$0xff] %v17656_v2  ;;  %v17666_v51 = vpop.f32.mrb[132].mxu0  ;;  %v13290_v32 = vpop.f32.mrb[129].mxu1  ;;  %4415 = vmax.xlane.f32.xlu1 %v4414_v11  ;;  %v4713_v11 = vmul.f32 1.442695, %v4555_v61 }
 0x4e8   :  { %22175 = vst [vmem:[#allocation147_spill] sm:$0xff] %v17666_v51  ;;  %v13296_v21 = vpop.f32.mrb[133].mxu0  ;;  %v17668_v36 = vpop.f32.mrb[130].mxu1  ;;  %v4978_v32 = vsel %vm4140_vm3, %v17662_v49, 0.0  ;;  %22183 = vst [vmem:[#allocation155_spill] sm:$0xff] %v17710_v15 }
 0x4e9   :  { %22176 = vst [vmem:[#allocation148_spill] sm:$0xff] %v17668_v36  ;;  %v17672_v2 = vpop.eup %14413  ;;  %v17674_v48 = vpop.f32.mrb[134].mxu0  ;;  %4409 = vmax.xlane.f32.xlu0 %v4408_v57  ;;  %v4559_v21 = vsub.f32 %v16975_v8, %v17422_v18  ;;  %14421 = vpow2.f32 %v4713_v11  ;;  %v4558_v11 = vsub.f32 %v16999_v58, %v17462_v4  ;;  %v4564_v58 = vsub.f32 %v17029_v26, %v17496_v39 }
 0x4ea   :  { %22177 = vst [vmem:[#allocation149_spill] sm:$0xff] %v17674_v48  ;;  %v13291_v17 = vpop.f32.mrb[131].mxu1  ;;  %v13297_v52 = vpop.f32.mrb[135].mxu0  ;;  %v4975_v19 = vsel %vm4140_vm3, %v17672_v2, 0.0  ;;  %v4420_v4 = vsel %vm4140_vm3, %v17710_v15, -inf  ;;  %v4561_v26 = vsub.f32 %v17026_v24, %v17504_v14  ;;  %v22190_v14 = vld [vmem:[#allocation121_spill] sm:$0xff] }
 0x4eb   :  { %4979 = vadd.xlane.f32.xlu1 %v4978_v32  ;;  %v17692_v57 = vpop.xlane.xlu0 %4286  ;;  %v17698_v8 = vpop.xlane.xlu1 %4289  ;;  %v4721_v61 = vmul.f32 1.442695, %v4559_v21  ;;  %v4423_v32 = vsel %vm4140_vm3, %v17686_v35, -inf  ;;  %v4719_v29 = vmul.f32 1.442695, %v4558_v11 }
 0x4ec   :  { %v4725_v15 = vmul.f32 1.442695, %v4561_v26 }
 0x4ed   :  { %4976 = vadd.xlane.f32.xlu0 %v4975_v19  ;;  %v4723_v19 = vmul.f32 1.442695, %v4560_v37  ;;  %14423 = vpow2.f32 %v4721_v61  ;;  %v4717_v37 = vmul.f32 1.442695, %v4557_v13 }
 0x4ee   :  { %v17700_v18 = vpop.f32.mrb[132].mxu1 }
 0x4ef   :  { %22181 = vst [vmem:[#allocation153_spill] sm:$0xff] %v17700_v18  ;;  %v17706_v3 = vpop.f32.mrb[136].mxu0  ;;  %v13302_v42 = vpop.f32.mrb[133].mxu1  ;;  %4418 = vmax.xlane.f32.xlu1 %v4417_v63  ;;  %v4426_v63 = vsel %vm4140_vm3, %v17696_v44, -inf  ;;  %14425 = vpow2.f32 %v4723_v19  ;;  %v4731_v19 = vmul.f32 1.442695, %v4564_v58  ;;  %v17762_v58 = vadd.f32 %v17144_v7, %v22190_v14 }
 0x4f0   :  { %22182 = vst [vmem:[#allocation154_spill] sm:$0xff] %v17706_v3  ;;  %v13308_v17 = vpop.f32.mrb[137].mxu0  ;;  %v17712_v52 = vpop.f32.mrb[134].mxu1  ;;  %14427 = vpow2.f32 %v4717_v37  ;;  %v4562_v37 = vsub.f32 %v17035_v9, %v17528_v25  ;;  %v22193_v14 = vld [vmem:[#allocation72_spill] sm:$0xff]  ;;  %v22203_v18 = vld [vmem:[#allocation75_spill] sm:$0xff] }
 0x4f1   :  { %22184 = vst [vmem:[#allocation156_spill] sm:$0xff] %v17712_v52  ;;  %v17718_v21 = vpop.f32.mrb[138].mxu0  ;;  %v17720_v12 = vpop.xlane.xlu0 %4304  ;;  %4424 = vmax.xlane.f32.xlu0 %v4423_v32  ;;  %14429 = vpow2.f32 %v4719_v29  ;;  %22191 = vst [vmem:[#allocation121_spill] sm:$0xff] %v17762_v58  ;;  %v22192_v29 = vld [vmem:[#allocation68_spill] sm:$0xff] }
 0x4f2   :  { %22185 = vst [vmem:[#allocation157_spill] sm:$0xff] %v17718_v21  ;;  %v13303_v54 = vpop.f32.mrb[135].mxu1  ;;  %v13309_v43 = vpop.f32.mrb[139].mxu0  ;;  %v4567_v22 = vsub.f32 %v22192_v29, %v17536_v33  ;;  %v4727_v7 = vmul.f32 1.442695, %v4562_v37  ;;  %v4429_v33 = vsel %vm4140_vm3, %v17762_v58, -inf }
 0x4f3   :  { %v17726_v42 = vpop.eup %14415  ;;  %v17728_v17 = vpop.xlane.xlu1 %4307  ;;  %4427 = vmax.xlane.f32.xlu1 %v4426_v63  ;;  %v4729_v54 = vmul.f32 1.442695, %v4563_v0  ;;  %v22202_v21 = vld [vmem:[#allocation81_spill] sm:$0xff] }
 0x4f4   :  { %v17734_v32 = vpop.eup %14417  ;;  %v4990_v61 = vsel %vm4140_vm3, %v17726_v42, 0.0 }
 0x4f5   :  { %v17736_v45 = vpop.xlane.xlu0 %4298  ;;  %4421 = vmax.xlane.f32.xlu0 %v4420_v4  ;;  %v17742_v13 = vpop.eup %14419  ;;  %v4987_v0 = vsel %vm4140_vm3, %v17734_v32, 0.0  ;;  %14431 = vpow2.f32 %v4729_v54 }
 0x4f6   :  { %v17738_v43 = vpop.f32.mrb[136].mxu1  ;;  %v17752_v35 = vpop.eup %14421 }
 0x4f7   :  { %22186 = vst [vmem:[#allocation158_spill] sm:$0xff] %v17738_v43  ;;  %v17746_v39 = vpop.xlane.xlu1 %4301  ;;  %v17748_v63 = vpop.f32.mrb[140].mxu0  ;;  %4991 = vadd.xlane.f32.xlu1 %v4990_v61  ;;  %v4999_v54 = vsel %vm4140_vm3, %v17752_v35, 0.0 }
 0x4f8   :  { %22187 = vst [vmem:[#allocation159_spill] sm:$0xff] %v17748_v63  ;;  %v13314_v11 = vpop.f32.mrb[137].mxu1  ;;  %v13320_v4 = vpop.f32.mrb[141].mxu0 }
 0x4f9   :  { %v17756_v44 = vpop.f32.mrb[138].mxu1  ;;  %v17758_v24 = vpop.f32.mrb[142].mxu0  ;;  %4988 = vadd.xlane.f32.xlu0 %v4987_v0  ;;  %v5002_v4 = vsel %vm4140_vm3, %v17742_v13, 0.0 }
 0x4fa   :  { %22188 = vst [vmem:[#allocation160_spill] sm:$0xff] %v17756_v44  ;;  %22189 = vst [vmem:[#allocation161_spill] sm:$0xff] %v17758_v24  ;;  %v4911_v61 = vpop.xlane.xlu0 %4910  ;;  %v13315_v11 = vpop.f32.mrb[139].mxu1 }
 0x4fb   :  { %14433 = vrcp.f32 %v4911_v61  ;;  %v13321_v9 = vpop.f32.mrb[143].mxu0  ;;  %v4914_v25 = vpop.xlane.xlu1 %4913  ;;  %5003 = vadd.xlane.f32.xlu1 %v5002_v4  ;;  %v4568_v11 = vsub.f32 %v22193_v14, %v17544_v23  ;;  %v22195_v4 = vld [vmem:[#allocation71_spill] sm:$0xff] }
 0x4fc   :  { %14435 = vpow2.f32 %v4731_v19  ;;  %v17770_v0 = vpop.eup %14423  ;;  %v4737_v19 = vmul.f32 1.442695, %v4567_v22  ;;  %v4565_v29 = vsub.f32 %v22195_v4, %v17570_v59  ;;  %v22196_v23 = vld [vmem:[#allocation7_spill] sm:$0xff]  ;;  %v22198_v4 = vld [vmem:[#allocation5_spill] sm:$0xff] }
 0x4fd   :  { %14437 = vrcp.f32 %v4914_v25  ;;  %5000 = vadd.xlane.f32.xlu0 %v4999_v54  ;;  %v17780_v61 = vpop.eup %14425  ;;  %v4566_v25 = vsub.f32 %v22196_v23, %v17576_v53  ;;  %v5011_v14 = vsel %vm4140_vm3, %v17770_v0, 0.0 }
 0x4fe   :  { %v17774_v26 = vpop.xlane.xlu0 %4316  ;;  %v17776_v28 = vpop.f32.mrb[140].mxu1  ;;  %14439 = vpow2.f32 %v4725_v15  ;;  %v4739_v15 = vmul.f32 1.442695, %v4568_v11  ;;  %v5014_v59 = vsel %vm4140_vm3, %v17780_v61, 0.0  ;;  %v4733_v53 = vmul.f32 1.442695, %v4565_v29 }
 0x4ff   :  { %22194 = vst [vmem:[#allocation68_spill] sm:$0xff] %v17776_v28  ;;  %v17784_v37 = vpop.xlane.xlu1 %4319  ;;  %v13326_v9 = vpop.f32.mrb[141].mxu1  ;;  %4430 = vmax.xlane.f32.xlu1 %v4429_v33  ;;  %14441 = vpow2.f32 %v4727_v7  ;;  %v4735_v7 = vmul.f32 1.442695, %v4566_v25  ;;  %v22200_v25 = vld [vmem:[#allocation73_spill] sm:$0xff] }
 0x500   :  { %v17788_v54 = vpop.f32.mrb[142].mxu1  ;;  %v17792_v58 = vpop.eup %14427  ;;  %14443 = vpow2.f32 %v4737_v19  ;;  %v4571_v9 = vsub.f32 %v22198_v4, %v17598_v16  ;;  %v4569_v63 = vsub.f32 %v22200_v25, %v17616_v38 }
 0x501   :  { %22197 = vst [vmem:[#allocation72_spill] sm:$0xff] %v17788_v54  ;;  %v13327_v22 = vpop.f32.mrb[143].mxu1  ;;  %5012 = vadd.xlane.f32.xlu0 %v5011_v14  ;;  %v17798_v33 = vpop.eup %14429  ;;  %v5005_v11 = vsel %vm4140_vm3, %v17792_v58, 0.0  ;;  %14445 = vpow2.f32 %v4739_v15  ;;  %v22201_v15 = vld [vmem:[#allocation80_spill] sm:$0xff] }
 0x502   :  { %v17794_v28 = vpop.xlane.xlu0 %4310  ;;  %v17804_v54 = vpop.eup %14431  ;;  %v22199_v22 = vld [vmem:[#allocation74_spill] sm:$0xff]  ;;  %v5008_v16 = vsel %vm4140_vm3, %v17798_v33, 0.0  ;;  %14447 = vpow2.f32 %v4733_v53  ;;  %v4570_v53 = vsub.f32 %v22203_v18, %v17640_v60 }
 0x503   :  { %v17802_v23 = vpop.xlane.xlu1 %4313  ;;  %5015 = vadd.xlane.f32.xlu1 %v5014_v59  ;;  %v4572_v24 = vsub.f32 %v22199_v22, %v17606_v5  ;;  %v4745_v59 = vmul.f32 1.442695, %v4571_v9  ;;  %14449 = vpow2.f32 %v4735_v7 }
 0x505   :  { %v14434_v14 = vpop.eup %14433  ;;  %5006 = vadd.xlane.f32.xlu0 %v5005_v11  ;;  %v5023_v11 = vsel %vm4140_vm3, %v17804_v54, 0.0  ;;  %v4747_v3 = vmul.f32 1.442695, %v4572_v24 }
 0x506   :  { %v17810_v19 = vpop.eup %14435  ;;  %v4917_v29 = vpop.xlane.xlu0 %4916  ;;  %v5421_v44 = vmul.f32 %v14434_v14, %v22201_v15  ;;  %v22204_v14 = vld [vmem:[#allocation76_spill] sm:$0xff]  ;;  %v22208_v15 = vld [vmem:[#allocation66_spill] sm:$0xff] }
 0x507   :  { %v14438_v4 = vpop.eup %14437  ;;  %v4920_v43 = vpop.xlane.xlu1 %4919  ;;  %5009 = vadd.xlane.f32.xlu1 %v5008_v16  ;;  %14451 = vrcp.f32 %v4917_v29  ;;  %v5026_v9 = vsel %vm4140_vm3, %v17810_v19, 0.0  ;;  %v4575_v16 = vsub.f32 %v22204_v14, %v17654_v46  ;;  %v22206_v29 = vld [vmem:[#allocation12_spill] sm:$0xff] }
 0x508   :  { %v5422_v5 = vmul.f32 %v14438_v4, %v22202_v21  ;;  %v17820_v22 = vpop.eup %14439  ;;  %14453 = vrcp.f32 %v4920_v43  ;;  %v4741_v21 = vmul.f32 1.442695, %v4569_v63  ;;  %v22205_v43 = vld [vmem:[#allocation77_spill] sm:$0xff] }
 0x509   :  { %5024 = vadd.xlane.f32.xlu0 %v5023_v11  ;;  %v17826_v7 = vpop.eup %14441  ;;  %14455 = vpow2.f32 %v4745_v59  ;;  %v5017_v60 = vsel %vm4140_vm3, %v17820_v22, 0.0  ;;  %v4576_v24 = vsub.f32 %v22205_v43, %v17658_v20  ;;  %v22207_v59 = vmov 0.0  }
 0x50a   :  { %v5549_v38 = vpack.c.bf16 %v5422_v5, %v5421_v44  ;;  %v17835_v18 = vpop.eup %14443  ;;  %14457 = vpow2.f32 %v4747_v3  ;;  %v4743_v44 = vmul.f32 1.442695, %v4570_v53  ;;  %v5020_v46 = vsel %vm4140_vm3, %v17826_v7, 0.0 }
 0x50b   :  { %5027 = vadd.xlane.f32.xlu1 %v5026_v9  ;;  %v17830_v4 = vpop.xlane.xlu1 %4322  ;;  %v17847_v25 = vpop.eup %14445  ;;  %14459 = vpow2.f32 %v4741_v21  ;;  %v4753_v3 = vmul.f32 1.442695, %v4575_v16  ;;  %v4573_v20 = vsub.f32 %v22208_v15, %v17692_v57  ;;  %v5035_v11 = vsel %vm4140_vm3, %v17835_v18, 0.0  ;;  %v22209_v9 = vld [vmem:[#allocation67_spill] sm:$0xff]  ;;  %v22211_v15 = vld [vmem:[#allocation86_spill] sm:$0xff] }
 0x50c   :  { %13331 = vmatmul.mubr.msk.bf16.vlgmr.msra.gmra.mrb[144].mxu0 %vm4140_vm3, %v5549_v38  ;;  %v17855_v53 = vpop.eup %14447  ;;  %14461 = vpow2.f32 %v4743_v44  ;;  %v4755_v38 = vmul.f32 1.442695, %v4576_v24  ;;  %v4574_v14 = vsub.f32 %v22209_v9, %v17698_v8  ;;  %v5038_v57 = vsel %vm4140_vm3, %v17847_v25, 0.0  ;;  %v22212_v9 = vld [vmem:[#allocation87_spill] sm:$0xff] }
 0x50d   :  { %13341 = vmatpush3.bf16.msra.mxu0 %v22206_v29  ;;  %5018 = vadd.xlane.f32.xlu0 %v5017_v60  ;;  %v17859_v60 = vpop.eup %14449  ;;  %14463 = vpow2.f32 %v4753_v3  ;;  %v4749_v43 = vmul.f32 1.442695, %v4573_v20  ;;  %v5029_v44 = vsel %vm4140_vm3, %v17855_v53, 0.0 }
 0x50e   :  { %v17840_v63 = vpop.xlane.xlu0 %4328  ;;  %13342 = vmatprep.mubr.msk.bf16.mxu0 %vm15166_vm1, %v22207_v59  ;;  %13352 = vmatprep.subr.bf16.mxu0 %v22207_v59  ;;  %14465 = vpow2.f32 %v4755_v38  ;;  %v4751_v8 = vmul.f32 1.442695, %v4574_v14  ;;  %v5032_v3 = vsel %vm4140_vm3, %v17859_v60, 0.0 }
 0x50f   :  { %5021 = vadd.xlane.f32.xlu1 %v5020_v46 }
 0x510   :  { %v17851_v5 = vpop.xlane.xlu1 %4331 }
 0x511   :  { %5036 = vadd.xlane.f32.xlu0 %v5035_v11  ;;  %v14452_v16 = vpop.eup %14451 }
 0x512   :  { %v17861_v21 = vpop.xlane.xlu0 %4325  ;;  %v14454_v29 = vpop.eup %14453  ;;  %v5423_v11 = vmul.f32 %v14452_v16, %v22211_v15  ;;  %v22220_v15 = vld [vmem:[#allocation79_spill] sm:$0xff] }
 0x513   :  { %5039 = vadd.xlane.f32.xlu1 %v5038_v57  ;;  %v17867_v24 = vpop.eup %14455  ;;  %v5424_v52 = vmul.f32 %v14454_v29, %v22212_v9  ;;  %v22214_v57 = vld [vmem:[#allocation69_spill] sm:$0xff]  ;;  %v22216_v29 = vld [vmem:[#allocation70_spill] sm:$0xff] }
 0x514   :  { %v4926_v46 = vpop.xlane.xlu1 %4925  ;;  %22210 = vst [vmem:[#allocation71_spill] sm:$0xff] %v17867_v24  ;;  %v17873_v20 = vpop.eup %14457  ;;  %v4577_v51 = vsub.f32 %v22214_v57, %v17736_v45  ;;  %v5047_v14 = vsel %vm4140_vm3, %v17867_v24, 0.0 }
 0x515   :  { %5030 = vadd.xlane.f32.xlu0 %v5029_v44  ;;  %14467 = vrcp.f32 %v4926_v46  ;;  %22213 = vst [vmem:[#allocation7_spill] sm:$0xff] %v17873_v20  ;;  %v5550_v36 = vpack.c.bf16 %v5424_v52, %v5423_v11  ;;  %v17881_v16 = vpop.eup %14459  ;;  %v4578_v46 = vsub.f32 %v22216_v29, %v17746_v39  ;;  %v4580_v11 = vsub.f32 %v22220_v15, %v17728_v17 }
 0x516   :  { %v4923_v48 = vpop.xlane.xlu0 %4922  ;;  %14469 = vpow2.f32 %v4749_v43  ;;  %22215 = vst [vmem:[#allocation5_spill] sm:$0xff] %v17881_v16  ;;  %v22217_v43 = vld [vmem:[#allocation13_spill] sm:$0xff]  ;;  %v17893_v52 = vpop.eup %14461  ;;  %v4757_v44 = vmul.f32 1.442695, %v4577_v51 }
 0x517   :  { %5033 = vadd.xlane.f32.xlu1 %v5032_v3  ;;  %14471 = vrcp.f32 %v4923_v48  ;;  %13337 = vmatmul.mubr.msk.bf16.vlgmr.msra.gmra.mrb[144].mxu1 %vm4140_vm3, %v5550_v36  ;;  %v5050_v48 = vsel %vm4140_vm3, %v17873_v20, 0.0  ;;  %22218 = vst [vmem:[#allocation74_spill] sm:$0xff] %v17893_v52  ;;  %v5041_v36 = vsel %vm4140_vm3, %v17881_v16, 0.0  ;;  %v4759_v9 = vmul.f32 1.442695, %v4578_v46 }
 0x518   :  { %v17877_v38 = vpop.xlane.xlu1 %4334  ;;  %14473 = vpow2.f32 %v4751_v8  ;;  %13347 = vmatpush3.bf16.msra.mxu1 %v22217_v43  ;;  %13348 = vmatprep.mubr.msk.bf16.mxu1 %vm15166_vm1, %v22207_v59  ;;  %v17900_v8 = vpop.eup %14463  ;;  %v5044_v51 = vsel %vm4140_vm3, %v17893_v52, 0.0  ;;  %v4763_v46 = vmul.f32 1.442695, %v4580_v11  ;;  %v17925_v11 = vld [vmem:[%s21710_s2 + $0x8] sm:$0xff] }
 0x519   :  { %5048 = vadd.xlane.f32.xlu0 %v5047_v14  ;;  %13358 = vmatprep.subr.bf16.mxu1 %v22207_v59  ;;  %22219 = vst [vmem:[#allocation73_spill] sm:$0xff] %v17900_v8  ;;  %v17908_v57 = vpop.eup %14465  ;;  %v22222_v14 = vld [vmem:[#allocation78_spill] sm:$0xff]  ;;  %14475 = vpow2.f32 %v4757_v44  ;;  %v5059_v16 = vsel %vm4140_vm3, %v17900_v8, 0.0  ;;  %v22225_v44 = vld [vmem:[#allocation92_spill] sm:$0xff] }
 0x51a   :  { %v17887_v45 = vpop.xlane.xlu0 %4340  ;;  %22221 = vst [vmem:[#allocation80_spill] sm:$0xff] %v17908_v57  ;;  %v4579_v29 = vsub.f32 %v22222_v14, %v17720_v12  ;;  %14477 = vpow2.f32 %v4759_v9  ;;  %v5062_v24 = vsel %vm4140_vm3, %v17908_v57, 0.0  ;;  %v22226_v14 = vld [vmem:[#allocation93_spill] sm:$0xff] }
 0x51b   :  { %5051 = vadd.xlane.f32.xlu1 %v5050_v48 }
 0x51c   :  { %v17896_v39 = vpop.xlane.xlu1 %4343  ;;  %v4761_v12 = vmul.f32 1.442695, %v4579_v29 }
 0x51d   :  { %5042 = vadd.xlane.f32.xlu0 %v5041_v36 }
 0x51e   :  { %v17904_v3 = vpop.xlane.xlu0 %4337 }
 0x51f   :  { %5045 = vadd.xlane.f32.xlu1 %v5044_v51  ;;  %v14468_v43 = vpop.eup %14467 }
 0x520   :  { %v4932_v48 = vpop.xlane.xlu1 %4931  ;;  %v17914_v17 = vpop.eup %14469  ;;  %v5426_v51 = vmul.f32 %v14468_v43, %v22225_v44 }
 0x521   :  { %22223 = vst [vmem:[#allocation81_spill] sm:$0xff] %v17914_v17  ;;  %5060 = vadd.xlane.f32.xlu0 %v5059_v16  ;;  %v14472_v36 = vpop.eup %14471  ;;  %14479 = vrcp.f32 %v4932_v48  ;;  %v17929_v16 = vadd.f32 %v17925_v11, %v17484_v62  ;;  %v5053_v29 = vsel %vm4140_vm3, %v17914_v17, 0.0  ;;  %v22231_v62 = vld [vmem:[#allocation19_spill] sm:$0xff] }
 0x522   :  { %v4929_v15 = vpop.xlane.xlu0 %4928  ;;  %v17918_v52 = vpop.eup %14473  ;;  %v5425_v20 = vmul.f32 %v14472_v36, %v22226_v14  ;;  %v17963_v14 = vld [vmem:[%s21710_s2] sm:$0xff] }
 0x523   :  { %22224 = vst [vmem:[#allocation75_spill] sm:$0xff] %v17918_v52  ;;  %5063 = vadd.xlane.f32.xlu1 %v5062_v24  ;;  %22227 = vst [vmem:[#allocation76_spill] sm:$0xff] %v17929_v16  ;;  %14481 = vrcp.f32 %v4929_v15  ;;  %v17937_v24 = vadd.f32 %v17925_v11, %v17516_v56  ;;  %v5056_v36 = vsel %vm4140_vm3, %v17918_v52, 0.0  ;;  %v17951_v56 = vpop.eup %14475  ;;  %v22238_v52 = vld [vmem:[#allocation99_spill] sm:$0xff] }
 0x524   :  { %v17931_v9 = vpop.xlane.xlu1 %4346  ;;  %14483 = vpow2.f32 %v4763_v46  ;;  %v5551_v43 = vpack.c.bf16 %v5426_v51, %v5425_v20  ;;  %v4432_v20 = vsel %vm4140_vm3, %v17929_v16, -inf  ;;  %22233 = vst [vmem:[#allocation86_spill] sm:$0xff] %v17951_v56  ;;  %v17958_v44 = vpop.eup %14477  ;;  %v22237_v16 = vld [vmem:[#allocation98_spill] sm:$0xff] }
 0x525   :  { %22228 = vst [vmem:[#allocation77_spill] sm:$0xff] %v17931_v9  ;;  %5054 = vadd.xlane.f32.xlu0 %v5053_v29  ;;  %22229 = vst [vmem:[#allocation12_spill] sm:$0xff] %v17937_v24  ;;  %14485 = vpow2.f32 %v4761_v12  ;;  %v4438_v12 = vsel %vm4140_vm3, %v17937_v24, -inf  ;;  %v17967_v29 = vadd.f32 %v17963_v14, %v17506_v1  ;;  %v22261_v9 = vld [vmem:[#allocation120_spill] sm:$0xff] }
 0x526   :  { %v17939_v48 = vpop.xlane.xlu0 %4352  ;;  %13343 = vmatmul.mubr.msk.bf16.vlgmr.msra.gmra.mrb[148].mxu0 %vm4140_vm3, %v5551_v43  ;;  %22234 = vst [vmem:[#allocation87_spill] sm:$0xff] %v17958_v44 }
 0x527   :  { %22230 = vst [vmem:[#allocation66_spill] sm:$0xff] %v17939_v48  ;;  %5057 = vadd.xlane.f32.xlu1 %v5056_v36  ;;  %13353 = vmatpush3.bf16.msra.mxu0 %v22231_v62  ;;  %22235 = vst [vmem:[#allocation69_spill] sm:$0xff] %v17967_v29  ;;  %v5065_v36 = vsel %vm4140_vm3, %v17951_v56, 0.0  ;;  %v4435_v57 = vsel %vm4140_vm3, %v17967_v29, -inf }
 0x528   :  { %v17945_v15 = vpop.xlane.xlu1 %4355  ;;  %13354 = vmatprep.mubr.msk.bf16.mxu0 %vm15166_vm1, %v22207_v59  ;;  %13364 = vmatprep.subr.bf16.mxu0 %v22207_v59 }
 0x529   :  { %22232 = vst [vmem:[#allocation67_spill] sm:$0xff] %v17945_v15  ;;  %4433 = vmax.xlane.f32.xlu0 %v4432_v20 }
 0x52a   :  { %v17954_v46 = vpop.xlane.xlu0 %4349 }
 0x52b   :  { %4439 = vmax.xlane.f32.xlu1 %v4438_v12  ;;  %v14480_v51 = vpop.eup %14479  ;;  %v5068_v12 = vsel %vm4140_vm3, %v17958_v44, 0.0 }
 0x52c   :  { %v4938_v43 = vpop.xlane.xlu1 %4937  ;;  %v5428_v17 = vmul.f32 %v14480_v51, %v22237_v16  ;;  %v22240_v16 = vld [vmem:[#allocation20_spill] sm:$0xff] }
 0x52d   :  { %5066 = vadd.xlane.f32.xlu0 %v5065_v36  ;;  %v14482_v62 = vpop.eup %14481  ;;  %14487 = vrcp.f32 %v4938_v43 }
 0x52e   :  { %v4935_v20 = vpop.xlane.xlu0 %4934  ;;  %v17973_v24 = vpop.eup %14483  ;;  %v5427_v8 = vmul.f32 %v14482_v62, %v22238_v52 }
 0x52f   :  { %22236 = vst [vmem:[#allocation70_spill] sm:$0xff] %v17973_v24  ;;  %5069 = vadd.xlane.f32.xlu1 %v5068_v12  ;;  %14489 = vrcp.f32 %v4935_v20  ;;  %v17979_v56 = vpop.eup %14485  ;;  %v5074_v44 = vsel %vm4140_vm3, %v17973_v24, 0.0  ;;  %v22245_v20 = vld [vmem:[#allocation104_spill] sm:$0xff] }
 0x530   :  { %v4962_v1 = vpop.xlane.xlu1 %4961  ;;  %22239 = vst [vmem:[#allocation13_spill] sm:$0xff] %v17979_v56  ;;  %v5552_v43 = vpack.c.bf16 %v5428_v17, %v5427_v8  ;;  %v5071_v51 = vsel %vm4140_vm3, %v17979_v56, 0.0 }
 0x531   :  { %4436 = vmax.xlane.f32.xlu0 %v4435_v57 }
 0x532   :  { %v4959_v36 = vpop.xlane.xlu0 %4958  ;;  %13349 = vmatmul.mubr.msk.bf16.vlgmr.msra.gmra.mrb[148].mxu1 %vm4140_vm3, %v5552_v43  ;;  %v22246_v43 = vld [vmem:[#allocation105_spill] sm:$0xff] }
 0x533   :  { %5075 = vadd.xlane.f32.xlu1 %v5074_v44  ;;  %13359 = vmatpush3.bf16.msra.mxu1 %v22240_v16 }
 0x534   :  { %v17985_v52 = vpop.xlane.xlu1 %4358  ;;  %13360 = vmatprep.mubr.msk.bf16.mxu1 %vm15166_vm1, %v22207_v59  ;;  %13370 = vmatprep.subr.bf16.mxu1 %v22207_v59 }
 0x535   :  { %22241 = vst [vmem:[#allocation79_spill] sm:$0xff] %v17985_v52  ;;  %5072 = vadd.xlane.f32.xlu0 %v5071_v51  ;;  %v22247_v51 = vld [vmem:[#allocation27_spill] sm:$0xff] }
 0x536   :  { %v17992_v8 = vpop.xlane.xlu0 %4364 }
 0x537   :  { %22242 = vst [vmem:[#allocation78_spill] sm:$0xff] %v17992_v8  ;;  %v14488_v57 = vpop.eup %14487 }
 0x538   :  { %v17994_v17 = vpop.xlane.xlu1 %4367  ;;  %v5430_v12 = vmul.f32 %v14488_v57, %v22245_v20  ;;  %v22248_v57 = vld [vmem:[#allocation14_spill] sm:$0xff] }
 0x539   :  { %22243 = vst [vmem:[#allocation92_spill] sm:$0xff] %v17994_v17  ;;  %v14490_v62 = vpop.eup %14489 }
 0x53a   :  { %v17996_v44 = vpop.xlane.xlu0 %4361  ;;  %v5429_v16 = vmul.f32 %v14490_v62, %v22246_v43 }
 0x53b   :  { %22244 = vst [vmem:[#allocation93_spill] sm:$0xff] %v17996_v44  ;;  %v22255_v44 = vld [vmem:[#allocation21_spill] sm:$0xff] }
 0x53c   :  { %v4944_v29 = vpop.xlane.xlu1 %4943  ;;  %v5553_v24 = vpack.c.bf16 %v5430_v12, %v5429_v16 }
 0x53d   :  { %14491 = vrcp.f32 %v4944_v29 }
 0x53e   :  { %v4941_v56 = vpop.xlane.xlu0 %4940  ;;  %13355 = vmatmul.mubr.msk.bf16.vlgmr.msra.gmra.mrb[152].mxu0 %vm4140_vm3, %v5553_v24 }
 0x53f   :  { %13365 = vmatpush3.bf16.msra.mxu0 %v22247_v51  ;;  %14493 = vrcp.f32 %v4941_v56  ;;  %13366 = vmatprep.mubr.msk.bf16.mxu0 %vm15166_vm1, %v22207_v59  ;;  %v22253_v56 = vld [vmem:[#allocation112_spill] sm:$0xff]  ;;  %v22254_v51 = vld [vmem:[#allocation113_spill] sm:$0xff] }
 0x540   :  { %v4974_v8 = vpop.xlane.xlu1 %4973  ;;  %13376 = vmatprep.subr.bf16.mxu0 %v22207_v59 }
 0x542   :  { %v4971_v17 = vpop.xlane.xlu0 %4970 }
 0x544   :  { %6600 = vrot.lane.b32.xlu1 %v22248_v57, %s15171_s29  ;;  %v18007_v62 = vpop.xlane.xlu1 %4370 }
 0x545   :  { %22249 = vst [vmem:[#allocation19_spill] sm:$0xff] %v18007_v62 }
 0x546   :  { %v18009_v20 = vpop.xlane.xlu0 %4376 }
 0x547   :  { %22250 = vst [vmem:[#allocation98_spill] sm:$0xff] %v18009_v20  ;;  %v14492_v29 = vpop.eup %14491  ;;  %v22256_v20 = vld [vmem:[#allocation29_spill] sm:$0xff] }
 0x548   :  { %v18011_v12 = vpop.xlane.xlu1 %4379  ;;  %v5432_v16 = vmul.f32 %v14492_v29, %v22253_v56 }
 0x549   :  { %22251 = vst [vmem:[#allocation99_spill] sm:$0xff] %v18011_v12  ;;  %v14494_v24 = vpop.eup %14493 }
 0x54a   :  { %v18013_v43 = vpop.xlane.xlu0 %4373  ;;  %v5431_v52 = vmul.f32 %v14494_v24, %v22254_v51  ;;  %v22257_v24 = vld [vmem:[#allocation85_spill] sm:$0xff] }
 0x54b   :  { %22252 = vst [vmem:[#allocation20_spill] sm:$0xff] %v18013_v43  ;;  %6553 = vrot.lane.b32.xlu0 %v22255_v44, %s15171_s29  ;;  %v4582_v56 = vsub.f32 %v22257_v24, %v17802_v23 }
 0x54c   :  { %v4950_v48 = vpop.xlane.xlu1 %4949  ;;  %v5554_v15 = vpack.c.bf16 %v5432_v16, %v5431_v52 }
 0x54d   :  { %14495 = vrcp.f32 %v4950_v48 }
 0x54e   :  { %v4947_v57 = vpop.xlane.xlu0 %4946  ;;  %13361 = vmatmul.mubr.msk.bf16.vlgmr.msra.gmra.mrb[152].mxu1 %vm4140_vm3, %v5554_v15  ;;  %v22259_v15 = vld [vmem:[#allocation83_spill] sm:$0xff] }
 0x54f   :  { %13371 = vmatpush3.bf16.msra.mxu1 %v22256_v20  ;;  %14497 = vrcp.f32 %v4947_v57  ;;  %13372 = vmatprep.mubr.msk.bf16.mxu1 %vm15166_vm1, %v22207_v59  ;;  %v4581_v52 = vsub.f32 %v22259_v15, %v17794_v28  ;;  %v4767_v20 = vmul.f32 1.442695, %v4582_v56  ;;  %v22262_v56 = vld [vmem:[#allocation84_spill] sm:$0xff] }
 0x550   :  { %v4986_v12 = vpop.xlane.xlu1 %4985  ;;  %13382 = vmatprep.subr.bf16.mxu1 %v22207_v59  ;;  %14499 = vrcp.f32 %v4959_v36  ;;  %v4584_v15 = vsub.f32 %v22262_v56, %v17784_v37  ;;  %v18050_v37 = vadd.f32 %v17963_v14, %v17512_v41 }
 0x551   :  { %14501 = vrcp.f32 %v4962_v1  ;;  %v4765_v43 = vmul.f32 1.442695, %v4581_v52  ;;  %v22263_v52 = vld [vmem:[#allocation82_spill] sm:$0xff] }
 0x552   :  { %v4983_v29 = vpop.xlane.xlu0 %4982  ;;  %14503 = vpow2.f32 %v4767_v20  ;;  %v4583_v20 = vsub.f32 %v22263_v52, %v17774_v26  ;;  %22266 = vst [vmem:[#allocation27_spill] sm:$0xff] %v18050_v37 }
 0x553   :  { %14505 = vrcp.f32 %v4971_v17 }
 0x554   :  { %v18026_v44 = vpop.xlane.xlu1 %4382  ;;  %14507 = vrcp.f32 %v4974_v8  ;;  %v22265_v8 = vld [vmem:[#allocation107_spill] sm:$0xff]  ;;  %v4769_v26 = vmul.f32 1.442695, %v4583_v20 }
 0x556   :  { %v18028_v48 = vpop.xlane.xlu0 %4388 }
 0x557   :  { %22258 = vst [vmem:[#allocation104_spill] sm:$0xff] %v18028_v48  ;;  %v14496_v16 = vpop.eup %14495 }
 0x558   :  { %v18032_v51 = vpop.xlane.xlu1 %4391  ;;  %v5434_v23 = vmul.f32 %v14496_v16, %v22261_v9  ;;  %v22264_v9 = vld [vmem:[#allocation35_spill] sm:$0xff] }
 0x559   :  { %22260 = vst [vmem:[#allocation105_spill] sm:$0xff] %v18032_v51  ;;  %v14498_v57 = vpop.eup %14497 }
 0x55a   :  { %v18034_v62 = vpop.xlane.xlu0 %4385  ;;  %v5433_v36 = vmul.f32 %v14498_v57, %v17466_v40  ;;  %v14500_v48 = vpop.eup %14499  ;;  %v22267_v57 = vld [vmem:[#allocation106_spill] sm:$0xff] }
 0x55b   :  { %v14502_v51 = vpop.eup %14501  ;;  %v5437_v17 = vmul.f32 %v14500_v48, %v22265_v8  ;;  %v22271_v8 = vld [vmem:[#allocation115_spill] sm:$0xff] }
 0x55c   :  { %v4956_v1 = vpop.xlane.xlu1 %4955  ;;  %v5555_v24 = vpack.c.bf16 %v5434_v23, %v5433_v36  ;;  %v5438_v23 = vmul.f32 %v14502_v51, %v22267_v57 }
 0x55d   :  { %14509 = vrcp.f32 %v4956_v1  ;;  %v18055_v1 = vpop.eup %14503 }
 0x55e   :  { %v4953_v28 = vpop.xlane.xlu0 %4952  ;;  %14511 = vpow2.f32 %v4765_v43  ;;  %13367 = vmatmul.mubr.msk.bf16.vlgmr.msra.gmra.mrb[156].mxu0 %vm4140_vm3, %v5555_v24  ;;  %v4771_v43 = vmul.f32 1.442695, %v4584_v15  ;;  %v22268_v24 = vld [vmem:[#allocation128_spill] sm:$0xff]  ;;  %v5557_v48 = vpack.c.bf16 %v5438_v23, %v5437_v17  ;;  %v14506_v56 = vpop.eup %14505  ;;  %v22270_v15 = vld [vmem:[#allocation43_spill] sm:$0xff]  ;;  %v22272_v23 = vld [vmem:[#allocation114_spill] sm:$0xff] }
 0x55f   :  { %13377 = vmatpush3.bf16.msra.mxu0 %v22264_v9  ;;  %14513 = vrcp.f32 %v4953_v28  ;;  %13378 = vmatprep.mubr.msk.bf16.mxu0 %vm15166_vm1, %v22207_v59  ;;  %v18059_v28 = vadd.f32 %v17925_v11, %v22268_v24  ;;  %v14508_v41 = vpop.eup %14507 }
 0x560   :  { %v4998_v40 = vpop.xlane.xlu1 %4997  ;;  %13388 = vmatprep.subr.bf16.mxu0 %v22207_v59  ;;  %14515 = vrcp.f32 %v4983_v29  ;;  %v4441_v29 = vsel %vm4140_vm3, %v18050_v37, -inf }
 0x561   :  { %22269 = vst [vmem:[#allocation14_spill] sm:$0xff] %v18059_v28  ;;  %14517 = vrcp.f32 %v4986_v12  ;;  %v5441_v12 = vmul.f32 %v14506_v56, %v22271_v8  ;;  %v4444_v17 = vsel %vm4140_vm3, %v18059_v28, -inf  ;;  %v5080_v56 = vsel %vm4140_vm3, %v18055_v1, 0.0 }
 0x562   :  { %v4995_v16 = vpop.xlane.xlu0 %4994  ;;  %14519 = vpow2.f32 %v4771_v43  ;;  %v18090_v8 = vadd.f32 %v17925_v11, %v17552_v34  ;;  %v22276_v34 = vld [vmem:[#allocation37_spill] sm:$0xff] }
 0x563   :  { %14521 = vpow2.f32 %v4769_v26  ;;  %v5442_v26 = vmul.f32 %v14508_v41, %v22272_v23 }
 0x564   :  { %v18053_v36 = vpop.xlane.xlu1 %4394  ;;  %22275 = vst [vmem:[#allocation113_spill] sm:$0xff] %v18090_v8  ;;  %14523 = vrcp.f32 %v4995_v16  ;;  %v22277_v16 = vld [vmem:[#allocation51_spill] sm:$0xff] }
 0x565   :  { %14525 = vrcp.f32 %v4998_v40  ;;  %v4450_v40 = vsel %vm4140_vm3, %v18090_v8, -inf }
 0x566   :  { %v18061_v52 = vpop.xlane.xlu0 %4400  ;;  %13379 = vmatmul.mubr.msk.bf16.vlgmr.msra.gmra.mrb[160].mxu0 %vm4140_vm3, %v5557_v48 }
 0x567   :  { %v14510_v51 = vpop.eup %14509  ;;  %13389 = vmatpush3.bf16.msra.mxu0 %v22270_v15  ;;  %13390 = vmatprep.mubr.msk.bf16.mxu0 %vm15166_vm1, %v22207_v59 }
 0x568   :  { %4442 = vmax.xlane.f32.xlu1 %v4441_v29  ;;  %v18067_v20 = vpop.xlane.xlu1 %4403  ;;  %v18069_v9 = vpop.eup %14511  ;;  %13400 = vmatprep.subr.bf16.mxu0 %v22207_v59  ;;  %v5436_v24 = vmul.f32 %v14510_v51, %v17532_v31  ;;  %v22273_v29 = vld [vmem:[#allocation129_spill] sm:$0xff] }
 0x569   :  { %v14514_v43 = vpop.eup %14513  ;;  %v18086_v15 = vadd.f32 %v17963_v14, %v22273_v29  ;;  %v5077_v31 = vsel %vm4140_vm3, %v18069_v9, 0.0 }
 0x56a   :  { %4445 = vmax.xlane.f32.xlu0 %v4444_v17  ;;  %v18077_v57 = vpop.xlane.xlu0 %4397  ;;  %v5435_v48 = vmul.f32 %v14514_v43, %v17540_v55  ;;  %v5559_v55 = vpack.c.bf16 %v5442_v26, %v5441_v12  ;;  %v14516_v51 = vpop.eup %14515  ;;  %v22278_v26 = vld [vmem:[#allocation123_spill] sm:$0xff] }
 0x56b   :  { %22274 = vst [vmem:[#allocation112_spill] sm:$0xff] %v18086_v15  ;;  %v14518_v23 = vpop.eup %14517 }
 0x56c   :  { %5081 = vadd.xlane.f32.xlu1 %v5080_v56  ;;  %v4968_v17 = vpop.xlane.xlu1 %4967  ;;  %v5556_v41 = vpack.c.bf16 %v5436_v24, %v5435_v48  ;;  %v18102_v12 = vpop.eup %14519  ;;  %v5445_v24 = vmul.f32 %v14516_v51, %v22278_v26  ;;  %v4447_v48 = vsel %vm4140_vm3, %v18086_v15, -inf }
 0x56d   :  { %14527 = vrcp.f32 %v4968_v17  ;;  %v18109_v29 = vpop.eup %14521 }
 0x56e   :  { %5078 = vadd.xlane.f32.xlu0 %v5077_v31  ;;  %v4965_v43 = vpop.xlane.xlu0 %4964  ;;  %13373 = vmatmul.mubr.msk.bf16.vlgmr.msra.gmra.mrb[156].mxu1 %vm4140_vm3, %v5556_v41  ;;  %v22280_v31 = vld [vmem:[#allocation122_spill] sm:$0xff] }
 0x56f   :  { %13391 = vmatmul.mubr.msk.bf16.vlgmr.msra.gmra.mrb[164].mxu0 %vm4140_vm3, %v5559_v55  ;;  %13383 = vmatpush3.bf16.msra.mxu1 %v22276_v34  ;;  %14529 = vrcp.f32 %v4965_v43  ;;  %v5446_v41 = vmul.f32 %v14518_v23, %v22280_v31  ;;  %v5086_v55 = vsel %vm4140_vm3, %v18102_v12, 0.0  ;;  %v5083_v43 = vsel %vm4140_vm3, %v18109_v29, 0.0 }
 0x570   :  { %13401 = vmatpush3.bf16.msra.mxu0 %v22277_v16  ;;  %v18100_v56 = vpop.xlane.xlu1 %4406  ;;  %4451 = vmax.xlane.f32.xlu1 %v4450_v40  ;;  %v14524_v16 = vpop.eup %14523 }
 0x571   :  { %13402 = vmatprep.mubr.msk.bf16.mxu0 %vm15166_vm1, %v22207_v59  ;;  %13412 = vmatprep.subr.bf16.mxu0 %v22207_v59  ;;  %v5561_v34 = vpack.c.bf16 %v5446_v41, %v5445_v24  ;;  %v14526_v23 = vpop.eup %14525  ;;  %v22282_v41 = vld [vmem:[#allocation131_spill] sm:$0xff] }
 0x572   :  { %4448 = vmax.xlane.f32.xlu0 %v4447_v48  ;;  %v18111_v17 = vpop.xlane.xlu0 %4412  ;;  %13384 = vmatprep.mubr.msk.bf16.mxu1 %vm15166_vm1, %v22207_v59  ;;  %v22281_v48 = vld [vmem:[#allocation59_spill] sm:$0xff] }
 0x573   :  { %22279 = vst [vmem:[#allocation21_spill] sm:$0xff] %v18111_v17  ;;  %13394 = vmatprep.subr.bf16.mxu1 %v22207_v59 }
 0x574   :  { %v18120_v51 = vpop.xlane.xlu1 %4415  ;;  %5087 = vadd.xlane.f32.xlu1 %v5086_v55  ;;  %v5449_v55 = vmul.f32 %v14524_v16, %v17558_v47  ;;  %v22283_v47 = vld [vmem:[#allocation45_spill] sm:$0xff]  ;;  %v22284_v16 = vld [vmem:[#allocation62_spill] sm:$0xff] }
 0x576   :  { %5084 = vadd.xlane.f32.xlu0 %v5083_v43  ;;  %v18124_v40 = vpop.xlane.xlu0 %4409  ;;  %v5450_v43 = vmul.f32 %v14526_v23, %v22282_v41 }
 0x577   :  { %13403 = vmatmul.mubr.msk.bf16.vlgmr.msra.gmra.mrb[168].mxu0 %vm4140_vm3, %v5561_v34  ;;  %v14528_v26 = vpop.eup %14527 }
 0x578   :  { %13413 = vmatpush3.bf16.msra.mxu0 %v22281_v48  ;;  %v4980_v31 = vpop.xlane.xlu1 %4979  ;;  %13414 = vmatprep.mubr.msk.bf16.mxu0 %vm15166_vm1, %v22207_v59  ;;  %v5440_v8 = vmul.f32 %v14528_v26, %v17604_v6  ;;  %v5563_v37 = vpack.c.bf16 %v5450_v43, %v5449_v55 }
 0x579   :  { %13424 = vmatprep.subr.bf16.mxu0 %v22207_v59  ;;  %v14530_v15 = vpop.eup %14529  ;;  %14531 = vrcp.f32 %v4980_v31 }
 0x57a   :  { %v4977_v24 = vpop.xlane.xlu0 %4976  ;;  %v5439_v34 = vmul.f32 %v14530_v15, %v17610_v50 }
 0x57b   :  { %14533 = vrcp.f32 %v4977_v24 }
 0x57c   :  { %v18135_v28 = vpop.xlane.xlu1 %4418  ;;  %v5558_v48 = vpack.c.bf16 %v5440_v8, %v5439_v34  ;;  %v22285_v8 = vld [vmem:[#allocation24_spill] sm:$0xff]  ;;  %v22286_v34 = vld [vmem:[#allocation53_spill] sm:$0xff] }
 0x57e   :  { %v18137_v17 = vpop.xlane.xlu0 %4424  ;;  %13385 = vmatmul.mubr.msk.bf16.vlgmr.msra.gmra.mrb[160].mxu1 %vm4140_vm3, %v5558_v48 }
 0x57f   :  { %13415 = vmatmul.mubr.msk.bf16.vlgmr.msra.gmra.mrb[172].mxu0 %vm4140_vm3, %v5563_v37  ;;  %13395 = vmatpush3.bf16.msra.mxu1 %v22283_v47  ;;  %v22288_v47 = vld [vmem:[#allocation22_spill] sm:$0xff] }
 0x580   :  { %13425 = vmatpush3.bf16.msra.mxu0 %v22284_v16  ;;  %v18143_v23 = vpop.xlane.xlu1 %4427  ;;  %13396 = vmatprep.mubr.msk.bf16.mxu1 %vm15166_vm1, %v22207_v59 }
 0x581   :  { %13406 = vmatprep.subr.bf16.mxu1 %v22207_v59  ;;  %13426 = vmatprep.mubr.msk.bf16.mxu0 %vm15166_vm1, %v22207_v59 }
 0x582   :  { %v18148_v50 = vpop.xlane.xlu0 %4421  ;;  %13436 = vmatprep.subr.bf16.mxu0 %v22207_v59 }
 0x583   :  { %v14532_v6 = vpop.eup %14531 }
 0x584   :  { %v4992_v37 = vpop.xlane.xlu1 %4991  ;;  %v5444_v31 = vmul.f32 %v14532_v6, %v17662_v49 }
 0x585   :  { %v14534_v15 = vpop.eup %14533  ;;  %14535 = vrcp.f32 %v4992_v37  ;;  %6694 = vrot.lane.b32.xlu1 %v22285_v8, %s15171_s29 }
 0x586   :  { %v4989_v26 = vpop.xlane.xlu0 %4988  ;;  %v5443_v55 = vmul.f32 %v14534_v15, %v17672_v2 }
 0x587   :  { %14537 = vrcp.f32 %v4989_v26 }
 0x588   :  { %v5004_v24 = vpop.xlane.xlu1 %5003  ;;  %v5560_v41 = vpack.c.bf16 %v5444_v31, %v5443_v55 }
 0x58a   :  { %v5001_v43 = vpop.xlane.xlu0 %5000  ;;  %13397 = vmatmul.mubr.msk.bf16.vlgmr.msra.gmra.mrb[164].mxu1 %vm4140_vm3, %v5560_v41 }
 0x58b   :  { %13407 = vmatpush3.bf16.msra.mxu1 %v22286_v34  ;;  %14539 = vrcp.f32 %v5001_v43  ;;  %13408 = vmatprep.mubr.msk.bf16.mxu1 %vm15166_vm1, %v22207_v59  ;;  %v22289_v43 = vld [vmem:[#allocation90_spill] sm:$0xff] }
 0x58c   :  { %v18159_v48 = vpop.xlane.xlu1 %4430  ;;  %6647 = vrot.lane.b32.xlu0 %v22288_v47, %s15171_s29  ;;  %13418 = vmatprep.subr.bf16.mxu1 %v22207_v59  ;;  %14541 = vrcp.f32 %v5004_v24  ;;  %v4586_v34 = vsub.f32 %v22289_v43, %v17861_v21  ;;  %v22290_v47 = vld [vmem:[#allocation61_spill] sm:$0xff] }
 0x58d   :  { %22287 = vst [vmem:[#allocation29_spill] sm:$0xff] %v18159_v48 }
 0x58e   :  { %v5013_v2 = vpop.xlane.xlu0 %5012 }
 0x58f   :  { %v14536_v49 = vpop.eup %14535 }
 0x590   :  { %v5016_v16 = vpop.xlane.xlu1 %5015  ;;  %v5448_v15 = vmul.f32 %v14536_v49, %v17726_v42  ;;  %v22291_v42 = vld [vmem:[#allocation88_spill] sm:$0xff] }
 0x591   :  { %v14538_v6 = vpop.eup %14537 }
 0x592   :  { %v5007_v37 = vpop.xlane.xlu0 %5006  ;;  %v5447_v8 = vmul.f32 %v14538_v6, %v17734_v32  ;;  %v4585_v32 = vsub.f32 %v22291_v42, %v17830_v4  ;;  %v4775_v6 = vmul.f32 1.442695, %v4586_v34 }
 0x593   :  { %14543 = vrcp.f32 %v5007_v37 }
 0x594   :  { %14545 = vrcp.f32 %v5016_v16  ;;  %v5010_v26 = vpop.xlane.xlu1 %5009  ;;  %v5562_v31 = vpack.c.bf16 %v5448_v15, %v5447_v8  ;;  %v4773_v15 = vmul.f32 1.442695, %v4585_v32 }
 0x595   :  { %14547 = vrcp.f32 %v5010_v26  ;;  %v14540_v55 = vpop.eup %14539 }
 0x596   :  { %14549 = vrcp.f32 %v5013_v2  ;;  %v5025_v41 = vpop.xlane.xlu0 %5024  ;;  %13409 = vmatmul.mubr.msk.bf16.vlgmr.msra.gmra.mrb[168].mxu1 %vm4140_vm3, %v5562_v31  ;;  %v14542_v24 = vpop.eup %14541  ;;  %v5451_v49 = vmul.f32 %v14540_v55, %v17752_v35  ;;  %v22292_v55 = vld [vmem:[#allocation91_spill] sm:$0xff] }
 0x597   :  { %13419 = vmatpush3.bf16.msra.mxu1 %v22290_v47  ;;  %13420 = vmatprep.mubr.msk.bf16.mxu1 %vm15166_vm1, %v22207_v59  ;;  %v5452_v16 = vmul.f32 %v14542_v24, %v17742_v13  ;;  %v4588_v43 = vsub.f32 %v22292_v55, %v17851_v5  ;;  %v22293_v24 = vld [vmem:[#allocation63_spill] sm:$0xff] }
 0x598   :  { %v5028_v48 = vpop.xlane.xlu1 %5027  ;;  %13430 = vmatprep.subr.bf16.mxu1 %v22207_v59 }
 0x599   :  { %v5564_v8 = vpack.c.bf16 %v5452_v16, %v5451_v49  ;;  %v4779_v32 = vmul.f32 1.442695, %v4588_v43  ;;  %v22295_v16 = vld [vmem:[#allocation130_spill] sm:$0xff]  ;;  %v22300_v43 = vld [vmem:[#allocation65_spill] sm:$0xff] }
 0x59a   :  { %v5019_v2 = vpop.xlane.xlu0 %5018 }
 0x59b   :  { %14551 = vrcp.f32 %v5019_v2 }
 0x59c   :  { %14553 = vrcp.f32 %v5028_v48  ;;  %v5022_v21 = vpop.xlane.xlu1 %5021 }
 0x59d   :  { %v14544_v37 = vpop.eup %14543  ;;  %14555 = vrcp.f32 %v5022_v21 }
 0x59e   :  { %v14546_v26 = vpop.eup %14545  ;;  %14557 = vrcp.f32 %v5025_v41  ;;  %v18179_v31 = vpop.xlane.xlu0 %5036  ;;  %13421 = vmatmul.mubr.msk.bf16.vlgmr.msra.gmra.mrb[172].mxu1 %vm4140_vm3, %v5564_v8  ;;  %v5453_v13 = vmul.f32 %v14544_v37, %v17792_v58  ;;  %v22294_v41 = vld [vmem:[#allocation89_spill] sm:$0xff] }
 0x59f   :  { %v14548_v4 = vpop.eup %14547  ;;  %14559 = vpow2.f32 %v4775_v6  ;;  %13431 = vmatpush3.bf16.msra.mxu1 %v22293_v24  ;;  %13432 = vmatprep.mubr.msk.bf16.mxu1 %vm15166_vm1, %v22207_v59  ;;  %v4587_v47 = vsub.f32 %v22294_v41, %v17840_v63  ;;  %v5456_v42 = vmul.f32 %v14546_v26, %v17780_v61  ;;  %v18201_v6 = vadd.f32 %v17963_v14, %v22295_v16  ;;  %v22297_v63 = vld [vmem:[#allocation64_spill] sm:$0xff]  ;;  %v22302_v16 = vld [vmem:[#allocation135_spill] sm:$0xff] }
 0x5a0   :  { %v14550_v35 = vpop.eup %14549  ;;  %v5454_v48 = vmul.f32 %v14548_v4, %v17798_v33  ;;  %v18187_v34 = vpop.xlane.xlu1 %5039  ;;  %14561 = vpow2.f32 %v4773_v15  ;;  %13442 = vmatprep.subr.bf16.mxu1 %v22207_v59  ;;  %v22298_v15 = vld [vmem:[#allocation132_spill] sm:$0xff] }
 0x5a1   :  { %v5455_v33 = vmul.f32 %v14550_v35, %v17770_v0  ;;  %22296 = vst [vmem:[#allocation85_spill] sm:$0xff] %v18201_v6  ;;  %v4777_v21 = vmul.f32 1.442695, %v4587_v47  ;;  %v18208_v0 = vadd.f32 %v17925_v11, %v22298_v15  ;;  %14563 = vpow2.f32 %v4779_v32 }
 0x5a2   :  { %v18195_v5 = vpop.xlane.xlu0 %5030  ;;  %v5565_v58 = vpack.c.bf16 %v5454_v48, %v5453_v13  ;;  %v4453_v24 = vsel %vm4140_vm3, %v18201_v6, -inf }
 0x5a3   :  { %v5566_v61 = vpack.c.bf16 %v5456_v42, %v5455_v33  ;;  %22299 = vst [vmem:[#allocation83_spill] sm:$0xff] %v18208_v0  ;;  %14565 = vpow2.f32 %v4777_v21  ;;  %v18239_v33 = vadd.f32 %v17925_v11, %v17590_v10  ;;  %v18247_v21 = vadd.f32 %v17963_v14, %v22302_v16 }
 0x5a4   :  { %v5034_v49 = vpop.xlane.xlu1 %5033  ;;  %13427 = vmatmul.mubr.msk.bf16.vlgmr.msra.gmra.mrb[176].mxu0 %vm4140_vm3, %v5565_v58  ;;  %14567 = vrcp.f32 %v18187_v34 }
 0x5a5   :  { %v14552_v2 = vpop.eup %14551  ;;  %13437 = vmatpush3.bf16.msra.mxu0 %v22297_v63  ;;  %13438 = vmatprep.mubr.msk.bf16.mxu0 %vm15166_vm1, %v22207_v59  ;;  %22301 = vst [vmem:[#allocation120_spill] sm:$0xff] %v18239_v33  ;;  %22303 = vst [vmem:[#allocation84_spill] sm:$0xff] %v18247_v21  ;;  %14569 = vrcp.f32 %v18179_v31 }
 0x5a6   :  { %v14554_v37 = vpop.eup %14553  ;;  %v18210_v8 = vpop.xlane.xlu0 %5048  ;;  %13448 = vmatprep.subr.bf16.mxu0 %v22207_v59  ;;  %13433 = vmatmul.mubr.msk.bf16.vlgmr.msra.gmra.mrb[176].mxu1 %vm4140_vm3, %v5566_v61  ;;  %v5457_v35 = vmul.f32 %v14552_v2, %v17820_v22  ;;  %v4462_v61 = vsel %vm4140_vm3, %v18239_v33, -inf  ;;  %14571 = vrcp.f32 %v5034_v49  ;;  %v22307_v33 = vld [vmem:[#allocation32_spill] sm:$0xff] }
 0x5a7   :  { %v14556_v26 = vpop.eup %14555  ;;  %13443 = vmatpush3.bf16.msra.mxu1 %v22300_v43  ;;  %13444 = vmatprep.mubr.msk.bf16.mxu1 %vm15166_vm1, %v22207_v59  ;;  %v5460_v48 = vmul.f32 %v14554_v37, %v17810_v19  ;;  %14573 = vrcp.f32 %v18195_v5 }
 0x5a8   :  { %v14558_v4 = vpop.eup %14557  ;;  %v5458_v55 = vmul.f32 %v14556_v26, %v17826_v7  ;;  %v18217_v13 = vpop.xlane.xlu1 %5051  ;;  %13454 = vmatprep.subr.bf16.mxu1 %v22207_v59  ;;  %v4456_v7 = vsel %vm4140_vm3, %v18208_v0, -inf  ;;  %v4459_v26 = vsel %vm4140_vm3, %v18247_v21, -inf }
 0x5a9   :  { %v18225_v41 = vpop.eup %14559  ;;  %4454 = vmax.xlane.f32.xlu1 %v4453_v24  ;;  %v5459_v58 = vmul.f32 %v14558_v4, %v17804_v54 }
 0x5aa   :  { %v18227_v22 = vpop.xlane.xlu0 %5042  ;;  %v5567_v47 = vpack.c.bf16 %v5458_v55, %v5457_v35  ;;  %v18231_v42 = vpop.eup %14561  ;;  %v5092_v32 = vsel %vm4140_vm3, %v18225_v41, 0.0 }
 0x5ab   :  { %4457 = vmax.xlane.f32.xlu0 %v4456_v7  ;;  %v5568_v2 = vpack.c.bf16 %v5460_v48, %v5459_v58  ;;  %v5089_v63 = vsel %vm4140_vm3, %v18231_v42, 0.0  ;;  %v18260_v37 = vpop.eup %14563 }
 0x5ac   :  { %v18234_v19 = vpop.xlane.xlu1 %5045  ;;  %13439 = vmatmul.mubr.msk.bf16.vlgmr.msra.gmra.mrb[180].mxu0 %vm4140_vm3, %v5567_v47  ;;  %v5098_v55 = vsel %vm4140_vm3, %v18260_v37, 0.0 }
 0x5ad   :  { %13450 = vmatprep.mubr.msk.bf16.mxu0 %vm15166_vm1, %v22207_v59  ;;  %5093 = vadd.xlane.f32.xlu1 %v5092_v32  ;;  %v18266_v4 = vpop.eup %14565 }
 0x5ae   :  { %v18249_v54 = vpop.xlane.xlu0 %5060  ;;  %13445 = vmatmul.mubr.msk.bf16.vlgmr.msra.gmra.mrb[180].mxu1 %vm4140_vm3, %v5568_v2  ;;  %v5095_v48 = vsel %vm4140_vm3, %v18266_v4, 0.0  ;;  %v14568_v58 = vpop.eup %14567 }
 0x5af   :  { %5090 = vadd.xlane.f32.xlu0 %v5089_v63  ;;  %13456 = vmatprep.mubr.msk.bf16.mxu1 %vm15166_vm1, %v22207_v59  ;;  %v14570_v31 = vpop.eup %14569  ;;  %v5464_v16 = vmul.f32 %v14568_v58, %v17847_v25 }
 0x5b0   :  { %v18254_v10 = vpop.xlane.xlu1 %5063  ;;  %v14572_v2 = vpop.eup %14571 }
 0x5b1   :  { %4463 = vmax.xlane.f32.xlu1 %v4462_v61  ;;  %v14574_v49 = vpop.eup %14573  ;;  %v5463_v61 = vmul.f32 %v14570_v31, %v17835_v18  ;;  %v5462_v5 = vmul.f32 %v14572_v2, %v17859_v60  ;;  %v22308_v18 = vld [vmem:[#allocation30_spill] sm:$0xff] }
 0x5b2   :  { %v18262_v15 = vpop.xlane.xlu0 %5054 }
 0x5b3   :  { %4460 = vmax.xlane.f32.xlu0 %v4459_v26  ;;  %v5570_v21 = vpack.c.bf16 %v5464_v16, %v5463_v61 }
 0x5b4   :  { %v18268_v35 = vpop.xlane.xlu1 %5057 }
 0x5b5   :  { %5099 = vadd.xlane.f32.xlu1 %v5098_v55  ;;  %v5461_v55 = vmul.f32 %v14574_v49, %v17855_v53  ;;  %v22309_v53 = vld [vmem:[#allocation97_spill] sm:$0xff]  ;;  %v22312_v49 = vld [vmem:[#allocation96_spill] sm:$0xff] }
 0x5b6   :  { %v18274_v43 = vpop.xlane.xlu0 %4433  ;;  %v4590_v60 = vsub.f32 %v22309_v53, %v17904_v3  ;;  %v4592_v61 = vsub.f32 %v22312_v49, %v17896_v39  ;;  %v22317_v53 = vld [vmem:[#allocation139_spill] sm:$0xff] }
 0x5b7   :  { %22304 = vst [vmem:[#allocation82_spill] sm:$0xff] %v18274_v43  ;;  %5096 = vadd.xlane.f32.xlu0 %v5095_v48  ;;  %v5569_v25 = vpack.c.bf16 %v5462_v5, %v5461_v55 }
 0x5b8   :  { %v18278_v24 = vpop.xlane.xlu1 %4439  ;;  %v4783_v58 = vmul.f32 1.442695, %v4590_v60  ;;  %v4787_v3 = vmul.f32 1.442695, %v4592_v61  ;;  %v18325_v60 = vadd.f32 %v17925_v11, %v22317_v53 }
 0x5b9   :  { %22305 = vst [vmem:[#allocation35_spill] sm:$0xff] %v18278_v24 }
 0x5ba   :  { %v18281_v7 = vpop.xlane.xlu0 %5066  ;;  %14575 = vpow2.f32 %v4783_v58  ;;  %22318 = vst [vmem:[#allocation115_spill] sm:$0xff] %v18325_v60 }
 0x5bc   :  { %v18283_v34 = vpop.xlane.xlu1 %5069 }
 0x5be   :  { %v18285_v47 = vpop.xlane.xlu0 %4436 }
 0x5bf   :  { %22306 = vst [vmem:[#allocation107_spill] sm:$0xff] %v18285_v47  ;;  %v22418_v47 = vld [vmem:[#allocation13_spill] sm:$0xff] }
 0x5c0   :  { %v18287_v32 = vpop.xlane.xlu1 %5075 }
 0x5c2   :  { %v18290_v63 = vpop.xlane.xlu0 %5072 }
 0x5c4   :  { %v6601_v26 = vpop.permute.xlu1 %6600 }
 0x5c5   :  { %13455 = vmatpush3.bf16.msra.mxu1 %v6601_v26  ;;  %v22314_v26 = vld [vmem:[#allocation95_spill] sm:$0xff] }
 0x5c6   :  { %v6554_v48 = vpop.permute.xlu0 %6553  ;;  %13466 = vmatprep.subr.bf16.mxu1 %v22207_v59  ;;  %6788 = vrot.lane.b32.xlu1 %v22307_v33, %s15171_s29  ;;  %v22310_v33 = vld [vmem:[#allocation94_spill] sm:$0xff]  ;;  %v4591_v55 = vsub.f32 %v22314_v26, %v17887_v45  ;;  %v4468_v45 = vsel %vm4140_vm3, %v18325_v60, -inf  ;;  %v18347_v26 = vadd.f32 %v17963_v14, %v17618_v27  ;;  %v22333_v60 = vld [vmem:[#allocation5_spill] sm:$0xff] }
 0x5c7   :  { %13449 = vmatpush3.bf16.msra.mxu0 %v6554_v48 }
 0x5c8   :  { %13457 = vmatmul.mubr.msk.bf16.vlgmr.msra.gmra.mrb[184].mxu1 %vm4140_vm3, %v5570_v21  ;;  %13460 = vmatprep.subr.bf16.mxu0 %v22207_v59  ;;  %v4589_v21 = vsub.f32 %v22310_v33, %v17877_v38  ;;  %v18329_v33 = vpop.eup %14575  ;;  %22322 = vst [vmem:[#allocation51_spill] sm:$0xff] %v18347_v26 }
 0x5c9   :  { %13468 = vmatprep.mubr.msk.bf16.mxu1 %vm15166_vm1, %v22207_v59  ;;  %v5104_v61 = vsel %vm4140_vm3, %v18329_v33, 0.0 }
 0x5ca   :  { %13451 = vmatmul.mubr.msk.bf16.vlgmr.msra.gmra.mrb[184].mxu0 %vm4140_vm3, %v5569_v25  ;;  %v4781_v31 = vmul.f32 1.442695, %v4589_v21  ;;  %v22315_v25 = vld [vmem:[#allocation137_spill] sm:$0xff] }
 0x5cb   :  { %13462 = vmatprep.mubr.msk.bf16.mxu0 %vm15166_vm1, %v22207_v59  ;;  %v18321_v38 = vadd.f32 %v17963_v14, %v22315_v25  ;;  %v4471_v25 = vsel %vm4140_vm3, %v18347_v26, -inf  ;;  %v22331_v26 = vld [vmem:[#allocation71_spill] sm:$0xff] }
 0x5cc   :  { %14577 = vpow2.f32 %v4781_v31 }
 0x5cd   :  { %6741 = vrot.lane.b32.xlu0 %v22308_v18, %s15171_s29  ;;  %22316 = vst [vmem:[#allocation43_spill] sm:$0xff] %v18321_v38  ;;  %v4785_v18 = vmul.f32 1.442695, %v4591_v55  ;;  %14579 = vpow2.f32 %v4787_v3  ;;  %v4465_v39 = vsel %vm4140_vm3, %v18321_v38, -inf }
 0x5cf   :  { %14581 = vpow2.f32 %v4785_v18 }
 0x5d0   :  { %14583 = vrcp.f32 %v18217_v13 }
 0x5d1   :  { %14585 = vrcp.f32 %v18234_v19 }
 0x5d2   :  { %14587 = vrcp.f32 %v18210_v8 }
 0x5d3   :  { %14589 = vrcp.f32 %v18227_v22 }
 0x5d6   :  { %v18333_v21 = vpop.eup %14577 }
 0x5df   :  { %v18311_v2 = vpop.f32.mrb[144].mxu0 }
 0x5e0   :  { %22311 = vst [vmem:[#allocation106_spill] sm:$0xff] %v18311_v2  ;;  %v13332_v16 = vpop.f32.mrb[145].mxu0  ;;  %v22329_v2 = vld [vmem:[#allocation7_spill] sm:$0xff] }
 0x5e1   :  { %v18315_v5 = vpop.f32.mrb[146].mxu0  ;;  %v18339_v16 = vadd.f32 %v17925_v11, %v17628_v30  ;;  %v18353_v30 = vpop.eup %14579 }
 0x5e2   :  { %22313 = vst [vmem:[#allocation128_spill] sm:$0xff] %v18315_v5  ;;  %v13333_v48 = vpop.f32.mrb[147].mxu0  ;;  %v18357_v18 = vpop.eup %14581  ;;  %v5110_v53 = vsel %vm4140_vm3, %v18353_v30, 0.0 }
 0x5e3   :  { %22320 = vst [vmem:[#allocation129_spill] sm:$0xff] %v18339_v16  ;;  %v5101_v48 = vsel %vm4140_vm3, %v18333_v21, 0.0  ;;  %v4474_v3 = vsel %vm4140_vm3, %v18339_v16, -inf  ;;  %v14584_v19 = vpop.eup %14583 }
 0x5ea   :  { %4466 = vmax.xlane.f32.xlu1 %v4465_v39  ;;  %v18335_v58 = vpop.f32.mrb[144].mxu1 }
 0x5eb   :  { %22319 = vst [vmem:[#allocation114_spill] sm:$0xff] %v18335_v58  ;;  %v13338_v31 = vpop.f32.mrb[145].mxu1 }
 0x5ec   :  { %4469 = vmax.xlane.f32.xlu0 %v4468_v45  ;;  %v18341_v49 = vpop.f32.mrb[146].mxu1  ;;  %v5107_v45 = vsel %vm4140_vm3, %v18357_v18, 0.0 }
 0x5ed   :  { %22321 = vst [vmem:[#allocation37_spill] sm:$0xff] %v18341_v49  ;;  %v13339_v55 = vpop.f32.mrb[147].mxu1 }
 0x5ee   :  { %5105 = vadd.xlane.f32.xlu1 %v5104_v61 }
 0x5f0   :  { %5102 = vadd.xlane.f32.xlu0 %v5101_v48 }
 0x5f2   :  { %4475 = vmax.xlane.f32.xlu1 %v4474_v3 }
 0x5f4   :  { %4472 = vmax.xlane.f32.xlu0 %v4471_v25 }
 0x5f5   :  { %v18359_v27 = vpop.xlane.xlu1 %4442 }
 0x5f6   :  { %22323 = vst [vmem:[#allocation123_spill] sm:$0xff] %v18359_v27  ;;  %5111 = vadd.xlane.f32.xlu1 %v5110_v53 }
 0x5f7   :  { %v18364_v39 = vpop.xlane.xlu0 %4445 }
 0x5f8   :  { %22324 = vst [vmem:[#allocation122_spill] sm:$0xff] %v18364_v39  ;;  %5108 = vadd.xlane.f32.xlu0 %v5107_v45  ;;  %v14586_v45 = vpop.eup %14585 }
 0x5f9   :  { %v18370_v31 = vpop.xlane.xlu1 %5081  ;;  %v18373_v61 = vpop.f32.mrb[148].mxu0 }
 0x5fa   :  { %22325 = vst [vmem:[#allocation59_spill] sm:$0xff] %v18373_v61  ;;  %v13344_v55 = vpop.f32.mrb[149].mxu0  ;;  %v14588_v8 = vpop.eup %14587  ;;  %v5468_v61 = vmul.f32 %v14584_v19, %v22329_v2 }
 0x5fb   :  { %v18375_v48 = vpop.xlane.xlu0 %5078  ;;  %v18377_v13 = vpop.f32.mrb[150].mxu0  ;;  %v22330_v55 = vld [vmem:[#allocation74_spill] sm:$0xff]  ;;  %v5467_v16 = vmul.f32 %v14588_v8, %v22331_v26  ;;  %v22342_v8 = vld [vmem:[#allocation67_spill] sm:$0xff] }
 0x5fc   :  { %22326 = vst [vmem:[#allocation131_spill] sm:$0xff] %v18377_v13  ;;  %v13345_v3 = vpop.f32.mrb[151].mxu0  ;;  %v14590_v22 = vpop.eup %14589  ;;  %v5466_v5 = vmul.f32 %v14586_v45, %v22330_v55 }
 0x5fd   :  { %v18379_v25 = vpop.xlane.xlu1 %4451  ;;  %v5465_v38 = vmul.f32 %v14590_v22, %v22333_v60  ;;  %v5572_v39 = vpack.c.bf16 %v5468_v61, %v5467_v16  ;;  %v22339_v16 = vld [vmem:[#allocation103_spill] sm:$0xff]  ;;  %v22341_v61 = vld [vmem:[#allocation100_spill] sm:$0xff]  ;;  %v22343_v22 = vld [vmem:[#allocation102_spill] sm:$0xff] }
 0x5fe   :  { %22327 = vst [vmem:[#allocation45_spill] sm:$0xff] %v18379_v25  ;;  %v4594_v26 = vsub.f32 %v22339_v16, %v17954_v46  ;;  %v4596_v55 = vsub.f32 %v22343_v22, %v22342_v8  ;;  %v22348_v16 = vld [vmem:[#allocation141_spill] sm:$0xff]  ;;  %v22352_v8 = vld [vmem:[#allocation148_spill] sm:$0xff] }
 0x5ff   :  { %v18381_v53 = vpop.xlane.xlu0 %4448  ;;  %v5571_v19 = vpack.c.bf16 %v5466_v5, %v5465_v38  ;;  %v18441_v22 = vadd.f32 %v17925_v11, %v22352_v8 }
 0x600   :  { %22328 = vst [vmem:[#allocation62_spill] sm:$0xff] %v18381_v53  ;;  %v22334_v53 = vld [vmem:[#allocation40_spill] sm:$0xff]  ;;  %v4795_v46 = vmul.f32 1.442695, %v4596_v55 }
 0x601   :  { %v18383_v58 = vpop.xlane.xlu1 %5087  ;;  %22353 = vst [vmem:[#allocation89_spill] sm:$0xff] %v18441_v22 }
 0x603   :  { %v18385_v49 = vpop.xlane.xlu0 %5084 }
 0x605   :  { %v6695_v13 = vpop.permute.xlu1 %6694  ;;  %v18390_v3 = vpop.f32.mrb[148].mxu1 }
 0x606   :  { %22332 = vst [vmem:[#allocation24_spill] sm:$0xff] %v18390_v3  ;;  %v13350_v0 = vpop.f32.mrb[149].mxu1  ;;  %13467 = vmatpush3.bf16.msra.mxu1 %v6695_v13 }
 0x607   :  { %v6648_v6 = vpop.permute.xlu0 %6647  ;;  %6882 = vrot.lane.b32.xlu1 %v22334_v53, %s15171_s29  ;;  %v18395_v25 = vpop.f32.mrb[150].mxu1  ;;  %13478 = vmatprep.subr.bf16.mxu1 %v22207_v59  ;;  %v22336_v0 = vld [vmem:[#allocation38_spill] sm:$0xff]  ;;  %v4791_v53 = vmul.f32 1.442695, %v4594_v26 }
 0x608   :  { %22335 = vst [vmem:[#allocation53_spill] sm:$0xff] %v18395_v25  ;;  %13461 = vmatpush3.bf16.msra.mxu0 %v6648_v6  ;;  %v13351_v2 = vpop.f32.mrb[151].mxu1  ;;  %v22367_v25 = vld [vmem:[#allocation80_spill] sm:$0xff] }
 0x609   :  { %13472 = vmatprep.subr.bf16.mxu0 %v22207_v59  ;;  %13469 = vmatmul.mubr.msk.bf16.vlgmr.msra.gmra.mrb[188].mxu1 %vm4140_vm3, %v5572_v39  ;;  %v22340_v39 = vld [vmem:[#allocation77_spill] sm:$0xff]  ;;  %14591 = vpow2.f32 %v4791_v53 }
 0x60a   :  { %13480 = vmatprep.mubr.msk.bf16.mxu1 %vm15166_vm1, %v22207_v59  ;;  %v4593_v13 = vsub.f32 %v22341_v61, %v22340_v39  ;;  %v18425_v39 = vadd.f32 %v17963_v14, %v22348_v16  ;;  %v22350_v61 = vld [vmem:[#allocation143_spill] sm:$0xff] }
 0x60b   :  { %13463 = vmatmul.mubr.msk.bf16.vlgmr.msra.gmra.mrb[188].mxu0 %vm4140_vm3, %v5571_v19  ;;  %v22345_v19 = vld [vmem:[#allocation66_spill] sm:$0xff] }
 0x60c   :  { %13474 = vmatprep.mubr.msk.bf16.mxu0 %vm15166_vm1, %v22207_v59  ;;  %v4789_v45 = vmul.f32 1.442695, %v4593_v13  ;;  %22349 = vst [vmem:[#allocation91_spill] sm:$0xff] %v18425_v39  ;;  %v18429_v13 = vadd.f32 %v17925_v11, %v22350_v61  ;;  %v4477_v53 = vsel %vm4140_vm3, %v18425_v39, -inf }
 0x60e   :  { %6835 = vrot.lane.b32.xlu0 %v22336_v0, %s15171_s29  ;;  %14593 = vpow2.f32 %v4789_v45  ;;  %v22346_v0 = vld [vmem:[#allocation101_spill] sm:$0xff]  ;;  %22351 = vst [vmem:[#allocation63_spill] sm:$0xff] %v18429_v13 }
 0x60f   :  { %14595 = vpow2.f32 %v4795_v46 }
 0x611   :  { %v18407_v6 = vpop.f32.mrb[152].mxu0 }
 0x612   :  { %22337 = vst [vmem:[#allocation22_spill] sm:$0xff] %v18407_v6  ;;  %v13356_v5 = vpop.f32.mrb[153].mxu0 }
 0x613   :  { %v18409_v38 = vpop.f32.mrb[154].mxu0  ;;  %v4595_v5 = vsub.f32 %v22346_v0, %v22345_v19  ;;  %v18433_v45 = vpop.eup %14591  ;;  %v22354_v19 = vld [vmem:[#allocation146_spill] sm:$0xff] }
 0x614   :  { %22338 = vst [vmem:[#allocation90_spill] sm:$0xff] %v18409_v38  ;;  %v13357_v60 = vpop.f32.mrb[155].mxu0  ;;  %v5116_v55 = vsel %vm4140_vm3, %v18433_v45, 0.0  ;;  %v18447_v0 = vadd.f32 %v17963_v14, %v22354_v19 }
 0x615   :  { %v4793_v26 = vmul.f32 1.442695, %v4595_v5 }
 0x616   :  { %22355 = vst [vmem:[#allocation130_spill] sm:$0xff] %v18447_v0  ;;  %v4483_v14 = vsel %vm4140_vm3, %v18447_v0, -inf }
 0x617   :  { %14597 = vpow2.f32 %v4793_v26  ;;  %v4486_v26 = vsel %vm4140_vm3, %v18441_v22, -inf }
 0x618   :  { %14599 = vrcp.f32 %v18254_v10 }
 0x619   :  { %14601 = vrcp.f32 %v18249_v54 }
 0x61a   :  { %14603 = vrcp.f32 %v18268_v35 }
 0x61b   :  { %14605 = vrcp.f32 %v18262_v15 }
 0x621   :  { %v18417_v2 = vpop.f32.mrb[152].mxu1 }
 0x622   :  { %22344 = vst [vmem:[#allocation61_spill] sm:$0xff] %v18417_v2  ;;  %v13362_v6 = vpop.f32.mrb[153].mxu1 }
 0x623   :  { %v18421_v60 = vpop.f32.mrb[154].mxu1  ;;  %v4480_v6 = vsel %vm4140_vm3, %v18429_v13, -inf }
 0x624   :  { %22347 = vst [vmem:[#allocation88_spill] sm:$0xff] %v18421_v60  ;;  %v13363_v38 = vpop.f32.mrb[155].mxu1 }
 0x625   :  { %v18437_v38 = vpop.eup %14593 }
 0x626   :  { %v5113_v5 = vsel %vm4140_vm3, %v18437_v38, 0.0  ;;  %v18455_v11 = vpop.eup %14595 }
 0x62b   :  { %4478 = vmax.xlane.f32.xlu1 %v4477_v53  ;;  %v18461_v53 = vpop.eup %14597 }
 0x62d   :  { %4481 = vmax.xlane.f32.xlu0 %v4480_v6 }
 0x62f   :  { %5117 = vadd.xlane.f32.xlu1 %v5116_v55  ;;  %v5122_v55 = vsel %vm4140_vm3, %v18455_v11, 0.0 }
 0x631   :  { %5114 = vadd.xlane.f32.xlu0 %v5113_v5  ;;  %v18451_v46 = vpop.f32.mrb[156].mxu0  ;;  %v5119_v5 = vsel %vm4140_vm3, %v18461_v53, 0.0 }
 0x632   :  { %22356 = vst [vmem:[#allocation64_spill] sm:$0xff] %v18451_v46  ;;  %v13368_v16 = vpop.f32.mrb[157].mxu0 }
 0x633   :  { %4487 = vmax.xlane.f32.xlu1 %v4486_v26  ;;  %v18457_v61 = vpop.f32.mrb[158].mxu0 }
 0x634   :  { %22357 = vst [vmem:[#allocation132_spill] sm:$0xff] %v18457_v61  ;;  %v13369_v6 = vpop.f32.mrb[159].mxu0 }
 0x635   :  { %4484 = vmax.xlane.f32.xlu0 %v4483_v14 }
 0x636   :  { %v18463_v8 = vpop.xlane.xlu1 %4454 }
 0x637   :  { %22358 = vst [vmem:[#allocation65_spill] sm:$0xff] %v18463_v8  ;;  %5123 = vadd.xlane.f32.xlu1 %v5122_v55 }
 0x638   :  { %v18468_v19 = vpop.xlane.xlu0 %4457 }
 0x639   :  { %22359 = vst [vmem:[#allocation135_spill] sm:$0xff] %v18468_v19  ;;  %5120 = vadd.xlane.f32.xlu0 %v5119_v5  ;;  %v18473_v16 = vpop.f32.mrb[160].mxu0  ;;  %v14600_v5 = vpop.eup %14599 }
 0x63a   :  { %22360 = vst [vmem:[#allocation32_spill] sm:$0xff] %v18473_v16  ;;  %v18476_v26 = vpop.xlane.xlu1 %5093  ;;  %v13380_v14 = vpop.f32.mrb[161].mxu0  ;;  %v5472_v15 = vmul.f32 %v14600_v5, %v22367_v25  ;;  %v22372_v25 = vld [vmem:[#allocation81_spill] sm:$0xff] }
 0x63b   :  { %v18478_v6 = vpop.f32.mrb[162].mxu0  ;;  %v14602_v14 = vpop.eup %14601 }
 0x63c   :  { %22361 = vst [vmem:[#allocation30_spill] sm:$0xff] %v18478_v6  ;;  %v18480_v46 = vpop.xlane.xlu0 %5090  ;;  %v13381_v10 = vpop.f32.mrb[163].mxu0 }
 0x63d   :  { %v14604_v3 = vpop.eup %14603 }
 0x63e   :  { %v18483_v55 = vpop.xlane.xlu1 %4463  ;;  %v14606_v39 = vpop.eup %14605 }
 0x63f   :  { %22362 = vst [vmem:[#allocation97_spill] sm:$0xff] %v18483_v55  ;;  %v22370_v55 = vld [vmem:[#allocation75_spill] sm:$0xff]  ;;  %v5469_v5 = vmul.f32 %v14606_v39, %v22372_v25  ;;  %v22375_v39 = vld [vmem:[#allocation46_spill] sm:$0xff]  ;;  %v22380_v25 = vld [vmem:[#allocation93_spill] sm:$0xff] }
 0x640   :  { %v18485_v61 = vpop.xlane.xlu0 %4460  ;;  %v5470_v19 = vmul.f32 %v14604_v3, %v22370_v55 }
 0x641   :  { %22363 = vst [vmem:[#allocation94_spill] sm:$0xff] %v18485_v61  ;;  %v18487_v54 = vpop.f32.mrb[156].mxu1 }
 0x642   :  { %22364 = vst [vmem:[#allocation96_spill] sm:$0xff] %v18487_v54  ;;  %v18489_v16 = vpop.f32.mrb[164].mxu0  ;;  %v18491_v35 = vpop.xlane.xlu1 %5099  ;;  %v22369_v54 = vld [vmem:[#allocation73_spill] sm:$0xff] }
 0x643   :  { %22365 = vst [vmem:[#allocation95_spill] sm:$0xff] %v18489_v16  ;;  %v13374_v2 = vpop.f32.mrb[157].mxu1  ;;  %v13392_v60 = vpop.f32.mrb[165].mxu0  ;;  %v5471_v61 = vmul.f32 %v14602_v14, %v22369_v54  ;;  %v5573_v14 = vpack.c.bf16 %v5470_v19, %v5469_v5  ;;  %v22381_v5 = vld [vmem:[#allocation111_spill] sm:$0xff] }
 0x644   :  { %v18493_v6 = vpop.f32.mrb[158].mxu1  ;;  %v18496_v10 = vpop.f32.mrb[166].mxu0  ;;  %v22371_v2 = vld [vmem:[#allocation48_spill] sm:$0xff] }
 0x645   :  { %22366 = vst [vmem:[#allocation137_spill] sm:$0xff] %v18493_v6  ;;  %22368 = vst [vmem:[#allocation139_spill] sm:$0xff] %v18496_v10  ;;  %v13375_v0 = vpop.f32.mrb[159].mxu1  ;;  %v13393_v22 = vpop.f32.mrb[167].mxu0  ;;  %v5574_v60 = vpack.c.bf16 %v5472_v15, %v5471_v61 }
 0x646   :  { %v18498_v13 = vpop.xlane.xlu0 %5096  ;;  %v6789_v16 = vpop.permute.xlu1 %6788 }
 0x647   :  { %13479 = vmatpush3.bf16.msra.mxu1 %v6789_v16 }
 0x648   :  { %6976 = vrot.lane.b32.xlu1 %v22371_v2, %s15171_s29  ;;  %13490 = vmatprep.subr.bf16.mxu1 %v22207_v59 }
 0x64a   :  { %v6742_v10 = vpop.permute.xlu0 %6741  ;;  %v18506_v0 = vpop.f32.mrb[168].mxu0  ;;  %13481 = vmatmul.mubr.msk.bf16.vlgmr.msra.gmra.mrb[192].mxu1 %vm4140_vm3, %v5574_v60 }
 0x64b   :  { %22373 = vst [vmem:[#allocation7_spill] sm:$0xff] %v18506_v0  ;;  %13473 = vmatpush3.bf16.msra.mxu0 %v6742_v10  ;;  %v13404_v22 = vpop.f32.mrb[169].mxu0  ;;  %13492 = vmatprep.mubr.msk.bf16.mxu1 %vm15166_vm1, %v22207_v59 }
 0x64c   :  { %v18509_v54 = vpop.f32.mrb[170].mxu0  ;;  %13484 = vmatprep.subr.bf16.mxu0 %v22207_v59  ;;  %v4598_v22 = vsub.f32 %v22381_v5, %v22380_v25  ;;  %v18542_v5 = vld [vmem:[%s21710_s2] sm:$0xff] }
 0x64d   :  { %22374 = vst [vmem:[#allocation74_spill] sm:$0xff] %v18509_v54  ;;  %v13405_v3 = vpop.f32.mrb[171].mxu0 }
 0x64e   :  { %13475 = vmatmul.mubr.msk.bf16.vlgmr.msra.gmra.mrb[192].mxu0 %vm4140_vm3, %v5573_v14  ;;  %v22382_v14 = vld [vmem:[#allocation79_spill] sm:$0xff]  ;;  %v22383_v3 = vld [vmem:[#allocation108_spill] sm:$0xff]  ;;  %v4799_v54 = vmul.f32 1.442695, %v4598_v22 }
 0x64f   :  { %6929 = vrot.lane.b32.xlu0 %v22375_v39, %s15171_s29  ;;  %13486 = vmatprep.mubr.msk.bf16.mxu0 %vm15166_vm1, %v22207_v59  ;;  %v4597_v39 = vsub.f32 %v22383_v3, %v22382_v14  ;;  %v22390_v22 = vld [vmem:[#allocation147_spill] sm:$0xff] }
 0x650   :  { %14607 = vpow2.f32 %v4799_v54 }
 0x651   :  { %v18519_v61 = vpop.f32.mrb[160].mxu1  ;;  %v4797_v6 = vmul.f32 1.442695, %v4597_v39 }
 0x652   :  { %22376 = vst [vmem:[#allocation71_spill] sm:$0xff] %v18519_v61  ;;  %v18521_v16 = vpop.f32.mrb[172].mxu0  ;;  %v13386_v55 = vpop.f32.mrb[161].mxu1 }
 0x653   :  { %22377 = vst [vmem:[#allocation5_spill] sm:$0xff] %v18521_v16  ;;  %v13416_v19 = vpop.f32.mrb[173].mxu0  ;;  %v18523_v15 = vpop.f32.mrb[162].mxu1  ;;  %14609 = vpow2.f32 %v4797_v6  ;;  %v22392_v6 = vld [vmem:[#allocation149_spill] sm:$0xff] }
 0x654   :  { %22378 = vst [vmem:[#allocation40_spill] sm:$0xff] %v18523_v15  ;;  %v18525_v10 = vpop.f32.mrb[174].mxu0  ;;  %v13387_v2 = vpop.f32.mrb[163].mxu1  ;;  %v22386_v19 = vld [vmem:[#allocation92_spill] sm:$0xff]  ;;  %v22387_v15 = vld [vmem:[#allocation110_spill] sm:$0xff] }
 0x655   :  { %22379 = vst [vmem:[#allocation38_spill] sm:$0xff] %v18525_v10  ;;  %v13417_v60 = vpop.f32.mrb[175].mxu0  ;;  %v4600_v8 = vsub.f32 %v22387_v15, %v22386_v19  ;;  %v22388_v2 = vld [vmem:[#allocation78_spill] sm:$0xff]  ;;  %v18551_v15 = vld [vmem:[%s21710_s2 + $0x8] sm:$0xff]  ;;  %s15172_s2 = smov 8  }
 0x656   :  { %v22389_v60 = vld [vmem:[#allocation109_spill] sm:$0xff]  ;;  %v18555_v54 = vadd.f32 %v18551_v15, %v22392_v6 }
 0x657   :  { %v4599_v10 = vsub.f32 %v22389_v60, %v22388_v2  ;;  %v4803_v25 = vmul.f32 1.442695, %v4600_v8  ;;  %v22400_v6 = vld [vmem:[#allocation153_spill] sm:$0xff] }
 0x658   :  { %22393 = vst [vmem:[#allocation67_spill] sm:$0xff] %v18555_v54  ;;  %v4492_v2 = vsel %vm4140_vm3, %v18555_v54, -inf }
 0x659   :  { %v4801_v14 = vmul.f32 1.442695, %v4599_v10  ;;  %14611 = vpow2.f32 %v4803_v25 }
 0x65a   :  { %v18563_v10 = vpop.eup %14607 }
 0x65b   :  { %14613 = vpow2.f32 %v4801_v14  ;;  %22396 = vst [vmem:[#allocation101_spill] sm:$0xff] %v18563_v10  ;;  %v5128_v14 = vsel %vm4140_vm3, %v18563_v10, 0.0  ;;  %v22421_v10 = vld [vmem:[#allocation86_spill] sm:$0xff] }
 0x65c   :  { %14615 = vrcp.f32 %v18290_v63 }
 0x65d   :  { %v18531_v0 = vpop.f32.mrb[164].mxu1  ;;  %v18567_v60 = vpop.eup %14609  ;;  %14617 = vrcp.f32 %v18283_v34 }
 0x65e   :  { %22384 = vst [vmem:[#allocation103_spill] sm:$0xff] %v18531_v0  ;;  %v13398_v61 = vpop.f32.mrb[165].mxu1  ;;  %22397 = vst [vmem:[#allocation141_spill] sm:$0xff] %v18567_v60  ;;  %14619 = vrcp.f32 %v18287_v32 }
 0x65f   :  { %v18533_v16 = vpop.f32.mrb[166].mxu1  ;;  %v18546_v61 = vadd.f32 %v18542_v5, %v22390_v22  ;;  %v22398_v22 = vld [vmem:[#allocation156_spill] sm:$0xff]  ;;  %14621 = vrcp.f32 %v18281_v7 }
 0x660   :  { %22385 = vst [vmem:[#allocation77_spill] sm:$0xff] %v18533_v16  ;;  %v13399_v55 = vpop.f32.mrb[167].mxu1  ;;  %v18571_v25 = vadd.f32 %v18551_v15, %v22398_v22 }
 0x661   :  { %22391 = vst [vmem:[#allocation100_spill] sm:$0xff] %v18546_v61  ;;  %v4489_v55 = vsel %vm4140_vm3, %v18546_v61, -inf }
 0x662   :  { %22399 = vst [vmem:[#allocation143_spill] sm:$0xff] %v18571_v25  ;;  %v4498_v22 = vsel %vm4140_vm3, %v18571_v25, -inf }
 0x669   :  { %v18557_v8 = vpop.f32.mrb[168].mxu1 }
 0x66a   :  { %22394 = vst [vmem:[#allocation102_spill] sm:$0xff] %v18557_v8  ;;  %v13410_v3 = vpop.f32.mrb[169].mxu1 }
 0x66b   :  { %v18559_v39 = vpop.f32.mrb[170].mxu1  ;;  %v18577_v3 = vadd.f32 %v18542_v5, %v22400_v6 }
 0x66c   :  { %22395 = vst [vmem:[#allocation66_spill] sm:$0xff] %v18559_v39  ;;  %4490 = vmax.xlane.f32.xlu1 %v4489_v55  ;;  %v13411_v19 = vpop.f32.mrb[171].mxu1  ;;  %v5125_v55 = vsel %vm4140_vm3, %v18567_v60, 0.0  ;;  %v18587_v39 = vpop.eup %14611  ;;  %v22422_v60 = vld [vmem:[#allocation56_spill] sm:$0xff] }
 0x66d   :  { %22401 = vst [vmem:[#allocation148_spill] sm:$0xff] %v18577_v3  ;;  %22404 = vst [vmem:[#allocation73_spill] sm:$0xff] %v18587_v39  ;;  %v4495_v6 = vsel %vm4140_vm3, %v18577_v3, -inf }
 0x66e   :  { %4493 = vmax.xlane.f32.xlu0 %v4492_v2 }
 0x670   :  { %5129 = vadd.xlane.f32.xlu1 %v5128_v14  ;;  %v18591_v14 = vpop.eup %14613 }
 0x671   :  { %v18581_v19 = vpop.f32.mrb[172].mxu1  ;;  %22405 = vst [vmem:[#allocation75_spill] sm:$0xff] %v18591_v14 }
 0x672   :  { %22402 = vst [vmem:[#allocation146_spill] sm:$0xff] %v18581_v19  ;;  %5126 = vadd.xlane.f32.xlu0 %v5125_v55  ;;  %v13422_v8 = vpop.f32.mrb[173].mxu1 }
 0x673   :  { %v18583_v2 = vpop.f32.mrb[174].mxu1  ;;  %v5134_v8 = vsel %vm4140_vm3, %v18587_v39, 0.0 }
 0x674   :  { %22403 = vst [vmem:[#allocation80_spill] sm:$0xff] %v18583_v2  ;;  %4499 = vmax.xlane.f32.xlu1 %v4498_v22  ;;  %v13423_v0 = vpop.f32.mrb[175].mxu1  ;;  %v5131_v22 = vsel %vm4140_vm3, %v18591_v14, 0.0 }
 0x676   :  { %4496 = vmax.xlane.f32.xlu0 %v4495_v6 }
 0x677   :  { %v18593_v16 = vpop.f32.mrb[176].mxu0  ;;  %v18595_v19 = vpop.xlane.xlu1 %4466 }
 0x678   :  { %22406 = vst [vmem:[#allocation48_spill] sm:$0xff] %v18593_v16  ;;  %22407 = vst [vmem:[#allocation81_spill] sm:$0xff] %v18595_v19  ;;  %v13428_v55 = vpop.f32.mrb[177].mxu0  ;;  %5135 = vadd.xlane.f32.xlu1 %v5134_v8 }
 0x679   :  { %v18600_v2 = vpop.f32.mrb[178].mxu0  ;;  %v18602_v0 = vpop.xlane.xlu0 %4469 }
 0x67a   :  { %22408 = vst [vmem:[#allocation46_spill] sm:$0xff] %v18600_v2  ;;  %22409 = vst [vmem:[#allocation93_spill] sm:$0xff] %v18602_v0  ;;  %v18609_v3 = vpop.f32.mrb[176].mxu1  ;;  %5132 = vadd.xlane.f32.xlu0 %v5131_v22  ;;  %v13429_v25 = vpop.f32.mrb[179].mxu0 }
 0x67b   :  { %22410 = vst [vmem:[#allocation111_spill] sm:$0xff] %v18609_v3  ;;  %v13434_v63 = vpop.f32.mrb[177].mxu1  ;;  %v18613_v8 = vpop.xlane.xlu1 %5105 }
 0x67c   :  { %v18615_v55 = vpop.f32.mrb[178].mxu1  ;;  %v14616_v0 = vpop.eup %14615 }
 0x67d   :  { %22411 = vst [vmem:[#allocation79_spill] sm:$0xff] %v18615_v55  ;;  %v13435_v34 = vpop.f32.mrb[179].mxu1  ;;  %v18619_v61 = vpop.xlane.xlu0 %5102  ;;  %v5475_v7 = vmul.f32 %v14616_v0, %v22418_v47  ;;  %v22423_v47 = vld [vmem:[#allocation54_spill] sm:$0xff]  ;;  %v22428_v0 = vld [vmem:[#allocation116_spill] sm:$0xff] }
 0x67e   :  { %v14618_v34 = vpop.eup %14617 }
 0x67f   :  { %v18621_v6 = vpop.f32.mrb[180].mxu0  ;;  %v18623_v16 = vpop.xlane.xlu1 %4475 }
 0x680   :  { %22412 = vst [vmem:[#allocation108_spill] sm:$0xff] %v18621_v6  ;;  %22413 = vst [vmem:[#allocation92_spill] sm:$0xff] %v18623_v16  ;;  %v13440_v25 = vpop.f32.mrb[181].mxu0  ;;  %v14620_v19 = vpop.eup %14619  ;;  %v22419_v6 = vld [vmem:[#allocation87_spill] sm:$0xff] }
 0x681   :  { %v18625_v22 = vpop.f32.mrb[182].mxu0  ;;  %v18627_v32 = vpop.xlane.xlu0 %4472 }
 0x682   :  { %22414 = vst [vmem:[#allocation110_spill] sm:$0xff] %v18625_v22  ;;  %22415 = vst [vmem:[#allocation78_spill] sm:$0xff] %v18627_v32  ;;  %v18631_v63 = vpop.f32.mrb[180].mxu1  ;;  %v13441_v2 = vpop.f32.mrb[183].mxu0  ;;  %v5474_v22 = vmul.f32 %v14618_v34, %v22419_v6 }
 0x683   :  { %22416 = vst [vmem:[#allocation109_spill] sm:$0xff] %v18631_v63  ;;  %v13446_v54 = vpop.f32.mrb[181].mxu1  ;;  %v18633_v3 = vpop.xlane.xlu1 %5111  ;;  %v22420_v2 = vld [vmem:[#allocation70_spill] sm:$0xff]  ;;  %v22435_v63 = vld [vmem:[#allocation117_spill] sm:$0xff] }
 0x684   :  { %v18635_v55 = vpop.f32.mrb[182].mxu1  ;;  %v14622_v32 = vpop.eup %14621  ;;  %v5476_v24 = vmul.f32 %v14620_v19, %v22420_v2  ;;  %v22427_v19 = vld [vmem:[#allocation19_spill] sm:$0xff] }
 0x685   :  { %22417 = vst [vmem:[#allocation147_spill] sm:$0xff] %v18635_v55  ;;  %v13447_v16 = vpop.f32.mrb[183].mxu1  ;;  %v18639_v27 = vpop.xlane.xlu0 %5108  ;;  %v5473_v43 = vmul.f32 %v14622_v32, %v22421_v10  ;;  %v4601_v6 = vsub.f32 %v22428_v0, %v22427_v19  ;;  %v22434_v0 = vld [vmem:[#allocation98_spill] sm:$0xff] }
 0x686   :  { %v5576_v25 = vpack.c.bf16 %v5476_v24, %v5475_v7  ;;  %v22426_v24 = vld [vmem:[#allocation119_spill] sm:$0xff]  ;;  %v4603_v55 = vsub.f32 %v22435_v63, %v22434_v0  ;;  %v22436_v7 = vld [vmem:[#allocation154_spill] sm:$0xff] }
 0x687   :  { %v6883_v54 = vpop.permute.xlu1 %6882  ;;  %v5575_v16 = vpack.c.bf16 %v5474_v22, %v5473_v43  ;;  %v22425_v43 = vld [vmem:[#allocation20_spill] sm:$0xff] }
 0x688   :  { %13491 = vmatpush3.bf16.msra.mxu1 %v6883_v54  ;;  %v4602_v10 = vsub.f32 %v22426_v24, %v22425_v43  ;;  %v4805_v43 = vmul.f32 1.442695, %v4601_v6  ;;  %v22432_v24 = vld [vmem:[#allocation99_spill] sm:$0xff] }
 0x689   :  { %v6836_v39 = vpop.permute.xlu0 %6835  ;;  %7070 = vrot.lane.b32.xlu1 %v22422_v60, %s15171_s29  ;;  %13502 = vmatprep.subr.bf16.mxu1 %v22207_v59 }
 0x68a   :  { %13485 = vmatpush3.bf16.msra.mxu0 %v6836_v39  ;;  %v4807_v54 = vmul.f32 1.442695, %v4602_v10  ;;  %v22438_v10 = vld [vmem:[#allocation157_spill] sm:$0xff] }
 0x68b   :  { %13496 = vmatprep.subr.bf16.mxu0 %v22207_v59  ;;  %13493 = vmatmul.mubr.msk.bf16.vlgmr.msra.gmra.mrb[196].mxu1 %vm4140_vm3, %v5576_v25 }
 0x68c   :  { %13504 = vmatprep.mubr.msk.bf16.mxu1 %vm15166_vm1, %v22207_v59  ;;  %14623 = vpow2.f32 %v4807_v54 }
 0x68d   :  { %13487 = vmatmul.mubr.msk.bf16.vlgmr.msra.gmra.mrb[196].mxu0 %vm4140_vm3, %v5575_v16  ;;  %14625 = vpow2.f32 %v4805_v43  ;;  %v22442_v43 = vld [vmem:[#allocation158_spill] sm:$0xff] }
 0x68e   :  { %13498 = vmatprep.mubr.msk.bf16.mxu0 %vm15166_vm1, %v22207_v59 }
 0x690   :  { %7023 = vrot.lane.b32.xlu0 %v22423_v47, %s15171_s29 }
 0x696   :  { %v18687_v54 = vpop.eup %14623 }
 0x69b   :  { %v18657_v39 = vpop.f32.mrb[184].mxu1 }
 0x69c   :  { %22424 = vst [vmem:[#allocation149_spill] sm:$0xff] %v18657_v39  ;;  %v13458_v60 = vpop.f32.mrb[185].mxu1  ;;  %v18683_v39 = vadd.f32 %v18551_v15, %v22438_v10 }
 0x69d   :  { %v18663_v22 = vpop.f32.mrb[184].mxu0  ;;  %v18665_v32 = vpop.f32.mrb[186].mxu1  ;;  %v22433_v60 = vld [vmem:[#allocation118_spill] sm:$0xff] }
 0x69e   :  { %22429 = vst [vmem:[#allocation156_spill] sm:$0xff] %v18663_v22  ;;  %22430 = vst [vmem:[#allocation153_spill] sm:$0xff] %v18665_v32  ;;  %v13452_v34 = vpop.f32.mrb[185].mxu0  ;;  %v13459_v25 = vpop.f32.mrb[187].mxu1  ;;  %v4604_v19 = vsub.f32 %v22433_v60, %v22432_v24  ;;  %v4504_v63 = vsel %vm4140_vm3, %v18683_v39, -inf  ;;  %v18701_v24 = vadd.f32 %v18542_v5, %v22442_v43 }
 0x69f   :  { %v18669_v2 = vpop.f32.mrb[186].mxu0  ;;  %v18679_v34 = vadd.f32 %v18542_v5, %v22436_v7  ;;  %v4809_v25 = vmul.f32 1.442695, %v4603_v55  ;;  %22439 = vst [vmem:[#allocation70_spill] sm:$0xff] %v18683_v39  ;;  %v22440_v7 = vld [vmem:[#allocation160_spill] sm:$0xff]  ;;  %v22446_v39 = vld [vmem:[#allocation2_spill] sm:$0xff] }
 0x6a0   :  { %22431 = vst [vmem:[#allocation13_spill] sm:$0xff] %v18669_v2  ;;  %v13453_v47 = vpop.f32.mrb[187].mxu0  ;;  %v4811_v14 = vmul.f32 1.442695, %v4604_v19  ;;  %v18695_v55 = vadd.f32 %v18551_v15, %v22440_v7  ;;  %22443 = vst [vmem:[#allocation56_spill] sm:$0xff] %v18701_v24 }
 0x6a1   :  { %22437 = vst [vmem:[#allocation87_spill] sm:$0xff] %v18679_v34  ;;  %v4501_v6 = vsel %vm4140_vm3, %v18679_v34, -inf  ;;  %v18691_v47 = vpop.eup %14625 }
 0x6a2   :  { %14627 = vpow2.f32 %v4811_v14  ;;  %22441 = vst [vmem:[#allocation86_spill] sm:$0xff] %v18695_v55  ;;  %v5140_v14 = vsel %vm4140_vm3, %v18687_v54, 0.0  ;;  %v5137_v60 = vsel %vm4140_vm3, %v18691_v47, 0.0  ;;  %v4510_v19 = vsel %vm4140_vm3, %v18695_v55, -inf }
 0x6a3   :  { %14629 = vpow2.f32 %v4809_v25  ;;  %v4507_v25 = vsel %vm4140_vm3, %v18701_v24, -inf }
 0x6a4   :  { %14631 = vrcp.f32 %v18385_v49 }
 0x6a5   :  { %14633 = vrcp.f32 %v18375_v48 }
 0x6a6   :  { %14635 = vrcp.f32 %v18383_v58 }
 0x6a7   :  { %14637 = vrcp.f32 %v18370_v31 }
 0x6ac   :  { %v18707_v0 = vpop.eup %14627 }
 0x6ad   :  { %4502 = vmax.xlane.f32.xlu1 %v4501_v6  ;;  %v18711_v10 = vpop.eup %14629 }
 0x6af   :  { %4505 = vmax.xlane.f32.xlu0 %v4504_v63  ;;  %v5146_v63 = vsel %vm4140_vm3, %v18707_v0, 0.0 }
 0x6b1   :  { %5141 = vadd.xlane.f32.xlu1 %v5140_v14  ;;  %v5143_v14 = vsel %vm4140_vm3, %v18711_v10, 0.0 }
 0x6b3   :  { %5138 = vadd.xlane.f32.xlu0 %v5137_v60 }
 0x6b5   :  { %4511 = vmax.xlane.f32.xlu1 %v4510_v19 }
 0x6b7   :  { %4508 = vmax.xlane.f32.xlu0 %v4507_v25  ;;  %v14632_v25 = vpop.eup %14631 }
 0x6b8   :  { %v18713_v6 = vpop.xlane.xlu1 %4478  ;;  %v5479_v58 = vmul.f32 %v14632_v25, %v18109_v29 }
 0x6b9   :  { %5147 = vadd.xlane.f32.xlu1 %v5146_v63  ;;  %v14634_v63 = vpop.eup %14633 }
 0x6ba   :  { %v18718_v7 = vpop.xlane.xlu0 %4481  ;;  %v14636_v22 = vpop.eup %14635  ;;  %v5477_v31 = vmul.f32 %v14634_v63, %v18069_v9  ;;  %v22448_v9 = vld [vmem:[#allocation127_spill] sm:$0xff] }
 0x6bb   :  { %5144 = vadd.xlane.f32.xlu0 %v5143_v14  ;;  %v14638_v48 = vpop.eup %14637  ;;  %v5480_v14 = vmul.f32 %v14636_v22, %v18102_v12  ;;  %v4606_v12 = vsub.f32 %v22448_v9, %v18034_v62  ;;  %v22456_v9 = vld [vmem:[#allocation104_spill] sm:$0xff] }
 0x6bc   :  { %v18725_v43 = vpop.xlane.xlu1 %5117  ;;  %v5478_v24 = vmul.f32 %v14638_v48, %v18055_v1  ;;  %v22447_v1 = vld [vmem:[#allocation4_spill] sm:$0xff] }
 0x6bd   :  { %v5578_v34 = vpack.c.bf16 %v5480_v14, %v5479_v58  ;;  %v4815_v48 = vmul.f32 1.442695, %v4606_v12  ;;  %v22454_v14 = vld [vmem:[#allocation105_spill] sm:$0xff] }
 0x6be   :  { %v18727_v60 = vpop.xlane.xlu0 %5114  ;;  %v22460_v12 = vld [vmem:[#allocation161_spill] sm:$0xff] }
 0x6bf   :  { %14639 = vpow2.f32 %v4815_v48 }
 0x6c0   :  { %v18729_v19 = vpop.xlane.xlu1 %4487 }
 0x6c1   :  { %22444 = vst [vmem:[#allocation54_spill] sm:$0xff] %v18729_v19  ;;  %v22458_v19 = vld [vmem:[#allocation159_spill] sm:$0xff] }
 0x6c2   :  { %v18731_v49 = vpop.xlane.xlu0 %4484 }
 0x6c3   :  { %22445 = vst [vmem:[#allocation20_spill] sm:$0xff] %v18731_v49  ;;  %v5577_v49 = vpack.c.bf16 %v5478_v24, %v5477_v31 }
 0x6c4   :  { %v18733_v16 = vpop.xlane.xlu1 %5123 }
 0x6c6   :  { %v18735_v2 = vpop.xlane.xlu0 %5120 }
 0x6c8   :  { %v6977_v32 = vpop.permute.xlu1 %6976 }
 0x6c9   :  { %13503 = vmatpush3.bf16.msra.mxu1 %v6977_v32  ;;  %v18783_v48 = vpop.eup %14639 }
 0x6ca   :  { %v6930_v55 = vpop.permute.xlu0 %6929  ;;  %7164 = vrot.lane.b32.xlu1 %v22446_v39, %s15171_s29  ;;  %13514 = vmatprep.subr.bf16.mxu1 %v22207_v59  ;;  %v22450_v39 = vld [vmem:[#allocation124_spill] sm:$0xff] }
 0x6cb   :  { %13497 = vmatpush3.bf16.msra.mxu0 %v6930_v55  ;;  %v4605_v22 = vsub.f32 %v22450_v39, %v18026_v44  ;;  %v22455_v44 = vld [vmem:[#allocation126_spill] sm:$0xff]  ;;  %v22457_v39 = vld [vmem:[#allocation125_spill] sm:$0xff] }
 0x6cc   :  { %13508 = vmatprep.subr.bf16.mxu0 %v22207_v59  ;;  %13505 = vmatmul.mubr.msk.bf16.vlgmr.msra.gmra.mrb[200].mxu1 %vm4140_vm3, %v5578_v34 }
 0x6cd   :  { %13516 = vmatprep.mubr.msk.bf16.mxu1 %vm15166_vm1, %v22207_v59  ;;  %v4813_v31 = vmul.f32 1.442695, %v4605_v22 }
 0x6ce   :  { %13499 = vmatmul.mubr.msk.bf16.vlgmr.msra.gmra.mrb[200].mxu0 %vm4140_vm3, %v5577_v49 }
 0x6cf   :  { %13510 = vmatprep.mubr.msk.bf16.mxu0 %vm15166_vm1, %v22207_v59  ;;  %14641 = vpow2.f32 %v4813_v31 }
 0x6d1   :  { %7117 = vrot.lane.b32.xlu0 %v22447_v1, %s15171_s29  ;;  %v4608_v1 = vsub.f32 %v22455_v44, %v22454_v14  ;;  %v5152_v44 = vsel %vm4140_vm3, %v18783_v48, 0.0 }
 0x6d9   :  { %v18787_v31 = vpop.eup %14641 }
 0x6dc   :  { %v18755_v29 = vpop.f32.mrb[188].mxu1 }
 0x6dd   :  { %22449 = vst [vmem:[#allocation119_spill] sm:$0xff] %v18755_v29  ;;  %v13470_v32 = vpop.f32.mrb[189].mxu1  ;;  %v18779_v29 = vadd.f32 %v18551_v15, %v22460_v12 }
 0x6de   :  { %v18759_v34 = vpop.f32.mrb[188].mxu0  ;;  %v18761_v55 = vpop.f32.mrb[190].mxu1  ;;  %v4607_v32 = vsub.f32 %v22457_v39, %v22456_v9  ;;  %v5149_v9 = vsel %vm4140_vm3, %v18787_v31, 0.0 }
 0x6df   :  { %22451 = vst [vmem:[#allocation19_spill] sm:$0xff] %v18759_v34  ;;  %22452 = vst [vmem:[#allocation116_spill] sm:$0xff] %v18761_v55  ;;  %v13464_v24 = vpop.f32.mrb[189].mxu0  ;;  %v13471_v25 = vpop.f32.mrb[191].mxu1 }
 0x6e0   :  { %v18765_v63 = vpop.f32.mrb[190].mxu0  ;;  %v4819_v24 = vmul.f32 1.442695, %v4608_v1  ;;  %v18775_v25 = vadd.f32 %v18542_v5, %v22458_v19  ;;  %v4817_v49 = vmul.f32 1.442695, %v4607_v32  ;;  %22461 = vst [vmem:[#allocation98_spill] sm:$0xff] %v18779_v29 }
 0x6e1   :  { %22453 = vst [vmem:[#allocation99_spill] sm:$0xff] %v18765_v63  ;;  %v13465_v58 = vpop.f32.mrb[191].mxu0  ;;  %v22462_v19 = vld [vmem:[#allocation72_spill] sm:$0xff] }
 0x6e2   :  { %22459 = vst [vmem:[#allocation118_spill] sm:$0xff] %v18775_v25  ;;  %14643 = vpow2.f32 %v4819_v24  ;;  %v4513_v22 = vsel %vm4140_vm3, %v18775_v25, -inf  ;;  %v4516_v58 = vsel %vm4140_vm3, %v18779_v29, -inf  ;;  %v18791_v14 = vadd.f32 %v18551_v15, %v22462_v19 }
 0x6e3   :  { %14645 = vpow2.f32 %v4817_v49  ;;  %v22464_v49 = vld [vmem:[#allocation68_spill] sm:$0xff] }
 0x6e4   :  { %22463 = vst [vmem:[#allocation117_spill] sm:$0xff] %v18791_v14  ;;  %v18797_v1 = vadd.f32 %v18542_v5, %v22464_v49  ;;  %v4522_v39 = vsel %vm4140_vm3, %v18791_v14, -inf  ;;  %14647 = vrcp.f32 %v18498_v13 }
 0x6e5   :  { %14649 = vrcp.f32 %v18480_v46 }
 0x6e6   :  { %22465 = vst [vmem:[#allocation154_spill] sm:$0xff] %v18797_v1  ;;  %v4519_v15 = vsel %vm4140_vm3, %v18797_v1, -inf  ;;  %14651 = vrcp.f32 %v18491_v35  ;;  %v22466_v1 = vld [vmem:[#allocation9_spill] sm:$0xff] }
 0x6e7   :  { %14653 = vrcp.f32 %v18476_v26 }
 0x6ec   :  { %v18803_v32 = vpop.eup %14643 }
 0x6ed   :  { %v18807_v24 = vpop.eup %14645  ;;  %v5158_v5 = vsel %vm4140_vm3, %v18803_v32, 0.0 }
 0x6ee   :  { %4514 = vmax.xlane.f32.xlu1 %v4513_v22 }
 0x6f0   :  { %4517 = vmax.xlane.f32.xlu0 %v4516_v58  ;;  %v5155_v58 = vsel %vm4140_vm3, %v18807_v24, 0.0 }
 0x6f2   :  { %5153 = vadd.xlane.f32.xlu1 %v5152_v44 }
 0x6f4   :  { %5150 = vadd.xlane.f32.xlu0 %v5149_v9  ;;  %v14648_v9 = vpop.eup %14647 }
 0x6f5   :  { %v5483_v35 = vmul.f32 %v14648_v9, %v18266_v4  ;;  %v22469_v4 = vld [vmem:[#allocation138_spill] sm:$0xff] }
 0x6f6   :  { %4523 = vmax.xlane.f32.xlu1 %v4522_v39  ;;  %v14650_v39 = vpop.eup %14649 }
 0x6f7   :  { %v5481_v26 = vmul.f32 %v14650_v39, %v18231_v42  ;;  %v22468_v42 = vld [vmem:[#allocation133_spill] sm:$0xff] }
 0x6f8   :  { %4520 = vmax.xlane.f32.xlu0 %v4519_v15 }
 0x6f9   :  { %v18809_v12 = vpop.xlane.xlu1 %4490 }
 0x6fa   :  { %5159 = vadd.xlane.f32.xlu1 %v5158_v5  ;;  %v14652_v5 = vpop.eup %14651 }
 0x6fb   :  { %v18814_v22 = vpop.xlane.xlu0 %4493  ;;  %v14654_v46 = vpop.eup %14653 }
 0x6fc   :  { %5156 = vadd.xlane.f32.xlu0 %v5155_v58  ;;  %v5484_v58 = vmul.f32 %v14652_v5, %v18260_v37  ;;  %v5482_v63 = vmul.f32 %v14654_v46, %v18225_v41  ;;  %v22467_v41 = vld [vmem:[#allocation8_spill] sm:$0xff]  ;;  %v4609_v37 = vsub.f32 %v22468_v42, %v18053_v36 }
 0x6fd   :  { %v18821_v19 = vpop.xlane.xlu1 %5129 }
 0x6fe   :  { %v5580_v14 = vpack.c.bf16 %v5484_v58, %v5483_v35  ;;  %v5579_v29 = vpack.c.bf16 %v5482_v63, %v5481_v26  ;;  %v22470_v63 = vld [vmem:[#allocation136_spill] sm:$0xff] }
 0x6ff   :  { %v18823_v44 = vpop.xlane.xlu0 %5126 }
 0x701   :  { %v18825_v49 = vpop.xlane.xlu1 %4499 }
 0x703   :  { %v18827_v13 = vpop.xlane.xlu0 %4496 }
 0x705   :  { %v18829_v15 = vpop.xlane.xlu1 %5135 }
 0x707   :  { %v18831_v62 = vpop.xlane.xlu0 %5132 }
 0x709   :  { %v7071_v34 = vpop.permute.xlu1 %7070 }
 0x70a   :  { %13515 = vmatpush3.bf16.msra.mxu1 %v7071_v34  ;;  %v4610_v34 = vsub.f32 %v22469_v4, %v18077_v57 }
 0x70b   :  { %v7024_v55 = vpop.permute.xlu0 %7023  ;;  %7258 = vrot.lane.b32.xlu1 %v22466_v1, %s15171_s29  ;;  %13526 = vmatprep.subr.bf16.mxu1 %v22207_v59  ;;  %v22472_v1 = vld [vmem:[#allocation134_spill] sm:$0xff] }
 0x70c   :  { %13509 = vmatpush3.bf16.msra.mxu0 %v7024_v55  ;;  %v4821_v55 = vmul.f32 1.442695, %v4609_v37  ;;  %v4611_v9 = vsub.f32 %v22472_v1, %v18061_v52  ;;  %v4823_v39 = vmul.f32 1.442695, %v4610_v34 }
 0x70d   :  { %13520 = vmatprep.subr.bf16.mxu0 %v22207_v59  ;;  %13517 = vmatmul.mubr.msk.bf16.vlgmr.msra.gmra.mrb[204].mxu1 %vm4140_vm3, %v5580_v14  ;;  %v4612_v14 = vsub.f32 %v22470_v63, %v18067_v20 }
 0x70e   :  { %13528 = vmatprep.mubr.msk.bf16.mxu1 %vm15166_vm1, %v22207_v59  ;;  %14655 = vpow2.f32 %v4821_v55 }
 0x70f   :  { %13511 = vmatmul.mubr.msk.bf16.vlgmr.msra.gmra.mrb[204].mxu0 %vm4140_vm3, %v5579_v29  ;;  %v4827_v57 = vmul.f32 1.442695, %v4612_v14  ;;  %14657 = vpow2.f32 %v4823_v39 }
 0x710   :  { %13522 = vmatprep.mubr.msk.bf16.mxu0 %vm15166_vm1, %v22207_v59 }
 0x711   :  { %14659 = vpow2.f32 %v4827_v57 }
 0x712   :  { %7211 = vrot.lane.b32.xlu0 %v22467_v41, %s15171_s29  ;;  %v4825_v41 = vmul.f32 1.442695, %v4611_v9 }
 0x714   :  { %14661 = vpow2.f32 %v4825_v41 }
 0x715   :  { %14663 = vrcp.f32 %v18639_v27 }
 0x716   :  { %14665 = vrcp.f32 %v18619_v61 }
 0x717   :  { %14667 = vrcp.f32 %v18633_v3 }
 0x718   :  { %v18869_v37 = vpop.eup %14655  ;;  %14669 = vrcp.f32 %v18613_v8 }
 0x719   :  { %v18871_v4 = vpop.eup %14657  ;;  %v5161_v34 = vsel %vm4140_vm3, %v18869_v37, 0.0 }
 0x71a   :  { %v5164_v63 = vsel %vm4140_vm3, %v18871_v4, 0.0 }
 0x71b   :  { %v18875_v55 = vpop.eup %14659 }
 0x71c   :  { %v5170_v1 = vsel %vm4140_vm3, %v18875_v55, 0.0 }
 0x71d   :  { %v18855_v29 = vpop.f32.mrb[192].mxu1 }
 0x71e   :  { %22471 = vst [vmem:[#allocation157_spill] sm:$0xff] %v18855_v29  ;;  %v13482_v5 = vpop.f32.mrb[193].mxu1  ;;  %v18879_v14 = vpop.eup %14661 }
 0x71f   :  { %v18859_v46 = vpop.f32.mrb[194].mxu1  ;;  %v5167_v9 = vsel %vm4140_vm3, %v18879_v14, 0.0  ;;  %v14664_v27 = vpop.eup %14663 }
 0x720   :  { %22473 = vst [vmem:[#allocation160_spill] sm:$0xff] %v18859_v46  ;;  %v13483_v26 = vpop.f32.mrb[195].mxu1  ;;  %v5487_v8 = vmul.f32 %v14664_v27, %v18357_v18 }
 0x721   :  { %v18861_v35 = vpop.f32.mrb[192].mxu0 }
 0x722   :  { %22474 = vst [vmem:[#allocation158_spill] sm:$0xff] %v18861_v35  ;;  %v13476_v58 = vpop.f32.mrb[193].mxu0  ;;  %v22477_v35 = vld [vmem:[#allocation15_spill] sm:$0xff] }
 0x723   :  { %v18865_v20 = vpop.f32.mrb[194].mxu0 }
 0x724   :  { %22475 = vst [vmem:[#allocation2_spill] sm:$0xff] %v18865_v20  ;;  %v13477_v42 = vpop.f32.mrb[195].mxu0 }
 0x725   :  { %v22476_v42 = vld [vmem:[#allocation16_spill] sm:$0xff] }
 0x72f   :  { %5162 = vadd.xlane.f32.xlu1 %v5161_v34  ;;  %v14666_v34 = vpop.eup %14665 }
 0x730   :  { %v14668_v61 = vpop.eup %14667 }
 0x731   :  { %5165 = vadd.xlane.f32.xlu0 %v5164_v63  ;;  %v14670_v3 = vpop.eup %14669  ;;  %v5488_v52 = vmul.f32 %v14668_v61, %v18353_v30  ;;  %v22479_v30 = vld [vmem:[#allocation145_spill] sm:$0xff] }
 0x732   :  { %v4614_v18 = vsub.f32 %v22479_v30, %v18124_v40 }
 0x733   :  { %5171 = vadd.xlane.f32.xlu1 %v5170_v1  ;;  %v5582_v29 = vpack.c.bf16 %v5488_v52, %v5487_v8  ;;  %v22481_v52 = vld [vmem:[#allocation21_spill] sm:$0xff] }
 0x735   :  { %5168 = vadd.xlane.f32.xlu0 %v5167_v9  ;;  %v5485_v9 = vmul.f32 %v14666_v34, %v18333_v21 }
 0x73a   :  { %v18885_v39 = vpop.xlane.xlu1 %4502 }
 0x73c   :  { %v18888_v5 = vpop.xlane.xlu0 %4505 }
 0x73e   :  { %v18893_v26 = vpop.xlane.xlu1 %5141 }
 0x740   :  { %v18895_v57 = vpop.xlane.xlu0 %5138 }
 0x742   :  { %v18897_v58 = vpop.xlane.xlu1 %4511 }
 0x744   :  { %v18899_v41 = vpop.xlane.xlu0 %4508  ;;  %7352 = vrot.lane.b32.xlu1 %v22476_v42, %s15171_s29  ;;  %v5486_v42 = vmul.f32 %v14670_v3, %v18329_v33  ;;  %v22478_v33 = vld [vmem:[#allocation140_spill] sm:$0xff] }
 0x745   :  { %v4613_v21 = vsub.f32 %v22478_v33, %v18100_v56 }
 0x746   :  { %v18903_v63 = vpop.xlane.xlu1 %5147  ;;  %v5581_v46 = vpack.c.bf16 %v5486_v42, %v5485_v9 }
 0x748   :  { %v18905_v1 = vpop.xlane.xlu0 %5144 }
 0x74a   :  { %v7165_v36 = vpop.permute.xlu1 %7164 }
 0x74b   :  { %7305 = vrot.lane.b32.xlu0 %v22477_v35, %s15171_s29  ;;  %13527 = vmatpush3.bf16.msra.mxu1 %v7165_v36  ;;  %v4829_v35 = vmul.f32 1.442695, %v4613_v21  ;;  %v22480_v36 = vld [vmem:[#allocation144_spill] sm:$0xff] }
 0x74c   :  { %v7118_v20 = vpop.permute.xlu0 %7117  ;;  %13538 = vmatprep.subr.bf16.mxu1 %v22207_v59 }
 0x74d   :  { %13521 = vmatpush3.bf16.msra.mxu0 %v7118_v20  ;;  %v4616_v20 = vsub.f32 %v22480_v36, %v18120_v51  ;;  %14671 = vpow2.f32 %v4829_v35  ;;  %v22493_v51 = vld [vmem:[#allocation150_spill] sm:$0xff] }
 0x74e   :  { %13532 = vmatprep.subr.bf16.mxu0 %v22207_v59  ;;  %13529 = vmatmul.mubr.msk.bf16.vlgmr.msra.gmra.mrb[208].mxu1 %vm4140_vm3, %v5582_v29  ;;  %v22482_v29 = vld [vmem:[#allocation142_spill] sm:$0xff] }
 0x74f   :  { %13540 = vmatprep.mubr.msk.bf16.mxu1 %vm15166_vm1, %v22207_v59  ;;  %v4615_v27 = vsub.f32 %v22482_v29, %v22481_v52  ;;  %v4835_v34 = vmul.f32 1.442695, %v4616_v20 }
 0x750   :  { %13523 = vmatmul.mubr.msk.bf16.vlgmr.msra.gmra.mrb[208].mxu0 %vm4140_vm3, %v5581_v46  ;;  %v4831_v46 = vmul.f32 1.442695, %v4614_v18 }
 0x751   :  { %13534 = vmatprep.mubr.msk.bf16.mxu0 %vm15166_vm1, %v22207_v59  ;;  %v4833_v61 = vmul.f32 1.442695, %v4615_v27 }
 0x752   :  { %14673 = vpow2.f32 %v4831_v46 }
 0x753   :  { %14675 = vpow2.f32 %v4835_v34 }
 0x754   :  { %14677 = vpow2.f32 %v4833_v61 }
 0x755   :  { %14679 = vrcp.f32 %v18735_v2 }
 0x756   :  { %14681 = vrcp.f32 %v18727_v60 }
 0x757   :  { %v18941_v18 = vpop.eup %14671  ;;  %14683 = vrcp.f32 %v18733_v16 }
 0x758   :  { %v5173_v36 = vsel %vm4140_vm3, %v18941_v18, 0.0  ;;  %14685 = vrcp.f32 %v18725_v43 }
 0x75c   :  { %v18943_v35 = vpop.eup %14673 }
 0x75d   :  { %v18947_v20 = vpop.eup %14675  ;;  %v5176_v52 = vsel %vm4140_vm3, %v18943_v35, 0.0 }
 0x75e   :  { %v18929_v3 = vpop.f32.mrb[196].mxu1  ;;  %v18951_v29 = vpop.eup %14677  ;;  %v5182_v27 = vsel %vm4140_vm3, %v18947_v20, 0.0 }
 0x75f   :  { %22483 = vst [vmem:[#allocation4_spill] sm:$0xff] %v18929_v3  ;;  %v13494_v56 = vpop.f32.mrb[197].mxu1  ;;  %v5179_v46 = vsel %vm4140_vm3, %v18951_v29, 0.0  ;;  %v22494_v3 = vld [vmem:[#allocation155_spill] sm:$0xff] }
 0x760   :  { %v18931_v8 = vpop.f32.mrb[196].mxu0  ;;  %v18933_v40 = vpop.f32.mrb[198].mxu1  ;;  %v22489_v56 = vld [vmem:[#allocation26_spill] sm:$0xff] }
 0x761   :  { %22484 = vst [vmem:[#allocation127_spill] sm:$0xff] %v18931_v8  ;;  %22485 = vst [vmem:[#allocation124_spill] sm:$0xff] %v18933_v40  ;;  %v13488_v9 = vpop.f32.mrb[197].mxu0  ;;  %v13495_v42 = vpop.f32.mrb[199].mxu1  ;;  %v4617_v8 = vsub.f32 %v22493_v51, %v18135_v28  ;;  %v4618_v40 = vsub.f32 %v22494_v3, %v18148_v50  ;;  %v22495_v28 = vld [vmem:[#allocation152_spill] sm:$0xff] }
 0x762   :  { %v18937_v33 = vpop.f32.mrb[198].mxu0  ;;  %v4620_v51 = vsub.f32 %v22495_v28, %v18143_v23 }
 0x763   :  { %22486 = vst [vmem:[#allocation105_spill] sm:$0xff] %v18937_v33  ;;  %v13489_v30 = vpop.f32.mrb[199].mxu0  ;;  %v4839_v3 = vmul.f32 1.442695, %v4618_v40 }
 0x768   :  { %5174 = vadd.xlane.f32.xlu1 %v5173_v36  ;;  %v22491_v36 = vld [vmem:[#allocation23_spill] sm:$0xff] }
 0x76a   :  { %5177 = vadd.xlane.f32.xlu0 %v5176_v52  ;;  %v14680_v52 = vpop.eup %14679 }
 0x76b   :  { %v14682_v60 = vpop.eup %14681  ;;  %v5491_v43 = vmul.f32 %v14680_v52, %v18461_v53 }
 0x76c   :  { %5183 = vadd.xlane.f32.xlu1 %v5182_v27  ;;  %v5489_v21 = vmul.f32 %v14682_v60, %v18437_v38  ;;  %v4837_v38 = vmul.f32 1.442695, %v4617_v8 }
 0x76e   :  { %5180 = vadd.xlane.f32.xlu0 %v5179_v46  ;;  %v14684_v46 = vpop.eup %14683  ;;  %14687 = vpow2.f32 %v4837_v38 }
 0x76f   :  { %v14686_v16 = vpop.eup %14685  ;;  %v5492_v33 = vmul.f32 %v14684_v46, %v18455_v11  ;;  %v22496_v11 = vld [vmem:[#allocation151_spill] sm:$0xff]  ;;  %14689 = vpow2.f32 %v4839_v3 }
 0x770   :  { %v4619_v50 = vsub.f32 %v22496_v11, %v18137_v17  ;;  %v22501_v11 = vld [vmem:[#allocation34_spill] sm:$0xff]  ;;  %v22502_v3 = vld [vmem:[#allocation31_spill] sm:$0xff] }
 0x772   :  { %v4841_v8 = vmul.f32 1.442695, %v4619_v50 }
 0x778   :  { %v19001_v23 = vpop.eup %14687 }
 0x77b   :  { %v18957_v34 = vpop.xlane.xlu1 %4514 }
 0x77c   :  { %22487 = vst [vmem:[#allocation126_spill] sm:$0xff] %v18957_v34 }
 0x77d   :  { %v18960_v61 = vpop.xlane.xlu0 %4517  ;;  %7446 = vrot.lane.b32.xlu1 %v22489_v56, %s15171_s29 }
 0x77e   :  { %22488 = vst [vmem:[#allocation104_spill] sm:$0xff] %v18960_v61  ;;  %v5584_v61 = vpack.c.bf16 %v5492_v33, %v5491_v43  ;;  %v19003_v33 = vpop.eup %14689 }
 0x77f   :  { %v18967_v9 = vpop.xlane.xlu1 %5153  ;;  %v5188_v60 = vsel %vm4140_vm3, %v19003_v33, 0.0 }
 0x781   :  { %v18969_v42 = vpop.xlane.xlu0 %5150 }
 0x783   :  { %v18971_v30 = vpop.xlane.xlu1 %4523 }
 0x784   :  { %22490 = vst [vmem:[#allocation125_spill] sm:$0xff] %v18971_v30  ;;  %7399 = vrot.lane.b32.xlu0 %v22491_v36, %s15171_s29 }
 0x785   :  { %v18975_v2 = vpop.xlane.xlu0 %4520 }
 0x786   :  { %22492 = vst [vmem:[#allocation159_spill] sm:$0xff] %v18975_v2  ;;  %v5490_v2 = vmul.f32 %v14686_v16, %v18433_v45  ;;  %v4843_v45 = vmul.f32 1.442695, %v4620_v51  ;;  %v22508_v16 = vld [vmem:[#allocation82_spill] sm:$0xff] }
 0x787   :  { %v18977_v27 = vpop.xlane.xlu1 %5159 }
 0x788   :  { %v5583_v53 = vpack.c.bf16 %v5490_v2, %v5489_v21  ;;  %14691 = vpow2.f32 %v4843_v45  ;;  %v5185_v21 = vsel %vm4140_vm3, %v19001_v23, 0.0 }
 0x789   :  { %v18979_v56 = vpop.xlane.xlu0 %5156  ;;  %14693 = vpow2.f32 %v4841_v8 }
 0x78a   :  { %14695 = vrcp.f32 %v18831_v62 }
 0x78b   :  { %v7259_v36 = vpop.permute.xlu1 %7258  ;;  %14697 = vrcp.f32 %v18823_v44 }
 0x78c   :  { %13539 = vmatpush3.bf16.msra.mxu1 %v7259_v36  ;;  %14699 = vrcp.f32 %v18829_v15  ;;  %v22504_v15 = vld [vmem:[#allocation141_spill] sm:$0xff] }
 0x78d   :  { %v7212_v30 = vpop.permute.xlu0 %7211  ;;  %13550 = vmatprep.subr.bf16.mxu1 %v22207_v59  ;;  %14701 = vrcp.f32 %v18821_v19  ;;  %v22505_v19 = vld [vmem:[#allocation29_spill] sm:$0xff] }
 0x78e   :  { %13533 = vmatpush3.bf16.msra.mxu0 %v7212_v30 }
 0x78f   :  { %13544 = vmatprep.subr.bf16.mxu0 %v22207_v59  ;;  %13541 = vmatmul.mubr.msk.bf16.vlgmr.msra.gmra.mrb[212].mxu1 %vm4140_vm3, %v5584_v61 }
 0x790   :  { %13552 = vmatprep.mubr.msk.bf16.mxu1 %vm15166_vm1, %v22207_v59 }
 0x791   :  { %13535 = vmatmul.mubr.msk.bf16.vlgmr.msra.gmra.mrb[212].mxu0 %vm4140_vm3, %v5583_v53 }
 0x792   :  { %13546 = vmatprep.mubr.msk.bf16.mxu0 %vm15166_vm1, %v22207_v59  ;;  %v19011_v30 = vpop.eup %14691 }
 0x793   :  { %v19017_v46 = vpop.eup %14693  ;;  %v5194_v28 = vsel %vm4140_vm3, %v19011_v30, 0.0 }
 0x794   :  { %v5191_v51 = vsel %vm4140_vm3, %v19017_v46, 0.0  ;;  %v14696_v8 = vpop.eup %14695 }
 0x79f   :  { %v19005_v17 = vpop.f32.mrb[200].mxu1 }
 0x7a0   :  { %22497 = vst [vmem:[#allocation161_spill] sm:$0xff] %v19005_v17  ;;  %v13506_v40 = vpop.f32.mrb[201].mxu1  ;;  %v22510_v17 = vld [vmem:[#allocation101_spill] sm:$0xff] }
 0x7a1   :  { %v19009_v61 = vpop.f32.mrb[200].mxu0  ;;  %5186 = vadd.xlane.f32.xlu1 %v5185_v21  ;;  %v19013_v2 = vpop.f32.mrb[202].mxu1 }
 0x7a2   :  { %22498 = vst [vmem:[#allocation72_spill] sm:$0xff] %v19009_v61  ;;  %22499 = vst [vmem:[#allocation68_spill] sm:$0xff] %v19013_v2  ;;  %v13500_v52 = vpop.f32.mrb[201].mxu0  ;;  %v13507_v43 = vpop.f32.mrb[203].mxu1  ;;  %v22509_v61 = vld [vmem:[#allocation76_spill] sm:$0xff] }
 0x7a3   :  { %5189 = vadd.xlane.f32.xlu0 %v5188_v60  ;;  %v19021_v36 = vpop.f32.mrb[202].mxu0  ;;  %v14698_v40 = vpop.eup %14697  ;;  %v22503_v60 = vld [vmem:[#allocation75_spill] sm:$0xff] }
 0x7a4   :  { %22500 = vst [vmem:[#allocation9_spill] sm:$0xff] %v19021_v36  ;;  %v13501_v38 = vpop.f32.mrb[203].mxu0  ;;  %v14700_v62 = vpop.eup %14699  ;;  %v5495_v43 = vmul.f32 %v14696_v8, %v22503_v60  ;;  %v4622_v36 = vsub.f32 %v22509_v61, %v22508_v16  ;;  %v22511_v60 = vld [vmem:[#allocation35_spill] sm:$0xff]  ;;  %v22514_v61 = vld [vmem:[#allocation69_spill] sm:$0xff] }
 0x7a5   :  { %5195 = vadd.xlane.f32.xlu1 %v5194_v28  ;;  %v14702_v52 = vpop.eup %14701  ;;  %v5493_v38 = vmul.f32 %v14698_v40, %v22504_v15  ;;  %v22506_v28 = vld [vmem:[#allocation121_spill] sm:$0xff]  ;;  %v22512_v15 = vld [vmem:[#allocation12_spill] sm:$0xff] }
 0x7a6   :  { %v5494_v2 = vmul.f32 %v14702_v52, %v22510_v17 }
 0x7a7   :  { %5192 = vadd.xlane.f32.xlu0 %v5191_v51  ;;  %v4621_v51 = vsub.f32 %v22506_v28, %v22505_v19  ;;  %v4624_v19 = vsub.f32 %v22512_v15, %v22511_v60  ;;  %v22513_v28 = vld [vmem:[#allocation107_spill] sm:$0xff]  ;;  %v22524_v15 = vld [vmem:[#allocation14_spill] sm:$0xff] }
 0x7a8   :  { %v5585_v8 = vpack.c.bf16 %v5494_v2, %v5493_v38  ;;  %v4623_v16 = vsub.f32 %v22514_v61, %v22513_v28  ;;  %v22523_v28 = vld [vmem:[#allocation122_spill] sm:$0xff] }
 0x7a9   :  { %v4845_v40 = vmul.f32 1.442695, %v4621_v51 }
 0x7aa   :  { %v4849_v17 = vmul.f32 1.442695, %v4623_v16  ;;  %v22519_v16 = vld [vmem:[#allocation42_spill] sm:$0xff] }
 0x7ab   :  { %14703 = vpow2.f32 %v4845_v40 }
 0x7b5   :  { %v19065_v2 = vpop.eup %14703 }
 0x7b6   :  { %7540 = vrot.lane.b32.xlu1 %v22501_v11, %s15171_s29  ;;  %v22507_v11 = vld [vmem:[#allocation73_spill] sm:$0xff] }
 0x7b7   :  { %v5496_v53 = vmul.f32 %v14700_v62, %v22507_v11  ;;  %v4847_v62 = vmul.f32 1.442695, %v4622_v36  ;;  %v5197_v36 = vsel %vm4140_vm3, %v19065_v2, 0.0 }
 0x7b9   :  { %v5586_v34 = vpack.c.bf16 %v5496_v53, %v5495_v43  ;;  %14705 = vpow2.f32 %v4847_v62 }
 0x7bc   :  { %v19035_v50 = vpop.xlane.xlu1 %5162 }
 0x7bd   :  { %7493 = vrot.lane.b32.xlu0 %v22502_v3, %s15171_s29 }
 0x7be   :  { %v19039_v45 = vpop.xlane.xlu0 %5165 }
 0x7c0   :  { %v19041_v21 = vpop.xlane.xlu1 %5171 }
 0x7c2   :  { %v19043_v44 = vpop.xlane.xlu0 %5168 }
 0x7c4   :  { %v7353_v3 = vpop.permute.xlu1 %7352 }
 0x7c5   :  { %13551 = vmatpush3.bf16.msra.mxu1 %v7353_v3 }
 0x7c6   :  { %v7306_v25 = vpop.permute.xlu0 %7305  ;;  %13562 = vmatprep.subr.bf16.mxu1 %v22207_v59 }
 0x7c7   :  { %13545 = vmatpush3.bf16.msra.mxu0 %v7306_v25  ;;  %v4851_v25 = vmul.f32 1.442695, %v4624_v19 }
 0x7c8   :  { %13556 = vmatprep.subr.bf16.mxu0 %v22207_v59  ;;  %13553 = vmatmul.mubr.msk.bf16.vlgmr.msra.gmra.mrb[216].mxu1 %vm4140_vm3, %v5586_v34  ;;  %v19067_v34 = vpop.eup %14705 }
 0x7c9   :  { %13564 = vmatprep.mubr.msk.bf16.mxu1 %vm15166_vm1, %v22207_v59  ;;  %14707 = vpow2.f32 %v4851_v25  ;;  %v5200_v52 = vsel %vm4140_vm3, %v19067_v34, 0.0 }
 0x7ca   :  { %13547 = vmatmul.mubr.msk.bf16.vlgmr.msra.gmra.mrb[216].mxu0 %vm4140_vm3, %v5585_v8  ;;  %14709 = vpow2.f32 %v4849_v17  ;;  %v22520_v17 = vld [vmem:[#allocation39_spill] sm:$0xff] }
 0x7cb   :  { %13558 = vmatprep.mubr.msk.bf16.mxu0 %vm15166_vm1, %v22207_v59  ;;  %14711 = vrcp.f32 %v18905_v1 }
 0x7cc   :  { %14713 = vrcp.f32 %v18895_v57 }
 0x7cd   :  { %14715 = vrcp.f32 %v18903_v63 }
 0x7ce   :  { %14717 = vrcp.f32 %v18893_v26  ;;  %v22521_v26 = vld [vmem:[#allocation123_spill] sm:$0xff] }
 0x7d3   :  { %v19071_v53 = vpop.eup %14707 }
 0x7d4   :  { %v19075_v43 = vpop.eup %14709  ;;  %v5206_v38 = vsel %vm4140_vm3, %v19071_v53, 0.0 }
 0x7d5   :  { %v5203_v51 = vsel %vm4140_vm3, %v19075_v43, 0.0 }
 0x7da   :  { %5198 = vadd.xlane.f32.xlu1 %v5197_v36 }
 0x7dc   :  { %5201 = vadd.xlane.f32.xlu0 %v5200_v52  ;;  %v14712_v52 = vpop.eup %14711 }
 0x7de   :  { %5207 = vadd.xlane.f32.xlu1 %v5206_v38  ;;  %v14714_v38 = vpop.eup %14713 }
 0x7df   :  { %v14716_v1 = vpop.eup %14715  ;;  %v5497_v63 = vmul.f32 %v14714_v38, %v18691_v47  ;;  %v22526_v38 = vld [vmem:[#allocation113_spill] sm:$0xff] }
 0x7e0   :  { %5204 = vadd.xlane.f32.xlu0 %v5203_v51  ;;  %v19081_v11 = vpop.f32.mrb[204].mxu1 }
 0x7e1   :  { %22515 = vst [vmem:[#allocation8_spill] sm:$0xff] %v19081_v11  ;;  %v13518_v3 = vpop.f32.mrb[205].mxu1 }
 0x7e2   :  { %v19083_v8 = vpop.f32.mrb[204].mxu0  ;;  %v19085_v40 = vpop.f32.mrb[206].mxu1 }
 0x7e3   :  { %22516 = vst [vmem:[#allocation133_spill] sm:$0xff] %v19083_v8  ;;  %22517 = vst [vmem:[#allocation138_spill] sm:$0xff] %v19085_v40  ;;  %v13512_v60 = vpop.f32.mrb[205].mxu0  ;;  %v13519_v19 = vpop.f32.mrb[207].mxu1  ;;  %v4626_v8 = vsub.f32 %v22524_v15, %v22523_v28  ;;  %v22528_v15 = vld [vmem:[#allocation112_spill] sm:$0xff] }
 0x7e4   :  { %v19089_v62 = vpop.f32.mrb[206].mxu0  ;;  %v14718_v3 = vpop.eup %14717  ;;  %v5499_v60 = vmul.f32 %v14712_v52, %v18711_v10  ;;  %v22522_v19 = vld [vmem:[#allocation27_spill] sm:$0xff]  ;;  %v22525_v52 = vld [vmem:[#allocation45_spill] sm:$0xff] }
 0x7e5   :  { %22518 = vst [vmem:[#allocation136_spill] sm:$0xff] %v19089_v62  ;;  %v13513_v61 = vpop.f32.mrb[207].mxu0  ;;  %v5498_v62 = vmul.f32 %v14718_v3, %v18687_v54 }
 0x7e6   :  { %v4625_v61 = vsub.f32 %v22522_v19, %v22521_v26  ;;  %v4628_v26 = vsub.f32 %v22526_v38, %v22525_v52  ;;  %v22537_v38 = vld [vmem:[#allocation135_spill] sm:$0xff] }
 0x7e7   :  { %v5587_v10 = vpack.c.bf16 %v5498_v62, %v5497_v63 }
 0x7e8   :  { %v4853_v47 = vmul.f32 1.442695, %v4625_v61  ;;  %v4859_v54 = vmul.f32 1.442695, %v4628_v26 }
 0x7ea   :  { %14719 = vpow2.f32 %v4853_v47 }
 0x7ef   :  { %7634 = vrot.lane.b32.xlu1 %v22519_v16, %s15171_s29  ;;  %v5500_v16 = vmul.f32 %v14716_v1, %v18707_v0  ;;  %v4855_v0 = vmul.f32 1.442695, %v4626_v8  ;;  %v22527_v1 = vld [vmem:[#allocation62_spill] sm:$0xff] }
 0x7f0   :  { %v4627_v28 = vsub.f32 %v22528_v15, %v22527_v1  ;;  %v22538_v1 = vld [vmem:[#allocation83_spill] sm:$0xff] }
 0x7f1   :  { %v5588_v40 = vpack.c.bf16 %v5500_v16, %v5499_v60  ;;  %14721 = vpow2.f32 %v4855_v0 }
 0x7f2   :  { %14723 = vpow2.f32 %v4859_v54 }
 0x7f4   :  { %v19129_v62 = vpop.eup %14719 }
 0x7f5   :  { %v19099_v25 = vpop.xlane.xlu1 %5174 }
 0x7f6   :  { %7587 = vrot.lane.b32.xlu0 %v22520_v17, %s15171_s29 }
 0x7f7   :  { %v19103_v36 = vpop.xlane.xlu0 %5177 }
 0x7f9   :  { %v19105_v51 = vpop.xlane.xlu1 %5183 }
 0x7fb   :  { %v19107_v57 = vpop.xlane.xlu0 %5180  ;;  %v19131_v8 = vpop.eup %14721 }
 0x7fc   :  { %v19135_v3 = vpop.eup %14723  ;;  %v5212_v60 = vsel %vm4140_vm3, %v19131_v8, 0.0 }
 0x7fd   :  { %v7447_v17 = vpop.permute.xlu1 %7446  ;;  %v5218_v19 = vsel %vm4140_vm3, %v19135_v3, 0.0 }
 0x7fe   :  { %13563 = vmatpush3.bf16.msra.mxu1 %v7447_v17 }
 0x7ff   :  { %v7400_v11 = vpop.permute.xlu0 %7399  ;;  %13574 = vmatprep.subr.bf16.mxu1 %v22207_v59 }
 0x800   :  { %13557 = vmatpush3.bf16.msra.mxu0 %v7400_v11  ;;  %v4857_v11 = vmul.f32 1.442695, %v4627_v28  ;;  %v22533_v28 = vld [vmem:[#allocation50_spill] sm:$0xff] }
 0x801   :  { %13568 = vmatprep.subr.bf16.mxu0 %v22207_v59  ;;  %13565 = vmatmul.mubr.msk.bf16.vlgmr.msra.gmra.mrb[220].mxu1 %vm4140_vm3, %v5588_v40  ;;  %v5209_v40 = vsel %vm4140_vm3, %v19129_v62, 0.0 }
 0x802   :  { %13576 = vmatprep.mubr.msk.bf16.mxu1 %vm15166_vm1, %v22207_v59  ;;  %14725 = vpow2.f32 %v4857_v11  ;;  %v22534_v11 = vld [vmem:[#allocation47_spill] sm:$0xff] }
 0x803   :  { %13559 = vmatmul.mubr.msk.bf16.vlgmr.msra.gmra.mrb[220].mxu0 %vm4140_vm3, %v5587_v10  ;;  %14727 = vrcp.f32 %v18979_v56 }
 0x804   :  { %13570 = vmatprep.mubr.msk.bf16.mxu0 %vm15166_vm1, %v22207_v59  ;;  %14729 = vrcp.f32 %v18969_v42 }
 0x805   :  { %14731 = vrcp.f32 %v18977_v27 }
 0x806   :  { %14733 = vrcp.f32 %v18967_v9  ;;  %v22535_v9 = vld [vmem:[#allocation65_spill] sm:$0xff] }
 0x80c   :  { %v19139_v63 = vpop.eup %14725 }
 0x80d   :  { %v5215_v61 = vsel %vm4140_vm3, %v19139_v63, 0.0 }
 0x813   :  { %5210 = vadd.xlane.f32.xlu1 %v5209_v40 }
 0x815   :  { %5213 = vadd.xlane.f32.xlu0 %v5212_v60  ;;  %v14728_v60 = vpop.eup %14727 }
 0x817   :  { %5219 = vadd.xlane.f32.xlu1 %v5218_v19  ;;  %v14730_v19 = vpop.eup %14729 }
 0x818   :  { %v14732_v56 = vpop.eup %14731  ;;  %v5501_v27 = vmul.f32 %v14730_v19, %v18787_v31  ;;  %v22540_v19 = vld [vmem:[#allocation120_spill] sm:$0xff] }
 0x819   :  { %5216 = vadd.xlane.f32.xlu0 %v5215_v61 }
 0x821   :  { %v19145_v16 = vpop.f32.mrb[208].mxu1 }
 0x822   :  { %22529 = vst [vmem:[#allocation134_spill] sm:$0xff] %v19145_v16  ;;  %v13530_v17 = vpop.f32.mrb[209].mxu1  ;;  %v4630_v16 = vsub.f32 %v22538_v1, %v22537_v38  ;;  %v22542_v38 = vld [vmem:[#allocation84_spill] sm:$0xff] }
 0x823   :  { %v19147_v10 = vpop.f32.mrb[208].mxu0  ;;  %v19149_v47 = vpop.f32.mrb[210].mxu1 }
 0x824   :  { %22530 = vst [vmem:[#allocation16_spill] sm:$0xff] %v19147_v10  ;;  %22531 = vst [vmem:[#allocation15_spill] sm:$0xff] %v19149_v47  ;;  %v13524_v52 = vpop.f32.mrb[209].mxu0  ;;  %v13531_v26 = vpop.f32.mrb[211].mxu1 }
 0x825   :  { %v19153_v0 = vpop.f32.mrb[210].mxu0  ;;  %v14734_v17 = vpop.eup %14733  ;;  %v5503_v52 = vmul.f32 %v14728_v60, %v18807_v24  ;;  %v22536_v26 = vld [vmem:[#allocation85_spill] sm:$0xff] }
 0x826   :  { %22532 = vst [vmem:[#allocation140_spill] sm:$0xff] %v19153_v0  ;;  %v13525_v15 = vpop.f32.mrb[211].mxu0  ;;  %v5502_v47 = vmul.f32 %v14734_v17, %v18783_v48  ;;  %v22539_v60 = vld [vmem:[#allocation97_spill] sm:$0xff] }
 0x827   :  { %v4629_v15 = vsub.f32 %v22536_v26, %v22535_v9  ;;  %v4632_v9 = vsub.f32 %v22540_v19, %v22539_v60 }
 0x828   :  { %7728 = vrot.lane.b32.xlu1 %v22533_v28, %s15171_s29  ;;  %v5504_v28 = vmul.f32 %v14732_v56, %v18803_v32  ;;  %v5589_v24 = vpack.c.bf16 %v5502_v47, %v5501_v27  ;;  %v4863_v32 = vmul.f32 1.442695, %v4630_v16  ;;  %v22541_v56 = vld [vmem:[#allocation94_spill] sm:$0xff] }
 0x829   :  { %v4861_v31 = vmul.f32 1.442695, %v4629_v15  ;;  %v4631_v1 = vsub.f32 %v22542_v38, %v22541_v56  ;;  %v4867_v48 = vmul.f32 1.442695, %v4632_v9 }
 0x82a   :  { %v5590_v0 = vpack.c.bf16 %v5504_v28, %v5503_v52  ;;  %v22543_v28 = vld [vmem:[#allocation58_spill] sm:$0xff] }
 0x82b   :  { %14735 = vpow2.f32 %v4861_v31 }
 0x82c   :  { %14737 = vpow2.f32 %v4863_v32  ;;  %v22551_v32 = vld [vmem:[#allocation93_spill] sm:$0xff] }
 0x82d   :  { %14739 = vpow2.f32 %v4867_v48 }
 0x82e   :  { %v19163_v54 = vpop.xlane.xlu1 %5186 }
 0x82f   :  { %7681 = vrot.lane.b32.xlu0 %v22534_v11, %s15171_s29 }
 0x830   :  { %v19167_v40 = vpop.xlane.xlu0 %5189 }
 0x832   :  { %v19169_v61 = vpop.xlane.xlu1 %5195 }
 0x834   :  { %v19171_v42 = vpop.xlane.xlu0 %5192 }
 0x835   :  { %v19193_v47 = vpop.eup %14735 }
 0x836   :  { %v7541_v11 = vpop.permute.xlu1 %7540  ;;  %v19195_v16 = vpop.eup %14737 }
 0x837   :  { %13575 = vmatpush3.bf16.msra.mxu1 %v7541_v11  ;;  %v19199_v17 = vpop.eup %14739  ;;  %v5224_v52 = vsel %vm4140_vm3, %v19195_v16, 0.0 }
 0x838   :  { %v7494_v10 = vpop.permute.xlu0 %7493  ;;  %13586 = vmatprep.subr.bf16.mxu1 %v22207_v59  ;;  %v5230_v26 = vsel %vm4140_vm3, %v19199_v17, 0.0 }
 0x839   :  { %13569 = vmatpush3.bf16.msra.mxu0 %v7494_v10  ;;  %v4865_v10 = vmul.f32 1.442695, %v4631_v1 }
 0x83a   :  { %13580 = vmatprep.subr.bf16.mxu0 %v22207_v59  ;;  %13577 = vmatmul.mubr.msk.bf16.vlgmr.msra.gmra.mrb[224].mxu1 %vm4140_vm3, %v5590_v0  ;;  %v5221_v0 = vsel %vm4140_vm3, %v19193_v47, 0.0 }
 0x83b   :  { %13588 = vmatprep.mubr.msk.bf16.mxu1 %vm15166_vm1, %v22207_v59  ;;  %14741 = vpow2.f32 %v4865_v10 }
 0x83c   :  { %13571 = vmatmul.mubr.msk.bf16.vlgmr.msra.gmra.mrb[224].mxu0 %vm4140_vm3, %v5589_v24  ;;  %14743 = vrcp.f32 %v19043_v44  ;;  %v22552_v44 = vld [vmem:[#allocation115_spill] sm:$0xff] }
 0x83d   :  { %13582 = vmatprep.mubr.msk.bf16.mxu0 %vm15166_vm1, %v22207_v59  ;;  %14745 = vrcp.f32 %v19039_v45 }
 0x83e   :  { %14747 = vrcp.f32 %v19041_v21 }
 0x83f   :  { %14749 = vrcp.f32 %v19035_v50  ;;  %v22548_v50 = vld [vmem:[#allocation55_spill] sm:$0xff] }
 0x845   :  { %v19203_v27 = vpop.eup %14741 }
 0x846   :  { %v5227_v15 = vsel %vm4140_vm3, %v19203_v27, 0.0  ;;  %v14744_v1 = vpop.eup %14743 }
 0x847   :  { %v14746_v48 = vpop.eup %14745 }
 0x84c   :  { %5222 = vadd.xlane.f32.xlu1 %v5221_v0  ;;  %v14748_v0 = vpop.eup %14747 }
 0x84e   :  { %5225 = vadd.xlane.f32.xlu0 %v5224_v52 }
 0x850   :  { %5231 = vadd.xlane.f32.xlu1 %v5230_v26  ;;  %v14750_v26 = vpop.eup %14749 }
 0x852   :  { %5228 = vadd.xlane.f32.xlu0 %v5227_v15  ;;  %v5507_v15 = vmul.f32 %v14744_v1, %v18879_v14  ;;  %v22553_v1 = vld [vmem:[#allocation92_spill] sm:$0xff] }
 0x861   :  { %7822 = vrot.lane.b32.xlu1 %v22543_v28, %s15171_s29  ;;  %v5506_v28 = vmul.f32 %v14746_v48, %v18871_v4  ;;  %v22554_v48 = vld [vmem:[#allocation129_spill] sm:$0xff] }
 0x862   :  { %v19214_v11 = vpop.f32.mrb[212].mxu1 }
 0x863   :  { %22544 = vst [vmem:[#allocation145_spill] sm:$0xff] %v19214_v11  ;;  %v13542_v24 = vpop.f32.mrb[213].mxu1 }
 0x864   :  { %v19217_v31 = vpop.f32.mrb[212].mxu0  ;;  %v19219_v60 = vpop.f32.mrb[214].mxu1  ;;  %v22549_v24 = vld [vmem:[#allocation81_spill] sm:$0xff] }
 0x865   :  { %22545 = vst [vmem:[#allocation144_spill] sm:$0xff] %v19217_v31  ;;  %22546 = vst [vmem:[#allocation21_spill] sm:$0xff] %v19219_v60  ;;  %v13536_v19 = vpop.f32.mrb[213].mxu0  ;;  %v13543_v9 = vpop.f32.mrb[215].mxu1  ;;  %v4634_v31 = vsub.f32 %v22552_v44, %v22551_v32  ;;  %v22556_v44 = vld [vmem:[#allocation51_spill] sm:$0xff] }
 0x866   :  { %v19223_v45 = vpop.f32.mrb[214].mxu0  ;;  %v22550_v19 = vld [vmem:[#allocation43_spill] sm:$0xff] }
 0x867   :  { %22547 = vst [vmem:[#allocation142_spill] sm:$0xff] %v19223_v45  ;;  %v13537_v21 = vpop.f32.mrb[215].mxu0  ;;  %v19227_v56 = vpop.xlane.xlu1 %5198  ;;  %v4633_v9 = vsub.f32 %v22550_v19, %v22549_v24  ;;  %v5505_v45 = vmul.f32 %v14750_v26, %v18869_v37  ;;  %v4636_v24 = vsub.f32 %v22554_v48, %v22553_v1 }
 0x868   :  { %7775 = vrot.lane.b32.xlu0 %v22548_v50, %s15171_s29  ;;  %v5508_v21 = vmul.f32 %v14748_v0, %v18875_v55  ;;  %v4871_v55 = vmul.f32 1.442695, %v4634_v31  ;;  %v22555_v0 = vld [vmem:[#allocation78_spill] sm:$0xff] }
 0x869   :  { %v19231_v38 = vpop.xlane.xlu0 %5201  ;;  %v5591_v14 = vpack.c.bf16 %v5506_v28, %v5505_v45  ;;  %v4869_v4 = vmul.f32 1.442695, %v4633_v9  ;;  %v4635_v32 = vsub.f32 %v22556_v44, %v22555_v0  ;;  %v4875_v37 = vmul.f32 1.442695, %v4636_v24 }
 0x86a   :  { %v5592_v60 = vpack.c.bf16 %v5508_v21, %v5507_v15  ;;  %v22557_v21 = vld [vmem:[#allocation3_spill] sm:$0xff] }
 0x86b   :  { %v19233_v10 = vpop.xlane.xlu1 %5207  ;;  %14751 = vpow2.f32 %v4869_v4 }
 0x86c   :  { %14753 = vpow2.f32 %v4871_v55 }
 0x86d   :  { %v19235_v52 = vpop.xlane.xlu0 %5204  ;;  %14755 = vpow2.f32 %v4875_v37 }
 0x86f   :  { %v7635_v50 = vpop.permute.xlu1 %7634 }
 0x870   :  { %13587 = vmatpush3.bf16.msra.mxu1 %v7635_v50 }
 0x871   :  { %v7588_v11 = vpop.permute.xlu0 %7587  ;;  %13598 = vmatprep.subr.bf16.mxu1 %v22207_v59 }
 0x872   :  { %13581 = vmatpush3.bf16.msra.mxu0 %v7588_v11  ;;  %v4873_v11 = vmul.f32 1.442695, %v4635_v32 }
 0x873   :  { %13592 = vmatprep.subr.bf16.mxu0 %v22207_v59  ;;  %13589 = vmatmul.mubr.msk.bf16.vlgmr.msra.gmra.mrb[228].mxu1 %vm4140_vm3, %v5592_v60 }
 0x874   :  { %13600 = vmatprep.mubr.msk.bf16.mxu1 %vm15166_vm1, %v22207_v59  ;;  %14757 = vpow2.f32 %v4873_v11 }
 0x875   :  { %13583 = vmatmul.mubr.msk.bf16.vlgmr.msra.gmra.mrb[228].mxu0 %vm4140_vm3, %v5591_v14  ;;  %v19257_v45 = vpop.eup %14751  ;;  %14759 = vrcp.f32 %v19107_v57 }
 0x876   :  { %13594 = vmatprep.mubr.msk.bf16.mxu0 %vm15166_vm1, %v22207_v59  ;;  %v19259_v31 = vpop.eup %14753  ;;  %v5233_v60 = vsel %vm4140_vm3, %v19257_v45, 0.0  ;;  %14761 = vrcp.f32 %v19103_v36 }
 0x877   :  { %v19263_v26 = vpop.eup %14755  ;;  %v5236_v15 = vsel %vm4140_vm3, %v19259_v31, 0.0  ;;  %14763 = vrcp.f32 %v19105_v51 }
 0x878   :  { %v5242_v19 = vsel %vm4140_vm3, %v19263_v26, 0.0  ;;  %14765 = vrcp.f32 %v19099_v25  ;;  %v22560_v25 = vld [vmem:[#allocation6_spill] sm:$0xff] }
 0x87e   :  { %v19267_v28 = vpop.eup %14757 }
 0x87f   :  { %v5239_v9 = vsel %vm4140_vm3, %v19267_v28, 0.0  ;;  %v14760_v32 = vpop.eup %14759 }
 0x880   :  { %v14762_v37 = vpop.eup %14761 }
 0x885   :  { %5234 = vadd.xlane.f32.xlu1 %v5233_v60  ;;  %v14764_v60 = vpop.eup %14763 }
 0x887   :  { %5237 = vadd.xlane.f32.xlu0 %v5236_v15 }
 0x889   :  { %5243 = vadd.xlane.f32.xlu1 %v5242_v19  ;;  %v14766_v19 = vpop.eup %14765 }
 0x88a   :  { %v5509_v57 = vmul.f32 %v14766_v19, %v18941_v18 }
 0x88b   :  { %5240 = vadd.xlane.f32.xlu0 %v5239_v9  ;;  %v5511_v9 = vmul.f32 %v14760_v32, %v18951_v29  ;;  %v22563_v32 = vld [vmem:[#allocation54_spill] sm:$0xff] }
 0x89a   :  { %7916 = vrot.lane.b32.xlu1 %v22557_v21, %s15171_s29  ;;  %v5510_v21 = vmul.f32 %v14762_v37, %v18943_v35 }
 0x89b   :  { %v19278_v50 = vpop.f32.mrb[216].mxu1 }
 0x89c   :  { %v13554_v14 = vpop.f32.mrb[217].mxu1  ;;  %v5593_v29 = vpack.c.bf16 %v5510_v21, %v5509_v57 }
 0x89d   :  { %v19281_v4 = vpop.f32.mrb[216].mxu0  ;;  %v19283_v1 = vpop.f32.mrb[218].mxu1  ;;  %v22561_v14 = vld [vmem:[#allocation91_spill] sm:$0xff] }
 0x89e   :  { %22558 = vst [vmem:[#allocation26_spill] sm:$0xff] %v19281_v4  ;;  %v13548_v48 = vpop.f32.mrb[217].mxu0  ;;  %v13555_v24 = vpop.f32.mrb[219].mxu1 }
 0x89f   :  { %v19287_v36 = vpop.f32.mrb[218].mxu0  ;;  %v4637_v48 = vsub.f32 %v22561_v14, %v18713_v6  ;;  %v5512_v24 = vmul.f32 %v14764_v60, %v18947_v20  ;;  %v22564_v6 = vld [vmem:[#allocation89_spill] sm:$0xff]  ;;  %v22565_v60 = vld [vmem:[#allocation20_spill] sm:$0xff] }
 0x8a0   :  { %22559 = vst [vmem:[#allocation23_spill] sm:$0xff] %v19287_v36  ;;  %v13549_v51 = vpop.f32.mrb[219].mxu0  ;;  %v19291_v0 = vpop.xlane.xlu1 %5210  ;;  %v4640_v37 = vsub.f32 %v22564_v6, %v22563_v32 }
 0x8a1   :  { %7869 = vrot.lane.b32.xlu0 %v22560_v25, %s15171_s29  ;;  %v22562_v25 = vld [vmem:[#allocation63_spill] sm:$0xff]  ;;  %v5594_v36 = vpack.c.bf16 %v5512_v24, %v5511_v9  ;;  %v4877_v35 = vmul.f32 1.442695, %v4637_v48 }
 0x8a2   :  { %v19295_v44 = vpop.xlane.xlu0 %5213  ;;  %v4638_v55 = vsub.f32 %v22562_v25, %v18718_v7  ;;  %v22566_v7 = vld [vmem:[#allocation130_spill] sm:$0xff]  ;;  %v4883_v18 = vmul.f32 1.442695, %v4640_v37 }
 0x8a3   :  { %v4639_v14 = vsub.f32 %v22566_v7, %v22565_v60  ;;  %14767 = vpow2.f32 %v4877_v35 }
 0x8a4   :  { %v19297_v11 = vpop.xlane.xlu1 %5219  ;;  %v4879_v20 = vmul.f32 1.442695, %v4638_v55 }
 0x8a6   :  { %v19299_v15 = vpop.xlane.xlu0 %5216  ;;  %14769 = vpow2.f32 %v4879_v20 }
 0x8a7   :  { %14771 = vpow2.f32 %v4883_v18 }
 0x8a8   :  { %v7729_v51 = vpop.permute.xlu1 %7728 }
 0x8a9   :  { %13599 = vmatpush3.bf16.msra.mxu1 %v7729_v51  ;;  %v22567_v51 = vld [vmem:[#allocation11_spill] sm:$0xff] }
 0x8aa   :  { %v7682_v4 = vpop.permute.xlu0 %7681  ;;  %13610 = vmatprep.subr.bf16.mxu1 %v22207_v59 }
 0x8ab   :  { %13593 = vmatpush3.bf16.msra.mxu0 %v7682_v4  ;;  %v4881_v4 = vmul.f32 1.442695, %v4639_v14 }
 0x8ac   :  { %13604 = vmatprep.subr.bf16.mxu0 %v22207_v59  ;;  %13601 = vmatmul.mubr.msk.bf16.vlgmr.msra.gmra.mrb[232].mxu1 %vm4140_vm3, %v5594_v36 }
 0x8ad   :  { %13612 = vmatprep.mubr.msk.bf16.mxu1 %vm15166_vm1, %v22207_v59  ;;  %14773 = vpow2.f32 %v4881_v4  ;;  %v19321_v57 = vpop.eup %14767 }
 0x8ae   :  { %13595 = vmatmul.mubr.msk.bf16.vlgmr.msra.gmra.mrb[232].mxu0 %vm4140_vm3, %v5593_v29  ;;  %v5245_v55 = vsel %vm4140_vm3, %v19321_v57, 0.0  ;;  %14775 = vrcp.f32 %v19171_v42 }
 0x8af   :  { %13606 = vmatprep.mubr.msk.bf16.mxu0 %vm15166_vm1, %v22207_v59  ;;  %14777 = vrcp.f32 %v19167_v40 }
 0x8b0   :  { %v19323_v36 = vpop.eup %14769  ;;  %14779 = vrcp.f32 %v19169_v61 }
 0x8b1   :  { %v19327_v19 = vpop.eup %14771  ;;  %v5248_v9 = vsel %vm4140_vm3, %v19323_v36, 0.0  ;;  %14781 = vrcp.f32 %v19163_v54  ;;  %v22570_v54 = vld [vmem:[#allocation10_spill] sm:$0xff] }
 0x8b2   :  { %v5254_v48 = vsel %vm4140_vm3, %v19327_v19, 0.0 }
 0x8b7   :  { %v19331_v21 = vpop.eup %14773 }
 0x8b8   :  { %v5251_v24 = vsel %vm4140_vm3, %v19331_v21, 0.0  ;;  %v14776_v14 = vpop.eup %14775 }
 0x8b9   :  { %v14778_v18 = vpop.eup %14777 }
 0x8be   :  { %5246 = vadd.xlane.f32.xlu1 %v5245_v55  ;;  %v14780_v55 = vpop.eup %14779 }
 0x8c0   :  { %5249 = vadd.xlane.f32.xlu0 %v5248_v9 }
 0x8c2   :  { %5255 = vadd.xlane.f32.xlu1 %v5254_v48  ;;  %v14782_v48 = vpop.eup %14781 }
 0x8c3   :  { %v5513_v42 = vmul.f32 %v14782_v48, %v19001_v23 }
 0x8c4   :  { %5252 = vadd.xlane.f32.xlu0 %v5251_v24  ;;  %v5515_v24 = vmul.f32 %v14776_v14, %v19017_v46 }
 0x8d3   :  { %8010 = vrot.lane.b32.xlu1 %v22567_v51, %s15171_s29  ;;  %v5514_v51 = vmul.f32 %v14778_v18, %v19003_v33 }
 0x8d4   :  { %v19342_v25 = vpop.f32.mrb[220].mxu1 }
 0x8d5   :  { %v13566_v29 = vpop.f32.mrb[221].mxu1  ;;  %v5595_v46 = vpack.c.bf16 %v5514_v51, %v5513_v42  ;;  %v22575_v51 = vld [vmem:[#allocation18_spill] sm:$0xff] }
 0x8d6   :  { %v19345_v35 = vpop.f32.mrb[220].mxu0  ;;  %v19347_v32 = vpop.f32.mrb[222].mxu1  ;;  %v22571_v29 = vld [vmem:[#allocation100_spill] sm:$0xff] }
 0x8d7   :  { %22568 = vst [vmem:[#allocation150_spill] sm:$0xff] %v19345_v35  ;;  %v13560_v6 = vpop.f32.mrb[221].mxu0  ;;  %v13567_v37 = vpop.f32.mrb[223].mxu1 }
 0x8d8   :  { %v19351_v40 = vpop.f32.mrb[222].mxu0  ;;  %v4641_v6 = vsub.f32 %v22571_v29, %v18809_v12  ;;  %v5516_v37 = vmul.f32 %v14780_v55, %v19011_v30  ;;  %v22573_v12 = vld [vmem:[#allocation143_spill] sm:$0xff] }
 0x8d9   :  { %22569 = vst [vmem:[#allocation155_spill] sm:$0xff] %v19351_v40  ;;  %v13561_v61 = vpop.f32.mrb[223].mxu0  ;;  %v19355_v60 = vpop.xlane.xlu1 %5222  ;;  %v4644_v14 = vsub.f32 %v22573_v12, %v18825_v49 }
 0x8da   :  { %7963 = vrot.lane.b32.xlu0 %v22570_v54, %s15171_s29  ;;  %v22572_v54 = vld [vmem:[#allocation67_spill] sm:$0xff]  ;;  %v5596_v40 = vpack.c.bf16 %v5516_v37, %v5515_v24  ;;  %v4885_v33 = vmul.f32 1.442695, %v4641_v6 }
 0x8db   :  { %v19359_v7 = vpop.xlane.xlu0 %5225  ;;  %v4642_v20 = vsub.f32 %v22572_v54, %v18814_v22  ;;  %v22574_v22 = vld [vmem:[#allocation148_spill] sm:$0xff]  ;;  %v4891_v23 = vmul.f32 1.442695, %v4644_v14 }
 0x8dc   :  { %v4643_v18 = vsub.f32 %v22574_v22, %v18827_v13  ;;  %14783 = vpow2.f32 %v4885_v33 }
 0x8dd   :  { %v19361_v4 = vpop.xlane.xlu1 %5231  ;;  %v4887_v30 = vmul.f32 1.442695, %v4642_v20 }
 0x8df   :  { %v19363_v9 = vpop.xlane.xlu0 %5228  ;;  %14785 = vpow2.f32 %v4887_v30 }
 0x8e0   :  { %14787 = vpow2.f32 %v4891_v23 }
 0x8e1   :  { %v7823_v61 = vpop.permute.xlu1 %7822 }
 0x8e2   :  { %13611 = vmatpush3.bf16.msra.mxu1 %v7823_v61 }
 0x8e3   :  { %v7776_v35 = vpop.permute.xlu0 %7775  ;;  %13622 = vmatprep.subr.bf16.mxu1 %v22207_v59 }
 0x8e4   :  { %13605 = vmatpush3.bf16.msra.mxu0 %v7776_v35  ;;  %v4889_v35 = vmul.f32 1.442695, %v4643_v18 }
 0x8e5   :  { %13616 = vmatprep.subr.bf16.mxu0 %v22207_v59  ;;  %13613 = vmatmul.mubr.msk.bf16.vlgmr.msra.gmra.mrb[236].mxu1 %vm4140_vm3, %v5596_v40 }
 0x8e6   :  { %13624 = vmatprep.mubr.msk.bf16.mxu1 %vm15166_vm1, %v22207_v59  ;;  %14789 = vpow2.f32 %v4889_v35  ;;  %v19385_v49 = vpop.eup %14783 }
 0x8e7   :  { %13607 = vmatmul.mubr.msk.bf16.vlgmr.msra.gmra.mrb[236].mxu0 %vm4140_vm3, %v5595_v46  ;;  %v5257_v13 = vsel %vm4140_vm3, %v19385_v49, 0.0  ;;  %14791 = vrcp.f32 %v19235_v52 }
 0x8e8   :  { %13618 = vmatprep.mubr.msk.bf16.mxu0 %vm15166_vm1, %v22207_v59  ;;  %14793 = vrcp.f32 %v19231_v38 }
 0x8e9   :  { %v19387_v42 = vpop.eup %14785  ;;  %14795 = vrcp.f32 %v19233_v10 }
 0x8ea   :  { %v19391_v40 = vpop.eup %14787  ;;  %v5260_v20 = vsel %vm4140_vm3, %v19387_v42, 0.0  ;;  %14797 = vrcp.f32 %v19227_v56  ;;  %v22576_v56 = vld [vmem:[#allocation17_spill] sm:$0xff] }
 0x8eb   :  { %v5266_v48 = vsel %vm4140_vm3, %v19391_v40, 0.0 }
 0x8f0   :  { %v19395_v55 = vpop.eup %14789 }
 0x8f1   :  { %v5263_v24 = vsel %vm4140_vm3, %v19395_v55, 0.0  ;;  %v14792_v30 = vpop.eup %14791 }
 0x8f2   :  { %v14794_v22 = vpop.eup %14793 }
 0x8f3   :  { %v14796_v23 = vpop.eup %14795 }
 0x8f7   :  { %5258 = vadd.xlane.f32.xlu1 %v5257_v13  ;;  %v14798_v13 = vpop.eup %14797 }
 0x8f9   :  { %5261 = vadd.xlane.f32.xlu0 %v5260_v20  ;;  %v5519_v20 = vmul.f32 %v14792_v30, %v19075_v43 }
 0x8fb   :  { %5267 = vadd.xlane.f32.xlu1 %v5266_v48  ;;  %v5518_v48 = vmul.f32 %v14794_v22, %v19067_v34 }
 0x8fd   :  { %5264 = vadd.xlane.f32.xlu0 %v5263_v24  ;;  %v22577_v24 = vld [vmem:[#allocation87_spill] sm:$0xff] }
 0x90c   :  { %8104 = vrot.lane.b32.xlu1 %v22575_v51, %s15171_s29  ;;  %v4645_v51 = vsub.f32 %v22577_v24, %v18885_v39  ;;  %v22579_v39 = vld [vmem:[#allocation86_spill] sm:$0xff] }
 0x90d   :  { %v19406_v29 = vpop.f32.mrb[224].mxu1  ;;  %v4648_v30 = vsub.f32 %v22579_v39, %v18897_v58 }
 0x90e   :  { %v13578_v6 = vpop.f32.mrb[225].mxu1  ;;  %v4893_v34 = vmul.f32 1.442695, %v4645_v51  ;;  %v22581_v51 = vld [vmem:[#allocation28_spill] sm:$0xff] }
 0x90f   :  { %v19409_v37 = vpop.f32.mrb[224].mxu0  ;;  %v19411_v61 = vpop.f32.mrb[226].mxu1  ;;  %v5520_v6 = vmul.f32 %v14796_v23, %v19071_v53 }
 0x910   :  { %v13572_v54 = vpop.f32.mrb[225].mxu0  ;;  %v13579_v46 = vpop.f32.mrb[227].mxu1  ;;  %14799 = vpow2.f32 %v4893_v34 }
 0x911   :  { %v19415_v38 = vpop.f32.mrb[226].mxu0  ;;  %v22578_v46 = vld [vmem:[#allocation70_spill] sm:$0xff]  ;;  %v5598_v52 = vpack.c.bf16 %v5520_v6, %v5519_v20 }
 0x912   :  { %v13573_v10 = vpop.f32.mrb[227].mxu0  ;;  %v19419_v12 = vpop.xlane.xlu1 %5234 }
 0x913   :  { %8057 = vrot.lane.b32.xlu0 %v22576_v56, %s15171_s29  ;;  %v4646_v10 = vsub.f32 %v22578_v46, %v18888_v5  ;;  %v5517_v56 = vmul.f32 %v14798_v13, %v19065_v2  ;;  %v22580_v5 = vld [vmem:[#allocation56_spill] sm:$0xff]  ;;  %v4899_v2 = vmul.f32 1.442695, %v4648_v30 }
 0x914   :  { %v19423_v14 = vpop.xlane.xlu0 %5237  ;;  %v4647_v22 = vsub.f32 %v22580_v5, %v18899_v41 }
 0x915   :  { %v5597_v43 = vpack.c.bf16 %v5518_v48, %v5517_v56  ;;  %v4895_v53 = vmul.f32 1.442695, %v4646_v10 }
 0x916   :  { %v19425_v18 = vpop.xlane.xlu1 %5243 }
 0x917   :  { %14801 = vpow2.f32 %v4895_v53 }
 0x918   :  { %v19427_v35 = vpop.xlane.xlu0 %5240  ;;  %14803 = vpow2.f32 %v4899_v2 }
 0x91a   :  { %v7917_v54 = vpop.permute.xlu1 %7916  ;;  %v19449_v58 = vpop.eup %14799 }
 0x91b   :  { %13623 = vmatpush3.bf16.msra.mxu1 %v7917_v54  ;;  %v5269_v41 = vsel %vm4140_vm3, %v19449_v58, 0.0 }
 0x91c   :  { %v7870_v33 = vpop.permute.xlu0 %7869  ;;  %13634 = vmatprep.subr.bf16.mxu1 %v22207_v59 }
 0x91d   :  { %13617 = vmatpush3.bf16.msra.mxu0 %v7870_v33  ;;  %v4897_v33 = vmul.f32 1.442695, %v4647_v22 }
 0x91e   :  { %13628 = vmatprep.subr.bf16.mxu0 %v22207_v59  ;;  %13625 = vmatmul.mubr.msk.bf16.vlgmr.msra.gmra.mrb[240].mxu1 %vm4140_vm3, %v5598_v52 }
 0x91f   :  { %13636 = vmatprep.mubr.msk.bf16.mxu1 %vm15166_vm1, %v22207_v59  ;;  %14805 = vpow2.f32 %v4897_v33 }
 0x920   :  { %13619 = vmatmul.mubr.msk.bf16.vlgmr.msra.gmra.mrb[240].mxu0 %vm4140_vm3, %v5597_v43  ;;  %14807 = vrcp.f32 %v19299_v15 }
 0x921   :  { %13630 = vmatprep.mubr.msk.bf16.mxu0 %vm15166_vm1, %v22207_v59  ;;  %v19451_v52 = vpop.eup %14801  ;;  %14809 = vrcp.f32 %v19295_v44 }
 0x922   :  { %v19455_v23 = vpop.eup %14803  ;;  %v5272_v13 = vsel %vm4140_vm3, %v19451_v52, 0.0  ;;  %14811 = vrcp.f32 %v19297_v11 }
 0x923   :  { %v5278_v48 = vsel %vm4140_vm3, %v19455_v23, 0.0  ;;  %14813 = vrcp.f32 %v19291_v0  ;;  %v22584_v0 = vld [vmem:[#allocation25_spill] sm:$0xff] }
 0x929   :  { %v19459_v20 = vpop.eup %14805 }
 0x92a   :  { %v5275_v24 = vsel %vm4140_vm3, %v19459_v20, 0.0  ;;  %v14808_v53 = vpop.eup %14807 }
 0x92b   :  { %v14810_v5 = vpop.eup %14809 }
 0x92c   :  { %v14812_v2 = vpop.eup %14811 }
 0x930   :  { %5270 = vadd.xlane.f32.xlu1 %v5269_v41  ;;  %v14814_v41 = vpop.eup %14813 }
 0x931   :  { %v5521_v15 = vmul.f32 %v14814_v41, %v19129_v62 }
 0x932   :  { %5273 = vadd.xlane.f32.xlu0 %v5272_v13  ;;  %v5523_v13 = vmul.f32 %v14808_v53, %v19139_v63  ;;  %v22589_v53 = vld [vmem:[#allocation125_spill] sm:$0xff] }
 0x934   :  { %5279 = vadd.xlane.f32.xlu1 %v5278_v48  ;;  %v5522_v48 = vmul.f32 %v14810_v5, %v19131_v8  ;;  %v22590_v5 = vld [vmem:[#allocation117_spill] sm:$0xff] }
 0x936   :  { %5276 = vadd.xlane.f32.xlu0 %v5275_v24  ;;  %v22585_v24 = vld [vmem:[#allocation126_spill] sm:$0xff]  ;;  %v5599_v63 = vpack.c.bf16 %v5522_v48, %v5521_v15 }
 0x945   :  { %8198 = vrot.lane.b32.xlu1 %v22581_v51, %s15171_s29  ;;  %v22586_v51 = vld [vmem:[#allocation118_spill] sm:$0xff] }
 0x946   :  { %v19470_v6 = vpop.f32.mrb[228].mxu1 }
 0x947   :  { %v13590_v54 = vpop.f32.mrb[229].mxu1 }
 0x948   :  { %v19473_v46 = vpop.f32.mrb[228].mxu0  ;;  %v19475_v10 = vpop.f32.mrb[230].mxu1  ;;  %v4649_v54 = vsub.f32 %v22586_v51, %v22585_v24  ;;  %v4652_v24 = vsub.f32 %v22590_v5, %v22589_v53  ;;  %v22592_v51 = vld [vmem:[#allocation154_spill] sm:$0xff] }
 0x949   :  { %22582 = vst [vmem:[#allocation152_spill] sm:$0xff] %v19473_v46  ;;  %v13584_v56 = vpop.f32.mrb[229].mxu0  ;;  %v13591_v43 = vpop.f32.mrb[231].mxu1 }
 0x94a   :  { %v19479_v44 = vpop.f32.mrb[230].mxu0  ;;  %v5524_v56 = vmul.f32 %v14812_v2, %v19135_v3  ;;  %v4901_v8 = vmul.f32 1.442695, %v4649_v54  ;;  %v22591_v2 = vld [vmem:[#allocation159_spill] sm:$0xff]  ;;  %v4907_v62 = vmul.f32 1.442695, %v4652_v24 }
 0x94b   :  { %22583 = vst [vmem:[#allocation151_spill] sm:$0xff] %v19479_v44  ;;  %v13585_v11 = vpop.f32.mrb[231].mxu0  ;;  %v19483_v39 = vpop.xlane.xlu1 %5246 }
 0x94c   :  { %8151 = vrot.lane.b32.xlu0 %v22584_v0, %s15171_s29  ;;  %v22587_v11 = vld [vmem:[#allocation104_spill] sm:$0xff]  ;;  %v22588_v0 = vld [vmem:[#allocation98_spill] sm:$0xff]  ;;  %v5600_v44 = vpack.c.bf16 %v5524_v56, %v5523_v13  ;;  %14815 = vpow2.f32 %v4901_v8 }
 0x94d   :  { %v19487_v30 = vpop.xlane.xlu0 %5249  ;;  %v4650_v34 = vsub.f32 %v22588_v0, %v22587_v11  ;;  %v4651_v11 = vsub.f32 %v22592_v51, %v22591_v2  ;;  %v22595_v51 = vld [vmem:[#allocation33_spill] sm:$0xff] }
 0x94f   :  { %v19489_v22 = vpop.xlane.xlu1 %5255  ;;  %v4903_v3 = vmul.f32 1.442695, %v4650_v34 }
 0x951   :  { %v19491_v33 = vpop.xlane.xlu0 %5252  ;;  %14817 = vpow2.f32 %v4903_v3 }
 0x952   :  { %14819 = vpow2.f32 %v4907_v62  ;;  %v22596_v62 = vld [vmem:[#allocation44_spill] sm:$0xff] }
 0x953   :  { %v8011_v43 = vpop.permute.xlu1 %8010 }
 0x954   :  { %13635 = vmatpush3.bf16.msra.mxu1 %v8011_v43  ;;  %v22593_v43 = vld [vmem:[#allocation36_spill] sm:$0xff] }
 0x955   :  { %v7964_v46 = vpop.permute.xlu0 %7963  ;;  %13646 = vmatprep.subr.bf16.mxu1 %v22207_v59 }
 0x956   :  { %13629 = vmatpush3.bf16.msra.mxu0 %v7964_v46  ;;  %v4905_v46 = vmul.f32 1.442695, %v4651_v11  ;;  %v19513_v15 = vpop.eup %14815 }
 0x957   :  { %13640 = vmatprep.subr.bf16.mxu0 %v22207_v59  ;;  %13637 = vmatmul.mubr.msk.bf16.vlgmr.msra.gmra.mrb[244].mxu1 %vm4140_vm3, %v5600_v44  ;;  %v5281_v34 = vsel %vm4140_vm3, %v19513_v15, 0.0 }
 0x958   :  { %13648 = vmatprep.mubr.msk.bf16.mxu1 %vm15166_vm1, %v22207_v59  ;;  %14821 = vpow2.f32 %v4905_v46 }
 0x959   :  { %13631 = vmatmul.mubr.msk.bf16.vlgmr.msra.gmra.mrb[244].mxu0 %vm4140_vm3, %v5599_v63  ;;  %14823 = vrcp.f32 %v19363_v9  ;;  %v22600_v9 = vld [vmem:[#allocation60_spill] sm:$0xff] }
 0x95a   :  { %13642 = vmatprep.mubr.msk.bf16.mxu0 %vm15166_vm1, %v22207_v59  ;;  %14825 = vrcp.f32 %v19359_v7  ;;  %v22594_v7 = vld [vmem:[#allocation41_spill] sm:$0xff] }
 0x95b   :  { %v19515_v44 = vpop.eup %14817  ;;  %14827 = vrcp.f32 %v19361_v4 }
 0x95c   :  { %v19519_v41 = vpop.eup %14819  ;;  %v5284_v13 = vsel %vm4140_vm3, %v19515_v44, 0.0  ;;  %14829 = vrcp.f32 %v19355_v60 }
 0x95d   :  { %v5290_v54 = vsel %vm4140_vm3, %v19519_v41, 0.0  ;;  %14831 = vrcp.f32 %v19427_v35 }
 0x95e   :  { %14833 = vrcp.f32 %v19423_v14 }
 0x95f   :  { %14835 = vrcp.f32 %v19425_v18 }
 0x960   :  { %14837 = vrcp.f32 %v19419_v12 }
 0x961   :  { %14839 = vrcp.f32 %v19491_v33 }
 0x962   :  { %v19523_v48 = vpop.eup %14821  ;;  %14841 = vrcp.f32 %v19487_v30 }
 0x963   :  { %v5287_v56 = vsel %vm4140_vm3, %v19523_v48, 0.0  ;;  %v14824_v46 = vpop.eup %14823  ;;  %14843 = vrcp.f32 %v19489_v22 }
 0x964   :  { %14845 = vrcp.f32 %v19483_v39 }
 0x969   :  { %5282 = vadd.xlane.f32.xlu1 %v5281_v34  ;;  %v14826_v34 = vpop.eup %14825 }
 0x96b   :  { %5285 = vadd.xlane.f32.xlu0 %v5284_v13 }
 0x96d   :  { %5291 = vadd.xlane.f32.xlu1 %v5290_v54  ;;  %v22597_v54 = vld [vmem:[#allocation49_spill] sm:$0xff] }
 0x96f   :  { %5288 = vadd.xlane.f32.xlu0 %v5287_v56  ;;  %v14828_v56 = vpop.eup %14827 }
 0x97e   :  { %8292 = vrot.lane.b32.xlu1 %v22593_v43, %s15171_s29 }
 0x97f   :  { %v19534_v0 = vpop.f32.mrb[232].mxu1 }
 0x980   :  { %v13602_v63 = vpop.f32.mrb[233].mxu1 }
 0x981   :  { %v19537_v8 = vpop.f32.mrb[232].mxu0  ;;  %v19539_v53 = vpop.f32.mrb[234].mxu1 }
 0x982   :  { %v13596_v5 = vpop.f32.mrb[233].mxu0  ;;  %8339 = vrot.lane.b32.xlu1 %v22594_v7, %s15171_s29  ;;  %v13603_v24 = vpop.f32.mrb[235].mxu1  ;;  %v22598_v7 = vld [vmem:[#allocation52_spill] sm:$0xff] }
 0x983   :  { %v19545_v3 = vpop.f32.mrb[234].mxu0  ;;  %v14830_v63 = vpop.eup %14829  ;;  %v5527_v5 = vmul.f32 %v14824_v46, %v19203_v27  ;;  %v5526_v24 = vmul.f32 %v14826_v34, %v19195_v16  ;;  %v22601_v16 = vld [vmem:[#allocation46_spill] sm:$0xff] }
 0x984   :  { %v13597_v2 = vpop.f32.mrb[235].mxu0  ;;  %v19549_v60 = vpop.xlane.xlu1 %5258  ;;  %v5525_v4 = vmul.f32 %v14830_v63, %v19193_v47  ;;  %v22604_v47 = vld [vmem:[#allocation79_spill] sm:$0xff]  ;;  %v22608_v63 = vld [vmem:[#allocation16_spill] sm:$0xff] }
 0x985   :  { %8245 = vrot.lane.b32.xlu0 %v22595_v51, %s15171_s29  ;;  %v5528_v2 = vmul.f32 %v14828_v56, %v19199_v17  ;;  %v22602_v17 = vld [vmem:[#allocation48_spill] sm:$0xff]  ;;  %v14832_v12 = vpop.eup %14831 }
 0x986   :  { %v19553_v11 = vpop.xlane.xlu0 %5261  ;;  %8386 = vrot.lane.b32.xlu1 %v22596_v62, %s15171_s29  ;;  %v22599_v62 = vld [vmem:[#allocation57_spill] sm:$0xff]  ;;  %v5601_v46 = vpack.c.bf16 %v5526_v24, %v5525_v4  ;;  %v22603_v34 = vpack.i.bf16 %v22601_v16, %v22602_v17  ;;  %v22607_v56 = vld [vmem:[#allocation140_spill] sm:$0xff]  ;;  %v22611_v24 = vld [vmem:[#allocation134_spill] sm:$0xff] }
 0x987   :  { %v5602_v27 = vpack.c.bf16 %v5528_v2, %v5527_v5  ;;  %v22609_v5 = vpack.i.bf16 %v22607_v56, %v22608_v63 }
 0x988   :  { %v19557_v13 = vpop.xlane.xlu1 %5267 }
 0x989   :  { %8433 = vrot.lane.b32.xlu0 %v22597_v54, %s15171_s29 }
 0x98a   :  { %v19561_v43 = vpop.xlane.xlu0 %5264  ;;  %8480 = vrot.lane.b32.xlu1 %v22598_v7, %s15171_s29  ;;  %v22610_v7 = vld [vmem:[#allocation15_spill] sm:$0xff] }
 0x98b   :  { %v22612_v2 = vpack.i.bf16 %v22610_v7, %v22611_v24  ;;  %v5531_v7 = vmul.f32 %v14832_v12, %v19267_v28  ;;  %14847 = vrcp.f32 %v19561_v43  ;;  %v22616_v43 = vld [vmem:[#allocation110_spill] sm:$0xff] }
 0x98c   :  { %v8105_v51 = vpop.permute.xlu1 %8104  ;;  %14849 = vrcp.f32 %v19553_v11 }
 0x98d   :  { %8527 = vrot.lane.b32.xlu0 %v22599_v62, %s15171_s29  ;;  %13647 = vmatpush3.bf16.msra.mxu1 %v8105_v51  ;;  %14851 = vrcp.f32 %v19557_v13 }
 0x98e   :  { %v8058_v54 = vpop.permute.xlu0 %8057  ;;  %8574 = vrot.lane.b32.xlu1 %v22600_v9, %s15171_s29  ;;  %13658 = vmatprep.subr.bf16.mxu1 %v22207_v59  ;;  %v22605_v9 = vld [vmem:[#allocation111_spill] sm:$0xff]  ;;  %14853 = vrcp.f32 %v19549_v60 }
 0x98f   :  { %13641 = vmatpush3.bf16.msra.mxu0 %v8058_v54  ;;  %v22606_v4 = vpack.i.bf16 %v22604_v47, %v22605_v9  ;;  %v14834_v9 = vpop.eup %14833 }
 0x990   :  { %13652 = vmatprep.subr.bf16.mxu0 %v22207_v59  ;;  %13649 = vmatmul.mubr.msk.bf16.vlgmr.msra.gmra.mrb[248].mxu1 %vm4140_vm3, %v5602_v27  ;;  %v14836_v56 = vpop.eup %14835  ;;  %v5530_v24 = vmul.f32 %v14834_v9, %v19259_v31 }
 0x991   :  { %13880 = vrot.lane.b32.xlu0 %v22603_v34, %s15172_s2  ;;  %13660 = vmatprep.mubr.msk.bf16.mxu1 %vm15166_vm1, %v22207_v59 }
 0x992   :  { %13643 = vmatmul.mubr.msk.bf16.vlgmr.msra.gmra.mrb[248].mxu0 %vm4140_vm3, %v5601_v46  ;;  %13885 = vrot.lane.b32.xlu1 %v22606_v4, %s15172_s2 }
 0x993   :  { %13654 = vmatprep.mubr.msk.bf16.mxu0 %vm15166_vm1, %v22207_v59 }
 0x995   :  { %13890 = vrot.lane.b32.xlu0 %v22609_v5, %s15173_s21  ;;  %v14838_v5 = vpop.eup %14837 }
 0x996   :  { %13895 = vrot.lane.b32.xlu1 %v22612_v2, %s15173_s21  ;;  %v5532_v2 = vmul.f32 %v14836_v56, %v19263_v26  ;;  %v14840_v39 = vpop.eup %14839 }
 0x997   :  { %v14842_v22 = vpop.eup %14841 }
 0x998   :  { %v5534_v13 = vmul.f32 %v14842_v22, %v19323_v36 }
 0x9b8   :  { %v19600_v51 = vpop.f32.mrb[236].mxu1 }
 0x9b9   :  { %v13614_v62 = vpop.f32.mrb[237].mxu1 }
 0x9ba   :  { %v19603_v54 = vpop.f32.mrb[236].mxu0  ;;  %v19605_v27 = vpop.f32.mrb[238].mxu1 }
 0x9bb   :  { %v13608_v46 = vpop.f32.mrb[237].mxu0  ;;  %v14104_v16 = vpack.i.bf16 %v19605_v27, %v19600_v51  ;;  %v13615_v17 = vpop.f32.mrb[239].mxu1 }
 0x9bc   :  { %v19609_v34 = vpop.f32.mrb[238].mxu0  ;;  %v5529_v46 = vmul.f32 %v14838_v5, %v19257_v45 }
 0x9bd   :  { %v13609_v18 = vpop.f32.mrb[239].mxu0  ;;  %v19613_v35 = vpop.xlane.xlu1 %5270 }
 0x9be   :  { %v5604_v18 = vpack.c.bf16 %v5532_v2, %v5531_v7  ;;  %v5603_v14 = vpack.c.bf16 %v5530_v24, %v5529_v46  ;;  %v22613_v2 = vld [vmem:[#allocation147_spill] sm:$0xff] }
 0x9bf   :  { %v19615_v47 = vpop.xlane.xlu0 %5273 }
 0x9c1   :  { %v19617_v4 = vpop.xlane.xlu1 %5279 }
 0x9c3   :  { %v5277_v63 = vpop.xlane.xlu0 %5276 }
 0x9c4   :  { %14855 = vrcp.f32 %v5277_v63 }
 0x9c5   :  { %v8199_v62 = vpop.permute.xlu1 %8198  ;;  %14857 = vrcp.f32 %v19615_v47 }
 0x9c6   :  { %13659 = vmatpush3.bf16.msra.mxu1 %v8199_v62  ;;  %v22614_v62 = vld [vmem:[#allocation109_spill] sm:$0xff]  ;;  %14859 = vrcp.f32 %v19617_v4 }
 0x9c7   :  { %v8152_v17 = vpop.permute.xlu0 %8151  ;;  %13670 = vmatprep.subr.bf16.mxu1 %v22207_v59  ;;  %v22615_v46 = vpack.i.bf16 %v22613_v2, %v22614_v62  ;;  %14861 = vrcp.f32 %v19613_v35 }
 0x9c8   :  { %13653 = vmatpush3.bf16.msra.mxu0 %v8152_v17  ;;  %v14844_v17 = vpop.eup %14843 }
 0x9c9   :  { %13664 = vmatprep.subr.bf16.mxu0 %v22207_v59  ;;  %13661 = vmatmul.mubr.msk.bf16.vlgmr.msra.gmra.mrb[252].mxu1 %vm4140_vm3, %v5604_v18  ;;  %v22617_v18 = vld [vmem:[#allocation108_spill] sm:$0xff]  ;;  %v14846_v11 = vpop.eup %14845  ;;  %v5536_v60 = vmul.f32 %v14844_v17, %v19327_v19 }
 0x9ca   :  { %13672 = vmatprep.mubr.msk.bf16.mxu1 %vm15166_vm1, %v22207_v59  ;;  %v14848_v36 = vpop.eup %14847 }
 0x9cb   :  { %13655 = vmatmul.mubr.msk.bf16.vlgmr.msra.gmra.mrb[252].mxu0 %vm4140_vm3, %v5603_v14  ;;  %v5539_v62 = vmul.f32 %v14848_v36, %v19395_v55 }
 0x9cc   :  { %13666 = vmatprep.mubr.msk.bf16.mxu0 %vm15166_vm1, %v22207_v59 }
 0x9f1   :  { %v7956_v45 = vpop.f32.mrb[240].mxu1 }
 0x9f2   :  { %v13626_v31 = vpop.f32.mrb[241].mxu1 }
 0x9f3   :  { %v7909_v26 = vpop.f32.mrb[240].mxu0  ;;  %v7959_v28 = vpop.f32.mrb[242].mxu1 }
 0x9f4   :  { %v13620_v12 = vpop.f32.mrb[241].mxu0  ;;  %v13904_v14 = vpack.i.bf16 %v7959_v28, %v7956_v45  ;;  %v13627_v9 = vpop.f32.mrb[243].mxu1  ;;  %v22618_v45 = vpack.i.bf16 %v22616_v43, %v22617_v18 }
 0x9f5   :  { %v7912_v56 = vpop.f32.mrb[242].mxu0  ;;  %v22619_v12 = vld [vmem:[#allocation21_spill] sm:$0xff] }
 0x9f6   :  { %v13899_v5 = vpack.i.bf16 %v7912_v56, %v7909_v26  ;;  %v13621_v7 = vpop.f32.mrb[243].mxu0  ;;  %v5283_v24 = vpop.xlane.xlu1 %5282  ;;  %13905 = vrot.lane.b32.xlu1 %v13904_v14, %s15174_s9  ;;  %v5535_v26 = vmul.f32 %v14840_v39, %v19331_v21  ;;  %v22620_v14 = vld [vmem:[#allocation145_spill] sm:$0xff]  ;;  %v5533_v56 = vmul.f32 %v14846_v11, %v19321_v57 }
 0x9f7   :  { %v22621_v9 = vpack.i.bf16 %v22619_v12, %v22620_v14  ;;  %v22623_v7 = vld [vmem:[#allocation144_spill] sm:$0xff]  ;;  %v14850_v57 = vpop.eup %14849 }
 0x9f8   :  { %13900 = vrot.lane.b32.xlu0 %v13899_v5, %s15174_s9  ;;  %v5286_v30 = vpop.xlane.xlu0 %5285  ;;  %v22622_v5 = vld [vmem:[#allocation142_spill] sm:$0xff]  ;;  %v5606_v39 = vpack.c.bf16 %v5536_v60, %v5535_v26  ;;  %v5605_v19 = vpack.c.bf16 %v5534_v13, %v5533_v56  ;;  %v14852_v22 = vpop.eup %14851  ;;  %v5538_v4 = vmul.f32 %v14850_v57, %v19387_v42 }
 0x9f9   :  { %v22624_v2 = vpack.i.bf16 %v22622_v5, %v22623_v7  ;;  %v14854_v47 = vpop.eup %14853  ;;  %v5540_v35 = vmul.f32 %v14852_v22, %v19391_v40  ;;  %v14281_v60 = vld [vmem:[%s21711_s11] sm:$0xff]  }
 0x9fa   :  { %v5292_v33 = vpop.xlane.xlu1 %5291  ;;  %13915 = vrot.lane.b32.xlu1 %v22615_v46, %s15172_s2  ;;  %v5537_v17 = vmul.f32 %v14854_v47, %v19385_v49  ;;  %v14856_v55 = vpop.eup %14855  ;;  %v22625_v47 = vld [vmem:[#allocation153_spill] sm:$0xff] }
 0x9fb   :  { %v5608_v43 = vpack.c.bf16 %v5540_v35, %v5539_v62  ;;  %v5543_v40 = vmul.f32 %v14856_v55, %v19459_v20  ;;  %v22626_v62 = vld [vmem:[#allocation149_spill] sm:$0xff]  ;;  %v22632_v55 = vld [vmem:[#allocation23_spill] sm:$0xff] }
 0x9fc   :  { %13910 = vrot.lane.b32.xlu0 %v22618_v45, %s15172_s2  ;;  %v5289_v31 = vpop.xlane.xlu0 %5288  ;;  %v5607_v18 = vpack.c.bf16 %v5538_v4, %v5537_v17  ;;  %v14858_v45 = vpop.eup %14857  ;;  %v22627_v4 = vpack.i.bf16 %v22625_v47, %v22626_v62  ;;  %v22628_v35 = vld [vmem:[#allocation13_spill] sm:$0xff] }
 0x9fd   :  { %14863 = vrcp.f32 %v5289_v31  ;;  %v14860_v42 = vpop.eup %14859 }
 0x9fe   :  { %v8293_v28 = vpop.permute.xlu1 %8292  ;;  %13925 = vrot.lane.b32.xlu1 %v22621_v9, %s15173_s21  ;;  %14865 = vrcp.f32 %v5286_v30  ;;  %v14862_v49 = vpop.eup %14861  ;;  %v5542_v30 = vmul.f32 %v14858_v45, %v19451_v52 }
 0x9ff   :  { %13671 = vmatpush3.bf16.msra.mxu1 %v8293_v28  ;;  %14867 = vrcp.f32 %v5292_v33  ;;  %v5541_v33 = vmul.f32 %v14862_v49, %v19449_v58 }
 0xa00   :  { %13920 = vrot.lane.b32.xlu0 %v22624_v2, %s15173_s21  ;;  %v8246_v21 = vpop.permute.xlu0 %8245  ;;  %13682 = vmatprep.subr.bf16.mxu1 %v22207_v59  ;;  %14869 = vrcp.f32 %v5283_v24  ;;  %v5544_v24 = vmul.f32 %v14860_v42, %v19455_v23 }
 0xa01   :  { %13665 = vmatpush3.bf16.msra.mxu0 %v8246_v21  ;;  %v5609_v20 = vpack.c.bf16 %v5542_v30, %v5541_v33 }
 0xa02   :  { %13676 = vmatprep.subr.bf16.mxu0 %v22207_v59  ;;  %v8340_v63 = vpop.permute.xlu1 %8339  ;;  %13673 = vmatmul.mubr.msk.bf16.vlgmr.msra.gmra.mrb[0].mxu1 %vm4140_vm3, %v5606_v39  ;;  %v5610_v31 = vpack.c.bf16 %v5544_v24, %v5543_v40 }
 0xa03   :  { %13684 = vmatprep.mubr.msk.bf16.mxu1 %vm15166_vm1, %v22207_v59 }
 0xa04   :  { %13667 = vmatmul.mubr.msk.bf16.vlgmr.msra.gmra.mrb[0].mxu0 %vm4140_vm3, %v5605_v19  ;;  %v8434_v26 = vpop.permute.xlu0 %8433 }
 0xa05   :  { %13677 = vmatpush3.bf16.msra.mxu0 %v8340_v63  ;;  %13678 = vmatprep.mubr.msk.bf16.mxu0 %vm15166_vm1, %v22207_v59 }
 0xa06   :  { %13688 = vmatprep.subr.bf16.mxu0 %v22207_v59  ;;  %v8387_v46 = vpop.permute.xlu1 %8386 }
 0xa07   :  { %13683 = vmatpush3.bf16.msra.mxu1 %v8387_v46  ;;  %v14864_v13 = vpop.eup %14863  ;;  %v22629_v46 = vld [vmem:[#allocation156_spill] sm:$0xff] }
 0xa08   :  { %13694 = vmatprep.subr.bf16.mxu1 %v22207_v59  ;;  %v14866_v28 = vpop.eup %14865  ;;  %v8528_v14 = vpop.permute.xlu0 %8527  ;;  %v5547_v9 = vmul.f32 %v14864_v13, %v19523_v48  ;;  %v14282_v48 = vld [vmem:[%s21711_s11 + $0x8] sm:$0xff]   ;;  %v22630_v17 = vpack.i.bf16 %v22628_v35, %v22629_v46 }
 0xa09   :  { %v14868_v12 = vpop.eup %14867  ;;  %v5546_v58 = vmul.f32 %v14866_v28, %v19515_v44 }
 0xa0a   :  { %v8481_v11 = vpop.permute.xlu1 %8480  ;;  %13685 = vmatmul.mubr.msk.bf16.vlgmr.msra.gmra.mrb[4].mxu1 %vm4140_vm3, %v5608_v43  ;;  %v14870_v23 = vpop.eup %14869  ;;  %v5548_v56 = vmul.f32 %v14868_v12, %v19519_v41  ;;  %v22631_v43 = vpack.i.bf16 %v19283_v1, %v19278_v50 }
 0xa0b   :  { %13695 = vmatpush3.bf16.msra.mxu1 %v8481_v11  ;;  %13696 = vmatprep.mubr.msk.bf16.mxu1 %vm15166_vm1, %v22207_v59  ;;  %v5545_v5 = vmul.f32 %v14870_v23, %v19513_v15 }
 0xa0c   :  { %13679 = vmatmul.mubr.msk.bf16.vlgmr.msra.gmra.mrb[4].mxu0 %vm4140_vm3, %v5607_v18  ;;  %13706 = vmatprep.subr.bf16.mxu1 %v22207_v59  ;;  %v5612_v7 = vpack.c.bf16 %v5548_v56, %v5547_v9  ;;  %v22633_v18 = vld [vmem:[#allocation26_spill] sm:$0xff]  ;;  %v13881_v11 = vpop.permute.xlu0 %13880 }
 0xa0d   :  { %13689 = vmatpush3.bf16.msra.mxu0 %v8434_v26  ;;  %13690 = vmatprep.mubr.msk.bf16.mxu0 %vm15166_vm1, %v22207_v59  ;;  %v5611_v2 = vpack.c.bf16 %v5546_v58, %v5545_v5  ;;  %v22634_v45 = vpack.i.bf16 %v22632_v55, %v22633_v18  ;;  %v13883_v30 = vunpack.i.h.bf16 %v13881_v11  ;;  %v13882_v24 = vunpack.i.l.bf16 %v13881_v11  ;;  %v22635_v5 = vld [vmem:[#allocation128_spill] sm:$0xff]  ;;  %v22640_v11 = vld [vmem:[#allocation119_spill] sm:$0xff] }
 0xa0e   :  { %13700 = vmatprep.subr.bf16.mxu0 %v22207_v59  ;;  %v8575_v52 = vpop.permute.xlu1 %8574 }
 0xa10   :  { %v13891_v26 = vpop.permute.xlu0 %13890 }
 0xa11   :  { %v13893_v23 = vunpack.i.h.bf16 %v13891_v26  ;;  %v13892_v9 = vunpack.i.l.bf16 %v13891_v26  ;;  %v22642_v26 = vld [vmem:[#allocation99_spill] sm:$0xff] }
 0xa12   :  { %13697 = vmatmul.mubr.msk.bf16.vlgmr.msra.gmra.mrb[8].mxu1 %vm4140_vm3, %v5610_v31  ;;  %v13886_v42 = vpop.permute.xlu1 %13885 }
 0xa13   :  { %13707 = vmatpush3.bf16.msra.mxu1 %v8575_v52  ;;  %13708 = vmatprep.mubr.msk.bf16.mxu1 %vm15166_vm1, %v22207_v59  ;;  %v13888_v13 = vunpack.i.h.bf16 %v13886_v42 }
 0xa14   :  { %13691 = vmatmul.mubr.msk.bf16.vlgmr.msra.gmra.mrb[8].mxu0 %vm4140_vm3, %v5609_v20  ;;  %v13887_v20 = vunpack.i.l.bf16 %v13886_v42 }
 0xa15   :  { %13701 = vmatpush3.bf16.msra.mxu0 %v8528_v14  ;;  %13702 = vmatprep.mubr.msk.bf16.mxu0 %vm15166_vm1, %v22207_v59 }
 0xa16   :  { %13712 = vmatprep.subr.bf16.mxu0 %v14281_v60  ;;  %v13896_v49 = vpop.permute.xlu1 %13895 }
 0xa17   :  { %v13898_v50 = vunpack.i.h.bf16 %v13896_v49  ;;  %v13897_v1 = vunpack.i.l.bf16 %v13896_v49  ;;  %v22643_v49 = vld [vmem:[#allocation19_spill] sm:$0xff] }
 0xa1a   :  { %13709 = vmatmul.mubr.msk.bf16.vlgmr.msra.gmra.mrb[12].mxu1 %vm4140_vm3, %v5612_v7  ;;  %v9006_v7 = vsel %vm1005_vm2, %v22635_v5, %v13883_v30 }
 0xa1b   :  { %v9038_v35 = vsel %vm4140_vm3, %v9006_v7, %v13893_v23 }
 0xa1c   :  { %13703 = vmatmul.mubr.msk.bf16.vlgmr.msra.gmra.mrb[12].mxu0 %vm4140_vm3, %v5611_v2  ;;  %v22636_v2 = vld [vmem:[#allocation106_spill] sm:$0xff] }
 0xa1d   :  { %13713 = vmatpush3.bf16.msra.mxu0 %v14281_v60 }
 0xa1e   :  { %13714 = vmatprep.subr.bf16.mxu0 %v14282_v48 }
 0xa21   :  { %13715 = vmatpush3.bf16.msra.mxu0 %v14282_v48  ;;  %v9005_v48 = vsel %vm1005_vm2, %v22636_v2, %v13882_v24  ;;  %v22645_v24 = vpack.i.bf16 %v19347_v32, %v19342_v25 }
 0xa2a   :  { %v8050_v44 = vpop.f32.mrb[244].mxu1 }
 0xa2b   :  { %v13638_v21 = vpop.f32.mrb[245].mxu1 }
 0xa2c   :  { %v8003_v39 = vpop.f32.mrb[244].mxu0  ;;  %v8053_v36 = vpop.f32.mrb[246].mxu1  ;;  %v22637_v21 = vld [vmem:[#allocation37_spill] sm:$0xff] }
 0xa2d   :  { %v13632_v41 = vpop.f32.mrb[245].mxu0  ;;  %v13934_v19 = vpack.i.bf16 %v8053_v36, %v8050_v44  ;;  %v13639_v15 = vpop.f32.mrb[247].mxu1  ;;  %v22638_v36 = vld [vmem:[#allocation114_spill] sm:$0xff] }
 0xa2e   :  { %v8006_v57 = vpop.f32.mrb[246].mxu0  ;;  %v9007_v41 = vsel %vm1005_vm2, %v22638_v36, %v13887_v20 }
 0xa2f   :  { %v13929_v63 = vpack.i.bf16 %v8006_v57, %v8003_v39  ;;  %v13633_v22 = vpop.f32.mrb[247].mxu0  ;;  %13935 = vrot.lane.b32.xlu1 %v13934_v19, %s15174_s9  ;;  %v9008_v39 = vsel %vm1005_vm2, %v22637_v21, %v13888_v13 }
 0xa30   :  { %v9039_v22 = vsel %vm4140_vm3, %v9007_v41, %v13897_v1  ;;  %v22649_v41 = vld [vmem:[#allocation53_spill] sm:$0xff] }
 0xa31   :  { %13930 = vrot.lane.b32.xlu0 %v13929_v63, %s15174_s9  ;;  %v9040_v63 = vsel %vm4140_vm3, %v9008_v39, %v13898_v50 }
 0xa33   :  { %13945 = vrot.lane.b32.xlu1 %v22627_v4, %s15172_s2  ;;  %v9037_v4 = vsel %vm4140_vm3, %v9005_v48, %v13892_v9 }
 0xa35   :  { %13940 = vrot.lane.b32.xlu0 %v22630_v17, %s15172_s2 }
 0xa37   :  { %13955 = vrot.lane.b32.xlu1 %v22631_v43, %s15173_s21 }
 0xa39   :  { %13950 = vrot.lane.b32.xlu0 %v22634_v45, %s15173_s21  ;;  %v22639_v45 = vld [vmem:[#allocation116_spill] sm:$0xff] }
 0xa3a   :  { %v22641_v42 = vpack.i.bf16 %v22639_v45, %v22640_v11 }
 0xa63   :  { %v8144_v40 = vpop.f32.mrb[248].mxu1 }
 0xa64   :  { %v13650_v33 = vpop.f32.mrb[249].mxu1 }
 0xa65   :  { %v8097_v31 = vpop.f32.mrb[248].mxu0  ;;  %v8147_v60 = vpop.f32.mrb[250].mxu1  ;;  %v22646_v33 = vld [vmem:[#allocation155_spill] sm:$0xff] }
 0xa66   :  { %v13644_v28 = vpop.f32.mrb[249].mxu0  ;;  %v13964_v52 = vpack.i.bf16 %v8147_v60, %v8144_v40  ;;  %v13651_v12 = vpop.f32.mrb[251].mxu1  ;;  %v22644_v40 = vpack.i.bf16 %v22642_v26, %v22643_v49 }
 0xa67   :  { %v8100_v14 = vpop.f32.mrb[250].mxu0 }
 0xa68   :  { %v13959_v58 = vpack.i.bf16 %v8100_v14, %v8097_v31  ;;  %v13645_v56 = vpop.f32.mrb[251].mxu0  ;;  %v13906_v44 = vpop.permute.xlu1 %13905  ;;  %13965 = vrot.lane.b32.xlu1 %v13964_v52, %s15174_s9  ;;  %v22647_v31 = vld [vmem:[#allocation150_spill] sm:$0xff] }
 0xa69   :  { %v13908_v19 = vunpack.i.h.bf16 %v13906_v44  ;;  %v13907_v15 = vunpack.i.l.bf16 %v13906_v44  ;;  %v22648_v13 = vpack.i.bf16 %v22646_v33, %v22647_v31  ;;  %v22653_v33 = vld [vmem:[#allocation160_spill] sm:$0xff]  ;;  %v22654_v31 = vld [vmem:[#allocation157_spill] sm:$0xff] }
 0xa6a   :  { %13960 = vrot.lane.b32.xlu0 %v13959_v58, %s15174_s9  ;;  %v13901_v57 = vpop.permute.xlu0 %13900 }
 0xa6b   :  { %v13903_v47 = vunpack.i.h.bf16 %v13901_v57  ;;  %v13902_v62 = vunpack.i.l.bf16 %v13901_v57  ;;  %v9073_v46 = vsel %vm9069_vm4, %v9040_v63, %v13908_v19  ;;  %v9072_v17 = vsel %vm9069_vm4, %v9039_v22, %v13907_v15  ;;  %v22650_v15 = vld [vmem:[#allocation24_spill] sm:$0xff]  ;;  %v22651_v22 = vld [vmem:[#allocation131_spill] sm:$0xff] }
 0xa6c   :  { %v9103_v43 = vpack.c.bf16 %v9073_v46, %v9072_v17  ;;  %13975 = vrot.lane.b32.xlu1 %v22641_v42, %s15172_s2  ;;  %v13916_v20 = vpop.permute.xlu1 %13915 }
 0xa6d   :  { %v9070_v55 = vsel %vm9069_vm4, %v9037_v4, %v13902_v62  ;;  %v9071_v18 = vsel %vm9069_vm4, %v9038_v35, %v13903_v47  ;;  %v13918_v52 = vunpack.i.h.bf16 %v13916_v20  ;;  %v13917_v12 = vunpack.i.l.bf16 %v13916_v20  ;;  %v22652_v62 = vld [vmem:[#allocation59_spill] sm:$0xff]  ;;  %v22656_v20 = vld [vmem:[#allocation2_spill] sm:$0xff] }
 0xa6e   :  { %13970 = vrot.lane.b32.xlu0 %v22644_v40, %s15172_s2  ;;  %v9102_v30 = vpack.c.bf16 %v9071_v18, %v9070_v55  ;;  %v13911_v60 = vpop.permute.xlu0 %13910 }
 0xa6f   :  { %v13913_v9 = vunpack.i.h.bf16 %v13911_v60  ;;  %v13912_v58 = vunpack.i.l.bf16 %v13911_v60  ;;  %v9012_v19 = vsel %vm1005_vm2, %v22649_v41, %v13918_v52  ;;  %v9011_v57 = vsel %vm1005_vm2, %v22650_v15, %v13917_v12  ;;  %v22657_v60 = vld [vmem:[#allocation158_spill] sm:$0xff]  ;;  %v22661_v15 = vld [vmem:[#allocation88_spill] sm:$0xff] }
 0xa70   :  { %13716 = vmatprep.mubr.msk.bf16.mxu0 %vm97_vm0, %v9102_v30  ;;  %13985 = vrot.lane.b32.xlu1 %v22645_v24, %s15173_s21  ;;  %v13926_v28 = vpop.permute.xlu1 %13925  ;;  %v22660_v52 = vpack.i.bf16 %v19415_v38, %v19409_v37 }
 0xa71   :  { %13717 = vmatmul.mubr.msk.bf16.vlgmr.msra.gmra.mrb[16].mxu0 %vm97_vm0, %v9103_v43  ;;  %v13928_v56 = vunpack.i.h.bf16 %v13926_v28  ;;  %v13927_v5 = vunpack.i.l.bf16 %v13926_v28  ;;  %v9010_v47 = vsel %vm1005_vm2, %v22651_v22, %v13913_v9  ;;  %v9009_v4 = vsel %vm1005_vm2, %v22652_v62, %v13912_v58  ;;  %v22663_v62 = vld [vmem:[#allocation90_spill] sm:$0xff] }
 0xa72   :  { %13980 = vrot.lane.b32.xlu0 %v22648_v13, %s15173_s21  ;;  %v13921_v50 = vpop.permute.xlu0 %13920  ;;  %v22655_v13 = vpack.i.bf16 %v22653_v33, %v22654_v31  ;;  %v22658_v28 = vpack.i.bf16 %v22656_v20, %v22657_v60  ;;  %v22665_v20 = vld [vmem:[#allocation124_spill] sm:$0xff] }
 0xa73   :  { %v13923_v44 = vunpack.i.h.bf16 %v13921_v50  ;;  %v13922_v21 = vunpack.i.l.bf16 %v13921_v50  ;;  %v9043_v43 = vsel %vm4140_vm3, %v9011_v57, %v13927_v5  ;;  %v9044_v55 = vsel %vm4140_vm3, %v9012_v19, %v13928_v56  ;;  %v22666_v60 = vld [vmem:[#allocation4_spill] sm:$0xff] }
 0xa75   :  { %v9041_v11 = vsel %vm4140_vm3, %v9009_v4, %v13922_v21  ;;  %v9042_v42 = vsel %vm4140_vm3, %v9010_v47, %v13923_v44 }
 0xa9c   :  { %v8238_v1 = vpop.f32.mrb[252].mxu1 }
 0xa9d   :  { %v13662_v14 = vpop.f32.mrb[253].mxu1 }
 0xa9e   :  { %v8191_v23 = vpop.f32.mrb[252].mxu0  ;;  %v8241_v25 = vpop.f32.mrb[254].mxu1 }
 0xa9f   :  { %v13656_v32 = vpop.f32.mrb[253].mxu0  ;;  %v13994_v7 = vpack.i.bf16 %v8241_v25, %v8238_v1  ;;  %v13663_v2 = vpop.f32.mrb[255].mxu1  ;;  %v22659_v1 = vpack.i.bf16 %v19411_v61, %v19406_v29 }
 0xaa0   :  { %v8194_v48 = vpop.f32.mrb[254].mxu0 }
 0xaa1   :  { %v13989_v39 = vpack.i.bf16 %v8194_v48, %v8191_v23  ;;  %v13657_v36 = vpop.f32.mrb[255].mxu0  ;;  %v13936_v63 = vpop.permute.xlu1 %13935  ;;  %13995 = vrot.lane.b32.xlu1 %v13994_v7, %s15174_s9 }
 0xaa2   :  { %v13938_v35 = vunpack.i.h.bf16 %v13936_v63  ;;  %v13937_v46 = vunpack.i.l.bf16 %v13936_v63  ;;  %v22662_v63 = vld [vmem:[#allocation61_spill] sm:$0xff] }
 0xaa3   :  { %13990 = vrot.lane.b32.xlu0 %v13989_v39, %s15174_s9  ;;  %v13931_v17 = vpop.permute.xlu0 %13930 }
 0xaa4   :  { %v13933_v18 = vunpack.i.h.bf16 %v13931_v17  ;;  %v13932_v45 = vunpack.i.l.bf16 %v13931_v17  ;;  %v9077_v26 = vsel %vm9069_vm4, %v9044_v55, %v13938_v35  ;;  %v9076_v49 = vsel %vm9069_vm4, %v9043_v43, %v13937_v46  ;;  %v22664_v35 = vld [vmem:[#allocation22_spill] sm:$0xff] }
 0xaa5   :  { %v9105_v40 = vpack.c.bf16 %v9077_v26, %v9076_v49  ;;  %14005 = vrot.lane.b32.xlu1 %v22655_v13, %s15172_s2  ;;  %v13946_v12 = vpop.permute.xlu1 %13945 }
 0xaa6   :  { %v9074_v30 = vsel %vm9069_vm4, %v9041_v11, %v13932_v45  ;;  %v9075_v24 = vsel %vm9069_vm4, %v9042_v42, %v13933_v18  ;;  %v13948_v25 = vunpack.i.h.bf16 %v13946_v12  ;;  %v13947_v32 = vunpack.i.l.bf16 %v13946_v12  ;;  %v22668_v12 = vld [vmem:[#allocation105_spill] sm:$0xff] }
 0xaa7   :  { %14000 = vrot.lane.b32.xlu0 %v22658_v28, %s15172_s2  ;;  %v9104_v50 = vpack.c.bf16 %v9075_v24, %v9074_v30  ;;  %v13941_v14 = vpop.permute.xlu0 %13940  ;;  %v22667_v28 = vpack.i.bf16 %v22665_v20, %v22666_v60 }
 0xaa8   :  { %v13943_v7 = vunpack.i.h.bf16 %v13941_v14  ;;  %v13942_v2 = vunpack.i.l.bf16 %v13941_v14  ;;  %v9016_v57 = vsel %vm1005_vm2, %v22661_v15, %v13948_v25  ;;  %v9015_v22 = vsel %vm1005_vm2, %v22662_v63, %v13947_v32  ;;  %v22669_v14 = vld [vmem:[#allocation127_spill] sm:$0xff]  ;;  %v22675_v15 = vld [vmem:[#allocation68_spill] sm:$0xff] }
 0xaa9   :  { %13720 = vmatprep.mubr.msk.bf16.mxu0 %vm97_vm0, %v9104_v50  ;;  %14015 = vrot.lane.b32.xlu1 %v22659_v1, %s15173_s21  ;;  %v13956_v23 = vpop.permute.xlu1 %13955 }
 0xaaa   :  { %13721 = vmatmul.mubr.msk.bf16.gmra.mrb[20].mxu0 %vm97_vm0, %v9105_v40  ;;  %v13958_v48 = vunpack.i.h.bf16 %v13956_v23  ;;  %v13957_v44 = vunpack.i.l.bf16 %v13956_v23  ;;  %v9014_v4 = vsel %vm1005_vm2, %v22663_v62, %v13943_v7  ;;  %v9013_v46 = vsel %vm1005_vm2, %v22664_v35, %v13942_v2 }
 0xaab   :  { %14010 = vrot.lane.b32.xlu0 %v22660_v52, %s15173_s21  ;;  %v13951_v9 = vpop.permute.xlu0 %13950  ;;  %v22670_v23 = vpack.i.bf16 %v22668_v12, %v22669_v14  ;;  %v22671_v7 = vpack.i.bf16 %v19475_v10, %v19470_v6  ;;  %v22681_v35 = vpack.i.bf16 %v19539_v53, %v19534_v0  ;;  %v22683_v0 = vld [vmem:[#allocation138_spill] sm:$0xff]  ;;  %v22684_v53 = vld [vmem:[#allocation8_spill] sm:$0xff]  ;;  %v22690_v12 = vld [vmem:[#allocation137_spill] sm:$0xff] }
 0xaac   :  { %v13953_v37 = vunpack.i.h.bf16 %v13951_v9  ;;  %v13952_v38 = vunpack.i.l.bf16 %v13951_v9  ;;  %v9047_v18 = vsel %vm4140_vm3, %v9015_v22, %v13957_v44  ;;  %v9048_v45 = vsel %vm4140_vm3, %v9016_v57, %v13958_v48  ;;  %v22676_v57 = vld [vmem:[#allocation161_spill] sm:$0xff] }
 0xaad   :  { %v22677_v63 = vpack.i.bf16 %v22675_v15, %v22676_v57  ;;  %v22678_v22 = vld [vmem:[#allocation9_spill] sm:$0xff]  ;;  %v19893_v15 = vld [vmem:[%s21712_s12] ss:$0 sm:$0xff] }
 0xaae   :  { %v9045_v26 = vsel %vm4140_vm3, %v9013_v46, %v13952_v38  ;;  %v9046_v49 = vsel %vm4140_vm3, %v9014_v4, %v13953_v37 }
 0xad5   :  { %v8332_v58 = vpop.f32.mrb[0].mxu1 }
 0xad6   :  { %v13674_v56 = vpop.f32.mrb[1].mxu1 }
 0xad7   :  { %v8285_v5 = vpop.f32.mrb[0].mxu0  ;;  %v8335_v29 = vpop.f32.mrb[2].mxu1 }
 0xad8   :  { %v13668_v61 = vpop.f32.mrb[1].mxu0  ;;  %v14024_v21 = vpack.i.bf16 %v8335_v29, %v8332_v58  ;;  %v13675_v39 = vpop.f32.mrb[3].mxu1  ;;  %v22672_v29 = vld [vmem:[#allocation151_spill] sm:$0xff] }
 0xad9   :  { %v8288_v36 = vpop.f32.mrb[2].mxu0  ;;  %v22673_v61 = vld [vmem:[#allocation152_spill] sm:$0xff] }
 0xada   :  { %v14019_v41 = vpack.i.bf16 %v8288_v36, %v8285_v5  ;;  %v13669_v19 = vpop.f32.mrb[3].mxu0  ;;  %v13966_v47 = vpop.permute.xlu1 %13965  ;;  %14025 = vrot.lane.b32.xlu1 %v14024_v21, %s15174_s9  ;;  %v22674_v48 = vpack.i.bf16 %v22672_v29, %v22673_v61 }
 0xadb   :  { %v13968_v17 = vunpack.i.h.bf16 %v13966_v47  ;;  %v13967_v43 = vunpack.i.l.bf16 %v13966_v47  ;;  %v22679_v47 = vld [vmem:[#allocation72_spill] sm:$0xff] }
 0xadc   :  { %14020 = vrot.lane.b32.xlu0 %v14019_v41, %s15174_s9  ;;  %v13961_v55 = vpop.permute.xlu0 %13960  ;;  %v22680_v62 = vpack.i.bf16 %v22678_v22, %v22679_v47 }
 0xadd   :  { %v13963_v11 = vunpack.i.h.bf16 %v13961_v55  ;;  %v13962_v42 = vunpack.i.l.bf16 %v13961_v55  ;;  %v9081_v40 = vsel %vm9069_vm4, %v9048_v45, %v13968_v17  ;;  %v9080_v30 = vsel %vm9069_vm4, %v9047_v18, %v13967_v43  ;;  %v8426_v24 = vpop.f32.mrb[4].mxu1 }
 0xade   :  { %v9107_v33 = vpack.c.bf16 %v9081_v40, %v9080_v30  ;;  %14035 = vrot.lane.b32.xlu1 %v22667_v28, %s15172_s2  ;;  %v13686_v50 = vpop.f32.mrb[5].mxu1  ;;  %v22682_v55 = vpack.i.bf16 %v19545_v3, %v19537_v8  ;;  %v22685_v40 = vpack.i.bf16 %v22683_v0, %v22684_v53  ;;  %v22686_v30 = vld [vmem:[#allocation136_spill] sm:$0xff]  ;;  %v22689_v3 = vpack.i.bf16 %v19609_v34, %v19603_v54  ;;  %v15135_v53 = vld [vmem:[%s21999_s20 + $0x8] sm:$0xff] }
 0xadf   :  { %v9078_v31 = vsel %vm9069_vm4, %v9045_v26, %v13962_v42  ;;  %v9079_v13 = vsel %vm9069_vm4, %v9046_v49, %v13963_v11  ;;  %v8379_v1 = vpop.f32.mrb[4].mxu0  ;;  %v8429_v52 = vpop.f32.mrb[6].mxu1  ;;  %v22691_v34 = vld [vmem:[#allocation96_spill] sm:$0xff] }
 0xae0   :  { %14030 = vrot.lane.b32.xlu0 %v22670_v23, %s15172_s2  ;;  %v9106_v9 = vpack.c.bf16 %v9079_v13, %v9078_v31  ;;  %v14054_v58 = vpack.i.bf16 %v8429_v52, %v8426_v24  ;;  %v13687_v25 = vpop.f32.mrb[7].mxu1  ;;  %v13680_v32 = vpop.f32.mrb[5].mxu0  ;;  %v22687_v24 = vld [vmem:[#allocation133_spill] sm:$0xff] }
 0xae1   :  { %v8382_v56 = vpop.f32.mrb[6].mxu0  ;;  %v22688_v8 = vpack.i.bf16 %v22686_v30, %v22687_v24  ;;  %v13971_v31 = vpop.permute.xlu0 %13970  ;;  %v22693_v25 = vld [vmem:[#allocation64_spill] sm:$0xff] }
 0xae2   :  { %13724 = vmatprep.mubr.msk.bf16.mxu0 %vm97_vm0, %v9106_v9  ;;  %v14049_v5 = vpack.i.bf16 %v8382_v56, %v8379_v1  ;;  %14045 = vrot.lane.b32.xlu1 %v22671_v7, %s15173_s21  ;;  %v13681_v2 = vpop.f32.mrb[7].mxu0  ;;  %v13973_v50 = vunpack.i.h.bf16 %v13971_v31  ;;  %v13972_v1 = vunpack.i.l.bf16 %v13971_v31  ;;  %v22692_v9 = vld [vmem:[#allocation132_spill] sm:$0xff] }
 0xae3   :  { %13725 = vmatmul.mubr.msk.bf16.gmra.mrb[24].mxu0 %vm97_vm0, %v9107_v33  ;;  %v13976_v33 = vpop.permute.xlu1 %13975 }
 0xae4   :  { %14040 = vrot.lane.b32.xlu0 %v22674_v48, %s15173_s21  ;;  %v13978_v20 = vunpack.i.h.bf16 %v13976_v33  ;;  %v13977_v60 = vunpack.i.l.bf16 %v13976_v33  ;;  %v9017_v32 = vsel %vm1005_vm2, %v22693_v25, %v13972_v1 }
 0xae5   :  { %v8520_v44 = vpop.f32.mrb[8].mxu1  ;;  %v13981_v28 = vpop.permute.xlu0 %13980 }
 0xae6   :  { %14055 = vrot.lane.b32.xlu1 %v14054_v58, %s15174_s9  ;;  %v13698_v21 = vpop.f32.mrb[9].mxu1  ;;  %v13983_v27 = vunpack.i.h.bf16 %v13981_v28  ;;  %v9020_v54 = vsel %vm1005_vm2, %v22690_v12, %v13978_v20  ;;  %v9019_v14 = vsel %vm1005_vm2, %v22691_v34, %v13977_v60  ;;  %v9018_v58 = vsel %vm1005_vm2, %v22692_v9, %v13973_v50  ;;  %v22695_v60 = vld [vmem:[#allocation71_spill] sm:$0xff]  ;;  %v22696_v50 = vld [vmem:[#allocation30_spill] sm:$0xff] }
 0xae7   :  { %v8473_v39 = vpop.f32.mrb[8].mxu0  ;;  %v8523_v36 = vpop.f32.mrb[10].mxu1 }
 0xae8   :  { %14050 = vrot.lane.b32.xlu0 %v14049_v5, %s15174_s9  ;;  %v13692_v37 = vpop.f32.mrb[9].mxu0  ;;  %v14084_v38 = vpack.i.bf16 %v8523_v36, %v8520_v44  ;;  %v13699_v6 = vpop.f32.mrb[11].mxu1  ;;  %v9050_v21 = vsel %vm4140_vm3, %v9018_v58, %v13983_v27 }
 0xae9   :  { %v8476_v10 = vpop.f32.mrb[10].mxu0  ;;  %v13986_v13 = vpop.permute.xlu1 %13985 }
 0xaea   :  { %v14079_v41 = vpack.i.bf16 %v8476_v10, %v8473_v39  ;;  %v13693_v19 = vpop.f32.mrb[11].mxu0  ;;  %14065 = vrot.lane.b32.xlu1 %v22677_v63, %s15172_s2  ;;  %v13988_v52 = vunpack.i.h.bf16 %v13986_v13  ;;  %v13987_v51 = vunpack.i.l.bf16 %v13986_v13  ;;  %v22694_v13 = vld [vmem:[#allocation40_spill] sm:$0xff] }
 0xaec   :  { %14060 = vrot.lane.b32.xlu0 %v22680_v62, %s15172_s2  ;;  %v9051_v2 = vsel %vm4140_vm3, %v9019_v14, %v13987_v51  ;;  %v9052_v29 = vsel %vm4140_vm3, %v9020_v54, %v13988_v52  ;;  %v22697_v52 = vld [vmem:[#allocation32_spill] sm:$0xff] }
 0xaed   :  { %v8614_v4 = vpop.f32.mrb[12].mxu1 }
 0xaee   :  { %14075 = vrot.lane.b32.xlu1 %v22681_v35, %s15173_s21  ;;  %v13710_v46 = vpop.f32.mrb[13].mxu1 }
 0xaef   :  { %v8567_v17 = vpop.f32.mrb[12].mxu0  ;;  %v8617_v43 = vpop.f32.mrb[14].mxu1  ;;  %v15133_v46 = vld [vmem:[%s21999_s20] sm:$0xff] }
 0xaf0   :  { %14070 = vrot.lane.b32.xlu0 %v22682_v55, %s15173_s21  ;;  %v13704_v18 = vpop.f32.mrb[13].mxu0  ;;  %v14114_v45 = vpack.i.bf16 %v8617_v43, %v8614_v4  ;;  %v13711_v11 = vpop.f32.mrb[15].mxu1 }
 0xaf1   :  { %v8570_v42 = vpop.f32.mrb[14].mxu0 }
 0xaf2   :  { %v14109_v26 = vpack.i.bf16 %v8570_v42, %v8567_v17  ;;  %v13705_v49 = vpop.f32.mrb[15].mxu0  ;;  %14085 = vrot.lane.b32.xlu1 %v14084_v38, %s15174_s9 }
 0xaf4   :  { %14080 = vrot.lane.b32.xlu0 %v14079_v41, %s15174_s9 }
 0xaf6   :  { %14095 = vrot.lane.b32.xlu1 %v22685_v40, %s15172_s2 }
 0xaf8   :  { %14090 = vrot.lane.b32.xlu0 %v22688_v8, %s15172_s2 }
 0xafa   :  { %14105 = vrot.lane.b32.xlu1 %v14104_v16, %s15173_s21  ;;  %v13982_v16 = vunpack.i.l.bf16 %v13981_v28 }
 0xafc   :  { %14100 = vrot.lane.b32.xlu0 %v22689_v3, %s15173_s21  ;;  %v9049_v44 = vsel %vm4140_vm3, %v9017_v32, %v13982_v16  ;;  %v15136_v16 = vld [vmem:[%s21999_s20 + $0x18] sm:$0xff] }
 0xafe   :  { %14115 = vrot.lane.b32.xlu1 %v14114_v45, %s15174_s9 }
 0xb00   :  { %14110 = vrot.lane.b32.xlu0 %v14109_v26, %s15174_s9  ;;  %v15134_v26 = vld [vmem:[%s21999_s20 + $0x10] sm:$0xff] }
 0xb13   :  { %v13996_v23 = vpop.permute.xlu1 %13995 }
 0xb14   :  { %v13998_v56 = vunpack.i.h.bf16 %v13996_v23  ;;  %v13997_v5 = vunpack.i.l.bf16 %v13996_v23 }
 0xb15   :  { %v13991_v7 = vpop.permute.xlu0 %13990 }
 0xb16   :  { %v13993_v61 = vunpack.i.h.bf16 %v13991_v7  ;;  %v13992_v48 = vunpack.i.l.bf16 %v13991_v7  ;;  %v9085_v39 = vsel %vm9069_vm4, %v9052_v29, %v13998_v56  ;;  %v9084_v36 = vsel %vm9069_vm4, %v9051_v2, %v13997_v5 }
 0xb17   :  { %v9109_v37 = vpack.c.bf16 %v9085_v39, %v9084_v36  ;;  %v14006_v41 = vpop.permute.xlu1 %14005 }
 0xb18   :  { %v9082_v38 = vsel %vm9069_vm4, %v9049_v44, %v13992_v48  ;;  %v9083_v6 = vsel %vm9069_vm4, %v9050_v21, %v13993_v61  ;;  %v14008_v55 = vunpack.i.h.bf16 %v14006_v41  ;;  %v14007_v18 = vunpack.i.l.bf16 %v14006_v41 }
 0xb19   :  { %v9108_v10 = vpack.c.bf16 %v9083_v6, %v9082_v38  ;;  %v14001_v19 = vpop.permute.xlu0 %14000 }
 0xb1a   :  { %v14003_v45 = vunpack.i.h.bf16 %v14001_v19  ;;  %v14002_v11 = vunpack.i.l.bf16 %v14001_v19  ;;  %v9024_v20 = vsel %vm1005_vm2, %v22694_v13, %v14008_v55  ;;  %v9023_v28 = vsel %vm1005_vm2, %v22695_v60, %v14007_v18  ;;  %v22700_v55 = vld [vmem:[#allocation139_spill] sm:$0xff] }
 0xb1b   :  { %13728 = vmatprep.mubr.msk.bf16.mxu0 %vm97_vm0, %v9108_v10  ;;  %v14016_v35 = vpop.permute.xlu1 %14015 }
 0xb1c   :  { %13729 = vmatmul.mubr.msk.bf16.gmra.mrb[28].mxu0 %vm97_vm0, %v9109_v37  ;;  %v14018_v24 = vunpack.i.h.bf16 %v14016_v35  ;;  %v14017_v8 = vunpack.i.l.bf16 %v14016_v35  ;;  %v9022_v1 = vsel %vm1005_vm2, %v22696_v50, %v14003_v45  ;;  %v9021_v51 = vsel %vm1005_vm2, %v22697_v52, %v14002_v11  ;;  %v22699_v35 = vld [vmem:[#allocation103_spill] sm:$0xff] }
 0xb1d   :  { %v14011_v42 = vpop.permute.xlu0 %14010  ;;  %v22701_v45 = vld [vmem:[#allocation95_spill] sm:$0xff] }
 0xb1e   :  { %v14013_v3 = vunpack.i.h.bf16 %v14011_v42  ;;  %v14012_v33 = vunpack.i.l.bf16 %v14011_v42  ;;  %v9055_v9 = vsel %vm4140_vm3, %v9023_v28, %v14017_v8  ;;  %v9056_v58 = vsel %vm4140_vm3, %v9024_v20, %v14018_v24 }
 0xb20   :  { %v9053_v56 = vsel %vm4140_vm3, %v9021_v51, %v14012_v33  ;;  %v9054_v5 = vsel %vm4140_vm3, %v9022_v1, %v14013_v3 }
 0xb44   :  { %v13718_v57 = vpop.f32.mrb[16].mxu0 }
 0xb45   :  { %v9223_v63 = vpop.f32.mrb[17].mxu0  ;;  %v9232_v22 = vadd.f32 %v13718_v57, %v19893_v15 }
 0xb46   :  { %v9224_v47 = vadd.f32 %v19893_v15, %v9223_v63  ;;  %v13719_v62 = vpop.f32.mrb[18].mxu0 }
 0xb47   :  { %v9226_v4 = vpop.f32.mrb[19].mxu0  ;;  %v19906_v49 = vadd.f32 %v15134_v26, %v9232_v22  ;;  %v9235_v0 = vadd.f32 %v13719_v62, %v19893_v15  ;;  %v22698_v62 = vld [vmem:[#allocation77_spill] sm:$0xff] }
 0xb48   :  { %v19900_v17 = vadd.f32 %v15133_v46, %v9224_v47  ;;  %v9227_v43 = vadd.f32 %v19893_v15, %v9226_v4 }
 0xb49   :  { %v19929_v12 = vadd.f32 %v15136_v16, %v9235_v0  ;;  %v9390_v23 = vsel %vm97_vm0, %v19906_v49, 0.0 }
 0xb4a   :  { %v19912_v40 = vadd.f32 %v15135_v53, %v9227_v43  ;;  %v9384_v30 = vsel %vm97_vm0, %v19900_v17, 0.0 }
 0xb4b   :  { %9385 = vadd.xlane.f32.xlu0 %v9384_v30  ;;  %v9393_v39 = vsel %vm97_vm0, %v19929_v12, 0.0 }
 0xb4c   :  { %v9387_v31 = vsel %vm97_vm0, %v19912_v40, 0.0  ;;  %v14026_v27 = vpop.permute.xlu1 %14025 }
 0xb4d   :  { %9388 = vadd.xlane.f32.xlu1 %v9387_v31  ;;  %v14028_v54 = vunpack.i.h.bf16 %v14026_v27  ;;  %v14027_v34 = vunpack.i.l.bf16 %v14026_v27 }
 0xb4e   :  { %v14021_v14 = vpop.permute.xlu0 %14020 }
 0xb4f   :  { %v14023_v25 = vunpack.i.h.bf16 %v14021_v14  ;;  %v14022_v32 = vunpack.i.l.bf16 %v14021_v14  ;;  %9391 = vadd.xlane.f32.xlu0 %v9390_v23  ;;  %v9089_v7 = vsel %vm9069_vm4, %v9056_v58, %v14028_v54  ;;  %v9088_v2 = vsel %vm9069_vm4, %v9055_v9, %v14027_v34 }
 0xb50   :  { %v9111_v29 = vpack.c.bf16 %v9089_v7, %v9088_v2  ;;  %v14036_v44 = vpop.permute.xlu1 %14035 }
 0xb51   :  { %v9086_v61 = vsel %vm9069_vm4, %v9053_v56, %v14022_v32  ;;  %v9087_v48 = vsel %vm9069_vm4, %v9054_v5, %v14023_v25  ;;  %v14038_v37 = vunpack.i.h.bf16 %v14036_v44  ;;  %v14037_v38 = vunpack.i.l.bf16 %v14036_v44  ;;  %v22702_v32 = vld [vmem:[#allocation66_spill] sm:$0xff] }
 0xb52   :  { %v14031_v21 = vpop.permute.xlu0 %14030  ;;  %v9110_v36 = vpack.c.bf16 %v9087_v48, %v9086_v61  ;;  %v22703_v5 = vld [vmem:[#allocation102_spill] sm:$0xff]  ;;  %v22705_v48 = vld [vmem:[#allocation7_spill] sm:$0xff] }
 0xb53   :  { %9394 = vadd.xlane.f32.xlu0 %v9393_v39  ;;  %v14033_v10 = vunpack.i.h.bf16 %v14031_v21  ;;  %v14032_v41 = vunpack.i.l.bf16 %v14031_v21  ;;  %v9028_v4 = vsel %vm1005_vm2, %v22698_v62, %v14038_v37  ;;  %v9027_v46 = vsel %vm1005_vm2, %v22699_v35, %v14037_v38 }
 0xb54   :  { %13732 = vmatprep.mubr.msk.bf16.mxu0 %vm97_vm0, %v9110_v36  ;;  %v14046_v6 = vpop.permute.xlu1 %14045 }
 0xb55   :  { %13733 = vmatmul.mubr.msk.bf16.gmra.mrb[32].mxu0 %vm97_vm0, %v9111_v29  ;;  %v14048_v57 = vunpack.i.h.bf16 %v14046_v6  ;;  %v14047_v63 = vunpack.i.l.bf16 %v14046_v6  ;;  %v9026_v18 = vsel %vm1005_vm2, %v22700_v55, %v14033_v10  ;;  %v9025_v11 = vsel %vm1005_vm2, %v22701_v45, %v14032_v41  ;;  %v22704_v29 = vld [vmem:[#allocation74_spill] sm:$0xff] }
 0xb56   :  { %v14041_v19 = vpop.permute.xlu0 %14040 }
 0xb57   :  { %v14043_v22 = vunpack.i.h.bf16 %v14041_v19  ;;  %v14042_v47 = vunpack.i.l.bf16 %v14041_v19  ;;  %v9059_v53 = vsel %vm4140_vm3, %v9027_v46, %v14047_v63  ;;  %v9060_v30 = vsel %vm4140_vm3, %v9028_v4, %v14048_v57 }
 0xb58   :  { %v14056_v43 = vpop.permute.xlu1 %14055 }
 0xb59   :  { %v14058_v42 = vunpack.i.h.bf16 %v14056_v43  ;;  %v14057_v26 = vunpack.i.l.bf16 %v14056_v43  ;;  %v9057_v3 = vsel %vm4140_vm3, %v9025_v11, %v14042_v47  ;;  %v9058_v33 = vsel %vm4140_vm3, %v9026_v18, %v14043_v22 }
 0xb5a   :  { %v14051_v0 = vpop.permute.xlu0 %14050 }
 0xb5b   :  { %v14053_v24 = vunpack.i.h.bf16 %v14051_v0  ;;  %v14052_v8 = vunpack.i.l.bf16 %v14051_v0  ;;  %v9093_v31 = vsel %vm9069_vm4, %v9060_v30, %v14058_v42  ;;  %v9092_v13 = vsel %vm9069_vm4, %v9059_v53, %v14057_v26 }
 0xb5c   :  { %v9113_v20 = vpack.c.bf16 %v9093_v31, %v9092_v13  ;;  %v14066_v50 = vpop.permute.xlu1 %14065  ;;  %v22708_v13 = vld [vmem:[#allocation38_spill] sm:$0xff] }
 0xb5d   :  { %v9090_v60 = vsel %vm9069_vm4, %v9057_v3, %v14052_v8  ;;  %v9091_v28 = vsel %vm9069_vm4, %v9058_v33, %v14053_v24  ;;  %v14068_v51 = vunpack.i.h.bf16 %v14066_v50  ;;  %v14067_v27 = vunpack.i.l.bf16 %v14066_v50  ;;  %v22706_v24 = vld [vmem:[#allocation80_spill] sm:$0xff]  ;;  %v22707_v3 = vld [vmem:[#allocation146_spill] sm:$0xff] }
 0xb5e   :  { %v14061_v1 = vpop.permute.xlu0 %14060  ;;  %v9112_v52 = vpack.c.bf16 %v9091_v28, %v9090_v60  ;;  %v22709_v60 = vld [vmem:[#allocation5_spill] sm:$0xff] }
 0xb5f   :  { %v14063_v54 = vunpack.i.h.bf16 %v14061_v1  ;;  %v14062_v34 = vunpack.i.l.bf16 %v14061_v1  ;;  %v9032_v56 = vsel %vm1005_vm2, %v22702_v32, %v14068_v51  ;;  %v9031_v7 = vsel %vm1005_vm2, %v22703_v5, %v14067_v27 }
 0xb60   :  { %13736 = vmatprep.mubr.msk.bf16.mxu0 %vm97_vm0, %v9112_v52  ;;  %v14076_v16 = vpop.permute.xlu1 %14075 }
 0xb61   :  { %13737 = vmatmul.mubr.msk.bf16.gmra.mrb[36].mxu0 %vm97_vm0, %v9113_v20  ;;  %v14078_v23 = vunpack.i.h.bf16 %v14076_v16  ;;  %v14077_v9 = vunpack.i.l.bf16 %v14076_v16  ;;  %v9030_v61 = vsel %vm1005_vm2, %v22704_v29, %v14063_v54  ;;  %v9029_v44 = vsel %vm1005_vm2, %v22705_v48, %v14062_v34 }
 0xb62   :  { %v14071_v14 = vpop.permute.xlu0 %14070 }
 0xb63   :  { %v14073_v58 = vunpack.i.h.bf16 %v14071_v14  ;;  %v14072_v25 = vunpack.i.l.bf16 %v14071_v14  ;;  %v9063_v37 = vsel %vm4140_vm3, %v9031_v7, %v14077_v9  ;;  %v9064_v38 = vsel %vm4140_vm3, %v9032_v56, %v14078_v23 }
 0xb64   :  { %v14086_v2 = vpop.permute.xlu1 %14085 }
 0xb65   :  { %v14088_v21 = vunpack.i.h.bf16 %v14086_v2  ;;  %v14087_v39 = vunpack.i.l.bf16 %v14086_v2  ;;  %v9061_v41 = vsel %vm4140_vm3, %v9029_v44, %v14072_v25  ;;  %v9062_v19 = vsel %vm4140_vm3, %v9030_v61, %v14073_v58  ;;  %v15137_v44 = vld [vmem:[%s21999_s20 + $0x20] sm:$0xff] }
 0xb66   :  { %v14081_v36 = vpop.permute.xlu0 %14080 }
 0xb67   :  { %v14083_v6 = vunpack.i.h.bf16 %v14081_v36  ;;  %v14082_v10 = vunpack.i.l.bf16 %v14081_v36  ;;  %v9097_v57 = vsel %vm9069_vm4, %v9064_v38, %v14088_v21  ;;  %v9096_v63 = vsel %vm9069_vm4, %v9063_v37, %v14087_v39  ;;  %v15138_v37 = vld [vmem:[%s21999_s20 + $0x30] sm:$0xff] }
 0xb68   :  { %v9115_v22 = vpack.c.bf16 %v9097_v57, %v9096_v63  ;;  %v14096_v4 = vpop.permute.xlu1 %14095 }
 0xb69   :  { %v9094_v47 = vsel %vm9069_vm4, %v9061_v41, %v14082_v10  ;;  %v9095_v62 = vsel %vm9069_vm4, %v9062_v19, %v14083_v6  ;;  %v14098_v43 = vunpack.i.h.bf16 %v14096_v4  ;;  %v14097_v55 = vunpack.i.l.bf16 %v14096_v4  ;;  %v15139_v6 = vld [vmem:[%s21999_s20 + $0x28] sm:$0xff]  ;;  %v15140_v19 = vld [vmem:[%s21999_s20 + $0x38] sm:$0xff] }
 0xb6a   :  { %v14091_v35 = vpop.permute.xlu0 %14090  ;;  %v9114_v46 = vpack.c.bf16 %v9095_v62, %v9094_v47 }
 0xb6b   :  { %v14093_v45 = vunpack.i.h.bf16 %v14091_v35  ;;  %v14092_v11 = vunpack.i.l.bf16 %v14091_v35  ;;  %v9036_v8 = vsel %vm1005_vm2, %v22706_v24, %v14098_v43  ;;  %v9035_v33 = vsel %vm1005_vm2, %v22707_v3, %v14097_v55 }
 0xb6c   :  { %13740 = vmatprep.mubr.msk.bf16.mxu0 %vm97_vm0, %v9114_v46  ;;  %v14106_v18 = vpop.permute.xlu1 %14105 }
 0xb6d   :  { %13741 = vmatmul.mubr.msk.bf16.gmra.mrb[40].mxu0 %vm97_vm0, %v9115_v22  ;;  %v14108_v26 = vunpack.i.h.bf16 %v14106_v18  ;;  %v14107_v0 = vunpack.i.l.bf16 %v14106_v18  ;;  %v9034_v20 = vsel %vm1005_vm2, %v22708_v13, %v14093_v45  ;;  %v9033_v28 = vsel %vm1005_vm2, %v22709_v60, %v14092_v11  ;;  %v15141_v18 = vld [vmem:[%s21999_s20 + $0x40] sm:$0xff] }
 0xb6e   :  { %v14101_v42 = vpop.permute.xlu0 %14100 }
 0xb6f   :  { %v14103_v53 = vunpack.i.h.bf16 %v14101_v42  ;;  %v14102_v30 = vunpack.i.l.bf16 %v14101_v42  ;;  %v9067_v51 = vsel %vm4140_vm3, %v9035_v33, %v14107_v0  ;;  %v9068_v27 = vsel %vm4140_vm3, %v9036_v8, %v14108_v26  ;;  %v15142_v26 = vld [vmem:[%s21999_s20 + $0x50] sm:$0xff]  ;;  %v15144_v8 = vld [vmem:[%s21999_s20 + $0x58] sm:$0xff] }
 0xb70   :  { %v14116_v31 = vpop.permute.xlu1 %14115 }
 0xb71   :  { %v14118_v50 = vunpack.i.h.bf16 %v14116_v31  ;;  %v14117_v1 = vunpack.i.l.bf16 %v14116_v31  ;;  %v9065_v34 = vsel %vm4140_vm3, %v9033_v28, %v14102_v30  ;;  %v9066_v14 = vsel %vm4140_vm3, %v9034_v20, %v14103_v53  ;;  %v15143_v53 = vld [vmem:[%s21999_s20 + $0x48] sm:$0xff] }
 0xb72   :  { %v14111_v52 = vpop.permute.xlu0 %14110 }
 0xb73   :  { %v14113_v16 = vunpack.i.h.bf16 %v14111_v52  ;;  %v14112_v54 = vunpack.i.l.bf16 %v14111_v52  ;;  %v9101_v23 = vsel %vm9069_vm4, %v9068_v27, %v14118_v50  ;;  %v9100_v9 = vsel %vm9069_vm4, %v9067_v51, %v14117_v1  ;;  %v15145_v51 = vld [vmem:[%s21999_s20 + $0x60] sm:$0xff] }
 0xb74   :  { %v9117_v58 = vpack.c.bf16 %v9101_v23, %v9100_v9  ;;  %v15147_v23 = vld [vmem:[%s21999_s20 + $0x68] sm:$0xff] }
 0xb75   :  { %v9098_v25 = vsel %vm9069_vm4, %v9065_v34, %v14112_v54  ;;  %v9099_v32 = vsel %vm9069_vm4, %v9066_v14, %v14113_v16  ;;  %v15146_v34 = vld [vmem:[%s21999_s20 + $0x70] sm:$0xff] }
 0xb76   :  { %v9116_v56 = vpack.c.bf16 %v9099_v32, %v9098_v25  ;;  %v15148_v25 = vld [vmem:[%s21999_s20 + $0x78] sm:$0xff] }
 0xb78   :  { %13744 = vmatprep.mubr.msk.bf16.mxu0 %vm97_vm0, %v9116_v56 }
 0xb79   :  { %13745 = vmatmul.mubr.msk.bf16.gmra.mrb[44].mxu0 %vm97_vm0, %v9117_v58 }
 0xb7d   :  { %v13722_v5 = vpop.f32.mrb[20].mxu0 }
 0xb7e   :  { %v9239_v7 = vpop.f32.mrb[21].mxu0  ;;  %v9248_v2 = vadd.f32 %v13722_v5, %v19893_v15 }
 0xb7f   :  { %v9240_v29 = vadd.f32 %v19893_v15, %v9239_v7  ;;  %v13723_v61 = vpop.f32.mrb[22].mxu0 }
 0xb80   :  { %v9242_v48 = vpop.f32.mrb[23].mxu0  ;;  %v9251_v39 = vadd.f32 %v13723_v61, %v19893_v15  ;;  %v20011_v38 = vadd.f32 %v15138_v37, %v9248_v2 }
 0xb81   :  { %v20004_v21 = vadd.f32 %v15137_v44, %v9240_v29  ;;  %v9243_v36 = vadd.f32 %v19893_v15, %v9242_v48 }
 0xb82   :  { %v20023_v57 = vadd.f32 %v15140_v19, %v9251_v39  ;;  %v9402_v22 = vsel %vm97_vm0, %v20011_v38, 0.0  ;;  %v15150_v19 = vld [vmem:[%s21999_s20 + $0x90] sm:$0xff] }
 0xb83   :  { %v20016_v10 = vadd.f32 %v15139_v6, %v9243_v36  ;;  %v9396_v41 = vsel %vm97_vm0, %v20004_v21, 0.0  ;;  %v15149_v36 = vld [vmem:[%s21999_s20 + $0x80] sm:$0xff] }
 0xb84   :  { %9397 = vadd.xlane.f32.xlu0 %v9396_v41  ;;  %v9405_v47 = vsel %vm97_vm0, %v20023_v57, 0.0 }
 0xb85   :  { %v9399_v63 = vsel %vm97_vm0, %v20016_v10, 0.0 }
 0xb86   :  { %9400 = vadd.xlane.f32.xlu1 %v9399_v63 }
 0xb88   :  { %9403 = vadd.xlane.f32.xlu0 %v9402_v22  ;;  %v15151_v22 = vld [vmem:[%s21999_s20 + $0x88] sm:$0xff] }
 0xb8a   :  { %9406 = vadd.xlane.f32.xlu1 %v9405_v47 }
 0xbb6   :  { %v13726_v62 = vpop.f32.mrb[24].mxu0 }
 0xbb7   :  { %v9255_v4 = vpop.f32.mrb[25].mxu0  ;;  %v9264_v35 = vadd.f32 %v13726_v62, %v19893_v15 }
 0xbb8   :  { %v9256_v46 = vadd.f32 %v19893_v15, %v9255_v4  ;;  %v13727_v43 = vpop.f32.mrb[26].mxu0  ;;  %v15152_v4 = vld [vmem:[%s21999_s20 + $0x98] sm:$0xff] }
 0xbb9   :  { %v9258_v55 = vpop.f32.mrb[27].mxu0  ;;  %v9267_v11 = vadd.f32 %v13727_v43, %v19893_v15  ;;  %v20043_v0 = vadd.f32 %v15142_v26, %v9264_v35 }
 0xbba   :  { %v20036_v45 = vadd.f32 %v15141_v18, %v9256_v46  ;;  %v9259_v42 = vadd.f32 %v19893_v15, %v9258_v55 }
 0xbbb   :  { %v20055_v3 = vadd.f32 %v15144_v8, %v9267_v11  ;;  %v9414_v31 = vsel %vm97_vm0, %v20043_v0, 0.0  ;;  %v15153_v8 = vld [vmem:[%s21999_s20 + $0xa0] sm:$0xff] }
 0xbbc   :  { %v20048_v30 = vadd.f32 %v15143_v53, %v9259_v42  ;;  %v9408_v24 = vsel %vm97_vm0, %v20036_v45, 0.0 }
 0xbbd   :  { %9409 = vadd.xlane.f32.xlu0 %v9408_v24  ;;  %v9417_v13 = vsel %vm97_vm0, %v20055_v3, 0.0 }
 0xbbe   :  { %v9411_v33 = vsel %vm97_vm0, %v20048_v30, 0.0 }
 0xbbf   :  { %9412 = vadd.xlane.f32.xlu1 %v9411_v33 }
 0xbc1   :  { %9415 = vadd.xlane.f32.xlu0 %v9414_v31 }
 0xbc3   :  { %9418 = vadd.xlane.f32.xlu1 %v9417_v13 }
 0xbef   :  { %v13730_v20 = vpop.f32.mrb[28].mxu0 }
 0xbf0   :  { %v9271_v60 = vpop.f32.mrb[29].mxu0  ;;  %v9280_v28 = vadd.f32 %v13730_v20, %v19893_v15  ;;  %v15154_v20 = vld [vmem:[%s21999_s20 + $0xb0] sm:$0xff] }
 0xbf1   :  { %v9272_v50 = vadd.f32 %v19893_v15, %v9271_v60  ;;  %v13731_v1 = vpop.f32.mrb[30].mxu0 }
 0xbf2   :  { %v9274_v52 = vpop.f32.mrb[31].mxu0  ;;  %v9283_v16 = vadd.f32 %v13731_v1, %v19893_v15  ;;  %v20075_v14 = vadd.f32 %v15146_v34, %v9280_v28  ;;  %v15155_v28 = vld [vmem:[%s21999_s20 + $0xa8] sm:$0xff]  ;;  %v9386_v34 = vpop.xlane.xlu0 %9385 }
 0xbf3   :  { %v20068_v27 = vadd.f32 %v15145_v51, %v9272_v50  ;;  %v9275_v54 = vadd.f32 %v19893_v15, %v9274_v52  ;;  %v15156_v52 = vld [vmem:[%s21999_s20 + $0xb8] sm:$0xff] }
 0xbf4   :  { %v20087_v32 = vadd.f32 %v15148_v25, %v9283_v16  ;;  %v9426_v5 = vsel %vm97_vm0, %v20075_v14, 0.0 }
 0xbf5   :  { %v20080_v9 = vadd.f32 %v15147_v23, %v9275_v54  ;;  %v9420_v58 = vsel %vm97_vm0, %v20068_v27, 0.0 }
 0xbf6   :  { %9421 = vadd.xlane.f32.xlu0 %v9420_v58  ;;  %22711 = vst [vmem:[#allocation31_spill] sm:$0xff] %v20087_v32  ;;  %v9429_v7 = vsel %vm97_vm0, %v20087_v32, 0.0 }
 0xbf7   :  { %22710 = vst [vmem:[#allocation34_spill] sm:$0xff] %v20080_v9  ;;  %v9423_v56 = vsel %vm97_vm0, %v20080_v9, 0.0 }
 0xbf8   :  { %9424 = vadd.xlane.f32.xlu1 %v9423_v56 }
 0xbfa   :  { %9427 = vadd.xlane.f32.xlu0 %v9426_v5 }
 0xbfc   :  { %9430 = vadd.xlane.f32.xlu1 %v9429_v7 }
 0xc28   :  { %v13734_v2 = vpop.f32.mrb[32].mxu0 }
 0xc29   :  { %v9287_v29 = vpop.f32.mrb[33].mxu0  ;;  %v9296_v61 = vadd.f32 %v13734_v2, %v19893_v15 }
 0xc2a   :  { %v9288_v48 = vadd.f32 %v19893_v15, %v9287_v29  ;;  %v13735_v44 = vpop.f32.mrb[34].mxu0  ;;  %v15157_v29 = vld [vmem:[%s21999_s20 + $0xc0] sm:$0xff] }
 0xc2b   :  { %v9290_v39 = vpop.f32.mrb[35].mxu0  ;;  %v9299_v6 = vadd.f32 %v13735_v44, %v19893_v15  ;;  %v20107_v63 = vadd.f32 %v15150_v19, %v9296_v61 }
 0xc2c   :  { %v20100_v37 = vadd.f32 %v15149_v36, %v9288_v48  ;;  %v9291_v41 = vadd.f32 %v19893_v15, %v9290_v39  ;;  %v9392_v39 = vpop.xlane.xlu0 %9391  ;;  %v15158_v36 = vld [vmem:[%s21999_s20 + $0xd0] sm:$0xff] }
 0xc2d   :  { %22713 = vst [vmem:[#allocation141_spill] sm:$0xff] %v20107_v63  ;;  %v20119_v35 = vadd.f32 %v15152_v4, %v9299_v6  ;;  %v9438_v43 = vsel %vm97_vm0, %v20107_v63, 0.0 }
 0xc2e   :  { %22712 = vst [vmem:[#allocation75_spill] sm:$0xff] %v20100_v37  ;;  %v20112_v47 = vadd.f32 %v15151_v22, %v9291_v41  ;;  %v9432_v62 = vsel %vm97_vm0, %v20100_v37, 0.0  ;;  %v15159_v41 = vld [vmem:[%s21999_s20 + $0xc8] sm:$0xff] }
 0xc2f   :  { %9433 = vadd.xlane.f32.xlu0 %v9432_v62  ;;  %22715 = vst [vmem:[#allocation121_spill] sm:$0xff] %v20119_v35  ;;  %v9441_v18 = vsel %vm97_vm0, %v20119_v35, 0.0  ;;  %v15160_v62 = vld [vmem:[%s21999_s20 + $0xd8] sm:$0xff] }
 0xc30   :  { %22714 = vst [vmem:[#allocation29_spill] sm:$0xff] %v20112_v47  ;;  %v9435_v46 = vsel %vm97_vm0, %v20112_v47, 0.0 }
 0xc31   :  { %9436 = vadd.xlane.f32.xlu1 %v9435_v46 }
 0xc33   :  { %9439 = vadd.xlane.f32.xlu0 %v9438_v43 }
 0xc34   :  { %v13738_v55 = vpop.f32.mrb[36].mxu0 }
 0xc35   :  { %v9303_v11 = vpop.f32.mrb[37].mxu0  ;;  %9442 = vadd.xlane.f32.xlu1 %v9441_v18  ;;  %v9312_v42 = vadd.f32 %v13738_v55, %v19893_v15  ;;  %v9395_v55 = vpop.xlane.xlu0 %9394 }
 0xc36   :  { %v9304_v26 = vadd.f32 %v19893_v15, %v9303_v11  ;;  %v13739_v53 = vpop.f32.mrb[38].mxu0 }
 0xc37   :  { %v9306_v24 = vpop.f32.mrb[39].mxu0  ;;  %v9315_v31 = vadd.f32 %v13739_v53, %v19893_v15  ;;  %v20139_v60 = vadd.f32 %v15154_v20, %v9312_v42  ;;  %v9480_v42 = vmul.f32 0.03125, %v9386_v34 }
 0xc38   :  { %v20132_v33 = vadd.f32 %v15153_v8, %v9304_v26  ;;  %v9307_v13 = vadd.f32 %v19893_v15, %v9306_v24  ;;  %v9389_v26 = vpop.xlane.xlu1 %9388 }
 0xc39   :  { %22717 = vst [vmem:[#allocation82_spill] sm:$0xff] %v20139_v60  ;;  %v20151_v51 = vadd.f32 %v15156_v52, %v9315_v31  ;;  %v9450_v54 = vsel %vm97_vm0, %v20139_v60, 0.0  ;;  %v20201_v34 = vsub.f32 %v19900_v17, %v9480_v42 }
 0xc3a   :  { %22716 = vst [vmem:[#allocation73_spill] sm:$0xff] %v20132_v33  ;;  %v20144_v50 = vadd.f32 %v15155_v28, %v9307_v13  ;;  %v9444_v1 = vsel %vm97_vm0, %v20132_v33, 0.0  ;;  %v9398_v13 = vpop.xlane.xlu0 %9397  ;;  %v9481_v28 = vmul.f32 0.03125, %v9389_v26 }
 0xc3b   :  { %9445 = vadd.xlane.f32.xlu0 %v9444_v1  ;;  %22719 = vst [vmem:[#allocation101_spill] sm:$0xff] %v20151_v51  ;;  %v9453_v58 = vsel %vm97_vm0, %v20151_v51, 0.0  ;;  %v15161_v1 = vld [vmem:[%s21999_s20 + $0xe0] sm:$0xff] }
 0xc3c   :  { %22718 = vst [vmem:[#allocation76_spill] sm:$0xff] %v20144_v50  ;;  %v9447_v16 = vsel %vm97_vm0, %v20144_v50, 0.0 }
 0xc3d   :  { %9448 = vadd.xlane.f32.xlu1 %v9447_v16 }
 0xc3f   :  { %9451 = vadd.xlane.f32.xlu0 %v9450_v54 }
 0xc40   :  { %v13742_v23 = vpop.f32.mrb[40].mxu0 }
 0xc41   :  { %v9319_v25 = vpop.f32.mrb[41].mxu0  ;;  %9454 = vadd.xlane.f32.xlu1 %v9453_v58  ;;  %v9328_v56 = vadd.f32 %v13742_v23, %v19893_v15  ;;  %v9401_v23 = vpop.xlane.xlu1 %9400  ;;  %v9482_v58 = vmul.f32 0.03125, %v9392_v39 }
 0xc42   :  { %v9320_v5 = vadd.f32 %v19893_v15, %v9319_v25  ;;  %v13743_v7 = vpop.f32.mrb[42].mxu0  ;;  %v15162_v25 = vld [vmem:[%s21999_s20 + $0xf0] sm:$0xff] }
 0xc43   :  { %v9322_v2 = vpop.f32.mrb[43].mxu0  ;;  %v9331_v48 = vadd.f32 %v13743_v7, %v19893_v15  ;;  %v20171_v6 = vadd.f32 %v15158_v36, %v9328_v56  ;;  %v9404_v36 = vpop.xlane.xlu0 %9403 }
 0xc44   :  { %v20164_v61 = vadd.f32 %v15157_v29, %v9320_v5  ;;  %v9323_v44 = vadd.f32 %v19893_v15, %v9322_v2  ;;  %v15163_v5 = vld [vmem:[%s21999_s20 + $0xe8] sm:$0xff]  ;;  %v20216_v2 = vsub.f32 %v19912_v40, %v9481_v28  ;;  %v9483_v29 = vmul.f32 0.03125, %v9395_v55 }
 0xc45   :  { %22721 = vst [vmem:[#allocation12_spill] sm:$0xff] %v20171_v6  ;;  %v20183_v4 = vadd.f32 %v15160_v62, %v9331_v48  ;;  %v9462_v43 = vsel %vm97_vm0, %v20171_v6, 0.0  ;;  %v15164_v48 = vld [vmem:[%s21999_s20 + $0xf8] sm:$0xff] }
 0xc46   :  { %22720 = vst [vmem:[#allocation35_spill] sm:$0xff] %v20164_v61  ;;  %v20176_v19 = vadd.f32 %v15159_v41, %v9323_v44  ;;  %v9456_v22 = vsel %vm97_vm0, %v20164_v61, 0.0  ;;  %v20226_v41 = vsub.f32 %v19906_v49, %v9482_v58  ;;  %v20233_v55 = vsub.f32 %v19929_v12, %v9483_v29 }
 0xc47   :  { %9457 = vadd.xlane.f32.xlu0 %v9456_v22  ;;  %22723 = vst [vmem:[#allocation69_spill] sm:$0xff] %v20183_v4  ;;  %v9465_v11 = vsel %vm97_vm0, %v20183_v4, 0.0  ;;  %v9484_v22 = vmul.f32 0.03125, %v9398_v13  ;;  %v9545_v42 = vmul.f32 %v20216_v2, %v20216_v2 }
 0xc48   :  { %22722 = vst [vmem:[#allocation107_spill] sm:$0xff] %v20176_v19  ;;  %v9459_v46 = vsel %vm97_vm0, %v20176_v19, 0.0 }
 0xc49   :  { %9460 = vadd.xlane.f32.xlu1 %v9459_v46  ;;  %v9544_v46 = vmul.f32 %v20201_v34, %v20201_v34 }
 0xc4a   :  { %v9410_v26 = vpop.xlane.xlu0 %9409 }
 0xc4b   :  { %9463 = vadd.xlane.f32.xlu0 %v9462_v43  ;;  %v9407_v43 = vpop.xlane.xlu1 %9406 }
 0xc4c   :  { %v13746_v18 = vpop.f32.mrb[44].mxu0  ;;  %v9487_v28 = vmul.f32 0.03125, %v9407_v43 }
 0xc4d   :  { %v9335_v53 = vpop.f32.mrb[45].mxu0  ;;  %9466 = vadd.xlane.f32.xlu1 %v9465_v11  ;;  %v9344_v24 = vadd.f32 %v13746_v18, %v19893_v15  ;;  %v9485_v18 = vmul.f32 0.03125, %v9401_v23  ;;  %v9488_v23 = vmul.f32 0.03125, %v9410_v26 }
 0xc4e   :  { %v9336_v8 = vadd.f32 %v19893_v15, %v9335_v53  ;;  %v13747_v31 = vpop.f32.mrb[46].mxu0  ;;  %v20240_v53 = vsub.f32 %v20004_v21, %v9484_v22 }
 0xc4f   :  { %v9338_v20 = vpop.f32.mrb[47].mxu0  ;;  %v9347_v16 = vadd.f32 %v13747_v31, %v19893_v15  ;;  %v20206_v56 = vadd.f32 %v15162_v25, %v9344_v24  ;;  %v9486_v24 = vmul.f32 0.03125, %v9404_v36  ;;  %v9546_v31 = vmul.f32 %v20226_v41, %v20226_v41  ;;  %v9413_v13 = vpop.xlane.xlu1 %9412 }
 0xc50   :  { %v20196_v52 = vadd.f32 %v15161_v1, %v9336_v8  ;;  %v9339_v54 = vadd.f32 %v19893_v15, %v9338_v20  ;;  %v9576_v8 = vsel %vm97_vm0, %v9544_v46, 0.0  ;;  %v20246_v20 = vsub.f32 %v20016_v10, %v9485_v18 }
 0xc51   :  { %22725 = vst [vmem:[#allocation39_spill] sm:$0xff] %v20206_v56  ;;  %v20221_v44 = vadd.f32 %v15164_v48, %v9347_v16  ;;  %v9474_v62 = vsel %vm97_vm0, %v20206_v56, 0.0  ;;  %v9579_v1 = vsel %vm97_vm0, %v9545_v42, 0.0  ;;  %v9547_v16 = vmul.f32 %v20233_v55, %v20233_v55 }
 0xc52   :  { %22724 = vst [vmem:[#allocation42_spill] sm:$0xff] %v20196_v52  ;;  %v20211_v7 = vadd.f32 %v15163_v5, %v9339_v54  ;;  %v9468_v15 = vsel %vm97_vm0, %v20196_v52, 0.0  ;;  %v20252_v54 = vsub.f32 %v20011_v38, %v9486_v24  ;;  %v9582_v58 = vsel %vm97_vm0, %v9546_v31, 0.0  ;;  %v9416_v5 = vpop.xlane.xlu0 %9415 }
 0xc53   :  { %9469 = vadd.xlane.f32.xlu0 %v9468_v15  ;;  %22727 = vst [vmem:[#allocation27_spill] sm:$0xff] %v20221_v44  ;;  %v9477_v11 = vsel %vm97_vm0, %v20221_v44, 0.0  ;;  %v9548_v25 = vmul.f32 %v20240_v53, %v20240_v53  ;;  %v20258_v15 = vsub.f32 %v20023_v57, %v9487_v28  ;;  %v9489_v29 = vmul.f32 0.03125, %v9413_v13  ;;  %v9419_v36 = vpop.xlane.xlu1 %9418 }
 0xc54   :  { %22726 = vst [vmem:[#allocation123_spill] sm:$0xff] %v20211_v7  ;;  %v9471_v39 = vsel %vm97_vm0, %v20211_v7, 0.0  ;;  %v9585_v48 = vsel %vm97_vm0, %v9547_v16, 0.0  ;;  %v20264_v22 = vsub.f32 %v20036_v45, %v9488_v23  ;;  %v9550_v43 = vmul.f32 %v20252_v54, %v20252_v54 }
 0xc55   :  { %9472 = vadd.xlane.f32.xlu1 %v9471_v39  ;;  %v9549_v39 = vmul.f32 %v20246_v20, %v20246_v20  ;;  %v9588_v46 = vsel %vm97_vm0, %v9548_v25, 0.0  ;;  %v20270_v18 = vsub.f32 %v20048_v30, %v9489_v29  ;;  %v9551_v26 = vmul.f32 %v20258_v15, %v20258_v15 }
 0xc56   :  { %v9552_v31 = vmul.f32 %v20264_v22, %v20264_v22 }
 0xc57   :  { %9475 = vadd.xlane.f32.xlu0 %v9474_v62  ;;  %v9490_v62 = vmul.f32 0.03125, %v9416_v5  ;;  %v9591_v42 = vsel %vm97_vm0, %v9549_v39, 0.0  ;;  %v9597_v28 = vsel %vm97_vm0, %v9551_v26, 0.0 }
 0xc58   :  { %v9600_v16 = vsel %vm97_vm0, %v9552_v31, 0.0 }
 0xc59   :  { %9478 = vadd.xlane.f32.xlu1 %v9477_v11  ;;  %v9491_v11 = vmul.f32 0.03125, %v9419_v36  ;;  %v20276_v24 = vsub.f32 %v20043_v0, %v9490_v62 }
 0xc5b   :  { %9577 = vadd.xlane.f32.xlu0 %v9576_v8  ;;  %v9594_v8 = vsel %vm97_vm0, %v9550_v43, 0.0  ;;  %v20282_v13 = vsub.f32 %v20055_v3, %v9491_v11  ;;  %v9554_v23 = vmul.f32 %v20276_v24, %v20276_v24 }
 0xc5d   :  { %9580 = vadd.xlane.f32.xlu1 %v9579_v1  ;;  %v9553_v1 = vmul.f32 %v20270_v18, %v20270_v18  ;;  %v9555_v25 = vmul.f32 %v20282_v13, %v20282_v13  ;;  %v9606_v5 = vsel %vm97_vm0, %v9554_v23, 0.0 }
 0xc5f   :  { %9583 = vadd.xlane.f32.xlu0 %v9582_v58  ;;  %v9603_v58 = vsel %vm97_vm0, %v9553_v1, 0.0  ;;  %v9609_v29 = vsel %vm97_vm0, %v9555_v25, 0.0 }
 0xc61   :  { %9586 = vadd.xlane.f32.xlu1 %v9585_v48  ;;  %v14283_v48 = vld [vmem:[%s21713_s13] sm:$0xff]  }
 0xc62   :  { %13748 = vmatprep.subr.bf16.mxu1 %v14283_v48 }
 0xc63   :  { %9589 = vadd.xlane.f32.xlu0 %v9588_v46  ;;  %13749 = vmatpush3.bf16.msra.mxu1 %v14283_v48  ;;  %v14284_v46 = vld [vmem:[%s21713_s13 + $0x8] sm:$0xff]   ;;  %s15175_s13 = smov 32  }
 0xc64   :  { %13750 = vmatprep.subr.bf16.mxu1 %v14284_v46 }
 0xc65   :  { %9592 = vadd.xlane.f32.xlu1 %v9591_v42 }
 0xc67   :  { %9595 = vadd.xlane.f32.xlu0 %v9594_v8  ;;  %13751 = vmatpush3.bf16.msra.mxu1 %v14284_v46 }
 0xc69   :  { %9598 = vadd.xlane.f32.xlu1 %v9597_v28 }
 0xc6b   :  { %9601 = vadd.xlane.f32.xlu0 %v9600_v16 }
 0xc6d   :  { %9604 = vadd.xlane.f32.xlu1 %v9603_v58 }
 0xc6f   :  { %9607 = vadd.xlane.f32.xlu0 %v9606_v5 }
 0xc71   :  { %9610 = vadd.xlane.f32.xlu1 %v9609_v29 }
 0xc83   :  { %v9422_v39 = vpop.xlane.xlu0 %9421 }
 0xc84   :  { %v9492_v36 = vmul.f32 0.03125, %v9422_v39 }
 0xc85   :  { %v9425_v62 = vpop.xlane.xlu1 %9424 }
 0xc86   :  { %v20302_v43 = vsub.f32 %v20068_v27, %v9492_v36  ;;  %v9493_v11 = vmul.f32 0.03125, %v9425_v62 }
 0xc87   :  { %v9428_v42 = vpop.xlane.xlu0 %9427 }
 0xc88   :  { %v20305_v26 = vsub.f32 %v20080_v9, %v9493_v11  ;;  %v9494_v8 = vmul.f32 0.03125, %v9428_v42  ;;  %v9556_v31 = vmul.f32 %v20302_v43, %v20302_v43 }
 0xc89   :  { %v9431_v28 = vpop.xlane.xlu1 %9430 }
 0xc8a   :  { %v20310_v1 = vsub.f32 %v20075_v14, %v9494_v8  ;;  %v9495_v16 = vmul.f32 0.03125, %v9431_v28  ;;  %v9612_v23 = vsel %vm97_vm0, %v9556_v31, 0.0  ;;  %v9557_v58 = vmul.f32 %v20305_v26, %v20305_v26 }
 0xc8b   :  { %9613 = vadd.xlane.f32.xlu0 %v9612_v23 }
 0xc8c   :  { %v20316_v25 = vsub.f32 %v20087_v32, %v9495_v16  ;;  %v9615_v5 = vsel %vm97_vm0, %v9557_v58, 0.0  ;;  %v9558_v29 = vmul.f32 %v20310_v1, %v20310_v1 }
 0xc8d   :  { %9616 = vadd.xlane.f32.xlu1 %v9615_v5 }
 0xc8e   :  { %v9618_v48 = vsel %vm97_vm0, %v9558_v29, 0.0  ;;  %v9559_v39 = vmul.f32 %v20316_v25, %v20316_v25 }
 0xc8f   :  { %9619 = vadd.xlane.f32.xlu0 %v9618_v48 }
 0xc90   :  { %v9621_v36 = vsel %vm97_vm0, %v9559_v39, 0.0 }
 0xc91   :  { %9622 = vadd.xlane.f32.xlu1 %v9621_v36 }
 0xcbc   :  { %v9434_v62 = vpop.xlane.xlu0 %9433 }
 0xcbd   :  { %v9496_v46 = vmul.f32 0.03125, %v9434_v62 }
 0xcbe   :  { %v9437_v11 = vpop.xlane.xlu1 %9436 }
 0xcbf   :  { %v20326_v42 = vsub.f32 %v20100_v37, %v9496_v46  ;;  %v9497_v8 = vmul.f32 0.03125, %v9437_v11 }
 0xcc0   :  { %v9440_v31 = vpop.xlane.xlu0 %9439 }
 0xcc1   :  { %v20329_v28 = vsub.f32 %v20112_v47, %v9497_v8  ;;  %v9498_v16 = vmul.f32 0.03125, %v9440_v31  ;;  %v9560_v23 = vmul.f32 %v20326_v42, %v20326_v42 }
 0xcc2   :  { %v9443_v58 = vpop.xlane.xlu1 %9442 }
 0xcc3   :  { %v20334_v5 = vsub.f32 %v20107_v63, %v9498_v16  ;;  %v9499_v29 = vmul.f32 0.03125, %v9443_v58  ;;  %v9624_v48 = vsel %vm97_vm0, %v9560_v23, 0.0  ;;  %v9561_v39 = vmul.f32 %v20329_v28, %v20329_v28 }
 0xcc4   :  { %9625 = vadd.xlane.f32.xlu0 %v9624_v48 }
 0xcc5   :  { %v20340_v36 = vsub.f32 %v20119_v35, %v9499_v29  ;;  %v9627_v62 = vsel %vm97_vm0, %v9561_v39, 0.0  ;;  %v9562_v46 = vmul.f32 %v20334_v5, %v20334_v5 }
 0xcc6   :  { %9628 = vadd.xlane.f32.xlu1 %v9627_v62 }
 0xcc7   :  { %v9630_v11 = vsel %vm97_vm0, %v9562_v46, 0.0  ;;  %v9563_v8 = vmul.f32 %v20340_v36, %v20340_v36 }
 0xcc8   :  { %9631 = vadd.xlane.f32.xlu0 %v9630_v11  ;;  %v9446_v31 = vpop.xlane.xlu0 %9445 }
 0xcc9   :  { %v9500_v16 = vmul.f32 0.03125, %v9446_v31  ;;  %v9633_v23 = vsel %vm97_vm0, %v9563_v8, 0.0 }
 0xcca   :  { %v9449_v58 = vpop.xlane.xlu1 %9448  ;;  %9634 = vadd.xlane.f32.xlu1 %v9633_v23 }
 0xccb   :  { %v20350_v29 = vsub.f32 %v20132_v33, %v9500_v16  ;;  %v9501_v48 = vmul.f32 0.03125, %v9449_v58 }
 0xccc   :  { %v9452_v39 = vpop.xlane.xlu0 %9451 }
 0xccd   :  { %v20353_v59 = vsub.f32 %v20144_v50, %v9501_v48  ;;  %v9502_v62 = vmul.f32 0.03125, %v9452_v39  ;;  %v9564_v46 = vmul.f32 %v20350_v29, %v20350_v29 }
 0xcce   :  { %v9455_v47 = vpop.xlane.xlu1 %9454 }
 0xccf   :  { %v20358_v11 = vsub.f32 %v20139_v60, %v9502_v62  ;;  %v9503_v31 = vmul.f32 0.03125, %v9455_v47  ;;  %v9636_v8 = vsel %vm97_vm0, %v9564_v46, 0.0  ;;  %v9565_v16 = vmul.f32 %v20353_v59, %v20353_v59 }
 0xcd0   :  { %9637 = vadd.xlane.f32.xlu0 %v9636_v8 }
 0xcd1   :  { %v20364_v23 = vsub.f32 %v20151_v51, %v9503_v31  ;;  %v9639_v58 = vsel %vm97_vm0, %v9565_v16, 0.0  ;;  %v9566_v48 = vmul.f32 %v20358_v11, %v20358_v11 }
 0xcd2   :  { %9640 = vadd.xlane.f32.xlu1 %v9639_v58 }
 0xcd3   :  { %v9642_v39 = vsel %vm97_vm0, %v9566_v48, 0.0  ;;  %v9567_v47 = vmul.f32 %v20364_v23, %v20364_v23 }
 0xcd4   :  { %9643 = vadd.xlane.f32.xlu0 %v9642_v39  ;;  %v9458_v62 = vpop.xlane.xlu0 %9457 }
 0xcd5   :  { %v9504_v46 = vmul.f32 0.03125, %v9458_v62  ;;  %v9645_v50 = vsel %vm97_vm0, %v9567_v47, 0.0 }
 0xcd6   :  { %v9461_v8 = vpop.xlane.xlu1 %9460  ;;  %9646 = vadd.xlane.f32.xlu1 %v9645_v50 }
 0xcd7   :  { %v20374_v31 = vsub.f32 %v20164_v61, %v9504_v46  ;;  %v9505_v16 = vmul.f32 0.03125, %v9461_v8 }
 0xcd8   :  { %v9464_v51 = vpop.xlane.xlu0 %9463 }
 0xcd9   :  { %v20377_v60 = vsub.f32 %v20176_v19, %v9505_v16  ;;  %v9506_v58 = vmul.f32 0.03125, %v9464_v51  ;;  %v9568_v48 = vmul.f32 %v20374_v31, %v20374_v31 }
 0xcda   :  { %v9467_v33 = vpop.xlane.xlu1 %9466 }
 0xcdb   :  { %v20382_v39 = vsub.f32 %v20171_v6, %v9506_v58  ;;  %v9507_v62 = vmul.f32 0.03125, %v9467_v33  ;;  %v9648_v47 = vsel %vm97_vm0, %v9568_v48, 0.0  ;;  %v9569_v50 = vmul.f32 %v20377_v60, %v20377_v60 }
 0xcdc   :  { %9649 = vadd.xlane.f32.xlu0 %v9648_v47 }
 0xcdd   :  { %v20388_v46 = vsub.f32 %v20183_v4, %v9507_v62  ;;  %v9651_v8 = vsel %vm97_vm0, %v9569_v50, 0.0  ;;  %v9570_v51 = vmul.f32 %v20382_v39, %v20382_v39 }
 0xcde   :  { %9652 = vadd.xlane.f32.xlu1 %v9651_v8 }
 0xcdf   :  { %v9654_v16 = vsel %vm97_vm0, %v9570_v51, 0.0  ;;  %v9571_v33 = vmul.f32 %v20388_v46, %v20388_v46 }
 0xce0   :  { %9655 = vadd.xlane.f32.xlu0 %v9654_v16  ;;  %v9470_v58 = vpop.xlane.xlu0 %9469 }
 0xce1   :  { %v9508_v48 = vmul.f32 0.03125, %v9470_v58  ;;  %v9657_v19 = vsel %vm97_vm0, %v9571_v33, 0.0 }
 0xce2   :  { %v9473_v47 = vpop.xlane.xlu1 %9472  ;;  %9658 = vadd.xlane.f32.xlu1 %v9657_v19 }
 0xce3   :  { %v20398_v62 = vsub.f32 %v20196_v52, %v9508_v48  ;;  %v9509_v50 = vmul.f32 0.03125, %v9473_v47 }
 0xce4   :  { %v9476_v4 = vpop.xlane.xlu0 %9475 }
 0xce5   :  { %v20401_v6 = vsub.f32 %v20211_v7, %v9509_v50  ;;  %v9510_v8 = vmul.f32 0.03125, %v9476_v4  ;;  %v9572_v51 = vmul.f32 %v20398_v62, %v20398_v62 }
 0xce6   :  { %v9479_v61 = vpop.xlane.xlu1 %9478 }
 0xce7   :  { %v20406_v16 = vsub.f32 %v20206_v56, %v9510_v8  ;;  %v9511_v58 = vmul.f32 0.03125, %v9479_v61  ;;  %v9660_v33 = vsel %vm97_vm0, %v9572_v51, 0.0  ;;  %v9573_v19 = vmul.f32 %v20401_v6, %v20401_v6 }
 0xce8   :  { %9661 = vadd.xlane.f32.xlu0 %v9660_v33  ;;  %v9578_v48 = vpop.xlane.xlu0 %9577 }
 0xce9   :  { %v20412_v47 = vsub.f32 %v20221_v44, %v9511_v58  ;;  %v9672_v50 = vmul.f32 0.03125, %v9578_v48  ;;  %v9663_v4 = vsel %vm97_vm0, %v9573_v19, 0.0  ;;  %v9574_v7 = vmul.f32 %v20406_v16, %v20406_v16 }
 0xcea   :  { %v9581_v52 = vpop.xlane.xlu1 %9580  ;;  %9664 = vadd.xlane.f32.xlu1 %v9663_v4 }
 0xceb   :  { %v9704_v8 = vadd.f32 1e-05, %v9672_v50  ;;  %v9673_v61 = vmul.f32 0.03125, %v9581_v52  ;;  %v9666_v51 = vsel %vm97_vm0, %v9574_v7, 0.0  ;;  %v9575_v56 = vmul.f32 %v20412_v47, %v20412_v47 }
 0xcec   :  { %9667 = vadd.xlane.f32.xlu0 %v9666_v51  ;;  %v9584_v33 = vpop.xlane.xlu0 %9583 }
 0xced   :  { %14871 = vrsqrt.f32 %v9704_v8  ;;  %v9705_v58 = vadd.f32 1e-05, %v9673_v61  ;;  %v9674_v44 = vmul.f32 0.03125, %v9584_v33  ;;  %v9669_v48 = vsel %vm97_vm0, %v9575_v56, 0.0  ;;  %v20424_v56 = vld [vmem:[%s21714_s5] ss:$0 sm:$0xff] }
 0xcee   :  { %9670 = vadd.xlane.f32.xlu1 %v9669_v48  ;;  %v9587_v19 = vpop.xlane.xlu1 %9586 }
 0xcef   :  { %14873 = vrsqrt.f32 %v9705_v58  ;;  %v9706_v35 = vadd.f32 1e-05, %v9674_v44  ;;  %v9675_v37 = vmul.f32 0.03125, %v9587_v19 }
 0xcf0   :  { %v9590_v4 = vpop.xlane.xlu0 %9589 }
 0xcf1   :  { %14875 = vrsqrt.f32 %v9706_v35  ;;  %v9707_v52 = vadd.f32 1e-05, %v9675_v37  ;;  %v9676_v50 = vmul.f32 0.03125, %v9590_v4 }
 0xcf2   :  { %v9593_v7 = vpop.xlane.xlu1 %9592 }
 0xcf3   :  { %14877 = vrsqrt.f32 %v9707_v52  ;;  %v9708_v63 = vadd.f32 1e-05, %v9676_v50  ;;  %v9677_v32 = vmul.f32 0.03125, %v9593_v7  ;;  %v20432_v7 = vld [vmem:[%s21715_s6] ss:$0 sm:$0xff] }
 0xcf4   :  { %v9596_v51 = vpop.xlane.xlu0 %9595 }
 0xcf5   :  { %14879 = vrsqrt.f32 %v9708_v63  ;;  %v9709_v8 = vadd.f32 1e-05, %v9677_v32  ;;  %v9678_v61 = vmul.f32 0.03125, %v9596_v51 }
 0xcf6   :  { %v9599_v33 = vpop.xlane.xlu1 %9598 }
 0xcf7   :  { %v14872_v9 = vpop.eup %14871  ;;  %14881 = vrsqrt.f32 %v9709_v8  ;;  %v9710_v44 = vadd.f32 1e-05, %v9678_v61  ;;  %v9679_v35 = vmul.f32 0.03125, %v9599_v33 }
 0xcf8   :  { %v9602_v37 = vpop.xlane.xlu0 %9601  ;;  %v9768_v58 = vmul.f32 %v14872_v9, %v20201_v34 }
 0xcf9   :  { %v14874_v48 = vpop.eup %14873  ;;  %14883 = vrsqrt.f32 %v9710_v44  ;;  %v9711_v19 = vadd.f32 1e-05, %v9679_v35  ;;  %v9680_v4 = vmul.f32 0.03125, %v9602_v37 }
 0xcfa   :  { %v9605_v63 = vpop.xlane.xlu1 %9604  ;;  %v9769_v32 = vmul.f32 %v14874_v48, %v20216_v2  ;;  %v9806_v52 = vmul.f32 %v20424_v56, %v9768_v58 }
 0xcfb   :  { %v14876_v50 = vpop.eup %14875  ;;  %14885 = vrsqrt.f32 %v9711_v19  ;;  %v9712_v51 = vadd.f32 1e-05, %v9680_v4  ;;  %v9681_v8 = vmul.f32 0.03125, %v9605_v63 }
 0xcfc   :  { %v9770_v9 = vmul.f32 %v14876_v50, %v20226_v41  ;;  %v9608_v34 = vpop.xlane.xlu0 %9607  ;;  %v9807_v61 = vmul.f32 %v20424_v56, %v9769_v32  ;;  %v9844_v48 = vadd.f32 %v20432_v7, %v9806_v52 }
 0xcfd   :  { %v14878_v33 = vpop.eup %14877  ;;  %14887 = vrsqrt.f32 %v9712_v51  ;;  %v9713_v44 = vadd.f32 1e-05, %v9681_v8  ;;  %v9682_v2 = vmul.f32 0.03125, %v9608_v34 }
 0xcfe   :  { %v9808_v35 = vmul.f32 %v20424_v56, %v9770_v9  ;;  %v9771_v37 = vmul.f32 %v14878_v33, %v20233_v55  ;;  %v9611_v58 = vpop.xlane.xlu1 %9610  ;;  %v9845_v19 = vadd.f32 %v20432_v7, %v9807_v61 }
 0xcff   :  { %v14880_v4 = vpop.eup %14879  ;;  %14889 = vrsqrt.f32 %v9713_v44  ;;  %v9714_v63 = vadd.f32 1e-05, %v9682_v2  ;;  %v9683_v41 = vmul.f32 0.03125, %v9611_v58 }
 0xd00   :  { %v9809_v50 = vmul.f32 %v20424_v56, %v9771_v37  ;;  %v9876_v32 = vpack.c.bf16 %v9845_v19, %v9844_v48  ;;  %v9772_v51 = vmul.f32 %v14880_v4, %v20240_v53  ;;  %v9846_v9 = vadd.f32 %v20432_v7, %v9808_v35 }
 0xd01   :  { %v14882_v8 = vpop.eup %14881  ;;  %14891 = vrsqrt.f32 %v9714_v63  ;;  %v9715_v34 = vadd.f32 1e-05, %v9683_v41 }
 0xd02   :  { %v9847_v55 = vadd.f32 %v20432_v7, %v9809_v50  ;;  %13752 = vmatprep.mubr.msk.bf16.mxu1 %vm97_vm0, %v9876_v32  ;;  %v9773_v52 = vmul.f32 %v14882_v8, %v20246_v20  ;;  %v9810_v61 = vmul.f32 %v20424_v56, %v9772_v51 }
 0xd03   :  { %v14884_v33 = vpop.eup %14883  ;;  %14893 = vrsqrt.f32 %v9715_v34 }
 0xd04   :  { %v9877_v44 = vpack.c.bf16 %v9847_v55, %v9846_v9  ;;  %v9774_v2 = vmul.f32 %v14884_v33, %v20252_v54  ;;  %v9811_v53 = vmul.f32 %v20424_v56, %v9773_v52  ;;  %v9848_v48 = vadd.f32 %v20432_v7, %v9810_v61 }
 0xd05   :  { %v14886_v37 = vpop.eup %14885 }
 0xd06   :  { %v9812_v58 = vmul.f32 %v20424_v56, %v9774_v2  ;;  %v9775_v35 = vmul.f32 %v14886_v37, %v20258_v15  ;;  %13753 = vmatmul.mubr.msk.bf16.vlgmr.msra.gmra.mrb[16].mxu1 %vm97_vm0, %v9877_v44  ;;  %v9849_v20 = vadd.f32 %v20432_v7, %v9811_v53 }
 0xd07   :  { %v14888_v19 = vpop.eup %14887 }
 0xd08   :  { %v9813_v4 = vmul.f32 %v20424_v56, %v9775_v35  ;;  %v9878_v63 = vpack.c.bf16 %v9849_v20, %v9848_v48  ;;  %v9776_v41 = vmul.f32 %v14888_v19, %v20264_v22  ;;  %v9850_v50 = vadd.f32 %v20432_v7, %v9812_v58  ;;  %v14286_v58 = vld [vmem:[%s21716_s15 + $0x8] sm:$0xff]  }
 0xd09   :  { %v14890_v54 = vpop.eup %14889 }
 0xd0a   :  { %v9851_v32 = vadd.f32 %v20432_v7, %v9813_v4  ;;  %13756 = vmatprep.mubr.msk.bf16.mxu1 %vm97_vm0, %v9878_v63  ;;  %v9777_v15 = vmul.f32 %v14890_v54, %v20270_v18  ;;  %v9814_v51 = vmul.f32 %v20424_v56, %v9776_v41 }
 0xd0b   :  { %v14892_v8 = vpop.eup %14891 }
 0xd0c   :  { %v9879_v34 = vpack.c.bf16 %v9851_v32, %v9850_v50  ;;  %v9778_v9 = vmul.f32 %v14892_v8, %v20276_v24  ;;  %v9815_v55 = vmul.f32 %v20424_v56, %v9777_v15  ;;  %v9852_v33 = vadd.f32 %v20432_v7, %v9814_v51 }
 0xd0d   :  { %v14894_v52 = vpop.eup %14893 }
 0xd0e   :  { %v9816_v22 = vmul.f32 %v20424_v56, %v9778_v9  ;;  %v9779_v61 = vmul.f32 %v14894_v52, %v20282_v13  ;;  %13757 = vmatmul.mubr.msk.bf16.gmra.mrb[20].mxu1 %vm97_vm0, %v9879_v34  ;;  %v9853_v44 = vadd.f32 %v20432_v7, %v9815_v55  ;;  %v14285_v13 = vld [vmem:[%s21716_s15] sm:$0xff]  }
 0xd0f   :  { %13784 = vmatprep.subr.bf16.mxu0 %v14285_v13 }
 0xd10   :  { %v9817_v18 = vmul.f32 %v20424_v56, %v9779_v61  ;;  %v9880_v2 = vpack.c.bf16 %v9853_v44, %v9852_v33  ;;  %v9854_v53 = vadd.f32 %v20432_v7, %v9816_v22  ;;  %13785 = vmatpush3.bf16.msra.mxu0 %v14285_v13 }
 0xd11   :  { %13786 = vmatprep.subr.bf16.mxu0 %v14286_v58 }
 0xd12   :  { %v9855_v24 = vadd.f32 %v20432_v7, %v9817_v18  ;;  %13760 = vmatprep.mubr.msk.bf16.mxu1 %vm97_vm0, %v9880_v2 }
 0xd14   :  { %v9881_v37 = vpack.c.bf16 %v9855_v24, %v9854_v53  ;;  %13787 = vmatpush3.bf16.msra.mxu0 %v14286_v58 }
 0xd16   :  { %13761 = vmatmul.mubr.msk.bf16.gmra.mrb[24].mxu1 %vm97_vm0, %v9881_v37 }
 0xd18   :  { %v9614_v35 = vpop.xlane.xlu0 %9613 }
 0xd19   :  { %v9684_v48 = vmul.f32 0.03125, %v9614_v35 }
 0xd1a   :  { %v9617_v20 = vpop.xlane.xlu1 %9616 }
 0xd1b   :  { %v9716_v19 = vadd.f32 1e-05, %v9684_v48  ;;  %v9685_v4 = vmul.f32 0.03125, %v9617_v20 }
 0xd1c   :  { %v9620_v63 = vpop.xlane.xlu0 %9619 }
 0xd1d   :  { %14895 = vrsqrt.f32 %v9716_v19  ;;  %v9717_v41 = vadd.f32 1e-05, %v9685_v4  ;;  %v9686_v54 = vmul.f32 0.03125, %v9620_v63 }
 0xd1e   :  { %v9623_v50 = vpop.xlane.xlu1 %9622 }
 0xd1f   :  { %14897 = vrsqrt.f32 %v9717_v41  ;;  %v9718_v32 = vadd.f32 1e-05, %v9686_v54  ;;  %v9687_v15 = vmul.f32 0.03125, %v9623_v50 }
 0xd21   :  { %14899 = vrsqrt.f32 %v9718_v32  ;;  %v9719_v51 = vadd.f32 1e-05, %v9687_v15 }
 0xd23   :  { %14901 = vrsqrt.f32 %v9719_v51 }
 0xd27   :  { %v14896_v8 = vpop.eup %14895 }
 0xd28   :  { %v9780_v34 = vmul.f32 %v14896_v8, %v20302_v43 }
 0xd29   :  { %v14898_v9 = vpop.eup %14897 }
 0xd2a   :  { %v9781_v55 = vmul.f32 %v14898_v9, %v20305_v26  ;;  %v9818_v52 = vmul.f32 %v20424_v56, %v9780_v34  ;;  %v14287_v34 = vld [vmem:[%s21716_s15 + $0x10] sm:$0xff]  }
 0xd2b   :  { %v14900_v22 = vpop.eup %14899  ;;  %13788 = vmatprep.subr.bf16.mxu0 %v14287_v34 }
 0xd2c   :  { %v9782_v61 = vmul.f32 %v14900_v22, %v20310_v1  ;;  %v9819_v33 = vmul.f32 %v20424_v56, %v9781_v55  ;;  %v9856_v53 = vadd.f32 %v20432_v7, %v9818_v52  ;;  %13789 = vmatpush3.bf16.msra.mxu0 %v14287_v34 }
 0xd2d   :  { %v14902_v44 = vpop.eup %14901 }
 0xd2e   :  { %v9820_v18 = vmul.f32 %v20424_v56, %v9782_v61  ;;  %v9783_v2 = vmul.f32 %v14902_v44, %v20316_v25  ;;  %v9857_v24 = vadd.f32 %v20432_v7, %v9819_v33  ;;  %v14288_v33 = vld [vmem:[%s21716_s15 + $0x18] sm:$0xff]  }
 0xd2f   :  { %13790 = vmatprep.subr.bf16.mxu0 %v14288_v33 }
 0xd30   :  { %v9821_v43 = vmul.f32 %v20424_v56, %v9783_v2  ;;  %v9882_v37 = vpack.c.bf16 %v9857_v24, %v9856_v53  ;;  %v9858_v26 = vadd.f32 %v20432_v7, %v9820_v18  ;;  %13791 = vmatpush3.bf16.msra.mxu0 %v14288_v33 }
 0xd32   :  { %v9859_v13 = vadd.f32 %v20432_v7, %v9821_v43  ;;  %13764 = vmatprep.mubr.msk.bf16.mxu1 %vm97_vm0, %v9882_v37 }
 0xd34   :  { %v9883_v1 = vpack.c.bf16 %v9859_v13, %v9858_v26 }
 0xd36   :  { %13765 = vmatmul.mubr.msk.bf16.gmra.mrb[28].mxu1 %vm97_vm0, %v9883_v1 }
 0xd51   :  { %v9626_v58 = vpop.xlane.xlu0 %9625 }
 0xd52   :  { %v9688_v35 = vmul.f32 0.03125, %v9626_v58 }
 0xd53   :  { %v9629_v48 = vpop.xlane.xlu1 %9628 }
 0xd54   :  { %v9720_v25 = vadd.f32 1e-05, %v9688_v35  ;;  %v9689_v20 = vmul.f32 0.03125, %v9629_v48 }
 0xd55   :  { %v9632_v19 = vpop.xlane.xlu0 %9631 }
 0xd56   :  { %14903 = vrsqrt.f32 %v9720_v25  ;;  %v9721_v4 = vadd.f32 1e-05, %v9689_v20  ;;  %v9690_v63 = vmul.f32 0.03125, %v9632_v19 }
 0xd57   :  { %v9635_v41 = vpop.xlane.xlu1 %9634 }
 0xd58   :  { %14905 = vrsqrt.f32 %v9721_v4  ;;  %v9722_v54 = vadd.f32 1e-05, %v9690_v63  ;;  %v9691_v50 = vmul.f32 0.03125, %v9635_v41 }
 0xd5a   :  { %14907 = vrsqrt.f32 %v9722_v54  ;;  %v9723_v32 = vadd.f32 1e-05, %v9691_v50 }
 0xd5c   :  { %14909 = vrsqrt.f32 %v9723_v32 }
 0xd5d   :  { %v9638_v15 = vpop.xlane.xlu0 %9637 }
 0xd5e   :  { %v9692_v51 = vmul.f32 0.03125, %v9638_v15 }
 0xd5f   :  { %v9641_v8 = vpop.xlane.xlu1 %9640 }
 0xd60   :  { %v14904_v9 = vpop.eup %14903  ;;  %v9724_v55 = vadd.f32 1e-05, %v9692_v51  ;;  %v9693_v52 = vmul.f32 0.03125, %v9641_v8 }
 0xd61   :  { %v9644_v22 = vpop.xlane.xlu0 %9643  ;;  %v9784_v61 = vmul.f32 %v14904_v9, %v20326_v42 }
 0xd62   :  { %v14906_v44 = vpop.eup %14905  ;;  %14911 = vrsqrt.f32 %v9724_v55  ;;  %v9725_v18 = vadd.f32 1e-05, %v9693_v52  ;;  %v9694_v2 = vmul.f32 0.03125, %v9644_v22 }
 0xd63   :  { %v9647_v53 = vpop.xlane.xlu1 %9646  ;;  %v9785_v24 = vmul.f32 %v14906_v44, %v20329_v28  ;;  %v9822_v43 = vmul.f32 %v20424_v56, %v9784_v61 }
 0xd64   :  { %v14908_v37 = vpop.eup %14907  ;;  %14913 = vrsqrt.f32 %v9725_v18  ;;  %v9726_v26 = vadd.f32 1e-05, %v9694_v2  ;;  %v9695_v42 = vmul.f32 0.03125, %v9647_v53 }
 0xd65   :  { %v9786_v13 = vmul.f32 %v14908_v37, %v20334_v5  ;;  %v9823_v1 = vmul.f32 %v20424_v56, %v9785_v24  ;;  %v9860_v28 = vadd.f32 %v20432_v7, %v9822_v43 }
 0xd66   :  { %v14910_v58 = vpop.eup %14909  ;;  %14915 = vrsqrt.f32 %v9726_v26  ;;  %v9727_v35 = vadd.f32 1e-05, %v9695_v42 }
 0xd67   :  { %v9824_v48 = vmul.f32 %v20424_v56, %v9786_v13  ;;  %v9787_v25 = vmul.f32 %v14910_v58, %v20340_v36  ;;  %v9861_v20 = vadd.f32 %v20432_v7, %v9823_v1 }
 0xd68   :  { %14917 = vrsqrt.f32 %v9727_v35 }
 0xd69   :  { %v9825_v19 = vmul.f32 %v20424_v56, %v9787_v25  ;;  %v9650_v4 = vpop.xlane.xlu0 %9649  ;;  %v9884_v63 = vpack.c.bf16 %v9861_v20, %v9860_v28  ;;  %v9862_v41 = vadd.f32 %v20432_v7, %v9824_v48 }
 0xd6a   :  { %v9696_v5 = vmul.f32 0.03125, %v9650_v4 }
 0xd6b   :  { %v9863_v54 = vadd.f32 %v20432_v7, %v9825_v19  ;;  %v9653_v50 = vpop.xlane.xlu1 %9652  ;;  %13768 = vmatprep.mubr.msk.bf16.mxu1 %vm97_vm0, %v9884_v63 }
 0xd6c   :  { %v14912_v32 = vpop.eup %14911  ;;  %v9728_v15 = vadd.f32 1e-05, %v9696_v5  ;;  %v9697_v36 = vmul.f32 0.03125, %v9653_v50 }
 0xd6d   :  { %v9885_v51 = vpack.c.bf16 %v9863_v54, %v9862_v41  ;;  %v9656_v8 = vpop.xlane.xlu0 %9655  ;;  %v9788_v34 = vmul.f32 %v14912_v32, %v20350_v29 }
 0xd6e   :  { %v14914_v9 = vpop.eup %14913  ;;  %14919 = vrsqrt.f32 %v9728_v15  ;;  %v9729_v55 = vadd.f32 1e-05, %v9697_v36  ;;  %v9698_v52 = vmul.f32 0.03125, %v9656_v8 }
 0xd6f   :  { %v9659_v22 = vpop.xlane.xlu1 %9658  ;;  %13769 = vmatmul.mubr.msk.bf16.gmra.mrb[32].mxu1 %vm97_vm0, %v9885_v51  ;;  %v9789_v61 = vmul.f32 %v14914_v9, %v20353_v59  ;;  %v9826_v33 = vmul.f32 %v20424_v56, %v9788_v34 }
 0xd70   :  { %v14916_v44 = vpop.eup %14915  ;;  %14921 = vrsqrt.f32 %v9729_v55  ;;  %v9730_v18 = vadd.f32 1e-05, %v9698_v52  ;;  %v9699_v2 = vmul.f32 0.03125, %v9659_v22 }
 0xd71   :  { %v9790_v53 = vmul.f32 %v14916_v44, %v20358_v11  ;;  %v9827_v24 = vmul.f32 %v20424_v56, %v9789_v61  ;;  %v9864_v42 = vadd.f32 %v20432_v7, %v9826_v33 }
 0xd72   :  { %v14918_v29 = vpop.eup %14917  ;;  %14923 = vrsqrt.f32 %v9730_v18  ;;  %v9731_v43 = vadd.f32 1e-05, %v9699_v2 }
 0xd73   :  { %v9828_v37 = vmul.f32 %v20424_v56, %v9790_v53  ;;  %v9791_v26 = vmul.f32 %v14918_v29, %v20364_v23  ;;  %v9865_v59 = vadd.f32 %v20432_v7, %v9827_v24 }
 0xd74   :  { %14925 = vrsqrt.f32 %v9731_v43 }
 0xd75   :  { %v9829_v13 = vmul.f32 %v20424_v56, %v9791_v26  ;;  %v9662_v1 = vpop.xlane.xlu0 %9661  ;;  %v9886_v58 = vpack.c.bf16 %v9865_v59, %v9864_v42  ;;  %v9866_v11 = vadd.f32 %v20432_v7, %v9828_v37 }
 0xd76   :  { %v9700_v35 = vmul.f32 0.03125, %v9662_v1 }
 0xd77   :  { %v9867_v48 = vadd.f32 %v20432_v7, %v9829_v13  ;;  %v9665_v25 = vpop.xlane.xlu1 %9664  ;;  %13772 = vmatprep.mubr.msk.bf16.mxu1 %vm97_vm0, %v9886_v58 }
 0xd78   :  { %v14920_v28 = vpop.eup %14919  ;;  %v9732_v20 = vadd.f32 1e-05, %v9700_v35  ;;  %v9701_v23 = vmul.f32 0.03125, %v9665_v25 }
 0xd79   :  { %v9887_v19 = vpack.c.bf16 %v9867_v48, %v9866_v11  ;;  %v9668_v4 = vpop.xlane.xlu0 %9667  ;;  %v9792_v63 = vmul.f32 %v14920_v28, %v20374_v31 }
 0xd7a   :  { %v14922_v5 = vpop.eup %14921  ;;  %14927 = vrsqrt.f32 %v9732_v20  ;;  %v9733_v41 = vadd.f32 1e-05, %v9701_v23  ;;  %v9702_v54 = vmul.f32 0.03125, %v9668_v4 }
 0xd7b   :  { %v9671_v50 = vpop.xlane.xlu1 %9670  ;;  %13773 = vmatmul.mubr.msk.bf16.gmra.mrb[36].mxu1 %vm97_vm0, %v9887_v19  ;;  %v9793_v32 = vmul.f32 %v14922_v5, %v20377_v60  ;;  %v9830_v15 = vmul.f32 %v20424_v56, %v9792_v63 }
 0xd7c   :  { %v14924_v36 = vpop.eup %14923  ;;  %14929 = vrsqrt.f32 %v9733_v41  ;;  %v9734_v51 = vadd.f32 1e-05, %v9702_v54  ;;  %v9703_v8 = vmul.f32 0.03125, %v9671_v50 }
 0xd7d   :  { %v9794_v34 = vmul.f32 %v14924_v36, %v20382_v39  ;;  %v9831_v9 = vmul.f32 %v20424_v56, %v9793_v32  ;;  %v9868_v61 = vadd.f32 %v20432_v7, %v9830_v15 }
 0xd7e   :  { %v14926_v31 = vpop.eup %14925  ;;  %14931 = vrsqrt.f32 %v9734_v51  ;;  %v9735_v55 = vadd.f32 1e-05, %v9703_v8 }
 0xd7f   :  { %v9832_v52 = vmul.f32 %v20424_v56, %v9794_v34  ;;  %v9795_v22 = vmul.f32 %v14926_v31, %v20388_v46  ;;  %v9869_v60 = vadd.f32 %v20432_v7, %v9831_v9 }
 0xd80   :  { %14933 = vrsqrt.f32 %v9735_v55 }
 0xd81   :  { %v9833_v33 = vmul.f32 %v20424_v56, %v9795_v22  ;;  %v9888_v44 = vpack.c.bf16 %v9869_v60, %v9868_v61  ;;  %v9870_v18 = vadd.f32 %v20432_v7, %v9832_v52 }
 0xd83   :  { %v9871_v39 = vadd.f32 %v20432_v7, %v9833_v33  ;;  %13776 = vmatprep.mubr.msk.bf16.mxu1 %vm97_vm0, %v9888_v44 }
 0xd84   :  { %v14928_v2 = vpop.eup %14927 }
 0xd85   :  { %v9889_v53 = vpack.c.bf16 %v9871_v39, %v9870_v18  ;;  %v9796_v24 = vmul.f32 %v14928_v2, %v20398_v62 }
 0xd86   :  { %v14930_v29 = vpop.eup %14929 }
 0xd87   :  { %13777 = vmatmul.mubr.msk.bf16.gmra.mrb[40].mxu1 %vm97_vm0, %v9889_v53  ;;  %v9797_v46 = vmul.f32 %v14930_v29, %v20401_v6  ;;  %v9834_v43 = vmul.f32 %v20424_v56, %v9796_v24 }
 0xd88   :  { %v14932_v37 = vpop.eup %14931 }
 0xd89   :  { %v9798_v26 = vmul.f32 %v14932_v37, %v20406_v16  ;;  %v9835_v42 = vmul.f32 %v20424_v56, %v9797_v46  ;;  %v9872_v58 = vadd.f32 %v20432_v7, %v9834_v43 }
 0xd8a   :  { %v14934_v59 = vpop.eup %14933 }
 0xd8b   :  { %v9836_v13 = vmul.f32 %v20424_v56, %v9798_v26  ;;  %v9799_v1 = vmul.f32 %v14934_v59, %v20412_v47  ;;  %v9873_v62 = vadd.f32 %v20432_v7, %v9835_v42  ;;  %v20558_v47 = vld [vmem:[%s21717_s14] ss:$0 sm:$0xff] }
 0xd8d   :  { %v9837_v35 = vmul.f32 %v20424_v56, %v9799_v1  ;;  %v9890_v11 = vpack.c.bf16 %v9873_v62, %v9872_v58  ;;  %v9874_v6 = vadd.f32 %v20432_v7, %v9836_v13 }
 0xd8f   :  { %v9875_v48 = vadd.f32 %v20432_v7, %v9837_v35  ;;  %13780 = vmatprep.mubr.msk.bf16.mxu1 %vm97_vm0, %v9890_v11 }
 0xd91   :  { %v9891_v16 = vpack.c.bf16 %v9875_v48, %v9874_v6 }
 0xd93   :  { %13781 = vmatmul.mubr.msk.bf16.gmra.mrb[44].mxu1 %vm97_vm0, %v9891_v16 }
 0xdd9   :  { %v13754_v25 = vpop.f32.mrb[16].mxu1 }
 0xdda   :  { %v10006_v28 = vadd.f32 %v13754_v25, %v20558_v47  ;;  %v9997_v20 = vpop.f32.mrb[17].mxu1 }
 0xddb   :  { %v9998_v56 = vadd.f32 %v20558_v47, %v9997_v20  ;;  %v13755_v23 = vpop.f32.mrb[18].mxu1 }
 0xddc   :  { %v10009_v19 = vadd.f32 %v13755_v23, %v20558_v47  ;;  %v10000_v7 = vpop.f32.mrb[19].mxu1  ;;  %v10126_v63 = vmax.f32 %v10006_v28, 0.0 }
 0xddd   :  { %v10001_v4 = vadd.f32 %v20558_v47, %v10000_v7  ;;  %v10124_v41 = vmax.f32 %v9998_v56, 0.0 }
 0xdde   :  { %v10127_v5 = vmax.f32 %v10009_v19, 0.0 }
 0xddf   :  { %v10125_v54 = vmax.f32 %v10001_v4, 0.0 }
 0xde0   :  { %v10157_v50 = vpack.c.bf16 %v10127_v5, %v10126_v63 }
 0xde1   :  { %v10156_v32 = vpack.c.bf16 %v10125_v54, %v10124_v41  ;;  %v13758_v15 = vpop.f32.mrb[20].mxu1 }
 0xde2   :  { %v10022_v36 = vadd.f32 %v13758_v15, %v20558_v47  ;;  %v10013_v51 = vpop.f32.mrb[21].mxu1 }
 0xde3   :  { %v10014_v8 = vadd.f32 %v20558_v47, %v10013_v51  ;;  %v13759_v34 = vpop.f32.mrb[22].mxu1  ;;  %13792 = vmatprep.mubr.msk.bf16.mxu0 %vm10211_vm5, %v10156_v32 }
 0xde4   :  { %v10025_v9 = vadd.f32 %v13759_v34, %v20558_v47  ;;  %v10016_v31 = vpop.f32.mrb[23].mxu1  ;;  %13793 = vmatmul.mubr.msk.bf16.vlgmr.msra.gmra.mrb[48].mxu0 %vm10211_vm5, %v10157_v50  ;;  %v10130_v52 = vmax.f32 %v10022_v36, 0.0 }
 0xde5   :  { %v10017_v55 = vadd.f32 %v20558_v47, %v10016_v31  ;;  %v10128_v61 = vmax.f32 %v10014_v8, 0.0 }
 0xde6   :  { %v10131_v22 = vmax.f32 %v10025_v9, 0.0 }
 0xde7   :  { %v10129_v60 = vmax.f32 %v10017_v55, 0.0 }
 0xde8   :  { %v10159_v33 = vpack.c.bf16 %v10131_v22, %v10130_v52 }
 0xde9   :  { %v10158_v44 = vpack.c.bf16 %v10129_v60, %v10128_v61  ;;  %v13762_v18 = vpop.f32.mrb[24].mxu1 }
 0xdea   :  { %v10038_v39 = vadd.f32 %v13762_v18, %v20558_v47  ;;  %v10029_v2 = vpop.f32.mrb[25].mxu1 }
 0xdeb   :  { %v10030_v53 = vadd.f32 %v20558_v47, %v10029_v2  ;;  %v13763_v24 = vpop.f32.mrb[26].mxu1  ;;  %13796 = vmatprep.mubr.msk.bf16.mxu0 %vm10211_vm5, %v10158_v44 }
 0xdec   :  { %v10041_v29 = vadd.f32 %v13763_v24, %v20558_v47  ;;  %v10032_v46 = vpop.f32.mrb[27].mxu1  ;;  %13797 = vmatmul.mubr.msk.bf16.gmra.mrb[52].mxu0 %vm10211_vm5, %v10159_v33  ;;  %v10134_v37 = vmax.f32 %v10038_v39, 0.0 }
 0xded   :  { %v10033_v43 = vadd.f32 %v20558_v47, %v10032_v46  ;;  %v10132_v42 = vmax.f32 %v10030_v53, 0.0 }
 0xdee   :  { %v10135_v26 = vmax.f32 %v10041_v29, 0.0 }
 0xdef   :  { %v10133_v59 = vmax.f32 %v10033_v43, 0.0 }
 0xdf0   :  { %v10161_v13 = vpack.c.bf16 %v10135_v26, %v10134_v37 }
 0xdf1   :  { %v10160_v1 = vpack.c.bf16 %v10133_v59, %v10132_v42 }
 0xdf3   :  { %13800 = vmatprep.mubr.msk.bf16.mxu0 %vm10211_vm5, %v10160_v1 }
 0xdf4   :  { %13801 = vmatmul.mubr.msk.bf16.gmra.mrb[56].mxu0 %vm10211_vm5, %v10161_v13 }
 0xe09   :  { %v13766_v58 = vpop.f32.mrb[28].mxu1 }
 0xe0a   :  { %v10054_v62 = vadd.f32 %v13766_v58, %v20558_v47  ;;  %v10045_v35 = vpop.f32.mrb[29].mxu1 }
 0xe0b   :  { %v10046_v11 = vadd.f32 %v20558_v47, %v10045_v35  ;;  %v13767_v6 = vpop.f32.mrb[30].mxu1 }
 0xe0c   :  { %v10057_v48 = vadd.f32 %v13767_v6, %v20558_v47  ;;  %v10048_v16 = vpop.f32.mrb[31].mxu1  ;;  %v10138_v28 = vmax.f32 %v10054_v62, 0.0 }
 0xe0d   :  { %v10049_v25 = vadd.f32 %v20558_v47, %v10048_v16  ;;  %v10136_v56 = vmax.f32 %v10046_v11, 0.0 }
 0xe0e   :  { %v10139_v20 = vmax.f32 %v10057_v48, 0.0 }
 0xe0f   :  { %v10137_v23 = vmax.f32 %v10049_v25, 0.0 }
 0xe10   :  { %v10163_v19 = vpack.c.bf16 %v10139_v20, %v10138_v28 }
 0xe11   :  { %v10162_v7 = vpack.c.bf16 %v10137_v23, %v10136_v56 }
 0xe13   :  { %13804 = vmatprep.mubr.msk.bf16.mxu0 %vm10211_vm5, %v10162_v7 }
 0xe14   :  { %13805 = vmatmul.mubr.msk.bf16.gmra.mrb[60].mxu0 %vm10211_vm5, %v10163_v19 }
 0xe42   :  { %v13770_v4 = vpop.f32.mrb[32].mxu1 }
 0xe43   :  { %v10070_v63 = vadd.f32 %v13770_v4, %v20558_v47  ;;  %v10061_v5 = vpop.f32.mrb[33].mxu1 }
 0xe44   :  { %v10062_v41 = vadd.f32 %v20558_v47, %v10061_v5  ;;  %v13771_v54 = vpop.f32.mrb[34].mxu1 }
 0xe45   :  { %v10073_v50 = vadd.f32 %v13771_v54, %v20558_v47  ;;  %v10064_v32 = vpop.f32.mrb[35].mxu1  ;;  %v10142_v36 = vmax.f32 %v10070_v63, 0.0 }
 0xe46   :  { %v10065_v15 = vadd.f32 %v20558_v47, %v10064_v32  ;;  %v10140_v8 = vmax.f32 %v10062_v41, 0.0 }
 0xe47   :  { %v10143_v51 = vmax.f32 %v10073_v50, 0.0 }
 0xe48   :  { %v10141_v34 = vmax.f32 %v10065_v15, 0.0  ;;  %v20611_v15 = vld [vmem:[%s21718_s16] ss:$0 sm:$0xff] }
 0xe49   :  { %v10165_v9 = vpack.c.bf16 %v10143_v51, %v10142_v36 }
 0xe4a   :  { %v10164_v31 = vpack.c.bf16 %v10141_v34, %v10140_v8 }
 0xe4c   :  { %13808 = vmatprep.mubr.msk.bf16.mxu0 %vm10211_vm5, %v10164_v31 }
 0xe4d   :  { %13809 = vmatmul.mubr.msk.bf16.gmra.mrb[64].mxu0 %vm10211_vm5, %v10165_v9 }
 0xe4e   :  { %v13774_v55 = vpop.f32.mrb[36].mxu1 }
 0xe4f   :  { %v10086_v52 = vadd.f32 %v13774_v55, %v20558_v47  ;;  %v10077_v22 = vpop.f32.mrb[37].mxu1 }
 0xe50   :  { %v10078_v61 = vadd.f32 %v20558_v47, %v10077_v22  ;;  %v13775_v60 = vpop.f32.mrb[38].mxu1 }
 0xe51   :  { %v10089_v33 = vadd.f32 %v13775_v60, %v20558_v47  ;;  %v10080_v44 = vpop.f32.mrb[39].mxu1  ;;  %v10146_v39 = vmax.f32 %v10086_v52, 0.0 }
 0xe52   :  { %v10081_v18 = vadd.f32 %v20558_v47, %v10080_v44  ;;  %v10144_v53 = vmax.f32 %v10078_v61, 0.0 }
 0xe53   :  { %v10147_v2 = vmax.f32 %v10089_v33, 0.0 }
 0xe54   :  { %v10145_v24 = vmax.f32 %v10081_v18, 0.0 }
 0xe55   :  { %v10167_v29 = vpack.c.bf16 %v10147_v2, %v10146_v39 }
 0xe56   :  { %v10166_v46 = vpack.c.bf16 %v10145_v24, %v10144_v53 }
 0xe58   :  { %13812 = vmatprep.mubr.msk.bf16.mxu0 %vm10211_vm5, %v10166_v46 }
 0xe59   :  { %13813 = vmatmul.mubr.msk.bf16.gmra.mrb[68].mxu0 %vm10211_vm5, %v10167_v29 }
 0xe5a   :  { %v13778_v43 = vpop.f32.mrb[40].mxu1 }
 0xe5b   :  { %v10102_v37 = vadd.f32 %v13778_v43, %v20558_v47  ;;  %v10093_v26 = vpop.f32.mrb[41].mxu1 }
 0xe5c   :  { %v10094_v42 = vadd.f32 %v20558_v47, %v10093_v26  ;;  %v13779_v59 = vpop.f32.mrb[42].mxu1 }
 0xe5d   :  { %v10105_v13 = vadd.f32 %v13779_v59, %v20558_v47  ;;  %v10096_v1 = vpop.f32.mrb[43].mxu1  ;;  %v10150_v62 = vmax.f32 %v10102_v37, 0.0 }
 0xe5e   :  { %v10097_v58 = vadd.f32 %v20558_v47, %v10096_v1  ;;  %v10148_v11 = vmax.f32 %v10094_v42, 0.0 }
 0xe5f   :  { %v10151_v35 = vmax.f32 %v10105_v13, 0.0 }
 0xe60   :  { %v10149_v6 = vmax.f32 %v10097_v58, 0.0 }
 0xe61   :  { %v10169_v48 = vpack.c.bf16 %v10151_v35, %v10150_v62 }
 0xe62   :  { %v10168_v16 = vpack.c.bf16 %v10149_v6, %v10148_v11 }
 0xe64   :  { %13816 = vmatprep.mubr.msk.bf16.mxu0 %vm10211_vm5, %v10168_v16 }
 0xe65   :  { %13817 = vmatmul.mubr.msk.bf16.gmra.mrb[72].mxu0 %vm10211_vm5, %v10169_v48 }
 0xe66   :  { %v13782_v25 = vpop.f32.mrb[44].mxu1 }
 0xe67   :  { %v10118_v28 = vadd.f32 %v13782_v25, %v20558_v47  ;;  %v10109_v20 = vpop.f32.mrb[45].mxu1 }
 0xe68   :  { %v10110_v56 = vadd.f32 %v20558_v47, %v10109_v20  ;;  %v13783_v23 = vpop.f32.mrb[46].mxu1 }
 0xe69   :  { %v10121_v19 = vadd.f32 %v13783_v23, %v20558_v47  ;;  %v10112_v7 = vpop.f32.mrb[47].mxu1  ;;  %v10154_v63 = vmax.f32 %v10118_v28, 0.0 }
 0xe6a   :  { %v10113_v4 = vadd.f32 %v20558_v47, %v10112_v7  ;;  %v10152_v41 = vmax.f32 %v10110_v56, 0.0 }
 0xe6b   :  { %v10155_v5 = vmax.f32 %v10121_v19, 0.0 }
 0xe6c   :  { %v10153_v54 = vmax.f32 %v10113_v4, 0.0 }
 0xe6d   :  { %v10171_v50 = vpack.c.bf16 %v10155_v5, %v10154_v63 }
 0xe6e   :  { %v10170_v32 = vpack.c.bf16 %v10153_v54, %v10152_v41  ;;  %v22731_v54 = vld [vmem:[#allocation34_spill] sm:$0xff] }
 0xe70   :  { %13820 = vmatprep.mubr.msk.bf16.mxu0 %vm10211_vm5, %v10170_v32 }
 0xe71   :  { %13821 = vmatmul.mubr.msk.bf16.gmra.mrb[76].mxu0 %vm10211_vm5, %v10171_v50 }
 0xeb7   :  { %v13794_v36 = vpop.f32.mrb[48].mxu0 }
 0xeb8   :  { %v10303_v51 = vadd.f32 %v13794_v36, %v20611_v15  ;;  %v10294_v8 = vpop.f32.mrb[49].mxu0  ;;  %v22733_v36 = vld [vmem:[#allocation31_spill] sm:$0xff] }
 0xeb9   :  { %v10295_v47 = vadd.f32 %v20611_v15, %v10294_v8  ;;  %v13795_v34 = vpop.f32.mrb[50].mxu0 }
 0xeba   :  { %v20616_v9 = vadd.f32 %v10303_v51, %v19906_v49  ;;  %v10306_v31 = vadd.f32 %v13795_v34, %v20611_v15  ;;  %v10297_v55 = vpop.f32.mrb[51].mxu0 }
 0xebb   :  { %v10298_v52 = vadd.f32 %v20611_v15, %v10297_v55  ;;  %v20621_v22 = vadd.f32 %v10295_v47, %v19900_v17 }
 0xebc   :  { %v20624_v61 = vadd.f32 %v10306_v31, %v19929_v12  ;;  %v10461_v60 = vsel %vm97_vm0, %v20616_v9, 0.0 }
 0xebd   :  { %10462 = vadd.xlane.f32.xlu0 %v10461_v60  ;;  %v20629_v33 = vadd.f32 %v10298_v52, %v19912_v40  ;;  %v10455_v17 = vsel %vm97_vm0, %v20621_v22, 0.0  ;;  %v22735_v60 = vld [vmem:[#allocation141_spill] sm:$0xff] }
 0xebe   :  { %v10464_v49 = vsel %vm97_vm0, %v20624_v61, 0.0 }
 0xebf   :  { %10465 = vadd.xlane.f32.xlu1 %v10464_v49  ;;  %v13798_v44 = vpop.f32.mrb[52].mxu0  ;;  %v10458_v40 = vsel %vm97_vm0, %v20629_v33, 0.0 }
 0xec0   :  { %v10310_v18 = vpop.f32.mrb[53].mxu0  ;;  %v10319_v39 = vadd.f32 %v13798_v44, %v20611_v15 }
 0xec1   :  { %v10311_v12 = vadd.f32 %v20611_v15, %v10310_v18  ;;  %10456 = vadd.xlane.f32.xlu0 %v10455_v17  ;;  %v13799_v2 = vpop.f32.mrb[54].mxu0 }
 0xec2   :  { %v10313_v53 = vpop.f32.mrb[55].mxu0  ;;  %v10322_v29 = vadd.f32 %v13799_v2, %v20611_v15  ;;  %v20645_v43 = vadd.f32 %v10319_v39, %v20011_v38  ;;  %v22737_v39 = vld [vmem:[#allocation75_spill] sm:$0xff]  ;;  %v22739_v2 = vld [vmem:[#allocation121_spill] sm:$0xff] }
 0xec3   :  { %v20640_v24 = vadd.f32 %v10311_v12, %v20004_v21  ;;  %v10314_v46 = vadd.f32 %v20611_v15, %v10313_v53  ;;  %10459 = vadd.xlane.f32.xlu1 %v10458_v40 }
 0xec4   :  { %v20653_v42 = vadd.f32 %v10322_v29, %v20023_v57  ;;  %v22741_v29 = vld [vmem:[#allocation29_spill] sm:$0xff] }
 0xec5   :  { %v20648_v37 = vadd.f32 %v10314_v46, %v20016_v10  ;;  %v10467_v26 = vsel %vm97_vm0, %v20640_v24, 0.0  ;;  %v10473_v10 = vsel %vm97_vm0, %v20645_v43, 0.0 }
 0xec6   :  { %10468 = vadd.xlane.f32.xlu0 %v10467_v26  ;;  %v10476_v6 = vsel %vm97_vm0, %v20653_v42, 0.0 }
 0xec7   :  { %v13802_v21 = vpop.f32.mrb[56].mxu0  ;;  %v10470_v59 = vsel %vm97_vm0, %v20648_v37, 0.0 }
 0xec8   :  { %10471 = vadd.xlane.f32.xlu1 %v10470_v59  ;;  %v10326_v13 = vpop.f32.mrb[57].mxu0  ;;  %v10335_v1 = vadd.f32 %v13802_v21, %v20611_v15 }
 0xec9   :  { %v10327_v38 = vadd.f32 %v20611_v15, %v10326_v13  ;;  %v13803_v58 = vpop.f32.mrb[58].mxu0 }
 0xeca   :  { %10474 = vadd.xlane.f32.xlu0 %v10473_v10  ;;  %v10329_v62 = vpop.f32.mrb[59].mxu0  ;;  %v10338_v57 = vadd.f32 %v13803_v58, %v20611_v15  ;;  %v20669_v48 = vadd.f32 %v10335_v1, %v20043_v0 }
 0xecb   :  { %v20662_v35 = vadd.f32 %v10327_v38, %v20036_v45  ;;  %v10330_v11 = vadd.f32 %v20611_v15, %v10329_v62 }
 0xecc   :  { %10477 = vadd.xlane.f32.xlu1 %v10476_v6  ;;  %v20677_v45 = vadd.f32 %v10338_v57, %v20055_v3  ;;  %v10485_v20 = vsel %vm97_vm0, %v20669_v48, 0.0  ;;  %v22743_v57 = vld [vmem:[#allocation73_spill] sm:$0xff] }
 0xecd   :  { %v20672_v16 = vadd.f32 %v10330_v11, %v20048_v30  ;;  %v10479_v25 = vsel %vm97_vm0, %v20662_v35, 0.0 }
 0xece   :  { %10480 = vadd.xlane.f32.xlu0 %v10479_v25  ;;  %v10488_v0 = vsel %vm97_vm0, %v20677_v45, 0.0 }
 0xecf   :  { %22728 = vst [vmem:[#allocation122_spill] sm:$0xff] %v20672_v16  ;;  %v10482_v28 = vsel %vm97_vm0, %v20672_v16, 0.0 }
 0xed0   :  { %10483 = vadd.xlane.f32.xlu1 %v10482_v28  ;;  %v22745_v28 = vld [vmem:[#allocation82_spill] sm:$0xff] }
 0xed2   :  { %10486 = vadd.xlane.f32.xlu0 %v10485_v20 }
 0xed4   :  { %10489 = vadd.xlane.f32.xlu1 %v10488_v0  ;;  %v22747_v0 = vld [vmem:[#allocation76_spill] sm:$0xff] }
 0xee7   :  { %v13806_v30 = vpop.f32.mrb[60].mxu0 }
 0xee8   :  { %v10342_v56 = vpop.f32.mrb[61].mxu0  ;;  %v10351_v23 = vadd.f32 %v13806_v30, %v20611_v15 }
 0xee9   :  { %v10343_v19 = vadd.f32 %v20611_v15, %v10342_v56  ;;  %v13807_v3 = vpop.f32.mrb[62].mxu0 }
 0xeea   :  { %v10345_v7 = vpop.f32.mrb[63].mxu0  ;;  %v10354_v63 = vadd.f32 %v13807_v3, %v20611_v15  ;;  %v20693_v41 = vadd.f32 %v10351_v23, %v20075_v14  ;;  %v22749_v23 = vld [vmem:[#allocation101_spill] sm:$0xff] }
 0xeeb   :  { %v20688_v4 = vadd.f32 %v10343_v19, %v20068_v27  ;;  %v10346_v5 = vadd.f32 %v20611_v15, %v10345_v7 }
 0xeec   :  { %22730 = vst [vmem:[#allocation45_spill] sm:$0xff] %v20693_v41  ;;  %v20701_v51 = vadd.f32 %v10354_v63, %v22733_v36  ;;  %v10497_v8 = vsel %vm97_vm0, %v20693_v41, 0.0 }
 0xeed   :  { %22729 = vst [vmem:[#allocation14_spill] sm:$0xff] %v20688_v4  ;;  %v20696_v50 = vadd.f32 %v10346_v5, %v22731_v54  ;;  %v10491_v32 = vsel %vm97_vm0, %v20688_v4, 0.0 }
 0xeee   :  { %10492 = vadd.xlane.f32.xlu0 %v10491_v32  ;;  %22734 = vst [vmem:[#allocation62_spill] sm:$0xff] %v20701_v51  ;;  %v10500_v14 = vsel %vm97_vm0, %v20701_v51, 0.0 }
 0xeef   :  { %22732 = vst [vmem:[#allocation113_spill] sm:$0xff] %v20696_v50  ;;  %v10494_v27 = vsel %vm97_vm0, %v20696_v50, 0.0 }
 0xef0   :  { %10495 = vadd.xlane.f32.xlu1 %v10494_v27 }
 0xef2   :  { %10498 = vadd.xlane.f32.xlu0 %v10497_v8 }
 0xef4   :  { %10501 = vadd.xlane.f32.xlu1 %v10500_v14  ;;  %v22751_v14 = vld [vmem:[#allocation35_spill] sm:$0xff] }
 0xf20   :  { %v13810_v47 = vpop.f32.mrb[64].mxu0 }
 0xf21   :  { %v10367_v34 = vadd.f32 %v13810_v47, %v20611_v15  ;;  %v10358_v31 = vpop.f32.mrb[65].mxu0 }
 0xf22   :  { %v10359_v55 = vadd.f32 %v20611_v15, %v10358_v31  ;;  %v13811_v52 = vpop.f32.mrb[66].mxu0 }
 0xf23   :  { %v20712_v49 = vadd.f32 %v10367_v34, %v22735_v60  ;;  %v10370_v44 = vadd.f32 %v13811_v52, %v20611_v15  ;;  %v10361_v18 = vpop.f32.mrb[67].mxu0  ;;  %v22755_v60 = vld [vmem:[#allocation107_spill] sm:$0xff] }
 0xf24   :  { %v10362_v17 = vadd.f32 %v20611_v15, %v10361_v18  ;;  %v20717_v12 = vadd.f32 %v10359_v55, %v22737_v39  ;;  %v22753_v55 = vld [vmem:[#allocation12_spill] sm:$0xff] }
 0xf25   :  { %22736 = vst [vmem:[#allocation112_spill] sm:$0xff] %v20712_v49  ;;  %v20720_v53 = vadd.f32 %v10370_v44, %v22739_v2  ;;  %v10509_v40 = vsel %vm97_vm0, %v20712_v49, 0.0 }
 0xf26   :  { %22738 = vst [vmem:[#allocation50_spill] sm:$0xff] %v20717_v12  ;;  %10510 = vadd.xlane.f32.xlu0 %v10509_v40  ;;  %v20725_v46 = vadd.f32 %v10362_v17, %v22741_v29  ;;  %v10503_v21 = vsel %vm97_vm0, %v20717_v12, 0.0  ;;  %v22757_v17 = vld [vmem:[#allocation69_spill] sm:$0xff] }
 0xf27   :  { %22740 = vst [vmem:[#allocation47_spill] sm:$0xff] %v20720_v53  ;;  %v10512_v26 = vsel %vm97_vm0, %v20720_v53, 0.0 }
 0xf28   :  { %22742 = vst [vmem:[#allocation65_spill] sm:$0xff] %v20725_v46  ;;  %10513 = vadd.xlane.f32.xlu1 %v10512_v26  ;;  %v10506_v59 = vsel %vm97_vm0, %v20725_v46, 0.0 }
 0xf2a   :  { %10504 = vadd.xlane.f32.xlu0 %v10503_v21 }
 0xf2c   :  { %10507 = vadd.xlane.f32.xlu1 %v10506_v59  ;;  %v13814_v13 = vpop.f32.mrb[68].mxu0 }
 0xf2d   :  { %v10374_v1 = vpop.f32.mrb[69].mxu0  ;;  %v10383_v38 = vadd.f32 %v13814_v13, %v20611_v15 }
 0xf2e   :  { %v10375_v58 = vadd.f32 %v20611_v15, %v10374_v1  ;;  %v13815_v10 = vpop.f32.mrb[70].mxu0 }
 0xf2f   :  { %v10377_v62 = vpop.f32.mrb[71].mxu0  ;;  %v10386_v6 = vadd.f32 %v13815_v10, %v20611_v15  ;;  %v20741_v20 = vadd.f32 %v10383_v38, %v22745_v28  ;;  %v22763_v28 = vld [vmem:[#allocation123_spill] sm:$0xff] }
 0xf30   :  { %v20736_v11 = vadd.f32 %v10375_v58, %v22743_v57  ;;  %v10378_v25 = vadd.f32 %v20611_v15, %v10377_v62  ;;  %v22759_v58 = vld [vmem:[#allocation42_spill] sm:$0xff] }
 0xf31   :  { %22746 = vst [vmem:[#allocation135_spill] sm:$0xff] %v20741_v20  ;;  %v20749_v19 = vadd.f32 %v10386_v6, %v22749_v23  ;;  %v10521_v7 = vsel %vm97_vm0, %v20741_v20, 0.0  ;;  %v22761_v6 = vld [vmem:[#allocation39_spill] sm:$0xff] }
 0xf32   :  { %22744 = vst [vmem:[#allocation85_spill] sm:$0xff] %v20736_v11  ;;  %v20744_v30 = vadd.f32 %v10378_v25, %v22747_v0  ;;  %v10515_v56 = vsel %vm97_vm0, %v20736_v11, 0.0 }
 0xf33   :  { %10516 = vadd.xlane.f32.xlu0 %v10515_v56  ;;  %22750 = vst [vmem:[#allocation97_spill] sm:$0xff] %v20749_v19  ;;  %v10524_v5 = vsel %vm97_vm0, %v20749_v19, 0.0 }
 0xf34   :  { %22748 = vst [vmem:[#allocation83_spill] sm:$0xff] %v20744_v30  ;;  %v10518_v3 = vsel %vm97_vm0, %v20744_v30, 0.0 }
 0xf35   :  { %10519 = vadd.xlane.f32.xlu1 %v10518_v3 }
 0xf37   :  { %10522 = vadd.xlane.f32.xlu0 %v10521_v7  ;;  %v22765_v7 = vld [vmem:[#allocation27_spill] sm:$0xff] }
 0xf38   :  { %v13818_v63 = vpop.f32.mrb[72].mxu0 }
 0xf39   :  { %10525 = vadd.xlane.f32.xlu1 %v10524_v5  ;;  %v10390_v54 = vpop.f32.mrb[73].mxu0  ;;  %v10399_v32 = vadd.f32 %v13818_v63, %v20611_v15 }
 0xf3a   :  { %v10391_v36 = vadd.f32 %v20611_v15, %v10390_v54  ;;  %v13819_v27 = vpop.f32.mrb[74].mxu0 }
 0xf3b   :  { %v10393_v8 = vpop.f32.mrb[75].mxu0  ;;  %v10402_v34 = vadd.f32 %v13819_v27, %v20611_v15  ;;  %v20765_v52 = vadd.f32 %v10399_v32, %v22753_v55 }
 0xf3c   :  { %v20760_v47 = vadd.f32 %v10391_v36, %v22751_v14  ;;  %v10394_v31 = vadd.f32 %v20611_v15, %v10393_v8 }
 0xf3d   :  { %22754 = vst [vmem:[#allocation94_spill] sm:$0xff] %v20765_v52  ;;  %v20773_v39 = vadd.f32 %v10402_v34, %v22757_v17  ;;  %v10533_v40 = vsel %vm97_vm0, %v20765_v52, 0.0 }
 0xf3e   :  { %22752 = vst [vmem:[#allocation120_spill] sm:$0xff] %v20760_v47  ;;  %v20768_v44 = vadd.f32 %v10394_v31, %v22755_v60  ;;  %v10527_v18 = vsel %vm97_vm0, %v20760_v47, 0.0 }
 0xf3f   :  { %10528 = vadd.xlane.f32.xlu0 %v10527_v18  ;;  %22758 = vst [vmem:[#allocation58_spill] sm:$0xff] %v20773_v39  ;;  %v10536_v26 = vsel %vm97_vm0, %v20773_v39, 0.0 }
 0xf40   :  { %22756 = vst [vmem:[#allocation84_spill] sm:$0xff] %v20768_v44  ;;  %v10530_v2 = vsel %vm97_vm0, %v20768_v44, 0.0 }
 0xf41   :  { %10531 = vadd.xlane.f32.xlu1 %v10530_v2 }
 0xf43   :  { %10534 = vadd.xlane.f32.xlu0 %v10533_v40 }
 0xf44   :  { %v13822_v29 = vpop.f32.mrb[76].mxu0 }
 0xf45   :  { %10537 = vadd.xlane.f32.xlu1 %v10536_v26  ;;  %v10406_v21 = vpop.f32.mrb[77].mxu0  ;;  %v10415_v59 = vadd.f32 %v13822_v29, %v20611_v15 }
 0xf46   :  { %v10407_v13 = vadd.f32 %v20611_v15, %v10406_v21  ;;  %v13823_v1 = vpop.f32.mrb[78].mxu0 }
 0xf47   :  { %v10409_v38 = vpop.f32.mrb[79].mxu0  ;;  %v10418_v62 = vadd.f32 %v13823_v1, %v20611_v15  ;;  %v20789_v25 = vadd.f32 %v10415_v59, %v22761_v6 }
 0xf48   :  { %v20784_v10 = vadd.f32 %v10407_v13, %v22759_v58  ;;  %v10410_v57 = vadd.f32 %v20611_v15, %v10409_v38 }
 0xf49   :  { %22762 = vst [vmem:[#allocation81_spill] sm:$0xff] %v20789_v25  ;;  %v20797_v63 = vadd.f32 %v10418_v62, %v22765_v7  ;;  %v10545_v27 = vsel %vm97_vm0, %v20789_v25, 0.0 }
 0xf4a   :  { %22760 = vst [vmem:[#allocation55_spill] sm:$0xff] %v20784_v10  ;;  %v20792_v0 = vadd.f32 %v10410_v57, %v22763_v28  ;;  %v10463_v56 = vpop.xlane.xlu0 %10462  ;;  %v10539_v23 = vsel %vm97_vm0, %v20784_v10, 0.0 }
 0xf4b   :  { %v10553_v3 = vmul.f32 0.03125, %v10463_v56  ;;  %10540 = vadd.xlane.f32.xlu0 %v10539_v23  ;;  %22766 = vst [vmem:[#allocation93_spill] sm:$0xff] %v20797_v63  ;;  %v10548_v55 = vsel %vm97_vm0, %v20797_v63, 0.0 }
 0xf4c   :  { %22764 = vst [vmem:[#allocation43_spill] sm:$0xff] %v20792_v0  ;;  %v10466_v5 = vpop.xlane.xlu1 %10465  ;;  %v10542_v54 = vsel %vm97_vm0, %v20792_v0, 0.0 }
 0xf4d   :  { %v20802_v15 = vsub.f32 %v20616_v9, %v10553_v3  ;;  %v10554_v32 = vmul.f32 0.03125, %v10466_v5  ;;  %10543 = vadd.xlane.f32.xlu1 %v10542_v54 }
 0xf4e   :  { %v10457_v36 = vpop.xlane.xlu0 %10456 }
 0xf4f   :  { %v20807_v8 = vsub.f32 %v20624_v61, %v10554_v32  ;;  %v10551_v14 = vmul.f32 0.03125, %v10457_v36  ;;  %10546 = vadd.xlane.f32.xlu0 %v10545_v27  ;;  %v10617_v34 = vmul.f32 %v20802_v15, %v20802_v15 }
 0xf50   :  { %v10460_v31 = vpop.xlane.xlu1 %10459 }
 0xf51   :  { %v20814_v60 = vsub.f32 %v20621_v22, %v10551_v14  ;;  %v10552_v18 = vmul.f32 0.03125, %v10460_v31  ;;  %10549 = vadd.xlane.f32.xlu1 %v10548_v55  ;;  %v10653_v17 = vsel %vm97_vm0, %v10617_v34, 0.0  ;;  %v10618_v2 = vmul.f32 %v20807_v8, %v20807_v8 }
 0xf53   :  { %v20820_v40 = vsub.f32 %v20629_v33, %v10552_v18  ;;  %10654 = vadd.xlane.f32.xlu0 %v10653_v17  ;;  %v10469_v29 = vpop.xlane.xlu0 %10468  ;;  %v10656_v26 = vsel %vm97_vm0, %v10618_v2, 0.0  ;;  %v10615_v21 = vmul.f32 %v20814_v60, %v20814_v60 }
 0xf54   :  { %v10555_v59 = vmul.f32 0.03125, %v10469_v29 }
 0xf55   :  { %v10472_v13 = vpop.xlane.xlu1 %10471  ;;  %10657 = vadd.xlane.f32.xlu1 %v10656_v26  ;;  %v10647_v1 = vsel %vm97_vm0, %v10615_v21, 0.0  ;;  %v10616_v38 = vmul.f32 %v20820_v40, %v20820_v40 }
 0xf56   :  { %v20829_v58 = vsub.f32 %v20640_v24, %v10555_v59  ;;  %v10556_v62 = vmul.f32 0.03125, %v10472_v13 }
 0xf57   :  { %10648 = vadd.xlane.f32.xlu0 %v10647_v1  ;;  %v10475_v57 = vpop.xlane.xlu0 %10474  ;;  %v10650_v6 = vsel %vm97_vm0, %v10616_v38, 0.0 }
 0xf58   :  { %v20833_v28 = vsub.f32 %v20648_v37, %v10556_v62  ;;  %v10557_v56 = vmul.f32 0.03125, %v10475_v57  ;;  %v10619_v23 = vmul.f32 %v20829_v58, %v20829_v58 }
 0xf59   :  { %v10478_v3 = vpop.xlane.xlu1 %10477  ;;  %10651 = vadd.xlane.f32.xlu1 %v10650_v6 }
 0xf5a   :  { %v20838_v7 = vsub.f32 %v20645_v43, %v10557_v56  ;;  %v10558_v5 = vmul.f32 0.03125, %v10478_v3  ;;  %v10659_v54 = vsel %vm97_vm0, %v10619_v23, 0.0  ;;  %v10620_v32 = vmul.f32 %v20833_v28, %v20833_v28 }
 0xf5b   :  { %10660 = vadd.xlane.f32.xlu0 %v10659_v54  ;;  %v10481_v36 = vpop.xlane.xlu0 %10480 }
 0xf5c   :  { %v20844_v27 = vsub.f32 %v20653_v42, %v10558_v5  ;;  %v10559_v14 = vmul.f32 0.03125, %v10481_v36  ;;  %v10662_v34 = vsel %vm97_vm0, %v10620_v32, 0.0  ;;  %v10621_v31 = vmul.f32 %v20838_v7, %v20838_v7 }
 0xf5d   :  { %v10484_v55 = vpop.xlane.xlu1 %10483  ;;  %10663 = vadd.xlane.f32.xlu1 %v10662_v34 }
 0xf5e   :  { %v20850_v18 = vsub.f32 %v20662_v35, %v10559_v14  ;;  %v10560_v17 = vmul.f32 0.03125, %v10484_v55  ;;  %v10665_v2 = vsel %vm97_vm0, %v10621_v31, 0.0  ;;  %v10622_v29 = vmul.f32 %v20844_v27, %v20844_v27 }
 0xf5f   :  { %10666 = vadd.xlane.f32.xlu0 %v10665_v2  ;;  %v10487_v26 = vpop.xlane.xlu0 %10486 }
 0xf60   :  { %v20856_v21 = vsub.f32 %v20672_v16, %v10560_v17  ;;  %v10561_v59 = vmul.f32 0.03125, %v10487_v26  ;;  %v10668_v13 = vsel %vm97_vm0, %v10622_v29, 0.0  ;;  %v10623_v1 = vmul.f32 %v20850_v18, %v20850_v18 }
 0xf61   :  { %v10490_v38 = vpop.xlane.xlu1 %10489  ;;  %10669 = vadd.xlane.f32.xlu1 %v10668_v13 }
 0xf62   :  { %v20862_v62 = vsub.f32 %v20669_v48, %v10561_v59  ;;  %v10562_v57 = vmul.f32 0.03125, %v10490_v38  ;;  %v10671_v6 = vsel %vm97_vm0, %v10623_v1, 0.0  ;;  %v10624_v56 = vmul.f32 %v20856_v21, %v20856_v21 }
 0xf63   :  { %10672 = vadd.xlane.f32.xlu0 %v10671_v6 }
 0xf64   :  { %v20868_v23 = vsub.f32 %v20677_v45, %v10562_v57  ;;  %v10674_v3 = vsel %vm97_vm0, %v10624_v56, 0.0  ;;  %v10625_v5 = vmul.f32 %v20862_v62, %v20862_v62 }
 0xf65   :  { %10675 = vadd.xlane.f32.xlu1 %v10674_v3 }
 0xf66   :  { %v10677_v54 = vsel %vm97_vm0, %v10625_v5, 0.0  ;;  %v10626_v32 = vmul.f32 %v20868_v23, %v20868_v23 }
 0xf67   :  { %10678 = vadd.xlane.f32.xlu0 %v10677_v54 }
 0xf68   :  { %v10680_v36 = vsel %vm97_vm0, %v10626_v32, 0.0 }
 0xf69   :  { %10681 = vadd.xlane.f32.xlu1 %v10680_v36 }
 0xf7b   :  { %v10493_v14 = vpop.xlane.xlu0 %10492 }
 0xf7c   :  { %v10563_v34 = vmul.f32 0.03125, %v10493_v14 }
 0xf7d   :  { %v10496_v31 = vpop.xlane.xlu1 %10495 }
 0xf7e   :  { %v20878_v55 = vsub.f32 %v20688_v4, %v10563_v34  ;;  %v10564_v17 = vmul.f32 0.03125, %v10496_v31 }
 0xf7f   :  { %v10499_v2 = vpop.xlane.xlu0 %10498 }
 0xf80   :  { %v20881_v29 = vsub.f32 %v20696_v50, %v10564_v17  ;;  %v10565_v26 = vmul.f32 0.03125, %v10499_v2  ;;  %v10627_v59 = vmul.f32 %v20878_v55, %v20878_v55 }
 0xf81   :  { %v10502_v13 = vpop.xlane.xlu1 %10501 }
 0xf82   :  { %v20886_v1 = vsub.f32 %v20693_v41, %v10565_v26  ;;  %v10566_v38 = vmul.f32 0.03125, %v10502_v13  ;;  %v10683_v57 = vsel %vm97_vm0, %v10627_v59, 0.0  ;;  %v10628_v6 = vmul.f32 %v20881_v29, %v20881_v29 }
 0xf83   :  { %10684 = vadd.xlane.f32.xlu0 %v10683_v57 }
 0xf84   :  { %v20892_v56 = vsub.f32 %v20701_v51, %v10566_v38  ;;  %v10686_v3 = vsel %vm97_vm0, %v10628_v6, 0.0  ;;  %v10629_v5 = vmul.f32 %v20886_v1, %v20886_v1 }
 0xf85   :  { %10687 = vadd.xlane.f32.xlu1 %v10686_v3 }
 0xf86   :  { %v10689_v54 = vsel %vm97_vm0, %v10629_v5, 0.0  ;;  %v10630_v32 = vmul.f32 %v20892_v56, %v20892_v56 }
 0xf87   :  { %10690 = vadd.xlane.f32.xlu0 %v10689_v54 }
 0xf88   :  { %v10692_v36 = vsel %vm97_vm0, %v10630_v32, 0.0 }
 0xf89   :  { %10693 = vadd.xlane.f32.xlu1 %v10692_v36 }
 0xfb3   :  { %v10511_v14 = vpop.xlane.xlu0 %10510 }
 0xfb4   :  { %v10569_v34 = vmul.f32 0.03125, %v10511_v14 }
 0xfb5   :  { %v10514_v31 = vpop.xlane.xlu1 %10513 }
 0xfb6   :  { %v20902_v17 = vsub.f32 %v20712_v49, %v10569_v34  ;;  %v10570_v2 = vmul.f32 0.03125, %v10514_v31 }
 0xfb7   :  { %v10505_v26 = vpop.xlane.xlu0 %10504 }
 0xfb8   :  { %v20905_v59 = vsub.f32 %v20720_v53, %v10570_v2  ;;  %v10567_v13 = vmul.f32 0.03125, %v10505_v26  ;;  %v10633_v38 = vmul.f32 %v20902_v17, %v20902_v17 }
 0xfb9   :  { %v10508_v57 = vpop.xlane.xlu1 %10507 }
 0xfba   :  { %v20910_v6 = vsub.f32 %v20717_v12, %v10567_v13  ;;  %v10568_v3 = vmul.f32 0.03125, %v10508_v57  ;;  %v10701_v5 = vsel %vm97_vm0, %v10633_v38, 0.0  ;;  %v10634_v54 = vmul.f32 %v20905_v59, %v20905_v59 }
 0xfbb   :  { %10702 = vadd.xlane.f32.xlu0 %v10701_v5 }
 0xfbc   :  { %v20916_v32 = vsub.f32 %v20725_v46, %v10568_v3  ;;  %v10704_v36 = vsel %vm97_vm0, %v10634_v54, 0.0  ;;  %v10631_v14 = vmul.f32 %v20910_v6, %v20910_v6 }
 0xfbd   :  { %10705 = vadd.xlane.f32.xlu1 %v10704_v36 }
 0xfbe   :  { %v10695_v34 = vsel %vm97_vm0, %v10631_v14, 0.0  ;;  %v10632_v31 = vmul.f32 %v20916_v32, %v20916_v32 }
 0xfbf   :  { %10696 = vadd.xlane.f32.xlu0 %v10695_v34 }
 0xfc0   :  { %v10517_v2 = vpop.xlane.xlu0 %10516  ;;  %v10698_v26 = vsel %vm97_vm0, %v10632_v31, 0.0 }
 0xfc1   :  { %v10571_v13 = vmul.f32 0.03125, %v10517_v2  ;;  %10699 = vadd.xlane.f32.xlu1 %v10698_v26 }
 0xfc2   :  { %v10520_v38 = vpop.xlane.xlu1 %10519 }
 0xfc3   :  { %v20926_v57 = vsub.f32 %v20736_v11, %v10571_v13  ;;  %v10572_v3 = vmul.f32 0.03125, %v10520_v38 }
 0xfc4   :  { %v10523_v5 = vpop.xlane.xlu0 %10522 }
 0xfc5   :  { %v20929_v54 = vsub.f32 %v20744_v30, %v10572_v3  ;;  %v10573_v36 = vmul.f32 0.03125, %v10523_v5  ;;  %v10635_v14 = vmul.f32 %v20926_v57, %v20926_v57 }
 0xfc6   :  { %v10526_v46 = vpop.xlane.xlu1 %10525 }
 0xfc7   :  { %v20934_v34 = vsub.f32 %v20741_v20, %v10573_v36  ;;  %v10574_v31 = vmul.f32 0.03125, %v10526_v46  ;;  %v10707_v2 = vsel %vm97_vm0, %v10635_v14, 0.0  ;;  %v10636_v26 = vmul.f32 %v20929_v54, %v20929_v54 }
 0xfc8   :  { %10708 = vadd.xlane.f32.xlu0 %v10707_v2 }
 0xfc9   :  { %v20940_v13 = vsub.f32 %v20749_v19, %v10574_v31  ;;  %v10710_v38 = vsel %vm97_vm0, %v10636_v26, 0.0  ;;  %v10637_v3 = vmul.f32 %v20934_v34, %v20934_v34 }
 0xfca   :  { %10711 = vadd.xlane.f32.xlu1 %v10710_v38 }
 0xfcb   :  { %v10713_v5 = vsel %vm97_vm0, %v10637_v3, 0.0  ;;  %v10638_v46 = vmul.f32 %v20940_v13, %v20940_v13 }
 0xfcc   :  { %10714 = vadd.xlane.f32.xlu0 %v10713_v5  ;;  %v10529_v36 = vpop.xlane.xlu0 %10528 }
 0xfcd   :  { %v10575_v14 = vmul.f32 0.03125, %v10529_v36  ;;  %v10716_v30 = vsel %vm97_vm0, %v10638_v46, 0.0 }
 0xfce   :  { %v10532_v2 = vpop.xlane.xlu1 %10531  ;;  %10717 = vadd.xlane.f32.xlu1 %v10716_v30 }
 0xfcf   :  { %v20950_v31 = vsub.f32 %v20760_v47, %v10575_v14  ;;  %v10576_v26 = vmul.f32 0.03125, %v10532_v2 }
 0xfd0   :  { %v10535_v19 = vpop.xlane.xlu0 %10534 }
 0xfd1   :  { %v20953_v11 = vsub.f32 %v20768_v44, %v10576_v26  ;;  %v10577_v38 = vmul.f32 0.03125, %v10535_v19  ;;  %v10639_v3 = vmul.f32 %v20950_v31, %v20950_v31 }
 0xfd2   :  { %v10538_v20 = vpop.xlane.xlu1 %10537 }
 0xfd3   :  { %v20958_v5 = vsub.f32 %v20765_v52, %v10577_v38  ;;  %v10578_v36 = vmul.f32 0.03125, %v10538_v20  ;;  %v10719_v46 = vsel %vm97_vm0, %v10639_v3, 0.0  ;;  %v10640_v30 = vmul.f32 %v20953_v11, %v20953_v11 }
 0xfd4   :  { %10720 = vadd.xlane.f32.xlu0 %v10719_v46 }
 0xfd5   :  { %v20964_v14 = vsub.f32 %v20773_v39, %v10578_v36  ;;  %v10722_v2 = vsel %vm97_vm0, %v10640_v30, 0.0  ;;  %v10641_v19 = vmul.f32 %v20958_v5, %v20958_v5 }
 0xfd6   :  { %10723 = vadd.xlane.f32.xlu1 %v10722_v2 }
 0xfd7   :  { %v10725_v26 = vsel %vm97_vm0, %v10641_v19, 0.0  ;;  %v10642_v20 = vmul.f32 %v20964_v14, %v20964_v14 }
 0xfd8   :  { %10726 = vadd.xlane.f32.xlu0 %v10725_v26  ;;  %v10541_v38 = vpop.xlane.xlu0 %10540 }
 0xfd9   :  { %v10579_v3 = vmul.f32 0.03125, %v10541_v38  ;;  %v10728_v44 = vsel %vm97_vm0, %v10642_v20, 0.0 }
 0xfda   :  { %10729 = vadd.xlane.f32.xlu1 %v10728_v44  ;;  %v10544_v46 = vpop.xlane.xlu1 %10543 }
 0xfdb   :  { %v20974_v36 = vsub.f32 %v20784_v10, %v10579_v3  ;;  %v10580_v30 = vmul.f32 0.03125, %v10544_v46 }
 0xfdc   :  { %v10547_v47 = vpop.xlane.xlu0 %10546 }
 0xfdd   :  { %v20977_v39 = vsub.f32 %v20792_v0, %v10580_v30  ;;  %v10581_v2 = vmul.f32 0.03125, %v10547_v47  ;;  %v10643_v19 = vmul.f32 %v20974_v36, %v20974_v36 }
 0xfde   :  { %v10550_v52 = vpop.xlane.xlu1 %10549 }
 0xfdf   :  { %v20982_v26 = vsub.f32 %v20789_v25, %v10581_v2  ;;  %v10582_v38 = vmul.f32 0.03125, %v10550_v52  ;;  %v10731_v44 = vsel %vm97_vm0, %v10643_v19, 0.0  ;;  %v10644_v20 = vmul.f32 %v20977_v39, %v20977_v39 }
 0xfe0   :  { %10732 = vadd.xlane.f32.xlu0 %v10731_v44  ;;  %v10655_v3 = vpop.xlane.xlu0 %10654 }
 0xfe1   :  { %v20988_v46 = vsub.f32 %v20797_v63, %v10582_v38  ;;  %v10745_v30 = vmul.f32 0.03125, %v10655_v3  ;;  %v10734_v47 = vsel %vm97_vm0, %v10644_v20, 0.0  ;;  %v10645_v0 = vmul.f32 %v20982_v26, %v20982_v26 }
 0xfe2   :  { %10735 = vadd.xlane.f32.xlu1 %v10734_v47  ;;  %v10658_v2 = vpop.xlane.xlu1 %10657 }
 0xfe3   :  { %v10777_v25 = vadd.f32 1e-05, %v10745_v30  ;;  %v10746_v52 = vmul.f32 0.03125, %v10658_v2  ;;  %v10737_v19 = vsel %vm97_vm0, %v10645_v0, 0.0  ;;  %v10646_v10 = vmul.f32 %v20988_v46, %v20988_v46 }
 0xfe4   :  { %10738 = vadd.xlane.f32.xlu0 %v10737_v19  ;;  %v10649_v44 = vpop.xlane.xlu0 %10648 }
 0xfe5   :  { %14935 = vrsqrt.f32 %v10777_v25  ;;  %v10778_v38 = vadd.f32 1e-05, %v10746_v52  ;;  %v10743_v63 = vmul.f32 0.03125, %v10649_v44  ;;  %v10740_v3 = vsel %vm97_vm0, %v10646_v10, 0.0 }
 0xfe6   :  { %10741 = vadd.xlane.f32.xlu1 %v10740_v3  ;;  %v10652_v20 = vpop.xlane.xlu1 %10651 }
 0xfe7   :  { %14937 = vrsqrt.f32 %v10778_v38  ;;  %v10775_v12 = vadd.f32 1e-05, %v10743_v63  ;;  %v10744_v47 = vmul.f32 0.03125, %v10652_v20  ;;  %v21000_v63 = vld [vmem:[%s21719_s7] ss:$0 sm:$0xff] }
 0xfe8   :  { %v10661_v53 = vpop.xlane.xlu0 %10660  ;;  %v14289_v38 = vld [vmem:[%s21721_s17] sm:$0xff]  }
 0xfe9   :  { %14939 = vrsqrt.f32 %v10775_v12  ;;  %v10776_v30 = vadd.f32 1e-05, %v10744_v47  ;;  %v10747_v2 = vmul.f32 0.03125, %v10661_v53  ;;  %v21009_v47 = vld [vmem:[%s21720_s8] ss:$0 sm:$0xff]  ;;  %13824 = vmatprep.subr.bf16.mxu1 %v14289_v38 }
 0xfea   :  { %v10664_v0 = vpop.xlane.xlu1 %10663  ;;  %13825 = vmatpush3.bf16.msra.mxu1 %v14289_v38 }
 0xfeb   :  { %14941 = vrsqrt.f32 %v10776_v30  ;;  %v10779_v49 = vadd.f32 1e-05, %v10747_v2  ;;  %v10748_v50 = vmul.f32 0.03125, %v10664_v0 }
 0xfec   :  { %v10667_v19 = vpop.xlane.xlu0 %10666 }
 0xfed   :  { %14943 = vrsqrt.f32 %v10779_v49  ;;  %v10780_v25 = vadd.f32 1e-05, %v10748_v50  ;;  %v10749_v52 = vmul.f32 0.03125, %v10667_v19 }
 0xfee   :  { %v10670_v44 = vpop.xlane.xlu1 %10669 }
 0xfef   :  { %v14936_v4 = vpop.eup %14935  ;;  %14945 = vrsqrt.f32 %v10780_v25  ;;  %v10781_v10 = vadd.f32 1e-05, %v10749_v52  ;;  %v10750_v3 = vmul.f32 0.03125, %v10670_v44 }
 0xff0   :  { %v10841_v12 = vmul.f32 %v14936_v4, %v20802_v15  ;;  %v10673_v53 = vpop.xlane.xlu0 %10672 }
 0xff1   :  { %v14938_v49 = vpop.eup %14937  ;;  %14947 = vrsqrt.f32 %v10781_v10  ;;  %v10782_v50 = vadd.f32 1e-05, %v10750_v3  ;;  %v10751_v20 = vmul.f32 0.03125, %v10673_v53  ;;  %v14290_v10 = vld [vmem:[%s21721_s17 + $0x8] sm:$0xff]  }
 0xff2   :  { %v10842_v30 = vmul.f32 %v14938_v49, %v20807_v8  ;;  %v10676_v2 = vpop.xlane.xlu1 %10675  ;;  %v10879_v0 = vmul.f32 %v21000_v63, %v10841_v12  ;;  %13826 = vmatprep.subr.bf16.mxu1 %v14290_v10 }
 0xff3   :  { %v14940_v4 = vpop.eup %14939  ;;  %14949 = vrsqrt.f32 %v10782_v50  ;;  %v10783_v15 = vadd.f32 1e-05, %v10751_v20  ;;  %v10752_v19 = vmul.f32 0.03125, %v10676_v2  ;;  %13827 = vmatpush3.bf16.msra.mxu1 %v14290_v10 }
 0xff4   :  { %v10839_v25 = vmul.f32 %v14940_v4, %v20814_v60  ;;  %v10679_v52 = vpop.xlane.xlu0 %10678  ;;  %v10880_v44 = vmul.f32 %v21000_v63, %v10842_v30  ;;  %v21020_v50 = vadd.f32 %v21009_v47, %v10879_v0  ;;  %v14291_v0 = vld [vmem:[%s21721_s17 + $0x10] sm:$0xff]  }
 0xff5   :  { %v14942_v3 = vpop.eup %14941  ;;  %14951 = vrsqrt.f32 %v10783_v15  ;;  %v10784_v8 = vadd.f32 1e-05, %v10752_v19  ;;  %v10753_v53 = vmul.f32 0.03125, %v10679_v52  ;;  %13828 = vmatprep.subr.bf16.mxu1 %v14291_v0 }
 0xff6   :  { %v10840_v12 = vmul.f32 %v14942_v3, %v20820_v40  ;;  %v10682_v49 = vpop.xlane.xlu1 %10681  ;;  %v21023_v38 = vadd.f32 %v21009_v47, %v10880_v44  ;;  %v10877_v60 = vmul.f32 %v21000_v63, %v10839_v25 }
 0xff7   :  { %v14944_v20 = vpop.eup %14943  ;;  %14953 = vrsqrt.f32 %v10784_v8  ;;  %v10785_v30 = vadd.f32 1e-05, %v10753_v53  ;;  %v10754_v2 = vmul.f32 0.03125, %v10682_v49  ;;  %13829 = vmatpush3.bf16.msra.mxu1 %v14291_v0 }
 0xff8   :  { %v10843_v4 = vmul.f32 %v14944_v20, %v20829_v58  ;;  %v14124_v40 = vpack.i.bf16 %v21023_v38, %v21020_v50  ;;  %v10878_v15 = vmul.f32 %v21000_v63, %v10840_v12  ;;  %v21034_v52 = vadd.f32 %v21009_v47, %v10877_v60 }
 0xff9   :  { %v14946_v19 = vpop.eup %14945  ;;  %14955 = vrsqrt.f32 %v10785_v30  ;;  %v10786_v25 = vadd.f32 1e-05, %v10754_v2 }
 0xffa   :  { %v10844_v44 = vmul.f32 %v14946_v19, %v20833_v28  ;;  %14125 = vrot.lane.b32.xlu1 %v14124_v40, %s15175_s13  ;;  %v21039_v58 = vadd.f32 %v21009_v47, %v10878_v15  ;;  %v10881_v10 = vmul.f32 %v21000_v63, %v10843_v4  ;;  %v14292_v28 = vld [vmem:[%s21721_s17 + $0x18] sm:$0xff]  }
 0xffb   :  { %v14948_v3 = vpop.eup %14947  ;;  %14957 = vrsqrt.f32 %v10786_v25  ;;  %13830 = vmatprep.subr.bf16.mxu1 %v14292_v28 }
 0xffc   :  { %v10845_v8 = vmul.f32 %v14948_v3, %v20838_v7  ;;  %v14119_v53 = vpack.i.bf16 %v21039_v58, %v21034_v52  ;;  %v10882_v12 = vmul.f32 %v21000_v63, %v10844_v44  ;;  %v21050_v60 = vadd.f32 %v21009_v47, %v10881_v10  ;;  %13831 = vmatpush3.bf16.msra.mxu1 %v14292_v28  ;;  %v14294_v3 = vld [vmem:[%s21721_s17 + $0x28] sm:$0xff]  }
 0xffd   :  { %v14950_v49 = vpop.eup %14949 }
 0xffe   :  { %v10846_v20 = vmul.f32 %v14950_v49, %v20844_v27  ;;  %14130 = vrot.lane.b32.xlu1 %v14124_v40, %s15171_s29  ;;  %14120 = vrot.lane.b32.xlu0 %v14119_v53, %s15175_s13  ;;  %v21056_v7 = vadd.f32 %v21009_v47, %v10882_v12  ;;  %v10883_v30 = vmul.f32 %v21000_v63, %v10845_v8  ;;  %v14293_v27 = vld [vmem:[%s21721_s17 + $0x20] sm:$0xff]  }
 0xfff   :  { %v14952_v2 = vpop.eup %14951  ;;  %13832 = vmatprep.subr.bf16.mxu1 %v14293_v27 }
0x1000   :  { %v10847_v4 = vmul.f32 %v14952_v2, %v20850_v18  ;;  %v14144_v15 = vpack.i.bf16 %v21056_v7, %v21050_v60  ;;  %v10884_v0 = vmul.f32 %v21000_v63, %v10846_v20  ;;  %v21067_v19 = vadd.f32 %v21009_v47, %v10883_v30  ;;  %13833 = vmatpush3.bf16.msra.mxu1 %v14293_v27 }
0x1001   :  { %v14954_v40 = vpop.eup %14953  ;;  %13834 = vmatprep.subr.bf16.mxu1 %v14294_v3 }
0x1002   :  { %v10848_v25 = vmul.f32 %v14954_v40, %v20856_v21  ;;  %14145 = vrot.lane.b32.xlu0 %v14144_v15, %s15175_s13  ;;  %14135 = vrot.lane.b32.xlu1 %v14144_v15, %s15171_s29  ;;  %v21073_v18 = vadd.f32 %v21009_v47, %v10884_v0  ;;  %v10885_v44 = vmul.f32 %v21000_v63, %v10847_v4 }
0x1003   :  { %v14956_v10 = vpop.eup %14955 }
0x1004   :  { %v10849_v8 = vmul.f32 %v14956_v10, %v20862_v62  ;;  %v14149_v21 = vpack.i.bf16 %v21073_v18, %v21067_v19  ;;  %v10886_v53 = vmul.f32 %v21000_v63, %v10848_v25  ;;  %v21084_v28 = vadd.f32 %v21009_v47, %v10885_v44  ;;  %13835 = vmatpush3.bf16.msra.mxu1 %v14294_v3 }
0x1005   :  { %v14958_v12 = vpop.eup %14957 }
0x1006   :  { %v10850_v49 = vmul.f32 %v14958_v12, %v20868_v23  ;;  %14150 = vrot.lane.b32.xlu0 %v14149_v21, %s15171_s29  ;;  %14140 = vrot.lane.b32.xlu1 %v14149_v21, %s15175_s13  ;;  %v21090_v20 = vadd.f32 %v21009_v47, %v10886_v53  ;;  %v10887_v62 = vmul.f32 %v21000_v63, %v10849_v8 }
0x1008   :  { %v14164_v30 = vpack.i.bf16 %v21090_v20, %v21084_v28  ;;  %v10888_v2 = vmul.f32 %v21000_v63, %v10850_v49  ;;  %v21099_v23 = vadd.f32 %v21009_v47, %v10887_v62 }
0x100a   :  { %14165 = vrot.lane.b32.xlu0 %v14164_v30, %s15175_s13  ;;  %14155 = vrot.lane.b32.xlu1 %v14164_v30, %s15171_s29  ;;  %v21102_v4 = vadd.f32 %v21009_v47, %v10888_v2 }
0x100c   :  { %v14169_v15 = vpack.i.bf16 %v21102_v4, %v21099_v23 }
0x100e   :  { %14170 = vrot.lane.b32.xlu0 %v14169_v15, %s15171_s29  ;;  %14160 = vrot.lane.b32.xlu1 %v14169_v15, %s15175_s13 }
0x1010   :  { %v10685_v0 = vpop.xlane.xlu0 %10684 }
0x1011   :  { %v10755_v27 = vmul.f32 0.03125, %v10685_v0 }
0x1012   :  { %v10688_v40 = vpop.xlane.xlu1 %10687 }
0x1013   :  { %v10787_v25 = vadd.f32 1e-05, %v10755_v27  ;;  %v10756_v44 = vmul.f32 0.03125, %v10688_v40 }
0x1014   :  { %v10691_v10 = vpop.xlane.xlu0 %10690 }
0x1015   :  { %14959 = vrsqrt.f32 %v10787_v25  ;;  %v10788_v3 = vadd.f32 1e-05, %v10756_v44  ;;  %v10757_v8 = vmul.f32 0.03125, %v10691_v10 }
0x1016   :  { %v10694_v21 = vpop.xlane.xlu1 %10693 }
0x1017   :  { %14961 = vrsqrt.f32 %v10788_v3  ;;  %v10789_v53 = vadd.f32 1e-05, %v10757_v8  ;;  %v10758_v12 = vmul.f32 0.03125, %v10694_v21 }
0x1019   :  { %14963 = vrsqrt.f32 %v10789_v53  ;;  %v10790_v49 = vadd.f32 1e-05, %v10758_v12  ;;  %v22767_v12 = vmov 0.0  }
0x101b   :  { %14965 = vrsqrt.f32 %v10790_v49 }
0x101f   :  { %v14960_v62 = vpop.eup %14959 }
0x1020   :  { %v10851_v30 = vmul.f32 %v14960_v62, %v20878_v55 }
0x1021   :  { %v14962_v2 = vpop.eup %14961 }
0x1022   :  { %v10852_v15 = vmul.f32 %v14962_v2, %v20881_v29  ;;  %v10889_v0 = vmul.f32 %v21000_v63, %v10851_v30 }
0x1023   :  { %v14964_v27 = vpop.eup %14963 }
0x1024   :  { %v10853_v40 = vmul.f32 %v14964_v27, %v20886_v1  ;;  %v10890_v25 = vmul.f32 %v21000_v63, %v10852_v15  ;;  %v21115_v3 = vadd.f32 %v21009_v47, %v10889_v0 }
0x1025   :  { %v14966_v44 = vpop.eup %14965 }
0x1026   :  { %v10854_v10 = vmul.f32 %v14966_v44, %v20892_v56  ;;  %v21118_v8 = vadd.f32 %v21009_v47, %v10890_v25  ;;  %v10891_v55 = vmul.f32 %v21000_v63, %v10853_v40 }
0x1028   :  { %v14184_v29 = vpack.i.bf16 %v21118_v8, %v21115_v3  ;;  %v10892_v21 = vmul.f32 %v21000_v63, %v10854_v10  ;;  %v10929_v1 = vadd.f32 %v21009_v47, %v10891_v55 }
0x102a   :  { %14185 = vrot.lane.b32.xlu0 %v14184_v29, %s15175_s13  ;;  %14175 = vrot.lane.b32.xlu1 %v14184_v29, %s15171_s29  ;;  %v10930_v56 = vadd.f32 %v21009_v47, %v10892_v21 }
0x102c   :  { %v14189_v53 = vpack.i.bf16 %v10930_v56, %v10929_v1 }
0x102e   :  { %14190 = vrot.lane.b32.xlu0 %v14189_v53, %s15171_s29  ;;  %14180 = vrot.lane.b32.xlu1 %v14189_v53, %s15175_s13 }
0x1032   :  { %14195 = vrot.lane.b32.xlu1 %v22767_v12, %s15171_s29 }
0x1048   :  { %v10703_v49 = vpop.xlane.xlu0 %10702 }
0x1049   :  { %v10761_v62 = vmul.f32 0.03125, %v10703_v49 }
0x104a   :  { %v10706_v30 = vpop.xlane.xlu1 %10705 }
0x104b   :  { %v10793_v2 = vadd.f32 1e-05, %v10761_v62  ;;  %v10762_v15 = vmul.f32 0.03125, %v10706_v30 }
0x104c   :  { %v10697_v0 = vpop.xlane.xlu0 %10696 }
0x104d   :  { %14967 = vrsqrt.f32 %v10793_v2  ;;  %v10794_v27 = vadd.f32 1e-05, %v10762_v15  ;;  %v10759_v40 = vmul.f32 0.03125, %v10697_v0 }
0x104e   :  { %v10700_v25 = vpop.xlane.xlu1 %10699 }
0x104f   :  { %14969 = vrsqrt.f32 %v10794_v27  ;;  %v10791_v44 = vadd.f32 1e-05, %v10759_v40  ;;  %v10760_v10 = vmul.f32 0.03125, %v10700_v25 }
0x1051   :  { %14971 = vrsqrt.f32 %v10791_v44  ;;  %v10792_v55 = vadd.f32 1e-05, %v10760_v10 }
0x1053   :  { %14973 = vrsqrt.f32 %v10792_v55 }
0x1055   :  { %v10709_v29 = vpop.xlane.xlu0 %10708 }
0x1056   :  { %v10763_v21 = vmul.f32 0.03125, %v10709_v29 }
0x1057   :  { %v14968_v1 = vpop.eup %14967  ;;  %v10712_v56 = vpop.xlane.xlu1 %10711 }
0x1058   :  { %v10857_v53 = vmul.f32 %v14968_v1, %v20902_v17  ;;  %v10795_v49 = vadd.f32 1e-05, %v10763_v21  ;;  %v10764_v62 = vmul.f32 0.03125, %v10712_v56 }
0x1059   :  { %v14970_v30 = vpop.eup %14969  ;;  %v10715_v51 = vpop.xlane.xlu0 %10714 }
0x105a   :  { %v10858_v2 = vmul.f32 %v14970_v30, %v20905_v59  ;;  %14975 = vrsqrt.f32 %v10795_v49  ;;  %v10796_v15 = vadd.f32 1e-05, %v10764_v62  ;;  %v10765_v0 = vmul.f32 0.03125, %v10715_v51 }
0x105b   :  { %v14972_v27 = vpop.eup %14971  ;;  %v10718_v40 = vpop.xlane.xlu1 %10717  ;;  %v10895_v25 = vmul.f32 %v21000_v63, %v10857_v53 }
0x105c   :  { %v10855_v44 = vmul.f32 %v14972_v27, %v20910_v6  ;;  %14977 = vrsqrt.f32 %v10796_v15  ;;  %v10797_v10 = vadd.f32 1e-05, %v10765_v0  ;;  %v10766_v55 = vmul.f32 0.03125, %v10718_v40 }
0x105d   :  { %v14974_v29 = vpop.eup %14973  ;;  %v10896_v17 = vmul.f32 %v21000_v63, %v10858_v2  ;;  %v21140_v51 = vadd.f32 %v21009_v47, %v10895_v25 }
0x105e   :  { %v10856_v21 = vmul.f32 %v14974_v29, %v20916_v32  ;;  %14979 = vrsqrt.f32 %v10797_v10  ;;  %v10798_v1 = vadd.f32 1e-05, %v10766_v55  ;;  %v10893_v59 = vmul.f32 %v21000_v63, %v10855_v44 }
0x105f   :  { %v21143_v56 = vadd.f32 %v21009_v47, %v10896_v17 }
0x1060   :  { %14981 = vrsqrt.f32 %v10798_v1  ;;  %v10894_v6 = vmul.f32 %v21000_v63, %v10856_v21  ;;  %v21149_v32 = vadd.f32 %v21009_v47, %v10893_v59 }
0x1061   :  { %v10721_v53 = vpop.xlane.xlu0 %10720  ;;  %v14199_v49 = vpack.i.bf16 %v21143_v56, %v21140_v51 }
0x1062   :  { %v10767_v62 = vmul.f32 0.03125, %v10721_v53  ;;  %v21152_v30 = vadd.f32 %v21009_v47, %v10894_v6 }
0x1063   :  { %14200 = vrot.lane.b32.xlu1 %v14199_v49, %s15175_s13  ;;  %v10724_v2 = vpop.xlane.xlu1 %10723 }
0x1064   :  { %v14976_v15 = vpop.eup %14975  ;;  %v10799_v0 = vadd.f32 1e-05, %v10767_v62  ;;  %v10768_v27 = vmul.f32 0.03125, %v10724_v2  ;;  %v14204_v40 = vpack.i.bf16 %v21152_v30, %v21149_v32 }
0x1065   :  { %v10859_v25 = vmul.f32 %v14976_v15, %v20926_v57  ;;  %v10727_v44 = vpop.xlane.xlu0 %10726 }
0x1066   :  { %v14978_v10 = vpop.eup %14977  ;;  %14983 = vrsqrt.f32 %v10799_v0  ;;  %v10800_v55 = vadd.f32 1e-05, %v10768_v27  ;;  %v10769_v29 = vmul.f32 0.03125, %v10727_v44  ;;  %14205 = vrot.lane.b32.xlu0 %v14204_v40, %s15175_s13 }
0x1067   :  { %v10860_v17 = vmul.f32 %v14978_v10, %v20929_v54  ;;  %v10730_v21 = vpop.xlane.xlu1 %10729  ;;  %v10897_v1 = vmul.f32 %v21000_v63, %v10859_v25 }
0x1068   :  { %v14980_v59 = vpop.eup %14979  ;;  %14985 = vrsqrt.f32 %v10800_v55  ;;  %v10801_v6 = vadd.f32 1e-05, %v10769_v29  ;;  %v10770_v53 = vmul.f32 0.03125, %v10730_v21 }
0x1069   :  { %v10861_v62 = vmul.f32 %v14980_v59, %v20934_v34  ;;  %v10898_v57 = vmul.f32 %v21000_v63, %v10860_v17  ;;  %v21166_v54 = vadd.f32 %v21009_v47, %v10897_v1 }
0x106a   :  { %v14982_v2 = vpop.eup %14981  ;;  %14987 = vrsqrt.f32 %v10801_v6  ;;  %v10802_v15 = vadd.f32 1e-05, %v10770_v53  ;;  %14210 = vrot.lane.b32.xlu0 %v14199_v49, %s15171_s29 }
0x106b   :  { %v10862_v0 = vmul.f32 %v14982_v2, %v20940_v13  ;;  %v21169_v27 = vadd.f32 %v21009_v47, %v10898_v57  ;;  %v10899_v40 = vmul.f32 %v21000_v63, %v10861_v62 }
0x106c   :  { %14989 = vrsqrt.f32 %v10802_v15 }
0x106d   :  { %v10733_v25 = vpop.xlane.xlu0 %10732  ;;  %v14224_v34 = vpack.i.bf16 %v21169_v27, %v21166_v54  ;;  %v10900_v44 = vmul.f32 %v21000_v63, %v10862_v0  ;;  %v21178_v13 = vadd.f32 %v21009_v47, %v10899_v40 }
0x106e   :  { %v10771_v10 = vmul.f32 0.03125, %v10733_v25 }
0x106f   :  { %v10736_v55 = vpop.xlane.xlu1 %10735  ;;  %14225 = vrot.lane.b32.xlu0 %v14224_v34, %s15175_s13  ;;  %14215 = vrot.lane.b32.xlu1 %v14224_v34, %s15171_s29  ;;  %v21181_v49 = vadd.f32 %v21009_v47, %v10900_v44 }
0x1070   :  { %v14984_v29 = vpop.eup %14983  ;;  %v10803_v17 = vadd.f32 1e-05, %v10771_v10  ;;  %v10772_v21 = vmul.f32 0.03125, %v10736_v55 }
0x1071   :  { %v10863_v1 = vmul.f32 %v14984_v29, %v20950_v31  ;;  %v10739_v59 = vpop.xlane.xlu0 %10738  ;;  %v14229_v6 = vpack.i.bf16 %v21181_v49, %v21178_v13 }
0x1072   :  { %v14986_v53 = vpop.eup %14985  ;;  %14991 = vrsqrt.f32 %v10803_v17  ;;  %v10804_v62 = vadd.f32 1e-05, %v10772_v21  ;;  %v10773_v57 = vmul.f32 0.03125, %v10739_v59 }
0x1073   :  { %v10864_v2 = vmul.f32 %v14986_v53, %v20953_v11  ;;  %v10742_v15 = vpop.xlane.xlu1 %10741  ;;  %14230 = vrot.lane.b32.xlu0 %v14229_v6, %s15171_s29  ;;  %14220 = vrot.lane.b32.xlu1 %v14229_v6, %s15175_s13  ;;  %v10901_v0 = vmul.f32 %v21000_v63, %v10863_v1 }
0x1074   :  { %v14988_v40 = vpop.eup %14987  ;;  %14993 = vrsqrt.f32 %v10804_v62  ;;  %v10805_v31 = vadd.f32 1e-05, %v10773_v57  ;;  %v10774_v25 = vmul.f32 0.03125, %v10742_v15 }
0x1075   :  { %v10865_v34 = vmul.f32 %v14988_v40, %v20958_v5  ;;  %v14121_v44 = vpop.permute.xlu0 %14120  ;;  %v10902_v10 = vmul.f32 %v21000_v63, %v10864_v2  ;;  %v21193_v17 = vadd.f32 %v21009_v47, %v10901_v0 }
0x1076   :  { %v14990_v55 = vpop.eup %14989  ;;  %14995 = vrsqrt.f32 %v10805_v31  ;;  %v10806_v29 = vadd.f32 1e-05, %v10774_v25  ;;  %v14123_v11 = vunpack.i.h.bf16 %v14121_v44  ;;  %v14122_v59 = vunpack.i.l.bf16 %v14121_v44 }
0x1077   :  { %v10866_v21 = vmul.f32 %v14990_v55, %v20964_v14  ;;  %v14126_v1 = vpop.permute.xlu1 %14125  ;;  %v21197_v6 = vadd.f32 %v21009_v47, %v10902_v10  ;;  %v10903_v53 = vmul.f32 %v21000_v63, %v10865_v34 }
0x1078   :  { %14997 = vrsqrt.f32 %v10806_v29  ;;  %v14128_v5 = vunpack.i.h.bf16 %v14126_v1  ;;  %v14127_v62 = vunpack.i.l.bf16 %v14126_v1  ;;  %v11525_v0 = vsel %vm97_vm0, 0.0, %v14123_v11 }
0x1079   :  { %v14146_v57 = vpop.permute.xlu0 %14145  ;;  %v14244_v2 = vpack.i.bf16 %v21197_v6, %v21193_v17  ;;  %v10904_v15 = vmul.f32 %v21000_v63, %v10866_v21  ;;  %v11524_v14 = vsel %vm97_vm0, 0.0, %v14122_v59  ;;  %v21210_v34 = vadd.f32 %v21009_v47, %v10903_v53 }
0x107a   :  { %v14147_v40 = vunpack.i.l.bf16 %v14146_v57  ;;  %v11527_v31 = vsel %vm97_vm0, %v21039_v58, %v14128_v5  ;;  %v11526_v55 = vsel %vm97_vm0, %v21034_v52, %v14127_v62  ;;  %v14148_v29 = vunpack.i.h.bf16 %v14146_v57 }
0x107b   :  { %v14131_v25 = vpop.permute.xlu1 %14130  ;;  %14245 = vrot.lane.b32.xlu0 %v14244_v2, %s15175_s13  ;;  %14235 = vrot.lane.b32.xlu1 %v14244_v2, %s15171_s29  ;;  %v21213_v44 = vadd.f32 %v21009_v47, %v10904_v15 }
0x107c   :  { %v14992_v10 = vpop.eup %14991  ;;  %v14133_v11 = vunpack.i.h.bf16 %v14131_v25  ;;  %v14132_v21 = vunpack.i.l.bf16 %v14131_v25  ;;  %v11528_v59 = vsel %vm97_vm0, %v21020_v50, %v14147_v40  ;;  %v11529_v40 = vsel %vm97_vm0, %v21023_v38, %v14148_v29 }
0x107d   :  { %v10867_v58 = vmul.f32 %v14992_v10, %v20974_v36  ;;  %v14151_v1 = vpop.permute.xlu0 %14150  ;;  %v14249_v53 = vpack.i.bf16 %v21213_v44, %v21210_v34 }
0x107e   :  { %v14994_v5 = vpop.eup %14993  ;;  %v11556_v2 = vsel %vm10211_vm5, %v11524_v14, %v14132_v21  ;;  %v11557_v15 = vsel %vm10211_vm5, %v11525_v0, %v14133_v11  ;;  %v14153_v41 = vunpack.i.h.bf16 %v14151_v1  ;;  %v14152_v16 = vunpack.i.l.bf16 %v14151_v1 }
0x107f   :  { %v10868_v52 = vmul.f32 %v14994_v5, %v20977_v39  ;;  %v11588_v62 = vpack.c.bf16 %v11557_v15, %v11556_v2  ;;  %v14136_v57 = vpop.permute.xlu1 %14135  ;;  %14250 = vrot.lane.b32.xlu0 %v14249_v53, %s15171_s29  ;;  %14240 = vrot.lane.b32.xlu1 %v14249_v53, %s15175_s13  ;;  %v10905_v36 = vmul.f32 %v21000_v63, %v10867_v58 }
0x1080   :  { %v14996_v50 = vpop.eup %14995  ;;  %v11560_v14 = vsel %vm10211_vm5, %v11528_v59, %v14152_v16  ;;  %v14138_v25 = vunpack.i.h.bf16 %v14136_v57  ;;  %v14137_v0 = vunpack.i.l.bf16 %v14136_v57  ;;  %v11561_v39 = vsel %vm10211_vm5, %v11529_v40, %v14153_v41 }
0x1081   :  { %v10869_v10 = vmul.f32 %v14996_v50, %v20982_v26  ;;  %v14166_v11 = vpop.permute.xlu0 %14165  ;;  %13836 = vmatprep.mubr.msk.bf16.mxu1 %vm11659_vm6, %v11588_v62  ;;  %v10906_v21 = vmul.f32 %v21000_v63, %v10868_v52  ;;  %v21236_v1 = vadd.f32 %v21009_v47, %v10905_v36  ;;  %v11590_v15 = vpack.c.bf16 %v11561_v39, %v11560_v14 }
0x1082   :  { %v14998_v58 = vpop.eup %14997  ;;  %v11559_v53 = vsel %vm10211_vm5, %v11527_v31, %v14138_v25  ;;  %v11558_v38 = vsel %vm10211_vm5, %v11526_v55, %v14137_v0  ;;  %v14168_v16 = vunpack.i.h.bf16 %v14166_v11  ;;  %v14167_v29 = vunpack.i.l.bf16 %v14166_v11 }
0x1083   :  { %v10870_v59 = vmul.f32 %v14998_v58, %v20988_v46  ;;  %v11589_v26 = vpack.c.bf16 %v11559_v53, %v11558_v38  ;;  %v14141_v5 = vpop.permute.xlu1 %14140  ;;  %v21242_v41 = vadd.f32 %v21009_v47, %v10906_v21  ;;  %v10907_v2 = vmul.f32 %v21000_v63, %v10869_v10 }
0x1084   :  { %v14143_v52 = vunpack.i.h.bf16 %v14141_v5  ;;  %v14142_v62 = vunpack.i.l.bf16 %v14141_v5  ;;  %v11533_v46 = vsel %vm97_vm0, %v21073_v18, %v14168_v16  ;;  %v11532_v40 = vsel %vm97_vm0, %v21067_v19, %v14167_v29 }
0x1085   :  { %v14171_v57 = vpop.permute.xlu0 %14170  ;;  %13837 = vmatmul.mubr.msk.bf16.vlgmr.msra.gmra.mrb[48].mxu1 %vm11659_vm6, %v11589_v26  ;;  %v14264_v31 = vpack.i.bf16 %v21242_v41, %v21236_v1  ;;  %v10908_v55 = vmul.f32 %v21000_v63, %v10870_v59  ;;  %v10945_v25 = vadd.f32 %v21009_v47, %v10907_v2 }
0x1086   :  { %v14173_v36 = vunpack.i.h.bf16 %v14171_v57  ;;  %v14172_v50 = vunpack.i.l.bf16 %v14171_v57  ;;  %13840 = vmatprep.mubr.msk.bf16.mxu1 %vm11659_vm6, %v11590_v15  ;;  %v11531_v63 = vsel %vm97_vm0, %v21056_v7, %v14143_v52  ;;  %v11530_v18 = vsel %vm97_vm0, %v21050_v60, %v14142_v62 }
0x1087   :  { %v14156_v14 = vpop.permute.xlu1 %14155  ;;  %14265 = vrot.lane.b32.xlu0 %v14264_v31, %s15175_s13  ;;  %14255 = vrot.lane.b32.xlu1 %v14264_v31, %s15171_s29  ;;  %v10946_v0 = vadd.f32 %v21009_v47, %v10908_v55 }
0x1088   :  { %v14158_v10 = vunpack.i.h.bf16 %v14156_v14  ;;  %v14157_v39 = vunpack.i.l.bf16 %v14156_v14  ;;  %v11564_v11 = vsel %vm10211_vm5, %v11532_v40, %v14172_v50  ;;  %v11565_v19 = vsel %vm10211_vm5, %v11533_v46, %v14173_v36 }
0x1089   :  { %v14269_v21 = vpack.i.bf16 %v10946_v0, %v10945_v25  ;;  %v11592_v47 = vpack.c.bf16 %v11565_v19, %v11564_v11 }
0x108a   :  { %v11563_v58 = vsel %vm10211_vm5, %v11531_v63, %v14158_v10  ;;  %v11562_v53 = vsel %vm10211_vm5, %v11530_v18, %v14157_v39 }
0x108b   :  { %v11591_v38 = vpack.c.bf16 %v11563_v58, %v11562_v53  ;;  %14270 = vrot.lane.b32.xlu0 %v14269_v21, %s15171_s29  ;;  %14260 = vrot.lane.b32.xlu1 %v14269_v21, %s15175_s13  ;;  %v14161_v60 = vpop.permute.xlu1 %14160 }
0x108c   :  { %v14163_v7 = vunpack.i.h.bf16 %v14161_v60  ;;  %v14162_v16 = vunpack.i.l.bf16 %v14161_v60 }
0x108d   :  { %13841 = vmatmul.mubr.msk.bf16.gmra.mrb[52].mxu1 %vm11659_vm6, %v11591_v38 }
0x108e   :  { %13844 = vmatprep.mubr.msk.bf16.mxu1 %vm11659_vm6, %v11592_v47  ;;  %v11535_v2 = vsel %vm97_vm0, %v21090_v20, %v14163_v7  ;;  %v11534_v15 = vsel %vm97_vm0, %v21084_v28, %v14162_v16 }
0x108f   :  { %14275 = vrot.lane.b32.xlu1 %v22767_v12, %s15171_s29 }
0x109c   :  { %v14176_v29 = vpop.permute.xlu1 %14175  ;;  %v14186_v59 = vpop.permute.xlu0 %14185 }
0x109d   :  { %v14178_v26 = vunpack.i.h.bf16 %v14176_v29  ;;  %v14177_v5 = vunpack.i.l.bf16 %v14176_v29  ;;  %v14188_v52 = vunpack.i.h.bf16 %v14186_v59  ;;  %v14187_v62 = vunpack.i.l.bf16 %v14186_v59 }
0x109f   :  { %v11567_v57 = vsel %vm10211_vm5, %v11535_v2, %v14178_v26  ;;  %v11566_v31 = vsel %vm10211_vm5, %v11534_v15, %v14177_v5  ;;  %v11537_v40 = vsel %vm97_vm0, %v21102_v4, %v14188_v52  ;;  %v11536_v20 = vsel %vm97_vm0, %v21099_v23, %v14187_v62 }
0x10a0   :  { %v11593_v12 = vpack.c.bf16 %v11567_v57, %v11566_v31  ;;  %v14181_v55 = vpop.permute.xlu1 %14180  ;;  %v14191_v46 = vpop.permute.xlu0 %14190 }
0x10a1   :  { %v14193_v36 = vunpack.i.h.bf16 %v14191_v46  ;;  %v14192_v50 = vunpack.i.l.bf16 %v14191_v46  ;;  %v14183_v14 = vunpack.i.h.bf16 %v14181_v55  ;;  %v14182_v25 = vunpack.i.l.bf16 %v14181_v55 }
0x10a2   :  { %13845 = vmatmul.mubr.msk.bf16.gmra.mrb[56].mxu1 %vm11659_vm6, %v11593_v12 }
0x10a3   :  { %v11568_v28 = vsel %vm10211_vm5, %v11536_v20, %v14192_v50  ;;  %v11569_v0 = vsel %vm10211_vm5, %v11537_v40, %v14193_v36  ;;  %v11539_v11 = vsel %vm97_vm0, %v21118_v8, %v14183_v14  ;;  %v11538_v4 = vsel %vm97_vm0, %v21115_v3, %v14182_v25 }
0x10a4   :  { %v11594_v63 = vpack.c.bf16 %v11569_v0, %v11568_v28  ;;  %v14196_v18 = vpop.permute.xlu1 %14195 }
0x10a5   :  { %v14198_v10 = vunpack.i.h.bf16 %v14196_v18  ;;  %v14197_v39 = vunpack.i.l.bf16 %v14196_v18 }
0x10a6   :  { %13848 = vmatprep.mubr.msk.bf16.mxu1 %vm11659_vm6, %v11594_v63 }
0x10a7   :  { %v11570_v23 = vsel %vm10211_vm5, %v11538_v4, %v14197_v39  ;;  %v11571_v19 = vsel %vm10211_vm5, %v11539_v11, %v14198_v10 }
0x10a8   :  { %v11595_v21 = vpack.c.bf16 %v11571_v19, %v11570_v23 }
0x10aa   :  { %13849 = vmatmul.mubr.msk.bf16.gmra.mrb[60].mxu1 %vm11659_vm6, %v11595_v21 }
0x10d5   :  { %v14201_v47 = vpop.permute.xlu1 %14200 }
0x10d6   :  { %v14203_v29 = vunpack.i.h.bf16 %v14201_v47  ;;  %v14202_v59 = vunpack.i.l.bf16 %v14201_v47 }
0x10d8   :  { %v14206_v58 = vpop.permute.xlu0 %14205  ;;  %v11543_v31 = vsel %vm97_vm0, %v21152_v30, %v14203_v29  ;;  %v11542_v12 = vsel %vm97_vm0, %v21149_v32, %v14202_v59 }
0x10d9   :  { %v14208_v53 = vunpack.i.h.bf16 %v14206_v58  ;;  %v14207_v38 = vunpack.i.l.bf16 %v14206_v58 }
0x10db   :  { %v11541_v8 = vsel %vm97_vm0, 0.0, %v14208_v53  ;;  %v11540_v3 = vsel %vm97_vm0, 0.0, %v14207_v38 }
0x10dc   :  { %v14211_v60 = vpop.permute.xlu0 %14210 }
0x10dd   :  { %v14213_v7 = vunpack.i.h.bf16 %v14211_v60  ;;  %v14212_v16 = vunpack.i.l.bf16 %v14211_v60 }
0x10df   :  { %v11572_v26 = vsel %vm10211_vm5, %v11540_v3, %v14212_v16  ;;  %v11573_v5 = vsel %vm10211_vm5, %v11541_v8, %v14213_v7 }
0x10e0   :  { %v11596_v2 = vpack.c.bf16 %v11573_v5, %v11572_v26 }
0x10e1   :  { %v14216_v15 = vpop.permute.xlu1 %14215  ;;  %v14226_v52 = vpop.permute.xlu0 %14225 }
0x10e2   :  { %v14218_v62 = vunpack.i.h.bf16 %v14216_v15  ;;  %v14217_v57 = vunpack.i.l.bf16 %v14216_v15  ;;  %13852 = vmatprep.mubr.msk.bf16.mxu1 %vm11659_vm6, %v11596_v2  ;;  %v14228_v55 = vunpack.i.h.bf16 %v14226_v52  ;;  %v14227_v46 = vunpack.i.l.bf16 %v14226_v52 }
0x10e4   :  { %v11575_v36 = vsel %vm10211_vm5, %v11543_v31, %v14218_v62  ;;  %v11574_v50 = vsel %vm10211_vm5, %v11542_v12, %v14217_v57  ;;  %v11545_v28 = vsel %vm97_vm0, %v21143_v56, %v14228_v55  ;;  %v11544_v0 = vsel %vm97_vm0, %v21140_v51, %v14227_v46 }
0x10e5   :  { %v11597_v40 = vpack.c.bf16 %v11575_v36, %v11574_v50  ;;  %v14231_v20 = vpop.permute.xlu0 %14230  ;;  %v14221_v30 = vpop.permute.xlu1 %14220 }
0x10e6   :  { %v14233_v14 = vunpack.i.h.bf16 %v14231_v20  ;;  %v14232_v25 = vunpack.i.l.bf16 %v14231_v20  ;;  %v14223_v10 = vunpack.i.h.bf16 %v14221_v30  ;;  %v14222_v39 = vunpack.i.l.bf16 %v14221_v30 }
0x10e7   :  { %13853 = vmatmul.mubr.msk.bf16.gmra.mrb[64].mxu1 %vm11659_vm6, %v11597_v40 }
0x10e8   :  { %v11576_v32 = vsel %vm10211_vm5, %v11544_v0, %v14232_v25  ;;  %v11577_v63 = vsel %vm10211_vm5, %v11545_v28, %v14233_v14  ;;  %v11547_v56 = vsel %vm97_vm0, %v21169_v27, %v14223_v10  ;;  %v11546_v51 = vsel %vm97_vm0, %v21166_v54, %v14222_v39 }
0x10e9   :  { %v11598_v18 = vpack.c.bf16 %v11577_v63, %v11576_v32 }
0x10eb   :  { %13856 = vmatprep.mubr.msk.bf16.mxu1 %vm11659_vm6, %v11598_v18 }
0x10ed   :  { %v14236_v11 = vpop.permute.xlu1 %14235  ;;  %v14246_v4 = vpop.permute.xlu0 %14245 }
0x10ee   :  { %v14238_v23 = vunpack.i.h.bf16 %v14236_v11  ;;  %v14237_v19 = vunpack.i.l.bf16 %v14236_v11  ;;  %v14248_v21 = vunpack.i.h.bf16 %v14246_v4  ;;  %v14247_v58 = vunpack.i.l.bf16 %v14246_v4  ;;  %v21350_v4 = vld [vmem:[%s21722_s18] ss:$0 sm:$0xff] }
0x10f0   :  { %v11579_v53 = vsel %vm10211_vm5, %v11547_v56, %v14238_v23  ;;  %v11578_v38 = vsel %vm10211_vm5, %v11546_v51, %v14237_v19  ;;  %v11549_v8 = vsel %vm97_vm0, %v21181_v49, %v14248_v21  ;;  %v11548_v3 = vsel %vm97_vm0, %v21178_v13, %v14247_v58 }
0x10f1   :  { %v11599_v47 = vpack.c.bf16 %v11579_v53, %v11578_v38  ;;  %v14251_v60 = vpop.permute.xlu0 %14250  ;;  %v14241_v27 = vpop.permute.xlu1 %14240 }
0x10f2   :  { %v14253_v7 = vunpack.i.h.bf16 %v14251_v60  ;;  %v14252_v16 = vunpack.i.l.bf16 %v14251_v60  ;;  %v14243_v26 = vunpack.i.h.bf16 %v14241_v27  ;;  %v14242_v5 = vunpack.i.l.bf16 %v14241_v27 }
0x10f3   :  { %13857 = vmatmul.mubr.msk.bf16.gmra.mrb[68].mxu1 %vm11659_vm6, %v11599_v47 }
0x10f4   :  { %v11580_v54 = vsel %vm10211_vm5, %v11548_v3, %v14252_v16  ;;  %v11581_v29 = vsel %vm10211_vm5, %v11549_v8, %v14253_v7  ;;  %v11551_v49 = vsel %vm97_vm0, %v21197_v6, %v14243_v26  ;;  %v11550_v13 = vsel %vm97_vm0, %v21193_v17, %v14242_v5 }
0x10f5   :  { %v11600_v59 = vpack.c.bf16 %v11581_v29, %v11580_v54 }
0x10f7   :  { %13860 = vmatprep.mubr.msk.bf16.mxu1 %vm11659_vm6, %v11600_v59 }
0x10f9   :  { %v14256_v2 = vpop.permute.xlu1 %14255  ;;  %v14266_v15 = vpop.permute.xlu0 %14265 }
0x10fa   :  { %v14258_v52 = vunpack.i.h.bf16 %v14256_v2  ;;  %v14257_v62 = vunpack.i.l.bf16 %v14256_v2  ;;  %v14268_v57 = vunpack.i.h.bf16 %v14266_v15  ;;  %v14267_v31 = vunpack.i.l.bf16 %v14266_v15 }
0x10fc   :  { %v11583_v12 = vsel %vm10211_vm5, %v11551_v49, %v14258_v52  ;;  %v11582_v55 = vsel %vm10211_vm5, %v11550_v13, %v14257_v62  ;;  %v11553_v14 = vsel %vm97_vm0, %v21213_v44, %v14268_v57  ;;  %v11552_v6 = vsel %vm97_vm0, %v21210_v34, %v14267_v31 }
0x10fd   :  { %v11601_v46 = vpack.c.bf16 %v11583_v12, %v11582_v55  ;;  %v14261_v36 = vpop.permute.xlu1 %14260  ;;  %v14271_v50 = vpop.permute.xlu0 %14270 }
0x10fe   :  { %v14273_v40 = vunpack.i.h.bf16 %v14271_v50  ;;  %v14272_v20 = vunpack.i.l.bf16 %v14271_v50  ;;  %v14263_v25 = vunpack.i.h.bf16 %v14261_v36  ;;  %v14262_v28 = vunpack.i.l.bf16 %v14261_v36 }
0x10ff   :  { %13861 = vmatmul.mubr.msk.bf16.gmra.mrb[72].mxu1 %vm11659_vm6, %v11601_v46 }
0x1100   :  { %v11584_v17 = vsel %vm10211_vm5, %v11552_v6, %v14272_v20  ;;  %v11585_v0 = vsel %vm10211_vm5, %v11553_v14, %v14273_v40  ;;  %v11555_v10 = vsel %vm97_vm0, %v21242_v41, %v14263_v25  ;;  %v11554_v44 = vsel %vm97_vm0, %v21236_v1, %v14262_v28 }
0x1101   :  { %v11602_v30 = vpack.c.bf16 %v11585_v0, %v11584_v17  ;;  %v14276_v32 = vpop.permute.xlu1 %14275 }
0x1102   :  { %v14278_v63 = vunpack.i.h.bf16 %v14276_v32  ;;  %v14277_v18 = vunpack.i.l.bf16 %v14276_v32 }
0x1103   :  { %13864 = vmatprep.mubr.msk.bf16.mxu1 %vm11659_vm6, %v11602_v30 }
0x1104   :  { %v11586_v34 = vsel %vm10211_vm5, %v11554_v44, %v14277_v18  ;;  %v11587_v39 = vsel %vm10211_vm5, %v11555_v10, %v14278_v63 }
0x1105   :  { %v11603_v11 = vpack.c.bf16 %v11587_v39, %v11586_v34 }
0x1107   :  { %13865 = vmatmul.mubr.msk.bf16.gmra.mrb[76].mxu1 %vm11659_vm6, %v11603_v11 }
0x1158   :  { %v13838_v23 = vpop.f32.mrb[48].mxu1 }
0x1159   :  { %v21353_v41 = vadd.f32 %v13838_v23, %v21350_v4  ;;  %v11742_v19 = vpop.f32.mrb[49].mxu1 }
0x115a   :  { %v21356_v1 = vadd.f32 %v21350_v4, %v11742_v19  ;;  %v13839_v56 = vpop.f32.mrb[50].mxu1 }
0x115b   :  { %v12526_v51 = vmul.f32 -1.442695, %v21353_v41  ;;  %v21360_v21 = vadd.f32 %v13839_v56, %v21350_v4  ;;  %v11745_v58 = vpop.f32.mrb[51].mxu1 }
0x115c   :  { %v12524_v53 = vmul.f32 -1.442695, %v21356_v1  ;;  %v21364_v38 = vadd.f32 %v21350_v4, %v11745_v58 }
0x115d   :  { %14999 = vpow2.f32 %v12526_v51  ;;  %v12527_v47 = vmul.f32 -1.442695, %v21360_v21 }
0x115e   :  { %15001 = vpow2.f32 %v12524_v53  ;;  %v12525_v60 = vmul.f32 -1.442695, %v21364_v38 }
0x115f   :  { %15003 = vpow2.f32 %v12527_v47 }
0x1160   :  { %15005 = vpow2.f32 %v12525_v60  ;;  %v13842_v7 = vpop.f32.mrb[52].mxu1 }
0x1161   :  { %v21369_v16 = vadd.f32 %v13842_v7, %v21350_v4  ;;  %v11758_v8 = vpop.f32.mrb[53].mxu1 }
0x1162   :  { %v21372_v3 = vadd.f32 %v21350_v4, %v11758_v8  ;;  %v13843_v27 = vpop.f32.mrb[54].mxu1 }
0x1163   :  { %v12530_v54 = vmul.f32 -1.442695, %v21369_v16  ;;  %v21376_v29 = vadd.f32 %v13843_v27, %v21350_v4  ;;  %v11761_v59 = vpop.f32.mrb[55].mxu1 }
0x1164   :  { %v12528_v26 = vmul.f32 -1.442695, %v21372_v3  ;;  %v21380_v5 = vadd.f32 %v21350_v4, %v11761_v59 }
0x1165   :  { %15007 = vpow2.f32 %v12530_v54  ;;  %v12531_v2 = vmul.f32 -1.442695, %v21376_v29 }
0x1166   :  { %15009 = vpow2.f32 %v12528_v26  ;;  %v12529_v15 = vmul.f32 -1.442695, %v21380_v5 }
0x1167   :  { %v15000_v52 = vpop.eup %14999  ;;  %15011 = vpow2.f32 %v12531_v2 }
0x1168   :  { %v15002_v62 = vpop.eup %15001  ;;  %v11967_v49 = vadd.f32 1.0, %v15000_v52  ;;  %15013 = vpow2.f32 %v12529_v15 }
0x1169   :  { %v15004_v13 = vpop.eup %15003  ;;  %v11965_v31 = vadd.f32 1.0, %v15002_v62 }
0x116a   :  { %v15006_v57 = vpop.eup %15005  ;;  %15015 = vrcp.f32 %v11967_v49  ;;  %v11968_v12 = vadd.f32 1.0, %v15004_v13 }
0x116b   :  { %v11966_v55 = vadd.f32 1.0, %v15006_v57 }
0x116c   :  { %15017 = vrcp.f32 %v11968_v12 }
0x116d   :  { %15019 = vrcp.f32 %v11965_v31 }
0x116e   :  { %15021 = vrcp.f32 %v11966_v55 }
0x116f   :  { %v15008_v46 = vpop.eup %15007 }
0x1170   :  { %v15010_v36 = vpop.eup %15009  ;;  %v11971_v50 = vadd.f32 1.0, %v15008_v46 }
0x1171   :  { %v15012_v40 = vpop.eup %15011  ;;  %v11969_v14 = vadd.f32 1.0, %v15010_v36 }
0x1172   :  { %v15014_v20 = vpop.eup %15013  ;;  %15023 = vrcp.f32 %v11971_v50  ;;  %v11972_v6 = vadd.f32 1.0, %v15012_v40 }
0x1173   :  { %v11970_v28 = vadd.f32 1.0, %v15014_v20 }
0x1174   :  { %v15016_v25 = vpop.eup %15015  ;;  %15025 = vrcp.f32 %v11972_v6 }
0x1175   :  { %12097 = vrot.lane.b32.xlu0 %v15016_v25, %s15168_s26  ;;  %v13846_v17 = vpop.f32.mrb[56].mxu1  ;;  %15027 = vrcp.f32 %v11969_v14 }
0x1176   :  { %v15018_v0 = vpop.eup %15017  ;;  %v21386_v30 = vadd.f32 %v13846_v17, %v21350_v4  ;;  %v11774_v32 = vpop.f32.mrb[57].mxu1  ;;  %15029 = vrcp.f32 %v11970_v28 }
0x1177   :  { %v21389_v63 = vadd.f32 %v21350_v4, %v11774_v32  ;;  %12099 = vrot.lane.b32.xlu1 %v15018_v0, %s15168_s26  ;;  %v13847_v18 = vpop.f32.mrb[58].mxu1  ;;  %v15020_v10 = vpop.eup %15019 }
0x1178   :  { %v12534_v44 = vmul.f32 -1.442695, %v21386_v30  ;;  %v21394_v34 = vadd.f32 %v13847_v18, %v21350_v4  ;;  %v11777_v39 = vpop.f32.mrb[59].mxu1  ;;  %v15022_v19 = vpop.eup %15021 }
0x1179   :  { %v12532_v11 = vmul.f32 -1.442695, %v21389_v63  ;;  %v21398_v23 = vadd.f32 %v21350_v4, %v11777_v39  ;;  %12093 = vrot.lane.b32.xlu0 %v15020_v10, %s15168_s26 }
0x117a   :  { %15031 = vpow2.f32 %v12534_v44  ;;  %v12535_v56 = vmul.f32 -1.442695, %v21394_v34 }
0x117b   :  { %15033 = vpow2.f32 %v12532_v11  ;;  %v12533_v51 = vmul.f32 -1.442695, %v21398_v23  ;;  %12095 = vrot.lane.b32.xlu1 %v15022_v19, %s15168_s26 }
0x117c   :  { %v15024_v58 = vpop.eup %15023  ;;  %15035 = vpow2.f32 %v12535_v56 }
0x117d   :  { %15037 = vpow2.f32 %v12533_v51  ;;  %v13850_v53 = vpop.f32.mrb[60].mxu1  ;;  %12105 = vrot.lane.b32.xlu0 %v15024_v58, %s15168_s26 }
0x117e   :  { %v15026_v47 = vpop.eup %15025  ;;  %v21406_v60 = vadd.f32 %v13850_v53, %v21350_v4  ;;  %v11790_v7 = vpop.f32.mrb[61].mxu1 }
0x117f   :  { %v21409_v8 = vadd.f32 %v21350_v4, %v11790_v7  ;;  %v13851_v27 = vpop.f32.mrb[62].mxu1  ;;  %12107 = vrot.lane.b32.xlu1 %v15026_v47, %s15168_s26  ;;  %v15028_v54 = vpop.eup %15027 }
0x1180   :  { %v12538_v59 = vmul.f32 -1.442695, %v21406_v60  ;;  %v21414_v26 = vadd.f32 %v13851_v27, %v21350_v4  ;;  %v11793_v2 = vpop.f32.mrb[63].mxu1  ;;  %v15030_v62 = vpop.eup %15029 }
0x1181   :  { %v12536_v15 = vmul.f32 -1.442695, %v21409_v8  ;;  %v21418_v52 = vadd.f32 %v21350_v4, %v11793_v2  ;;  %12101 = vrot.lane.b32.xlu0 %v15028_v54, %s15168_s26 }
0x1182   :  { %15039 = vpow2.f32 %v12538_v59  ;;  %v12539_v49 = vmul.f32 -1.442695, %v21414_v26 }
0x1183   :  { %15041 = vpow2.f32 %v12536_v15  ;;  %v12537_v13 = vmul.f32 -1.442695, %v21418_v52  ;;  %12103 = vrot.lane.b32.xlu1 %v15030_v62, %s15168_s26 }
0x1184   :  { %v15032_v57 = vpop.eup %15031  ;;  %15043 = vpow2.f32 %v12539_v49 }
0x1185   :  { %v15034_v31 = vpop.eup %15033  ;;  %v11975_v12 = vadd.f32 1.0, %v15032_v57  ;;  %15045 = vpow2.f32 %v12537_v13 }
0x1186   :  { %v15036_v55 = vpop.eup %15035  ;;  %v11973_v36 = vadd.f32 1.0, %v15034_v31 }
0x1187   :  { %v15038_v46 = vpop.eup %15037  ;;  %15047 = vrcp.f32 %v11975_v12  ;;  %v11976_v50 = vadd.f32 1.0, %v15036_v55 }
0x1188   :  { %v11974_v40 = vadd.f32 1.0, %v15038_v46 }
0x1189   :  { %15049 = vrcp.f32 %v11976_v50 }
0x118a   :  { %15051 = vrcp.f32 %v11973_v36 }
0x118b   :  { %15053 = vrcp.f32 %v11974_v40 }
0x118c   :  { %v15040_v20 = vpop.eup %15039 }
0x118d   :  { %v15042_v14 = vpop.eup %15041  ;;  %v11979_v6 = vadd.f32 1.0, %v15040_v20 }
0x118e   :  { %v15044_v25 = vpop.eup %15043  ;;  %v11977_v17 = vadd.f32 1.0, %v15042_v14 }
0x118f   :  { %v15046_v28 = vpop.eup %15045  ;;  %15055 = vrcp.f32 %v11979_v6  ;;  %v11980_v0 = vadd.f32 1.0, %v15044_v25 }
0x1190   :  { %v11978_v18 = vadd.f32 1.0, %v15046_v28 }
0x1191   :  { %v15048_v32 = vpop.eup %15047  ;;  %15057 = vrcp.f32 %v11980_v0 }
0x1192   :  { %12113 = vrot.lane.b32.xlu0 %v15048_v32, %s15168_s26  ;;  %15059 = vrcp.f32 %v11977_v17 }
0x1193   :  { %v15050_v10 = vpop.eup %15049  ;;  %15061 = vrcp.f32 %v11978_v18 }
0x1194   :  { %12115 = vrot.lane.b32.xlu1 %v15050_v10, %s15168_s26  ;;  %v15052_v44 = vpop.eup %15051 }
0x1195   :  { %v15054_v39 = vpop.eup %15053 }
0x1196   :  { %12109 = vrot.lane.b32.xlu0 %v15052_v44, %s15168_s26 }
0x1198   :  { %12111 = vrot.lane.b32.xlu1 %v15054_v39, %s15168_s26 }
0x1199   :  { %v15056_v11 = vpop.eup %15055 }
0x119a   :  { %12121 = vrot.lane.b32.xlu0 %v15056_v11, %s15168_s26 }
0x119b   :  { %v15058_v19 = vpop.eup %15057 }
0x119c   :  { %12123 = vrot.lane.b32.xlu1 %v15058_v19, %s15168_s26  ;;  %v15060_v56 = vpop.eup %15059 }
0x119d   :  { %v15062_v51 = vpop.eup %15061 }
0x119e   :  { %12117 = vrot.lane.b32.xlu0 %v15060_v56, %s15168_s26 }
0x11a0   :  { %12119 = vrot.lane.b32.xlu1 %v15062_v51, %s15168_s26 }
0x11ba   :  { %v13854_v58 = vpop.f32.mrb[64].mxu1 }
0x11bb   :  { %v21433_v53 = vadd.f32 %v13854_v58, %v21350_v4  ;;  %v11806_v47 = vpop.f32.mrb[65].mxu1 }
0x11bc   :  { %v21436_v7 = vadd.f32 %v21350_v4, %v11806_v47  ;;  %v13855_v27 = vpop.f32.mrb[66].mxu1 }
0x11bd   :  { %v12542_v54 = vmul.f32 -1.442695, %v21433_v53  ;;  %v21440_v59 = vadd.f32 %v13855_v27, %v21350_v4  ;;  %v11809_v2 = vpop.f32.mrb[67].mxu1 }
0x11be   :  { %v12540_v15 = vmul.f32 -1.442695, %v21436_v7  ;;  %v21444_v62 = vadd.f32 %v21350_v4, %v11809_v2 }
0x11bf   :  { %15063 = vpow2.f32 %v12542_v54  ;;  %v12543_v49 = vmul.f32 -1.442695, %v21440_v59 }
0x11c0   :  { %15065 = vpow2.f32 %v12540_v15  ;;  %v12541_v13 = vmul.f32 -1.442695, %v21444_v62 }
0x11c1   :  { %15067 = vpow2.f32 %v12543_v49 }
0x11c2   :  { %15069 = vpow2.f32 %v12541_v13 }
0x11c6   :  { %v13858_v57 = vpop.f32.mrb[68].mxu1 }
0x11c7   :  { %v21449_v31 = vadd.f32 %v13858_v57, %v21350_v4  ;;  %v11822_v12 = vpop.f32.mrb[69].mxu1 }
0x11c8   :  { %v21452_v55 = vadd.f32 %v21350_v4, %v11822_v12  ;;  %v13859_v46 = vpop.f32.mrb[70].mxu1 }
0x11c9   :  { %v15064_v36 = vpop.eup %15063  ;;  %v12546_v50 = vmul.f32 -1.442695, %v21449_v31  ;;  %v21456_v40 = vadd.f32 %v13859_v46, %v21350_v4  ;;  %v11825_v20 = vpop.f32.mrb[71].mxu1 }
0x11ca   :  { %v15066_v14 = vpop.eup %15065  ;;  %v11983_v6 = vadd.f32 1.0, %v15064_v36  ;;  %v21459_v25 = vadd.f32 %v21350_v4, %v11825_v20  ;;  %v12544_v18 = vmul.f32 -1.442695, %v21452_v55 }
0x11cb   :  { %v15068_v28 = vpop.eup %15067  ;;  %v11981_v17 = vadd.f32 1.0, %v15066_v14  ;;  %15071 = vpow2.f32 %v12546_v50  ;;  %v12547_v44 = vmul.f32 -1.442695, %v21456_v40 }
0x11cc   :  { %v15070_v0 = vpop.eup %15069  ;;  %15073 = vrcp.f32 %v11983_v6  ;;  %v11984_v32 = vadd.f32 1.0, %v15068_v28  ;;  %v12545_v39 = vmul.f32 -1.442695, %v21459_v25 }
0x11cd   :  { %15075 = vrcp.f32 %v11981_v17  ;;  %v11982_v10 = vadd.f32 1.0, %v15070_v0 }
0x11ce   :  { %15077 = vrcp.f32 %v11984_v32 }
0x11cf   :  { %15079 = vrcp.f32 %v11982_v10 }
0x11d0   :  { %15081 = vpow2.f32 %v12544_v18 }
0x11d1   :  { %15083 = vpow2.f32 %v12547_v44 }
0x11d2   :  { %15085 = vpow2.f32 %v12545_v39  ;;  %v13862_v11 = vpop.f32.mrb[72].mxu1 }
0x11d3   :  { %v21465_v19 = vadd.f32 %v13862_v11, %v21350_v4  ;;  %v11838_v56 = vpop.f32.mrb[73].mxu1 }
0x11d4   :  { %v21468_v51 = vadd.f32 %v21350_v4, %v11838_v56  ;;  %v13863_v58 = vpop.f32.mrb[74].mxu1 }
0x11d5   :  { %v15072_v47 = vpop.eup %15071  ;;  %v12550_v27 = vmul.f32 -1.442695, %v21465_v19  ;;  %v21472_v54 = vadd.f32 %v13863_v58, %v21350_v4  ;;  %v11841_v2 = vpop.f32.mrb[75].mxu1 }
0x11d6   :  { %v15074_v15 = vpop.eup %15073  ;;  %v11987_v49 = vadd.f32 1.0, %v15072_v47  ;;  %v12548_v13 = vmul.f32 -1.442695, %v21468_v51  ;;  %v21476_v57 = vadd.f32 %v21350_v4, %v11841_v2 }
0x11d7   :  { %v15076_v12 = vpop.eup %15075  ;;  %15087 = vpow2.f32 %v12550_v27  ;;  %v12551_v46 = vmul.f32 -1.442695, %v21472_v54  ;;  %12129 = vrot.lane.b32.xlu0 %v15074_v15, %s15168_s26 }
0x11d8   :  { %v15078_v36 = vpop.eup %15077  ;;  %15089 = vrcp.f32 %v11987_v49  ;;  %v12549_v50 = vmul.f32 -1.442695, %v21476_v57 }
0x11d9   :  { %v15080_v20 = vpop.eup %15079  ;;  %15091 = vpow2.f32 %v12548_v13  ;;  %12131 = vrot.lane.b32.xlu1 %v15078_v36, %s15168_s26 }
0x11da   :  { %v15082_v14 = vpop.eup %15081  ;;  %15093 = vpow2.f32 %v12551_v46  ;;  %v13866_v6 = vpop.f32.mrb[76].mxu1 }
0x11db   :  { %v15084_v28 = vpop.eup %15083  ;;  %v11985_v17 = vadd.f32 1.0, %v15082_v14  ;;  %15095 = vpow2.f32 %v12549_v50  ;;  %v21483_v0 = vadd.f32 %v13866_v6, %v21350_v4  ;;  %v11854_v32 = vpop.f32.mrb[77].mxu1  ;;  %12125 = vrot.lane.b32.xlu0 %v15076_v12, %s15168_s26 }
0x11dc   :  { %v15086_v18 = vpop.eup %15085  ;;  %v11988_v10 = vadd.f32 1.0, %v15084_v28  ;;  %v21487_v44 = vadd.f32 %v21350_v4, %v11854_v32  ;;  %v13867_v39 = vpop.f32.mrb[78].mxu1 }
0x11dd   :  { %15097 = vrcp.f32 %v11985_v17  ;;  %v11986_v11 = vadd.f32 1.0, %v15086_v18  ;;  %v12554_v56 = vmul.f32 -1.442695, %v21483_v0  ;;  %v21491_v58 = vadd.f32 %v13867_v39, %v21350_v4  ;;  %v11857_v47 = vpop.f32.mrb[79].mxu1  ;;  %12127 = vrot.lane.b32.xlu1 %v15080_v20, %s15168_s26 }
0x11de   :  { %15099 = vrcp.f32 %v11988_v10  ;;  %v12552_v27 = vmul.f32 -1.442695, %v21487_v44  ;;  %v21496_v2 = vadd.f32 %v21350_v4, %v11857_v47 }
0x11df   :  { %15101 = vrcp.f32 %v11986_v11  ;;  %v12555_v15 = vmul.f32 -1.442695, %v21491_v58 }
0x11e0   :  { %15103 = vpow2.f32 %v12554_v56  ;;  %v12553_v49 = vmul.f32 -1.442695, %v21496_v2 }
0x11e1   :  { %v15088_v13 = vpop.eup %15087  ;;  %15105 = vpow2.f32 %v12552_v27 }
0x11e2   :  { %v15090_v12 = vpop.eup %15089  ;;  %v11991_v46 = vadd.f32 1.0, %v15088_v13  ;;  %15107 = vpow2.f32 %v12555_v15 }
0x11e3   :  { %v15092_v36 = vpop.eup %15091  ;;  %15109 = vpow2.f32 %v12553_v49  ;;  %12137 = vrot.lane.b32.xlu0 %v15090_v12, %s15168_s26 }
0x11e4   :  { %v15094_v50 = vpop.eup %15093  ;;  %15111 = vrcp.f32 %v11991_v46  ;;  %v11989_v20 = vadd.f32 1.0, %v15092_v36 }
0x11e5   :  { %v15096_v4 = vpop.eup %15095  ;;  %v11992_v14 = vadd.f32 1.0, %v15094_v50 }
0x11e6   :  { %v11990_v28 = vadd.f32 1.0, %v15096_v4 }
0x11e7   :  { %v15098_v6 = vpop.eup %15097  ;;  %15113 = vrcp.f32 %v11992_v14  ;;  %v12098_v17 = vpop.permute.xlu0 %12097 }
0x11e8   :  { %v15100_v32 = vpop.eup %15099  ;;  %15115 = vrcp.f32 %v11989_v20  ;;  %v12191_v18 = vmul.f32 %v12098_v17, %v21353_v41  ;;  %12133 = vrot.lane.b32.xlu0 %v15098_v6, %s15168_s26 }
0x11e9   :  { %v15102_v10 = vpop.eup %15101  ;;  %12139 = vrot.lane.b32.xlu1 %v15100_v32, %s15168_s26  ;;  %v12100_v39 = vpop.permute.xlu1 %12099  ;;  %15117 = vrcp.f32 %v11990_v28 }
0x11ea   :  { %v15104_v11 = vpop.eup %15103  ;;  %v12223_v56 = vadd.f32 %v12191_v18, %v20616_v9  ;;  %v12192_v47 = vmul.f32 %v12100_v39, %v21360_v21 }
0x11eb   :  { %v15106_v27 = vpop.eup %15105  ;;  %v12094_v15 = vpop.permute.xlu0 %12093  ;;  %v11995_v36 = vadd.f32 1.0, %v15104_v11 }
0x11ec   :  { %v15108_v49 = vpop.eup %15107  ;;  %v11993_v13 = vadd.f32 1.0, %v15106_v27  ;;  %12255 = vst.msk [vmem:[%s21723_s19 + $0x10] sm:$0xff] %vm97_vm0, %v12223_v56  ;;  %v12224_v41 = vadd.f32 %v12192_v47, %v20624_v61  ;;  %v12189_v12 = vmul.f32 %v12094_v15, %v21356_v1 }
0x11ed   :  { %v15110_v46 = vpop.eup %15109  ;;  %12135 = vrot.lane.b32.xlu1 %v15102_v10, %s15168_s26  ;;  %v12096_v9 = vpop.permute.xlu1 %12095  ;;  %v11996_v1 = vadd.f32 1.0, %v15108_v49 }
0x11ee   :  { %v15112_v21 = vpop.eup %15111  ;;  %15119 = vrcp.f32 %v11993_v13  ;;  %v11994_v50 = vadd.f32 1.0, %v15110_v46  ;;  %12256 = vst.msk [vmem:[%s21723_s19 + $0x18] sm:$0xff] %vm97_vm0, %v12224_v41  ;;  %v12221_v20 = vadd.f32 %v12189_v12, %v20621_v22  ;;  %v12190_v4 = vmul.f32 %v12096_v9, %v21364_v38  ;;  %v22768_v46 = vld [vmem:[#allocation122_spill] sm:$0xff]  ;;  %v22769_v9 = vld [vmem:[#allocation45_spill] sm:$0xff] }
0x11ef   :  { %12145 = vrot.lane.b32.xlu0 %v15112_v21, %s15168_s26  ;;  %v12106_v61 = vpop.permute.xlu0 %12105 }
0x11f0   :  { %15121 = vrcp.f32 %v11994_v50  ;;  %12253 = vst.msk [vmem:[%s21723_s19] sm:$0xff] %vm97_vm0, %v12221_v20  ;;  %v12222_v14 = vadd.f32 %v12190_v4, %v20629_v33  ;;  %v12195_v6 = vmul.f32 %v12106_v61, %v21369_v16  ;;  %v22770_v50 = vld [vmem:[#allocation62_spill] sm:$0xff] }
0x11f1   :  { %v15114_v28 = vpop.eup %15113  ;;  %v12108_v17 = vpop.permute.xlu1 %12107  ;;  %15123 = vrcp.f32 %v11995_v36  ;;  %v22771_v61 = vld [vmem:[#allocation14_spill] sm:$0xff] }
0x11f2   :  { %v15116_v32 = vpop.eup %15115  ;;  %12254 = vst.msk [vmem:[%s21723_s19 + $0x8] sm:$0xff] %vm97_vm0, %v12222_v14  ;;  %v12227_v22 = vadd.f32 %v12195_v6, %v20645_v43  ;;  %12147 = vrot.lane.b32.xlu1 %v15114_v28, %s15168_s26  ;;  %v12196_v38 = vmul.f32 %v12108_v17, %v21376_v29  ;;  %15125 = vrcp.f32 %v11996_v1  ;;  %v22772_v14 = vld [vmem:[#allocation113_spill] sm:$0xff] }
0x11f3   :  { %12141 = vrot.lane.b32.xlu0 %v15116_v32, %s15168_s26  ;;  %v12102_v33 = vpop.permute.xlu0 %12101  ;;  %v15118_v10 = vpop.eup %15117  ;;  %v22773_v32 = vld [vmem:[#allocation112_spill] sm:$0xff] }
0x11f4   :  { %12259 = vst.msk [vmem:[%s21723_s19 + $0x30] sm:$0xff] %vm97_vm0, %v12227_v22  ;;  %v12228_v16 = vadd.f32 %v12196_v38, %v20653_v42  ;;  %v12193_v18 = vmul.f32 %v12102_v33, %v21372_v3  ;;  %v22774_v33 = vld [vmem:[#allocation47_spill] sm:$0xff] }
0x11f5   :  { %v12104_v39 = vpop.permute.xlu1 %12103 }
0x11f6   :  { %12260 = vst.msk [vmem:[%s21723_s19 + $0x38] sm:$0xff] %vm97_vm0, %v12228_v16  ;;  %v12225_v43 = vadd.f32 %v12193_v18, %v20640_v24  ;;  %12143 = vrot.lane.b32.xlu1 %v15118_v10, %s15168_s26  ;;  %v12194_v29 = vmul.f32 %v12104_v39, %v21380_v5 }
0x11f8   :  { %v15120_v11 = vpop.eup %15119  ;;  %12257 = vst.msk [vmem:[%s21723_s19 + $0x20] sm:$0xff] %vm97_vm0, %v12225_v43  ;;  %v12226_v42 = vadd.f32 %v12194_v29, %v20648_v37  ;;  %v22776_v43 = vld [vmem:[#allocation65_spill] sm:$0xff] }
0x11f9   :  { %12149 = vrot.lane.b32.xlu0 %v15120_v11, %s15168_s26 }
0x11fa   :  { %v15122_v3 = vpop.eup %15121  ;;  %12258 = vst.msk [vmem:[%s21723_s19 + $0x28] sm:$0xff] %vm97_vm0, %v12226_v42  ;;  %v22777_v42 = vld [vmem:[#allocation135_spill] sm:$0xff] }
0x11fb   :  { %12151 = vrot.lane.b32.xlu1 %v15122_v3, %s15168_s26  ;;  %v15124_v24 = vpop.eup %15123 }
0x11fc   :  { %v15126_v5 = vpop.eup %15125 }
0x11fd   :  { %12153 = vrot.lane.b32.xlu0 %v15124_v24, %s15168_s26 }
0x11ff   :  { %12155 = vrot.lane.b32.xlu1 %v15126_v5, %s15168_s26 }
0x1204   :  { %v12114_v56 = vpop.permute.xlu0 %12113 }
0x1205   :  { %v12199_v47 = vmul.f32 %v12114_v56, %v21386_v30 }
0x1206   :  { %v12116_v37 = vpop.permute.xlu1 %12115 }
0x1207   :  { %v12231_v27 = vadd.f32 %v12199_v47, %v20669_v48  ;;  %v12200_v15 = vmul.f32 %v12116_v37, %v21394_v34  ;;  %v22778_v47 = vld [vmem:[#allocation85_spill] sm:$0xff] }
0x1208   :  { %v12110_v49 = vpop.permute.xlu0 %12109 }
0x1209   :  { %12263 = vst.msk [vmem:[%s21723_s19 + $0x50] sm:$0xff] %vm97_vm0, %v12231_v27  ;;  %v12232_v13 = vadd.f32 %v12200_v15, %v20677_v45  ;;  %v12197_v41 = vmul.f32 %v12110_v49, %v21389_v63  ;;  %v22779_v27 = vld [vmem:[#allocation97_spill] sm:$0xff] }
0x120a   :  { %v12112_v12 = vpop.permute.xlu1 %12111 }
0x120b   :  { %12264 = vst.msk [vmem:[%s21723_s19 + $0x58] sm:$0xff] %vm97_vm0, %v12232_v13  ;;  %v12229_v48 = vadd.f32 %v12197_v41, %v20662_v35  ;;  %v12198_v30 = vmul.f32 %v12112_v12, %v21398_v23  ;;  %v22780_v13 = vld [vmem:[#allocation83_spill] sm:$0xff]  ;;  %v22781_v12 = vld [vmem:[#allocation94_spill] sm:$0xff] }
0x120c   :  { %v12122_v34 = vpop.permute.xlu0 %12121 }
0x120d   :  { %12261 = vst.msk [vmem:[%s21723_s19 + $0x40] sm:$0xff] %vm97_vm0, %v12229_v48  ;;  %v12230_v45 = vadd.f32 %v12198_v30, %v22768_v46  ;;  %v12203_v63 = vmul.f32 %v12122_v34, %v21406_v60 }
0x120e   :  { %v12124_v36 = vpop.permute.xlu1 %12123 }
0x120f   :  { %12262 = vst.msk [vmem:[%s21723_s19 + $0x48] sm:$0xff] %vm97_vm0, %v12230_v45  ;;  %v12235_v35 = vadd.f32 %v12203_v63, %v22769_v9  ;;  %v12204_v23 = vmul.f32 %v12124_v36, %v21414_v26  ;;  %v22782_v45 = vld [vmem:[#allocation58_spill] sm:$0xff]  ;;  %v22783_v63 = vld [vmem:[#allocation120_spill] sm:$0xff] }
0x1210   :  { %v12118_v21 = vpop.permute.xlu0 %12117 }
0x1211   :  { %12267 = vst.msk [vmem:[%s21723_s19 + $0x70] sm:$0xff] %vm97_vm0, %v12235_v35  ;;  %v12236_v20 = vadd.f32 %v12204_v23, %v22770_v50  ;;  %v12201_v60 = vmul.f32 %v12118_v21, %v21409_v8  ;;  %v22784_v35 = vld [vmem:[#allocation84_spill] sm:$0xff] }
0x1212   :  { %v12120_v4 = vpop.permute.xlu1 %12119 }
0x1213   :  { %12268 = vst.msk [vmem:[%s21723_s19 + $0x78] sm:$0xff] %vm97_vm0, %v12236_v20  ;;  %v12233_v1 = vadd.f32 %v12201_v60, %v22771_v61  ;;  %v12202_v26 = vmul.f32 %v12120_v4, %v21418_v52  ;;  %v22785_v20 = vld [vmem:[#allocation55_spill] sm:$0xff] }
0x1214   :  { %v22786_v61 = vld [vmem:[#allocation43_spill] sm:$0xff] }
0x1215   :  { %12265 = vst.msk [vmem:[%s21723_s19 + $0x60] sm:$0xff] %vm97_vm0, %v12233_v1  ;;  %v12234_v6 = vadd.f32 %v12202_v26, %v22772_v14  ;;  %v22787_v14 = vld [vmem:[#allocation81_spill] sm:$0xff] }
0x1217   :  { %12266 = vst.msk [vmem:[%s21723_s19 + $0x68] sm:$0xff] %vm97_vm0, %v12234_v6 }
0x1249   :  { %v12130_v8 = vpop.permute.xlu0 %12129 }
0x124a   :  { %v12207_v28 = vmul.f32 %v12130_v8, %v21433_v53  ;;  %v22775_v53 = vld [vmem:[#allocation50_spill] sm:$0xff]  ;;  %v22788_v8 = vld [vmem:[#allocation93_spill] sm:$0xff] }
0x124b   :  { %v12132_v17 = vpop.permute.xlu1 %12131 }
0x124c   :  { %v12239_v22 = vadd.f32 %v12207_v28, %v22773_v32  ;;  %v12208_v52 = vmul.f32 %v12132_v17, %v21440_v59 }
0x124d   :  { %v12126_v38 = vpop.permute.xlu0 %12125 }
0x124e   :  { %12271 = vst.msk [vmem:[%s21723_s19 + $0x90] sm:$0xff] %vm97_vm0, %v12239_v22  ;;  %v12240_v16 = vadd.f32 %v12208_v52, %v22774_v33  ;;  %v12205_v18 = vmul.f32 %v12126_v38, %v21436_v7 }
0x124f   :  { %v12128_v10 = vpop.permute.xlu1 %12127 }
0x1250   :  { %12272 = vst.msk [vmem:[%s21723_s19 + $0x98] sm:$0xff] %vm97_vm0, %v12240_v16  ;;  %v12237_v39 = vadd.f32 %v12205_v18, %v22775_v53  ;;  %v12206_v59 = vmul.f32 %v12128_v10, %v21444_v62 }
0x1252   :  { %12269 = vst.msk [vmem:[%s21723_s19 + $0x80] sm:$0xff] %vm97_vm0, %v12237_v39  ;;  %v12238_v29 = vadd.f32 %v12206_v59, %v22776_v43 }
0x1254   :  { %12270 = vst.msk [vmem:[%s21723_s19 + $0x88] sm:$0xff] %vm97_vm0, %v12238_v29 }
0x1255   :  { %v12138_v7 = vpop.permute.xlu0 %12137 }
0x1256   :  { %v12211_v11 = vmul.f32 %v12138_v7, %v21449_v31 }
0x1258   :  { %v12243_v3 = vadd.f32 %v12211_v11, %v22777_v42 }
0x125a   :  { %12275 = vst.msk [vmem:[%s21723_s19 + $0xb0] sm:$0xff] %vm97_vm0, %v12243_v3  ;;  %v12134_v62 = vpop.permute.xlu0 %12133 }
0x125b   :  { %v12140_v24 = vpop.permute.xlu1 %12139  ;;  %v12209_v5 = vmul.f32 %v12134_v62, %v21452_v55 }
0x125c   :  { %v12212_v56 = vmul.f32 %v12140_v24, %v21456_v40 }
0x125d   :  { %v12241_v37 = vadd.f32 %v12209_v5, %v22778_v47 }
0x125e   :  { %v12244_v15 = vadd.f32 %v12212_v56, %v22779_v27 }
0x125f   :  { %12273 = vst.msk [vmem:[%s21723_s19 + $0xa0] sm:$0xff] %vm97_vm0, %v12241_v37  ;;  %v12136_v31 = vpop.permute.xlu1 %12135 }
0x1260   :  { %12276 = vst.msk [vmem:[%s21723_s19 + $0xb8] sm:$0xff] %vm97_vm0, %v12244_v15  ;;  %v12210_v49 = vmul.f32 %v12136_v31, %v21459_v25 }
0x1261   :  { %v12146_v55 = vpop.permute.xlu0 %12145 }
0x1262   :  { %v12242_v40 = vadd.f32 %v12210_v49, %v22780_v13  ;;  %v12215_v41 = vmul.f32 %v12146_v55, %v21465_v19 }
0x1264   :  { %12274 = vst.msk [vmem:[%s21723_s19 + $0xa8] sm:$0xff] %vm97_vm0, %v12242_v40  ;;  %v12247_v48 = vadd.f32 %v12215_v41, %v22781_v12  ;;  %v12148_v30 = vpop.permute.xlu1 %12147 }
0x1265   :  { %v12216_v34 = vmul.f32 %v12148_v30, %v21472_v54  ;;  %v12142_v46 = vpop.permute.xlu0 %12141 }
0x1266   :  { %12279 = vst.msk [vmem:[%s21723_s19 + $0xd0] sm:$0xff] %vm97_vm0, %v12247_v48  ;;  %v12213_v25 = vmul.f32 %v12142_v46, %v21468_v51 }
0x1267   :  { %v12248_v19 = vadd.f32 %v12216_v34, %v22782_v45 }
0x1268   :  { %v12245_v36 = vadd.f32 %v12213_v25, %v22783_v63  ;;  %v12144_v9 = vpop.permute.xlu1 %12143 }
0x1269   :  { %12280 = vst.msk [vmem:[%s21723_s19 + $0xd8] sm:$0xff] %vm97_vm0, %v12248_v19  ;;  %v12214_v54 = vmul.f32 %v12144_v9, %v21476_v57 }
0x126a   :  { %12277 = vst.msk [vmem:[%s21723_s19 + $0xc0] sm:$0xff] %vm97_vm0, %v12245_v36 }
0x126b   :  { %v12246_v23 = vadd.f32 %v12214_v54, %v22784_v35  ;;  %v12150_v51 = vpop.permute.xlu0 %12149 }
0x126c   :  { %v12217_v21 = vmul.f32 %v12150_v51, %v21487_v44 }
0x126d   :  { %12278 = vst.msk [vmem:[%s21723_s19 + $0xc8] sm:$0xff] %vm97_vm0, %v12246_v23  ;;  %v12152_v50 = vpop.permute.xlu1 %12151 }
0x126e   :  { %v12249_v60 = vadd.f32 %v12217_v21, %v22785_v20  ;;  %v12218_v57 = vmul.f32 %v12152_v50, %v21496_v2 }
0x126f   :  { %v12154_v4 = vpop.permute.xlu0 %12153 }
0x1270   :  { %12281 = vst.msk [vmem:[%s21723_s19 + $0xe0] sm:$0xff] %vm97_vm0, %v12249_v60  ;;  %v12250_v1 = vadd.f32 %v12218_v57, %v22786_v61  ;;  %v12219_v44 = vmul.f32 %v12154_v4, %v21483_v0 }
0x1271   :  { %v12156_v26 = vpop.permute.xlu1 %12155 }
0x1272   :  { %12282 = vst.msk [vmem:[%s21723_s19 + $0xe8] sm:$0xff] %vm97_vm0, %v12250_v1  ;;  %v12251_v6 = vadd.f32 %v12219_v44, %v22787_v14  ;;  %v12220_v2 = vmul.f32 %v12156_v26, %v21491_v58 }
0x1274   :  { %12283 = vst.msk [vmem:[%s21723_s19 + $0xf0] sm:$0xff] %vm97_vm0, %v12251_v6  ;;  %v12252_v28 = vadd.f32 %v12220_v2, %v22788_v8 }
0x1276   :  { %12284 = vst.msk [vmem:[%s21723_s19 + $0xf8] sm:$0xff] %vm97_vm0, %v12252_v28 }

</bundles_post_ra>
